<compile_context>
chip_gen: v7x
topology: tpu7x:2x2x1
jax: 0.10.0
libtpu: 0.0.40
codegen_flags: <defaults>
</compile_context>

<pallas_src>
import math
import numpy as np
import jax
import jax.numpy as jnp
from jax.experimental import pallas as pl
from jax.experimental.pallas import tpu as pltpu

MAT_MODE = ((0, 1), (0, 2), (1, 2))   # (width-coord axis, height-coord axis) per plane
VEC_MODE = (2, 1, 0)                  # coordinate axis sampled by each line
APP_DIM = 27
OUT_W = 32                            # sigma (row 0) + 27 appearance rows + padding (mult. of 8)


def _vm_kernel(xyz_ref, cells_ref, pg_ref, lg_ref, wt_ref, out_ref):
    # Transposed layout: points along lanes.
    #   xyz_ref:   (3, TN)      f32   sample coords in [-1, 1]
    #   cells_ref: (R*R, 2)     f32   [:,0] = flat_cell // R (height), [:,1] = flat_cell % R (width)
    #   pg_ref:    (3, C, R*R)  bf16  fused plane grids (density | appearance channels)
    #   lg_ref:    (3C, 3R)     bf16  block-diagonal fused line grids
    #   wt_ref:    (OUT_W, 3C)  f32   fused projection (row 0 -> sigma, rows 1..27 -> basis_mat)
    #   out_ref:   (OUT_W, TN)  f32   lane-dense fused output
    r = lg_ref.shape[1] // 3

    # align_corners=True:  pixel index = (coord + 1) / 2 * (R - 1)
    idx = (xyz_ref[...] + 1.0) * (0.5 * (r - 1))            # (3, TN)

    cells = cells_ref[...]
    h_cell = cells[:, 0:1]                                   # (R*R, 1)
    w_cell = cells[:, 1:2]                                   # (R*R, 1)
    l_cell = cells[0:r, 1:2]                                 # (R, 1): flat % R == arange(R) for flat < R

    def tent(cell_col, coord_row):
        # (K, 1) cell centres vs (1, TN) coords -> (K, TN) bilinear (tent) weights; reproduces
        # grid_sample(align_corners=True, padding_mode='zeros') exactly for these grids.
        return jnp.maximum(0.0, 1.0 - jnp.abs(cell_col - coord_row))

    # ---- lines: ONE fused matmul against the block-diagonal line grid ------------------
    wl = jnp.concatenate([tent(l_cell, idx[a:a + 1, :]) for a in VEC_MODE],
                         axis=0).astype(jnp.bfloat16)        # (3R, TN)
    lf = jnp.dot(lg_ref[...], wl, preferred_element_type=jnp.float32)      # (3C, TN)

    # ---- planes: tent build + h*w product + bf16 cast fused per plane ------------------
    pf_parts = []
    for i, (wa, ha) in enumerate(MAT_MODE):
        w2 = (tent(h_cell, idx[ha:ha + 1, :]) *
              tent(w_cell, idx[wa:wa + 1, :])).astype(jnp.bfloat16)         # (R*R, TN)
        pf_parts.append(jnp.dot(pg_ref[i], w2, preferred_element_type=jnp.float32))  # (C, TN)
    pf = jnp.concatenate(pf_parts, axis=0)                                  # (3C, TN)

    # ---- ONE fused sigma + appearance projection (f32; K = 3C is tiny) -----------------
    out_ref[...] = jnp.dot(wt_ref[...], pf * lf, preferred_element_type=jnp.float32)


def vm_split_forward(xyz, d_plane, d_line, a_plane, a_line, basis_w, *, tn=512):
    """xyz: (N, 3); d_plane/a_plane: (3, C*, R, R); d_line/a_line: (3, C*, R, 1);
    basis_w: (27, 3*Ca) (torch Linear weight).  Returns (sigma (N,), app (N, 27))."""
    n = xyz.shape[0]
    r = d_plane.shape[-1]
    cd = d_plane.shape[1]
    ca = a_plane.shape[1]
    c = cd + ca
    rr = r * r

    # ---- plain-JAX glue (layout only, no sampling math) --------------------------------
    # Channel-fused (density | appearance), channel-major, lane-dense plane grids.
    pg = jnp.concatenate([d_plane.reshape(3, cd, rr),
                          a_plane.reshape(3, ca, rr)], axis=1).astype(jnp.bfloat16)   # (3, C, R*R)
    # Block-diagonal fused line grids: lg[i*C + ch, i*R + h] = line_i[ch, h].
    line = jnp.concatenate([d_line[..., 0], a_line[..., 0]], axis=1)                  # (3, C, R)
    lg = jnp.zeros((3 * c, 3 * r), jnp.float32)
    for i in range(3):
        lg = lg.at[i * c:(i + 1) * c, i * r:(i + 1) * r].set(line[i])
    lg = lg.astype(jnp.bfloat16)
    # Fused projection: row 0 sums density channels (sigma); rows 1..27 apply basis_mat to
    # the appearance channels; remaining rows are padding.
    wt = jnp.zeros((OUT_W, 3 * c), jnp.float32)
    for i in range(3):
        wt = wt.at[0, i * c:i * c + cd].set(1.0)
        wt = wt.at[1:1 + APP_DIM, i * c + cd:(i + 1) * c].set(basis_w[:, i * ca:(i + 1) * ca])
    # Flat plane-cell coordinates, passed as an INPUT (Pallas kernels may not capture
    # non-scalar constants).
    flat = np.arange(rr)
    cells = jnp.asarray(np.stack([flat // r, flat % r], axis=1), jnp.float32)         # (R*R, 2)

    # Points in lanes; pad N up to a multiple of the tile (padded coords are valid samples at
    # the grid centre and are simply discarded below).
    xyz_t = xyz.T                                                                      # (3, N)
    n_pad = -(-n // tn) * tn
    if n_pad != n:
        xyz_t = jnp.pad(xyz_t, ((0, 0), (0, n_pad - n)))
    grid = (n_pad // tn,)

    flops = n_pad * (3 * 2 * c * rr + 2 * (3 * c) * (3 * r) + 2 * OUT_W * (3 * c)
                     + 30 * rr + 15 * r)
    bytes_accessed = (xyz_t.size * 4 + cells.size * 4 + pg.size * 2 + lg.size * 2
                      + wt.size * 4 + OUT_W * n_pad * 4)
    cost = pl.CostEstimate(flops=int(flops), transcendentals=0,
                           bytes_accessed=int(bytes_accessed))

    def _const_spec(shape, single_buffer):
        index_map = lambda i, _nd=len(shape): (0,) * _nd
        if single_buffer:
            # Grid-constant operand: a single VMEM buffer suffices (block index never changes).
            return pl.BlockSpec(shape, index_map, pipeline_mode=pl.Buffered(1))
        return pl.BlockSpec(shape, index_map)

    def _build(single_buffer):
        return pl.pallas_call(
            _vm_kernel,
            grid=grid,
            in_specs=[
                pl.BlockSpec((3, tn), lambda i: (0, i)),
                _const_spec((rr, 2), single_buffer),
                _const_spec((3, c, rr), single_buffer),
                _const_spec((3 * c, 3 * r), single_buffer),
                _const_spec((OUT_W, 3 * c), single_buffer),
            ],
            out_specs=pl.BlockSpec((OUT_W, tn), lambda i: (0, i)),
            out_shape=jax.ShapeDtypeStruct((OUT_W, n_pad), jnp.float32),
            compiler_params=pltpu.CompilerParams(
                dimension_semantics=("parallel",),
                vmem_limit_bytes=32 * 1024 * 1024),
            cost_estimate=cost,
        )

    try:
        out_t = _build(True)(xyz_t, cells, pg, lg, wt)
    except Exception:
        # pl.Buffered(1) not supported by this JAX/TPU build -> default double buffering.
        out_t = _build(False)(xyz_t, cells, pg, lg, wt)

    sigma = out_t[0, :n]
    app = out_t[1:1 + APP_DIM, :n].T
    return sigma, app


def reference_forward(xyz, d_plane, d_line, a_plane, a_line, basis_w):
    """Plain-JAX f32 reference mirroring torch grid_sample(align_corners=True) semantics."""
    r = d_plane.shape[-1]
    idx = (xyz + 1.0) * 0.5 * (r - 1)
    grid1 = jnp.arange(r, dtype=jnp.float32)

    def tent(cc):  # (N,) -> (N, R)
        return jnp.maximum(0.0, 1.0 - jnp.abs(cc[:, None] - grid1[None, :]))

    sigma = jnp.zeros((xyz.shape[0],), jnp.float32)
    parts = []
    for i in range(3):
        wx = tent(idx[:, MAT_MODE[i][0]])
        wy = tent(idx[:, MAT_MODE[i][1]])
        wl = tent(idx[:, VEC_MODE[i]])
        pfd = jnp.einsum('nh,nw,chw->nc', wy, wx, d_plane[i])
        lfd = jnp.einsum('nh,ch->nc', wl, d_line[i][:, :, 0])
        sigma = sigma + jnp.sum(pfd * lfd, axis=1)
        pfa = jnp.einsum('nh,nw,chw->nc', wy, wx, a_plane[i])
        lfa = jnp.einsum('nh,ch->nc', wl, a_line[i][:, :, 0])
        parts.append(pfa * lfa)
    comb = jnp.concatenate(parts, axis=1)
    return sigma, comb @ basis_w.T


if __name__ == "__main__":
    # Small, module-consistent shapes: res=16, density_n_comp=8, app_n_comp=8, N=1024 points.
    R, CD, CA, N = 16, 8, 8, 1024
    key = jax.random.PRNGKey(0)
    k = jax.random.split(key, 6)

    d_plane = 0.1 * jax.random.normal(k[0], (3, CD, R, R), jnp.float32)
    d_line = 0.1 * jax.random.normal(k[1], (3, CD, R, 1), jnp.float32)
    a_plane = 0.1 * jax.random.normal(k[2], (3, CA, R, R), jnp.float32)
    a_line = 0.1 * jax.random.normal(k[3], (3, CA, R, 1), jnp.float32)
    basis_w = (1.0 / math.sqrt(3 * CA)) * jax.random.normal(k[4], (APP_DIM, 3 * CA), jnp.float32)
    xyz = jax.random.uniform(k[5], (N, 3), jnp.float32, minval=-1.0, maxval=1.0)

    sigma, app = vm_split_forward(xyz, d_plane, d_line, a_plane, a_line, basis_w, tn=512)
    jax.block_until_ready((sigma, app))

    ref_sigma, ref_app = reference_forward(xyz, d_plane, d_line, a_plane, a_line, basis_w)
    assert sigma.shape == (N,) and app.shape == (N, APP_DIM)
    # bf16 grids / interpolation weights with f32 accumulation -> ~1e-3 error budget.
    assert jnp.allclose(sigma, ref_sigma, atol=1e-2, rtol=1e-2), "sigma mismatch"
    assert jnp.allclose(app, ref_app, atol=1e-2, rtol=1e-2), "app feature mismatch"

    print("KERNEL_OK")
</pallas_src>

<mosaic_0001>
module attributes {stable_mosaic.version = 11 : i64} {
  func.func @_vm_kernel(%arg0: i32, %arg1: memref<3x512xf32, #tpu.memory_space<vmem>>, %arg2: memref<256x2xf32, #tpu.memory_space<vmem>>, %arg3: memref<3x16x256xbf16, #tpu.memory_space<vmem>>, %arg4: memref<48x48xbf16, #tpu.memory_space<vmem>>, %arg5: memref<32x48xf32, #tpu.memory_space<vmem>>, %arg6: memref<32x512xf32, #tpu.memory_space<vmem>>) attributes {dimension_semantics = [#tpu.dimension_semantics<parallel>], iteration_bounds = array<i64: 2>, scalar_prefetch = 0 : i64, scratch_operands = 0 : i64, tpu.core_type = #tpu.core_type<tc>, window_params = [{transform_indices = @transform_0, window_bounds = array<i64: 3, 512>}, {pipeline_mode = #tpu.pipeline_mode<synchronous>, transform_indices = @transform_1, window_bounds = array<i64: 256, 2>}, {pipeline_mode = #tpu.pipeline_mode<synchronous>, transform_indices = @transform_2, window_bounds = array<i64: 3, 16, 256>}, {pipeline_mode = #tpu.pipeline_mode<synchronous>, transform_indices = @transform_3, window_bounds = array<i64: 48, 48>}, {pipeline_mode = #tpu.pipeline_mode<synchronous>, transform_indices = @transform_4, window_bounds = array<i64: 32, 48>}, {transform_indices = @transform_5, window_bounds = array<i64: 32, 512>}]} {
    %c0 = arith.constant 0 : index
    %c0_0 = arith.constant 0 : index
    %0 = vector.load %arg1[%c0, %c0_0] : memref<3x512xf32, #tpu.memory_space<vmem>>, vector<3x512xf32>
    %cst = arith.constant 1.000000e+00 : f32
    %1 = vector.broadcast %cst : f32 to vector<3x512xf32>
    %2 = arith.addf %0, %1 : vector<3x512xf32>
    %cst_1 = arith.constant 7.500000e+00 : f32
    %3 = vector.broadcast %cst_1 : f32 to vector<3x512xf32>
    %4 = arith.mulf %2, %3 : vector<3x512xf32>
    %c0_2 = arith.constant 0 : index
    %c0_3 = arith.constant 0 : index
    %5 = vector.load %arg2[%c0_2, %c0_3] : memref<256x2xf32, #tpu.memory_space<vmem>>, vector<256x2xf32>
    %6 = vector.extract_strided_slice %5 {offsets = [0, 0], sizes = [256, 1], strides = [1, 1]} : vector<256x2xf32> to vector<256x1xf32>
    %7 = vector.extract_strided_slice %5 {offsets = [0, 1], sizes = [256, 1], strides = [1, 1]} : vector<256x2xf32> to vector<256x1xf32>
    %8 = vector.extract_strided_slice %5 {offsets = [0, 1], sizes = [16, 1], strides = [1, 1]} : vector<256x2xf32> to vector<16x1xf32>
    %9 = vector.extract_strided_slice %4 {offsets = [2, 0], sizes = [1, 512], strides = [1, 1]} : vector<3x512xf32> to vector<1x512xf32>
    %10 = vector.broadcast %8 : vector<16x1xf32> to vector<16x512xf32>
    %11 = vector.broadcast %9 : vector<1x512xf32> to vector<16x512xf32>
    %12 = arith.subf %10, %11 : vector<16x512xf32>
    %13 = math.absf %12 : vector<16x512xf32>
    %cst_4 = arith.constant 1.000000e+00 : f32
    %14 = vector.broadcast %cst_4 : f32 to vector<16x512xf32>
    %15 = arith.subf %14, %13 : vector<16x512xf32>
    %cst_5 = arith.constant 0.000000e+00 : f32
    %16 = vector.broadcast %cst_5 : f32 to vector<16x512xf32>
    %17 = arith.maximumf %16, %15 : vector<16x512xf32>
    %18 = vector.extract_strided_slice %4 {offsets = [1, 0], sizes = [1, 512], strides = [1, 1]} : vector<3x512xf32> to vector<1x512xf32>
    %19 = vector.broadcast %8 : vector<16x1xf32> to vector<16x512xf32>
    %20 = vector.broadcast %18 : vector<1x512xf32> to vector<16x512xf32>
    %21 = arith.subf %19, %20 : vector<16x512xf32>
    %22 = math.absf %21 : vector<16x512xf32>
    %cst_6 = arith.constant 1.000000e+00 : f32
    %23 = vector.broadcast %cst_6 : f32 to vector<16x512xf32>
    %24 = arith.subf %23, %22 : vector<16x512xf32>
    %cst_7 = arith.constant 0.000000e+00 : f32
    %25 = vector.broadcast %cst_7 : f32 to vector<16x512xf32>
    %26 = arith.maximumf %25, %24 : vector<16x512xf32>
    %27 = vector.extract_strided_slice %4 {offsets = [0, 0], sizes = [1, 512], strides = [1, 1]} : vector<3x512xf32> to vector<1x512xf32>
    %28 = vector.broadcast %8 : vector<16x1xf32> to vector<16x512xf32>
    %29 = vector.broadcast %27 : vector<1x512xf32> to vector<16x512xf32>
    %30 = arith.subf %28, %29 : vector<16x512xf32>
    %31 = math.absf %30 : vector<16x512xf32>
    %cst_8 = arith.constant 1.000000e+00 : f32
    %32 = vector.broadcast %cst_8 : f32 to vector<16x512xf32>
    %33 = arith.subf %32, %31 : vector<16x512xf32>
    %cst_9 = arith.constant 0.000000e+00 : f32
    %34 = vector.broadcast %cst_9 : f32 to vector<16x512xf32>
    %35 = arith.maximumf %34, %33 : vector<16x512xf32>
    %36 = tpu.concatenate %17, %26, %35 in 0 : vector<16x512xf32>, vector<16x512xf32>, vector<16x512xf32> -> vector<48x512xf32>
    %37 = arith.truncf %36 : vector<48x512xf32> to vector<48x512xbf16>
    %c0_10 = arith.constant 0 : index
    %c0_11 = arith.constant 0 : index
    %38 = vector.load %arg4[%c0_10, %c0_11] : memref<48x48xbf16, #tpu.memory_space<vmem>>, vector<48x48xbf16>
    %cst_12 = arith.constant dense<0.000000e+00> : vector<48x512xf32>
    %39 = tpu.matmul %38, %37, %cst_12 {dimension_numbers = #tpu.dot_dimension_numbers<[1], [0], [0], [1], [0, 0, 1, 1], [], []>} : vector<48x48xbf16>, vector<48x512xbf16>, vector<48x512xf32> -> vector<48x512xf32>
    %40 = vector.extract_strided_slice %4 {offsets = [1, 0], sizes = [1, 512], strides = [1, 1]} : vector<3x512xf32> to vector<1x512xf32>
    %41 = vector.broadcast %6 : vector<256x1xf32> to vector<256x512xf32>
    %42 = vector.broadcast %40 : vector<1x512xf32> to vector<256x512xf32>
    %43 = arith.subf %41, %42 : vector<256x512xf32>
    %44 = math.absf %43 : vector<256x512xf32>
    %cst_13 = arith.constant 1.000000e+00 : f32
    %45 = vector.broadcast %cst_13 : f32 to vector<256x512xf32>
    %46 = arith.subf %45, %44 : vector<256x512xf32>
    %cst_14 = arith.constant 0.000000e+00 : f32
    %47 = vector.broadcast %cst_14 : f32 to vector<256x512xf32>
    %48 = arith.maximumf %47, %46 : vector<256x512xf32>
    %49 = vector.extract_strided_slice %4 {offsets = [0, 0], sizes = [1, 512], strides = [1, 1]} : vector<3x512xf32> to vector<1x512xf32>
    %50 = vector.broadcast %7 : vector<256x1xf32> to vector<256x512xf32>
    %51 = vector.broadcast %49 : vector<1x512xf32> to vector<256x512xf32>
    %52 = arith.subf %50, %51 : vector<256x512xf32>
    %53 = math.absf %52 : vector<256x512xf32>
    %cst_15 = arith.constant 1.000000e+00 : f32
    %54 = vector.broadcast %cst_15 : f32 to vector<256x512xf32>
    %55 = arith.subf %54, %53 : vector<256x512xf32>
    %cst_16 = arith.constant 0.000000e+00 : f32
    %56 = vector.broadcast %cst_16 : f32 to vector<256x512xf32>
    %57 = arith.maximumf %56, %55 : vector<256x512xf32>
    %58 = arith.mulf %48, %57 : vector<256x512xf32>
    %59 = arith.truncf %58 : vector<256x512xf32> to vector<256x512xbf16>
    %c0_17 = arith.constant 0 : index
    %c0_18 = arith.constant 0 : index
    %c0_19 = arith.constant 0 : index
    %60 = vector.load %arg3[%c0_17, %c0_18, %c0_19] : memref<3x16x256xbf16, #tpu.memory_space<vmem>>, vector<1x16x256xbf16>
    %61 = vector.shape_cast %60 : vector<1x16x256xbf16> to vector<16x256xbf16>
    %cst_20 = arith.constant dense<0.000000e+00> : vector<16x512xf32>
    %62 = tpu.matmul %61, %59, %cst_20 {dimension_numbers = #tpu.dot_dimension_numbers<[1], [0], [0], [1], [0, 0, 1, 1], [], []>} : vector<16x256xbf16>, vector<256x512xbf16>, vector<16x512xf32> -> vector<16x512xf32>
    %63 = vector.extract_strided_slice %4 {offsets = [2, 0], sizes = [1, 512], strides = [1, 1]} : vector<3x512xf32> to vector<1x512xf32>
    %64 = vector.broadcast %6 : vector<256x1xf32> to vector<256x512xf32>
    %65 = vector.broadcast %63 : vector<1x512xf32> to vector<256x512xf32>
    %66 = arith.subf %64, %65 : vector<256x512xf32>
    %67 = math.absf %66 : vector<256x512xf32>
    %cst_21 = arith.constant 1.000000e+00 : f32
    %68 = vector.broadcast %cst_21 : f32 to vector<256x512xf32>
    %69 = arith.subf %68, %67 : vector<256x512xf32>
    %cst_22 = arith.constant 0.000000e+00 : f32
    %70 = vector.broadcast %cst_22 : f32 to vector<256x512xf32>
    %71 = arith.maximumf %70, %69 : vector<256x512xf32>
    %72 = vector.extract_strided_slice %4 {offsets = [0, 0], sizes = [1, 512], strides = [1, 1]} : vector<3x512xf32> to vector<1x512xf32>
    %73 = vector.broadcast %7 : vector<256x1xf32> to vector<256x512xf32>
    %74 = vector.broadcast %72 : vector<1x512xf32> to vector<256x512xf32>
    %75 = arith.subf %73, %74 : vector<256x512xf32>
    %76 = math.absf %75 : vector<256x512xf32>
    %cst_23 = arith.constant 1.000000e+00 : f32
    %77 = vector.broadcast %cst_23 : f32 to vector<256x512xf32>
    %78 = arith.subf %77, %76 : vector<256x512xf32>
    %cst_24 = arith.constant 0.000000e+00 : f32
    %79 = vector.broadcast %cst_24 : f32 to vector<256x512xf32>
    %80 = arith.maximumf %79, %78 : vector<256x512xf32>
    %81 = arith.mulf %71, %80 : vector<256x512xf32>
    %82 = arith.truncf %81 : vector<256x512xf32> to vector<256x512xbf16>
    %c1 = arith.constant 1 : index
    %c0_25 = arith.constant 0 : index
    %c0_26 = arith.constant 0 : index
    %83 = vector.load %arg3[%c1, %c0_25, %c0_26] : memref<3x16x256xbf16, #tpu.memory_space<vmem>>, vector<1x16x256xbf16>
    %84 = vector.shape_cast %83 : vector<1x16x256xbf16> to vector<16x256xbf16>
    %cst_27 = arith.constant dense<0.000000e+00> : vector<16x512xf32>
    %85 = tpu.matmul %84, %82, %cst_27 {dimension_numbers = #tpu.dot_dimension_numbers<[1], [0], [0], [1], [0, 0, 1, 1], [], []>} : vector<16x256xbf16>, vector<256x512xbf16>, vector<16x512xf32> -> vector<16x512xf32>
    %86 = vector.extract_strided_slice %4 {offsets = [2, 0], sizes = [1, 512], strides = [1, 1]} : vector<3x512xf32> to vector<1x512xf32>
    %87 = vector.broadcast %6 : vector<256x1xf32> to vector<256x512xf32>
    %88 = vector.broadcast %86 : vector<1x512xf32> to vector<256x512xf32>
    %89 = arith.subf %87, %88 : vector<256x512xf32>
    %90 = math.absf %89 : vector<256x512xf32>
    %cst_28 = arith.constant 1.000000e+00 : f32
    %91 = vector.broadcast %cst_28 : f32 to vector<256x512xf32>
    %92 = arith.subf %91, %90 : vector<256x512xf32>
    %cst_29 = arith.constant 0.000000e+00 : f32
    %93 = vector.broadcast %cst_29 : f32 to vector<256x512xf32>
    %94 = arith.maximumf %93, %92 : vector<256x512xf32>
    %95 = vector.extract_strided_slice %4 {offsets = [1, 0], sizes = [1, 512], strides = [1, 1]} : vector<3x512xf32> to vector<1x512xf32>
    %96 = vector.broadcast %7 : vector<256x1xf32> to vector<256x512xf32>
    %97 = vector.broadcast %95 : vector<1x512xf32> to vector<256x512xf32>
    %98 = arith.subf %96, %97 : vector<256x512xf32>
    %99 = math.absf %98 : vector<256x512xf32>
    %cst_30 = arith.constant 1.000000e+00 : f32
    %100 = vector.broadcast %cst_30 : f32 to vector<256x512xf32>
    %101 = arith.subf %100, %99 : vector<256x512xf32>
    %cst_31 = arith.constant 0.000000e+00 : f32
    %102 = vector.broadcast %cst_31 : f32 to vector<256x512xf32>
    %103 = arith.maximumf %102, %101 : vector<256x512xf32>
    %104 = arith.mulf %94, %103 : vector<256x512xf32>
    %105 = arith.truncf %104 : vector<256x512xf32> to vector<256x512xbf16>
    %c2 = arith.constant 2 : index
    %c0_32 = arith.constant 0 : index
    %c0_33 = arith.constant 0 : index
    %106 = vector.load %arg3[%c2, %c0_32, %c0_33] : memref<3x16x256xbf16, #tpu.memory_space<vmem>>, vector<1x16x256xbf16>
    %107 = vector.shape_cast %106 : vector<1x16x256xbf16> to vector<16x256xbf16>
    %cst_34 = arith.constant dense<0.000000e+00> : vector<16x512xf32>
    %108 = tpu.matmul %107, %105, %cst_34 {dimension_numbers = #tpu.dot_dimension_numbers<[1], [0], [0], [1], [0, 0, 1, 1], [], []>} : vector<16x256xbf16>, vector<256x512xbf16>, vector<16x512xf32> -> vector<16x512xf32>
    %109 = tpu.concatenate %62, %85, %108 in 0 : vector<16x512xf32>, vector<16x512xf32>, vector<16x512xf32> -> vector<48x512xf32>
    %c0_35 = arith.constant 0 : index
    %c0_36 = arith.constant 0 : index
    %110 = vector.load %arg5[%c0_35, %c0_36] : memref<32x48xf32, #tpu.memory_space<vmem>>, vector<32x48xf32>
    %111 = arith.mulf %109, %39 : vector<48x512xf32>
    %cst_37 = arith.constant dense<0.000000e+00> : vector<32x512xf32>
    %112 = tpu.matmul %110, %111, %cst_37 {dimension_numbers = #tpu.dot_dimension_numbers<[1], [0], [0], [1], [0, 0, 1, 1], [], []>} : vector<32x48xf32>, vector<48x512xf32>, vector<32x512xf32> -> vector<32x512xf32>
    %c0_38 = arith.constant 0 : index
    %c0_39 = arith.constant 0 : index
    %113 = vector.load %arg6[%c0_38, %c0_39] : memref<32x512xf32, #tpu.memory_space<vmem>>, vector<32x512xf32>
    tpu.vector_store %arg6[%c0_38, %c0_39], %112 {strides = array<i32>} : memref<32x512xf32, #tpu.memory_space<vmem>>, vector<32x512xf32>,
    return
  }
  func.func @transform_0(%arg0: i32) -> (i32, i32) {
    %c0_i32 = arith.constant 0 : i32
    %c0_i32_0 = arith.constant 0 : i32
    return %c0_i32, %arg0 : i32, i32
  }
  func.func @transform_1(%arg0: i32) -> (i32, i32) {
    %c0_i32 = arith.constant 0 : i32
    %c0_i32_0 = arith.constant 0 : i32
    %c0_i32_1 = arith.constant 0 : i32
    return %c0_i32, %c0_i32_0 : i32, i32
  }
  func.func @transform_2(%arg0: i32) -> (i32, i32, i32) {
    %c0_i32 = arith.constant 0 : i32
    %c0_i32_0 = arith.constant 0 : i32
    %c0_i32_1 = arith.constant 0 : i32
    %c0_i32_2 = arith.constant 0 : i32
    return %c0_i32, %c0_i32_0, %c0_i32_1 : i32, i32, i32
  }
  func.func @transform_3(%arg0: i32) -> (i32, i32) {
    %c0_i32 = arith.constant 0 : i32
    %c0_i32_0 = arith.constant 0 : i32
    %c0_i32_1 = arith.constant 0 : i32
    return %c0_i32, %c0_i32_0 : i32, i32
  }
  func.func @transform_4(%arg0: i32) -> (i32, i32) {
    %c0_i32 = arith.constant 0 : i32
    %c0_i32_0 = arith.constant 0 : i32
    %c0_i32_1 = arith.constant 0 : i32
    return %c0_i32, %c0_i32_0 : i32, i32
  }
  func.func @transform_5(%arg0: i32) -> (i32, i32) {
    %c0_i32 = arith.constant 0 : i32
    %c0_i32_0 = arith.constant 0 : i32
    return %c0_i32, %arg0 : i32, i32
  }
}

module attributes {stable_mosaic.version = 11 : i64} {
  func.func @_vm_kernel(%arg0: i32, %arg1: memref<3x512xf32, #tpu.memory_space<vmem>>, %arg2: memref<256x2xf32, #tpu.memory_space<vmem>>, %arg3: memref<3x16x256xbf16, #tpu.memory_space<vmem>>, %arg4: memref<48x48xbf16, #tpu.memory_space<vmem>>, %arg5: memref<32x48xf32, #tpu.memory_space<vmem>>, %arg6: memref<32x512xf32, #tpu.memory_space<vmem>>) attributes {dimension_semantics = [#tpu.dimension_semantics<parallel>], iteration_bounds = array<i64: 2>, scalar_prefetch = 0 : i64, scratch_operands = 0 : i64, tpu.core_type = #tpu.core_type<tc>, window_params = [{transform_indices = @transform_0, window_bounds = array<i64: 3, 512>}, {pipeline_mode = #tpu.pipeline_mode<synchronous>, transform_indices = @transform_1, window_bounds = array<i64: 256, 2>}, {pipeline_mode = #tpu.pipeline_mode<synchronous>, transform_indices = @transform_2, window_bounds = array<i64: 3, 16, 256>}, {pipeline_mode = #tpu.pipeline_mode<synchronous>, transform_indices = @transform_3, window_bounds = array<i64: 48, 48>}, {pipeline_mode = #tpu.pipeline_mode<synchronous>, transform_indices = @transform_4, window_bounds = array<i64: 32, 48>}, {transform_indices = @transform_5, window_bounds = array<i64: 32, 512>}]} {
    %c0 = arith.constant 0 : index
    %c0_0 = arith.constant 0 : index
    %0 = vector.load %arg1[%c0, %c0_0] : memref<3x512xf32, #tpu.memory_space<vmem>>, vector<3x512xf32>
    %cst = arith.constant 1.000000e+00 : f32
    %1 = vector.broadcast %cst : f32 to vector<3x512xf32>
    %2 = arith.addf %0, %1 : vector<3x512xf32>
    %cst_1 = arith.constant 7.500000e+00 : f32
    %3 = vector.broadcast %cst_1 : f32 to vector<3x512xf32>
    %4 = arith.mulf %2, %3 : vector<3x512xf32>
    %c0_2 = arith.constant 0 : index
    %c0_3 = arith.constant 0 : index
    %5 = vector.load %arg2[%c0_2, %c0_3] : memref<256x2xf32, #tpu.memory_space<vmem>>, vector<256x2xf32>
    %6 = vector.extract_strided_slice %5 {offsets = [0, 0], sizes = [256, 1], strides = [1, 1]} : vector<256x2xf32> to vector<256x1xf32>
    %7 = vector.extract_strided_slice %5 {offsets = [0, 1], sizes = [256, 1], strides = [1, 1]} : vector<256x2xf32> to vector<256x1xf32>
    %8 = vector.extract_strided_slice %5 {offsets = [0, 1], sizes = [16, 1], strides = [1, 1]} : vector<256x2xf32> to vector<16x1xf32>
    %9 = vector.extract_strided_slice %4 {offsets = [2, 0], sizes = [1, 512], strides = [1, 1]} : vector<3x512xf32> to vector<1x512xf32>
    %10 = vector.broadcast %8 : vector<16x1xf32> to vector<16x512xf32>
    %11 = vector.broadcast %9 : vector<1x512xf32> to vector<16x512xf32>
    %12 = arith.subf %10, %11 : vector<16x512xf32>
    %13 = math.absf %12 : vector<16x512xf32>
    %cst_4 = arith.constant 1.000000e+00 : f32
    %14 = vector.broadcast %cst_4 : f32 to vector<16x512xf32>
    %15 = arith.subf %14, %13 : vector<16x512xf32>
    %cst_5 = arith.constant 0.000000e+00 : f32
    %16 = vector.broadcast %cst_5 : f32 to vector<16x512xf32>
    %17 = arith.maximumf %16, %15 : vector<16x512xf32>
    %18 = vector.extract_strided_slice %4 {offsets = [1, 0], sizes = [1, 512], strides = [1, 1]} : vector<3x512xf32> to vector<1x512xf32>
    %19 = vector.broadcast %8 : vector<16x1xf32> to vector<16x512xf32>
    %20 = vector.broadcast %18 : vector<1x512xf32> to vector<16x512xf32>
    %21 = arith.subf %19, %20 : vector<16x512xf32>
    %22 = math.absf %21 : vector<16x512xf32>
    %cst_6 = arith.constant 1.000000e+00 : f32
    %23 = vector.broadcast %cst_6 : f32 to vector<16x512xf32>
    %24 = arith.subf %23, %22 : vector<16x512xf32>
    %cst_7 = arith.constant 0.000000e+00 : f32
    %25 = vector.broadcast %cst_7 : f32 to vector<16x512xf32>
    %26 = arith.maximumf %25, %24 : vector<16x512xf32>
    %27 = vector.extract_strided_slice %4 {offsets = [0, 0], sizes = [1, 512], strides = [1, 1]} : vector<3x512xf32> to vector<1x512xf32>
    %28 = vector.broadcast %8 : vector<16x1xf32> to vector<16x512xf32>
    %29 = vector.broadcast %27 : vector<1x512xf32> to vector<16x512xf32>
    %30 = arith.subf %28, %29 : vector<16x512xf32>
    %31 = math.absf %30 : vector<16x512xf32>
    %cst_8 = arith.constant 1.000000e+00 : f32
    %32 = vector.broadcast %cst_8 : f32 to vector<16x512xf32>
    %33 = arith.subf %32, %31 : vector<16x512xf32>
    %cst_9 = arith.constant 0.000000e+00 : f32
    %34 = vector.broadcast %cst_9 : f32 to vector<16x512xf32>
    %35 = arith.maximumf %34, %33 : vector<16x512xf32>
    %36 = tpu.concatenate %17, %26, %35 in 0 : vector<16x512xf32>, vector<16x512xf32>, vector<16x512xf32> -> vector<48x512xf32>
    %37 = arith.truncf %36 : vector<48x512xf32> to vector<48x512xbf16>
    %c0_10 = arith.constant 0 : index
    %c0_11 = arith.constant 0 : index
    %38 = vector.load %arg4[%c0_10, %c0_11] : memref<48x48xbf16, #tpu.memory_space<vmem>>, vector<48x48xbf16>
    %cst_12 = arith.constant dense<0.000000e+00> : vector<48x512xf32>
    %39 = tpu.matmul %38, %37, %cst_12 {dimension_numbers = #tpu.dot_dimension_numbers<[1], [0], [0], [1], [0, 0, 1, 1], [], []>} : vector<48x48xbf16>, vector<48x512xbf16>, vector<48x512xf32> -> vector<48x512xf32>
    %40 = vector.extract_strided_slice %4 {offsets = [1, 0], sizes = [1, 512], strides = [1, 1]} : vector<3x512xf32> to vector<1x512xf32>
    %41 = vector.broadcast %6 : vector<256x1xf32> to vector<256x512xf32>
    %42 = vector.broadcast %40 : vector<1x512xf32> to vector<256x512xf32>
    %43 = arith.subf %41, %42 : vector<256x512xf32>
    %44 = math.absf %43 : vector<256x512xf32>
    %cst_13 = arith.constant 1.000000e+00 : f32
    %45 = vector.broadcast %cst_13 : f32 to vector<256x512xf32>
    %46 = arith.subf %45, %44 : vector<256x512xf32>
    %cst_14 = arith.constant 0.000000e+00 : f32
    %47 = vector.broadcast %cst_14 : f32 to vector<256x512xf32>
    %48 = arith.maximumf %47, %46 : vector<256x512xf32>
    %49 = vector.extract_strided_slice %4 {offsets = [0, 0], sizes = [1, 512], strides = [1, 1]} : vector<3x512xf32> to vector<1x512xf32>
    %50 = vector.broadcast %7 : vector<256x1xf32> to vector<256x512xf32>
    %51 = vector.broadcast %49 : vector<1x512xf32> to vector<256x512xf32>
    %52 = arith.subf %50, %51 : vector<256x512xf32>
    %53 = math.absf %52 : vector<256x512xf32>
    %cst_15 = arith.constant 1.000000e+00 : f32
    %54 = vector.broadcast %cst_15 : f32 to vector<256x512xf32>
    %55 = arith.subf %54, %53 : vector<256x512xf32>
    %cst_16 = arith.constant 0.000000e+00 : f32
    %56 = vector.broadcast %cst_16 : f32 to vector<256x512xf32>
    %57 = arith.maximumf %56, %55 : vector<256x512xf32>
    %58 = arith.mulf %48, %57 : vector<256x512xf32>
    %59 = arith.truncf %58 : vector<256x512xf32> to vector<256x512xbf16>
    %c0_17 = arith.constant 0 : index
    %c0_18 = arith.constant 0 : index
    %c0_19 = arith.constant 0 : index
    %60 = vector.load %arg3[%c0_17, %c0_18, %c0_19] : memref<3x16x256xbf16, #tpu.memory_space<vmem>>, vector<1x16x256xbf16>
    %61 = vector.shape_cast %60 : vector<1x16x256xbf16> to vector<16x256xbf16>
    %cst_20 = arith.constant dense<0.000000e+00> : vector<16x512xf32>
    %62 = tpu.matmul %61, %59, %cst_20 {dimension_numbers = #tpu.dot_dimension_numbers<[1], [0], [0], [1], [0, 0, 1, 1], [], []>} : vector<16x256xbf16>, vector<256x512xbf16>, vector<16x512xf32> -> vector<16x512xf32>
    %63 = vector.extract_strided_slice %4 {offsets = [2, 0], sizes = [1, 512], strides = [1, 1]} : vector<3x512xf32> to vector<1x512xf32>
    %64 = vector.broadcast %6 : vector<256x1xf32> to vector<256x512xf32>
    %65 = vector.broadcast %63 : vector<1x512xf32> to vector<256x512xf32>
    %66 = arith.subf %64, %65 : vector<256x512xf32>
    %67 = math.absf %66 : vector<256x512xf32>
    %cst_21 = arith.constant 1.000000e+00 : f32
    %68 = vector.broadcast %cst_21 : f32 to vector<256x512xf32>
    %69 = arith.subf %68, %67 : vector<256x512xf32>
    %cst_22 = arith.constant 0.000000e+00 : f32
    %70 = vector.broadcast %cst_22 : f32 to vector<256x512xf32>
    %71 = arith.maximumf %70, %69 : vector<256x512xf32>
    %72 = vector.extract_strided_slice %4 {offsets = [0, 0], sizes = [1, 512], strides = [1, 1]} : vector<3x512xf32> to vector<1x512xf32>
    %73 = vector.broadcast %7 : vector<256x1xf32> to vector<256x512xf32>
    %74 = vector.broadcast %72 : vector<1x512xf32> to vector<256x512xf32>
    %75 = arith.subf %73, %74 : vector<256x512xf32>
    %76 = math.absf %75 : vector<256x512xf32>
    %cst_23 = arith.constant 1.000000e+00 : f32
    %77 = vector.broadcast %cst_23 : f32 to vector<256x512xf32>
    %78 = arith.subf %77, %76 : vector<256x512xf32>
    %cst_24 = arith.constant 0.000000e+00 : f32
    %79 = vector.broadcast %cst_24 : f32 to vector<256x512xf32>
    %80 = arith.maximumf %79, %78 : vector<256x512xf32>
    %81 = arith.mulf %71, %80 : vector<256x512xf32>
    %82 = arith.truncf %81 : vector<256x512xf32> to vector<256x512xbf16>
    %c1 = arith.constant 1 : index
    %c0_25 = arith.constant 0 : index
    %c0_26 = arith.constant 0 : index
    %83 = vector.load %arg3[%c1, %c0_25, %c0_26] : memref<3x16x256xbf16, #tpu.memory_space<vmem>>, vector<1x16x256xbf16>
    %84 = vector.shape_cast %83 : vector<1x16x256xbf16> to vector<16x256xbf16>
    %cst_27 = arith.constant dense<0.000000e+00> : vector<16x512xf32>
    %85 = tpu.matmul %84, %82, %cst_27 {dimension_numbers = #tpu.dot_dimension_numbers<[1], [0], [0], [1], [0, 0, 1, 1], [], []>} : vector<16x256xbf16>, vector<256x512xbf16>, vector<16x512xf32> -> vector<16x512xf32>
    %86 = vector.extract_strided_slice %4 {offsets = [2, 0], sizes = [1, 512], strides = [1, 1]} : vector<3x512xf32> to vector<1x512xf32>
    %87 = vector.broadcast %6 : vector<256x1xf32> to vector<256x512xf32>
    %88 = vector.broadcast %86 : vector<1x512xf32> to vector<256x512xf32>
    %89 = arith.subf %87, %88 : vector<256x512xf32>
    %90 = math.absf %89 : vector<256x512xf32>
    %cst_28 = arith.constant 1.000000e+00 : f32
    %91 = vector.broadcast %cst_28 : f32 to vector<256x512xf32>
    %92 = arith.subf %91, %90 : vector<256x512xf32>
    %cst_29 = arith.constant 0.000000e+00 : f32
    %93 = vector.broadcast %cst_29 : f32 to vector<256x512xf32>
    %94 = arith.maximumf %93, %92 : vector<256x512xf32>
    %95 = vector.extract_strided_slice %4 {offsets = [1, 0], sizes = [1, 512], strides = [1, 1]} : vector<3x512xf32> to vector<1x512xf32>
    %96 = vector.broadcast %7 : vector<256x1xf32> to vector<256x512xf32>
    %97 = vector.broadcast %95 : vector<1x512xf32> to vector<256x512xf32>
    %98 = arith.subf %96, %97 : vector<256x512xf32>
    %99 = math.absf %98 : vector<256x512xf32>
    %cst_30 = arith.constant 1.000000e+00 : f32
    %100 = vector.broadcast %cst_30 : f32 to vector<256x512xf32>
    %101 = arith.subf %100, %99 : vector<256x512xf32>
    %cst_31 = arith.constant 0.000000e+00 : f32
    %102 = vector.broadcast %cst_31 : f32 to vector<256x512xf32>
    %103 = arith.maximumf %102, %101 : vector<256x512xf32>
    %104 = arith.mulf %94, %103 : vector<256x512xf32>
    %105 = arith.truncf %104 : vector<256x512xf32> to vector<256x512xbf16>
    %c2 = arith.constant 2 : index
    %c0_32 = arith.constant 0 : index
    %c0_33 = arith.constant 0 : index
    %106 = vector.load %arg3[%c2, %c0_32, %c0_33] : memref<3x16x256xbf16, #tpu.memory_space<vmem>>, vector<1x16x256xbf16>
    %107 = vector.shape_cast %106 : vector<1x16x256xbf16> to vector<16x256xbf16>
    %cst_34 = arith.constant dense<0.000000e+00> : vector<16x512xf32>
    %108 = tpu.matmul %107, %105, %cst_34 {dimension_numbers = #tpu.dot_dimension_numbers<[1], [0], [0], [1], [0, 0, 1, 1], [], []>} : vector<16x256xbf16>, vector<256x512xbf16>, vector<16x512xf32> -> vector<16x512xf32>
    %109 = tpu.concatenate %62, %85, %108 in 0 : vector<16x512xf32>, vector<16x512xf32>, vector<16x512xf32> -> vector<48x512xf32>
    %c0_35 = arith.constant 0 : index
    %c0_36 = arith.constant 0 : index
    %110 = vector.load %arg5[%c0_35, %c0_36] : memref<32x48xf32, #tpu.memory_space<vmem>>, vector<32x48xf32>
    %111 = arith.mulf %109, %39 : vector<48x512xf32>
    %cst_37 = arith.constant dense<0.000000e+00> : vector<32x512xf32>
    %112 = tpu.matmul %110, %111, %cst_37 {dimension_numbers = #tpu.dot_dimension_numbers<[1], [0], [0], [1], [0, 0, 1, 1], [], []>} : vector<32x48xf32>, vector<48x512xf32>, vector<32x512xf32> -> vector<32x512xf32>
    %c0_38 = arith.constant 0 : index
    %c0_39 = arith.constant 0 : index
    %113 = vector.load %arg6[%c0_38, %c0_39] : memref<32x512xf32, #tpu.memory_space<vmem>>, vector<32x512xf32>
    tpu.vector_store %arg6[%c0_38, %c0_39], %112 {strides = array<i32>} : memref<32x512xf32, #tpu.memory_space<vmem>>, vector<32x512xf32>,
    return
  }
  func.func @transform_0(%arg0: i32) -> (i32, i32) {
    %c0_i32 = arith.constant 0 : i32
    %c0_i32_0 = arith.constant 0 : i32
    return %c0_i32, %arg0 : i32, i32
  }
  func.func @transform_1(%arg0: i32) -> (i32, i32) {
    %c0_i32 = arith.constant 0 : i32
    %c0_i32_0 = arith.constant 0 : i32
    %c0_i32_1 = arith.constant 0 : i32
    return %c0_i32, %c0_i32_0 : i32, i32
  }
  func.func @transform_2(%arg0: i32) -> (i32, i32, i32) {
    %c0_i32 = arith.constant 0 : i32
    %c0_i32_0 = arith.constant 0 : i32
    %c0_i32_1 = arith.constant 0 : i32
    %c0_i32_2 = arith.constant 0 : i32
    return %c0_i32, %c0_i32_0, %c0_i32_1 : i32, i32, i32
  }
  func.func @transform_3(%arg0: i32) -> (i32, i32) {
    %c0_i32 = arith.constant 0 : i32
    %c0_i32_0 = arith.constant 0 : i32
    %c0_i32_1 = arith.constant 0 : i32
    return %c0_i32, %c0_i32_0 : i32, i32
  }
  func.func @transform_4(%arg0: i32) -> (i32, i32) {
    %c0_i32 = arith.constant 0 : i32
    %c0_i32_0 = arith.constant 0 : i32
    %c0_i32_1 = arith.constant 0 : i32
    return %c0_i32, %c0_i32_0 : i32, i32
  }
  func.func @transform_5(%arg0: i32) -> (i32, i32) {
    %c0_i32 = arith.constant 0 : i32
    %c0_i32_0 = arith.constant 0 : i32
    return %c0_i32, %arg0 : i32, i32
  }
}

</mosaic_0001>

<bundles_post_ra>
// kernel: tpu_custom_call.1
= control target key start
LH: loop header
LB: loop body
LE: loop exit
PB: predicated region body
PF: predicated region fallthrough
CT: control target
= control target key end

     0   :  { %10 = vsyncpa [#allocation3], 0  ;;  %s7055_s0 = inlined_call_operand.vmem [shape: f32[3,1024], index: 0, kind: input, shape index: {}]   ;;  %s7056_s1 = inlined_call_operand.vmem [shape: f32[256,2], index: 1, kind: input, shape index: {}]   ;;  %s7057_s2 = inlined_call_operand.vmem [shape: bf16[3,16,256], index: 2, kind: input, shape index: {}]   ;;  %s7058_s3 = inlined_call_operand.vmem [shape: bf16[48,48], index: 3, kind: input, shape index: {}]   ;;  %s7059_s4 = inlined_call_operand.vmem [shape: f32[32,48], index: 4, kind: input, shape index: {}]   ;;  %s7060_s5 = inlined_call_operand.hbm [shape: f32[32,1024], index: 5, kind: output, shape index: {}]  }
   0x1   :  { %12 = vsyncpa [#allocation3 + $0x1], 0  ;;  %s4349_s18 = smov 0   ;;  %s4351_s19 = smov 0  }
   0x2   :  { %s4353_s20 = smov 0   ;;  %s4355_s21 = smov 0  }
   0x3 LB: > { %s4370_s22 = sadd.s32 4294967295, %s4310_s21   ;;  %s4094_s23 = sadd.s32 4294967294, %s4310_s21   ;;  %s4310_s21 = sphi %s4355_s21, %s7916_s21   ;;  %s4306_s20 = sphi %s4353_s20, %s7915_s20   ;;  %s4302_s19 = sphi %s4351_s19, %s7914_s19   ;;  %s4298_s18 = sphi %s4349_s18, %s7913_s18  }
   0x4   : > { %s4374_s24 = sadd.s32 1, %s4310_s21   ;;  %s135_s25 = sadd.s32 1, %s4306_s20 }
   0x5   : > { %s132_s26 = ssub.s32 %s4310_s21, %s4374_s24  ;;  %p145_p0 = scmp.ne.s32.totalorder %s4306_s20, %s4302_s19 }
   0x6   : > { %p133_p1 = scmp.eq.s32.totalorder %s132_s26, 0  ;;  %p146_p2 = scmp.eq.s32.totalorder %s4370_s22, 1 }
   0x7   : > { %p151_p3 = scmp.ne.s32.totalorder %s4302_s19, %s4298_s18  ;;  %p152_p4 = scmp.eq.s32.totalorder %s4094_s23, 1 }
   0x8   : > { %s4385_s27 = scalar_select %p133_p1, %s4306_s20, %s135_s25  }
   0x9   : > { %p4387_p5 = por %p146_p2, %p145_p0  ;;  %p4391_p6 = por %p152_p4, %p151_p3 }
   0xa   : > { %p4097_p7 = scmp.ge.s32.totalorder %s4310_s21, 1  ;;  %p191_p8 = scmp.lt.s32.totalorder %s4310_s21, 3 }
   0xc   : > { %p192_p9 = pnand %p4097_p7, %p191_p8 }
   0xe   : > { %195 = sbr.rel (%p192_p9) target bundleno = 1294 (0x50e), region = 40 }
  0x15   : > { %v233_v0 = vld [vmem:[%s7056_s1] sm:$0xff]  ;;  %v7063_v1 = vmov 0   ;;  %v7061_v2 = vmov 1   ;;  %v234_v3 = vld [vmem:[%s7056_s1 + $0x8] sm:$0xff]  ;;  %v236_v4 = vld [vmem:[%s7056_s1 + $0x18] sm:$0xff]  ;;  %s4099_s13 = sshll.u32 %s4370_s22, 2  ;;  %v277_v31 = vlaneseq }
  0x16   : > { %4204 = vset.pattern.permute.xlu1 %v7063_v1  ;;  %4203 = vset.pattern.permute.xlu0 %v7061_v2  ;;  %v235_v5 = vld [vmem:[%s7056_s1 + $0x10] sm:$0xff]  ;;  %v237_v8 = vld [vmem:[%s7056_s1 + $0x20] sm:$0xff]  ;;  %v238_v10 = vld [vmem:[%s7056_s1 + $0x28] sm:$0xff]  ;;  %p220_p10 = scmp.lt.s32.totalorder %s4099_s13, 7  ;;  %vm514_vm0 = vcmask 392192   ;;  %s216_s26 = sand.u32 1, %s4302_s19  }
  0x17   : > { %651 = vperm.xlu1 %4204, %v233_v0   ;;  %267 = vperm.xlu0 %4203, %v233_v0   ;;  %v239_v6 = vld [vmem:[%s7056_s1 + $0x30] sm:$0xff]  ;;  %v240_v13 = vld [vmem:[%s7056_s1 + $0x38] sm:$0xff]  ;;  %v241_v16 = vld [vmem:[%s7056_s1 + $0x40] sm:$0xff]  ;;  %v278_v34 = vshrl.u32 %v277_v31, 7  ;;  %s4098_s30 = sshll.u32 %s216_s26, 7  ;;  %s4133_s7 = sshll.u32 %s4370_s22, 9 }
  0x18   : > { %556 = vmatprep.mubr.bf16.mxu0 %v7063_v1  ;;  %619 = vmatprep.mubr.bf16.mxu1 %v7063_v1  ;;  %v243_v7 = vld [vmem:[%s7056_s1 + $0x50] sm:$0xff]  ;;  %v242_v17 = vld [vmem:[%s7056_s1 + $0x48] sm:$0xff]  ;;  %v244_v18 = vld [vmem:[%s7056_s1 + $0x58] sm:$0xff]  ;;  %s7918_s13 = smov (!%p220_p10, %s4099_s13), 7  ;;  %s6985_s6 = scalar_lea.vmem [#allocation2], %s4098_s30 }
  0x19   : > { %v247_v9 = vld [vmem:[%s7056_s1 + $0x70] sm:$0xff]  ;;  %v245_v19 = vld [vmem:[%s7056_s1 + $0x60] sm:$0xff]  ;;  %v248_v20 = vld [vmem:[%s7056_s1 + $0x78] sm:$0xff]  ;;  %s4100_s16 = sshll.u32 %s7918_s13, 2  ;;  %v279_v38 = vsub.s32 2, %v278_v34  ;;  %v347_v40 = vsub.s32 1, %v278_v34  ;;  %s7004_s11 = scalar_lea.hbm %s7060_s5, %s4133_s7 }
  0x1a   : > { %v4434_v11 = vld [vmem:[%s7056_s1 + $0x90] sm:$0xff]  ;;  %v246_v21 = vld [vmem:[%s7056_s1 + $0x68] sm:$0xff]  ;;  %v249_v22 = vld [vmem:[%s7056_s1 + $0x80] sm:$0xff]  ;;  %s223_s25 = scalar_lea.vmem %s7055_s0, %s4100_s16  ;;  %v351_v41 = vsub.s32 5, %v278_v34  ;;  %v283_v43 = vsub.s32 6, %v278_v34  ;;  %v415_v44 = vsub.s32 0, %v278_v34 }
  0x1b   : > { %655 = vperm.xlu1 %4204, %v234_v3   ;;  %272 = vperm.xlu0 %4203, %v234_v3   ;;  %v4441_v12 = vld [vmem:[%s7056_s1 + $0xb0] sm:$0xff]  ;;  %v252_v23 = vld [vmem:[%s7056_s1 + $0x98] sm:$0xff]  ;;  %v253_v24 = vld [vmem:[%s7056_s1 + $0xa0] sm:$0xff]  ;;  %v419_v45 = vsub.s32 4, %v278_v34  ;;  %s4032_s8 = sshll.u32 %s6985_s6, 4  ;;  %s7014_s22 = scalar_lea.sflag [#allocation3], %s216_s26  ;;  %s7007_s8 = int_to_ptr.vmem [resolvable:$true] %s4032_s8 }
  0x1c   : > { %v4450_v14 = vld [vmem:[%s7056_s1 + $0xd0] sm:$0xff]  ;;  %v4499_v25 = vld [vmem:[%s7056_s1 + $0xb8] sm:$0xff]  ;;  %v4505_v26 = vld [vmem:[%s7056_s1 + $0xc0] sm:$0xff]  ;;  %s4248_s12 = scalar_lea.vmem %s7007_s8, 2048  ;;  %s4315_s13 = smov [#allocation2]  }
  0x1d   : > { %v4457_v15 = vld [vmem:[%s7056_s1 + $0xf0] sm:$0xff]  ;;  %v4512_v27 = vld [vmem:[%s7056_s1 + $0xd8] sm:$0xff]  ;;  %v250_v28 = vld [vmem:[%s7056_s1 + $0x88] sm:$0xff]  ;;  %p4249_p11 = scmp.ne.s32.totalorder %s7007_s8, %s4248_s12  ;;  %s4252_s14 = sshll.u32 %s4315_s13, 4  ;;  %s4253_s14 = int_to_ptr.vmem [resolvable:$false] %s4252_s14 }
  0x1e   : > { %v4522_v29 = vld [vmem:[%s7056_s1 + $0xe0] sm:$0xff]  ;;  %v4529_v30 = vld [vmem:[%s7056_s1 + $0xf8] sm:$0xff]  ;;  %v228_v33 = vld [vmem:[%s223_s25 + $0x8] sm:$0x77]  ;;  %s4254_s15 = scalar_lea.vmem %s4253_s14, 4096  ;;  %p4255_p0 = scmp.lt.s32.totalorder %s7007_s8, %s4253_s14 }
  0x1f   : > { %665 = vperm.xlu1 %4204, %v236_v4   ;;  %4205 = vset.pattern.permute.xlu0 %v7063_v1  ;;  %v227_v32 = vld [vmem:[%s223_s25] sm:$0x77]  ;;  %v230_v36 = vadd.f32 1.0, %v228_v33  ;;  %v254_v37 = vld [vmem:[%s7056_s1 + $0xa8] sm:$0xff]  ;;  %p4250_p12 = pnand %p4249_p11, %p4387_p5  ;;  %p4256_p1 = scmp.lt.s32.totalorder %s4254_s15, %s4248_s12 }
  0x20   : > { %660 = vperm.xlu0 %4205, %v235_v5   ;;  %v229_v35 = vadd.f32 1.0, %v227_v32 }
  0x21   : > { %v232_v42 = vmul.f32 7.5, %v230_v36  ;;  %p4251_p13 = pneg %p4250_p12  ;;  %p4257_p2 = por %p4256_p1, %p4255_p0 }
  0x22   : > { %v231_v39 = vmul.f32 7.5, %v229_v35 }
  0x23   : > { %4206 = vset.pattern.permute.xlu1 %v7061_v2  ;;  %v360_v48 = vrot.slane %v232_v42, %v351_v41  ;;  %v292_v51 = vrot.slane %v232_v42, %v283_v43  ;;  %v356_v52 = vrot.slane %v232_v42, %v347_v40  ;;  %v288_v53 = vrot.slane %v232_v42, %v279_v38  ;;  %p4258_p3 = pnand %p4257_p2, %p4251_p13 }
  0x24   : > { %1321 = vperm.xlu1 %4206, %v235_v5   ;;  %680 = vperm.xlu0 %4205, %v239_v6   ;;  %v348_v46 = vrot.slane %v231_v39, %v347_v40  ;;  %v352_v47 = vrot.slane %v231_v39, %v351_v41  ;;  %v280_v49 = vrot.slane %v231_v39, %v279_v38 }
  0x25   : > { %v284_v50 = vrot.slane %v231_v39, %v283_v43  ;;  %v420_v54 = vrot.slane %v231_v39, %v419_v45  ;;  %v428_v55 = vrot.slane %v232_v42, %v419_v45  ;;  %v416_v56 = vrot.slane %v231_v39, %v415_v44 }
  0x26   : > { %v424_v57 = vrot.slane %v232_v42, %v415_v44  ;;  %v4544_v58 = vrot.slane %v348_v46, %v347_v40  ;;  %v4546_v59 = vrot.slane %v352_v47, %v347_v40  ;;  %v4548_v60 = vrot.slane %v360_v48, %v347_v40 }
  0x27   : > { %v4550_v61 = vrot.slane %v280_v49, %v279_v38  ;;  %v4552_v62 = vrot.slane %v284_v50, %v279_v38  ;;  %v4554_v63 = vrot.slane %v292_v51, %v279_v38  ;;  %v4556_v0 = vrot.slane %v356_v52, %v347_v40 }
  0x28   : > { %4207 = vset.pattern.permute.xlu1 %v7063_v1  ;;  %700 = vperm.xlu0 %4205, %v243_v7   ;;  %7369 = vst [vmem:[#allocation5_spill] sm:$0xff] %v4544_v58  ;;  %7370 = vst [vmem:[#allocation6_spill] sm:$0xff] %v4546_v59  ;;  %v4558_v3 = vrot.slane %v288_v53, %v279_v38 }
  0x29   : > { %670 = vperm.xlu1 %4207, %v237_v8   ;;  %7371 = vst [vmem:[#allocation7_spill] sm:$0xff] %v4548_v60 }
  0x2c   : > { %720 = vperm.xlu0 %4205, %v247_v9  }
  0x2d   : > { %675 = vperm.xlu1 %4207, %v238_v10  }
  0x30   : > { %740 = vperm.xlu0 %4205, %v4434_v11  }
  0x31   : > { %4208 = vset.pattern.permute.xlu1 %v7061_v2 }
  0x32   : > { %1333 = vperm.xlu1 %4208, %v238_v10  }
  0x34   : > { %760 = vperm.xlu0 %4205, %v4441_v12  }
  0x36   : > { %4209 = vset.pattern.permute.xlu1 %v7063_v1 }
  0x37   : > { %685 = vperm.xlu1 %4209, %v240_v13  }
  0x38   : > { %780 = vperm.xlu0 %4205, %v4450_v14  }
  0x3b   : > { %4210 = vset.pattern.permute.xlu1 %v7061_v2 }
  0x3c   : > { %1337 = vperm.xlu1 %4210, %v239_v6   ;;  %800 = vperm.xlu0 %4205, %v4457_v15   ;;  %v4565_v6 = vrot.slane %v420_v54, %v415_v44 }
  0x40   : > { %4211 = vset.pattern.permute.xlu1 %v7063_v1  ;;  %4233 = vset.pattern.permute.xlu0 %v7061_v2 }
  0x41   : > { %690 = vperm.xlu1 %4211, %v241_v16   ;;  %1325 = vperm.xlu0 %4233, %v236_v4  }
  0x45   : > { %695 = vperm.xlu1 %4211, %v242_v17   ;;  %1329 = vperm.xlu0 %4233, %v237_v8   ;;  %v4569_v8 = vrot.slane %v416_v56, %v415_v44 }
  0x49   : > { %4212 = vset.pattern.permute.xlu1 %v7061_v2  ;;  %1341 = vperm.xlu0 %4233, %v240_v13  }
  0x4a   : > { %1349 = vperm.xlu1 %4212, %v242_v17  }
  0x4d   : > { %1345 = vperm.xlu0 %4233, %v241_v16  }
  0x4e   : > { %4213 = vset.pattern.permute.xlu1 %v7063_v1 }
  0x4f   : > { %705 = vperm.xlu1 %4213, %v244_v18  }
  0x51   : > { %1357 = vperm.xlu0 %4233, %v244_v18  }
  0x53   : > { %4214 = vset.pattern.permute.xlu1 %v7061_v2 }
  0x54   : > { %1353 = vperm.xlu1 %4214, %v243_v7   ;;  %v4567_v7 = vrot.slane %v428_v55, %v415_v44 }
  0x55   : > { %1361 = vperm.xlu0 %4233, %v245_v19  }
  0x58   : > { %4215 = vset.pattern.permute.xlu1 %v7063_v1 }
  0x59   : > { %710 = vperm.xlu1 %4215, %v245_v19   ;;  %1373 = vperm.xlu0 %4233, %v248_v20  }
  0x5d   : > { %715 = vperm.xlu1 %4215, %v246_v21   ;;  %1377 = vperm.xlu0 %4233, %v249_v22  }
  0x61   : > { %4216 = vset.pattern.permute.xlu1 %v7061_v2  ;;  %1389 = vperm.xlu0 %4233, %v252_v23  }
  0x62   : > { %1365 = vperm.xlu1 %4216, %v246_v21  }
  0x65   : > { %1393 = vperm.xlu0 %4233, %v253_v24  }
  0x66   : > { %4217 = vset.pattern.permute.xlu1 %v7063_v1 }
  0x67   : > { %725 = vperm.xlu1 %4217, %v248_v20  }
  0x69   : > { %1405 = vperm.xlu0 %4233, %v4499_v25  }
  0x6b   : > { %4218 = vset.pattern.permute.xlu1 %v7061_v2 }
  0x6c   : > { %1369 = vperm.xlu1 %4218, %v247_v9   ;;  %v4571_v9 = vrot.slane %v424_v57, %v415_v44 }
  0x6d   : > { %1409 = vperm.xlu0 %4233, %v4505_v26  }
  0x70   : > { %4219 = vset.pattern.permute.xlu1 %v7063_v1 }
  0x71   : > { %730 = vperm.xlu1 %4219, %v249_v22   ;;  %1421 = vperm.xlu0 %4233, %v4512_v27  }
  0x75   : > { %735 = vperm.xlu1 %4219, %v250_v28   ;;  %1425 = vperm.xlu0 %4233, %v4522_v29  }
  0x79   : > { %4220 = vset.pattern.permute.xlu1 %v7061_v2  ;;  %1437 = vperm.xlu0 %4233, %v4529_v30  }
  0x7a   : > { %1381 = vperm.xlu1 %4220, %v250_v28  }
  0x7e   : > { %4221 = vset.pattern.permute.xlu1 %v7063_v1 }
  0x7f   : > { %745 = vperm.xlu1 %4221, %v252_v23  }
  0x83   : > { %4222 = vset.pattern.permute.xlu1 %v7061_v2 }
  0x84   : > { %1385 = vperm.xlu1 %4222, %v4434_v11  }
  0x88   : > { %4223 = vset.pattern.permute.xlu1 %v7063_v1 }
  0x89   : > { %750 = vperm.xlu1 %4223, %v253_v24  }
  0x8d   : > { %755 = vperm.xlu1 %4223, %v254_v37  }
  0x91   : > { %4224 = vset.pattern.permute.xlu1 %v7061_v2 }
  0x92   : > { %1397 = vperm.xlu1 %4224, %v254_v37  }
  0x96   : > { %4225 = vset.pattern.permute.xlu1 %v7063_v1  ;;  %v4561_v4 = vpop.permute.xlu1 %651  ;;  %v4563_v5 = vpop.permute.xlu0 %267 }
  0x97   : > { %765 = vperm.xlu1 %4225, %v4499_v25   ;;  %v314_v10 = vsub.f32 %v4563_v5, %v4552_v62  ;;  %v316_v11 = vsub.f32 %v4563_v5, %v4554_v63  ;;  %v313_v13 = vsub.f32 %v4563_v5, %v4550_v61  ;;  %v315_v16 = vsub.f32 %v4563_v5, %v4558_v3 }
  0x98   : > { %v382_v17 = vsub.f32 %v4563_v5, %v4546_v59  ;;  %v384_v18 = vsub.f32 %v4563_v5, %v4548_v60  ;;  %v381_v19 = vsub.f32 %v4563_v5, %v4544_v58  ;;  %v2210_v20 = vsub.f32 %v4561_v4, %v4550_v61 }
  0x99   : > { %v322_v21 = vand.u32 2147483647, %v314_v10  ;;  %v324_v22 = vand.u32 2147483647, %v316_v11  ;;  %v321_v23 = vand.u32 2147483647, %v313_v13  ;;  %v383_v24 = vsub.f32 %v4563_v5, %v4556_v0 }
  0x9a   : > { %v4592_v25 = vpop.permute.xlu0 %272  ;;  %v323_v28 = vand.u32 2147483647, %v315_v16  ;;  %v390_v31 = vand.u32 2147483647, %v382_v17  ;;  %v392_v32 = vand.u32 2147483647, %v384_v18  ;;  %v2212_v33 = vsub.f32 %v4561_v4, %v4558_v3  ;;  %v4616_v17 = vpop.permute.xlu1 %655 }
  0x9b   : > { %4226 = vset.pattern.permute.xlu1 %v7061_v2  ;;  %v318_v34 = vsub.f32 %v4592_v25, %v4552_v62  ;;  %v330_v35 = vsub.f32 1.0, %v322_v21  ;;  %v320_v36 = vsub.f32 %v4592_v25, %v4554_v63  ;;  %v332_v37 = vsub.f32 1.0, %v324_v22  ;;  %v258_v18 = vld [vmem:[%s7056_s1 + $0xc8] sm:$0xff] }
  0x9c   : > { %1401 = vperm.xlu1 %4226, %v4441_v12   ;;  %v317_v38 = vsub.f32 %v4592_v25, %v4550_v61  ;;  %v329_v39 = vsub.f32 1.0, %v321_v23  ;;  %v319_v40 = vsub.f32 %v4592_v25, %v4558_v3  ;;  %v331_v41 = vsub.f32 1.0, %v323_v28 }
  0x9d   : > { %v326_v42 = vand.u32 2147483647, %v318_v34  ;;  %v338_v43 = vmax.f32 %v330_v35, 0.0  ;;  %v328_v44 = vand.u32 2147483647, %v320_v36  ;;  %v340_v45 = vmax.f32 %v332_v37, 0.0 }
  0x9e   : > { %v325_v46 = vand.u32 2147483647, %v317_v38  ;;  %v337_v47 = vmax.f32 %v329_v39, 0.0  ;;  %v327_v48 = vand.u32 2147483647, %v319_v40  ;;  %v339_v49 = vmax.f32 %v331_v41, 0.0 }
  0x9f   : > { %v4606_v50 = vpop.permute.xlu0 %660  ;;  %v334_v51 = vsub.f32 1.0, %v326_v42  ;;  %v336_v12 = vsub.f32 1.0, %v328_v44  ;;  %v386_v52 = vsub.f32 %v4592_v25, %v4546_v59  ;;  %v398_v53 = vsub.f32 1.0, %v390_v31 }
  0xa0   : > { %4227 = vset.pattern.permute.xlu1 %v7063_v1  ;;  %v333_v54 = vsub.f32 1.0, %v325_v46  ;;  %v335_v55 = vsub.f32 1.0, %v327_v48  ;;  %v388_v56 = vsub.f32 %v4592_v25, %v4548_v60  ;;  %v400_v57 = vsub.f32 1.0, %v392_v32 }
  0xa1   : > { %770 = vperm.xlu1 %4227, %v4505_v26   ;;  %v342_v10 = vmax.f32 %v334_v51, 0.0  ;;  %v344_v11 = vmax.f32 %v336_v12, 0.0  ;;  %v394_v13 = vand.u32 2147483647, %v386_v52  ;;  %v4614_v16 = vmax.f32 %v398_v53, 0.0 }
  0xa2   : > { %v341_v21 = vmax.f32 %v333_v54, 0.0  ;;  %v343_v22 = vmax.f32 %v335_v55, 0.0  ;;  %v396_v23 = vand.u32 2147483647, %v388_v56  ;;  %v4621_v28 = vmax.f32 %v400_v57, 0.0 }
  0xa3   : > { %7372 = vst [vmem:[#allocation8_spill] sm:$0xff] %v4614_v16  ;;  %v4623_v31 = vpop.permute.xlu0 %680  ;;  %v482_v32 = vpack.c.bf16 %v342_v10, %v338_v43  ;;  %v484_v26 = vpack.c.bf16 %v344_v11, %v340_v45  ;;  %v402_v34 = vsub.f32 1.0, %v394_v13  ;;  %v385_v35 = vsub.f32 %v4592_v25, %v4544_v58 }
  0xa4   : > { %7373 = vst [vmem:[#allocation9_spill] sm:$0xff] %v4621_v28  ;;  %v481_v36 = vpack.c.bf16 %v341_v21, %v337_v47  ;;  %v483_v37 = vpack.c.bf16 %v343_v22, %v339_v49  ;;  %v404_v38 = vsub.f32 1.0, %v396_v23  ;;  %v389_v39 = vand.u32 2147483647, %v381_v19 }
  0xa5   : > { %775 = vperm.xlu1 %4227, %v258_v18   ;;  %524 = vmatprep.subr.bf16.mxu0 %v482_v32  ;;  %v4627_v40 = vmax.f32 %v402_v34, 0.0  ;;  %v393_v41 = vand.u32 2147483647, %v385_v35  ;;  %v2214_v42 = vsub.f32 %v4616_v17, %v4550_v61  ;;  %v2338_v43 = vand.u32 2147483647, %v2210_v20 }
  0xa6   : > { %587 = vmatprep.subr.bf16.mxu1 %v484_v26  ;;  %525 = vmatpush1.bf16.msra.mxu0 %v481_v36  ;;  %v4634_v44 = vmax.f32 %v404_v38, 0.0  ;;  %v397_v45 = vsub.f32 1.0, %v389_v39  ;;  %v387_v19 = vsub.f32 %v4592_v25, %v4556_v0  ;;  %v391_v46 = vand.u32 2147483647, %v383_v24 }
  0xa7   : > { %7374 = vst [vmem:[#allocation10_spill] sm:$0xff] %v4627_v40  ;;  %588 = vmatpush1.bf16.msra.mxu1 %v483_v37  ;;  %v4641_v47 = vpop.permute.xlu0 %700  ;;  %v486_v48 = vpack.c.bf16 %v4627_v40, %v4614_v16  ;;  %v401_v49 = vsub.f32 1.0, %v393_v41  ;;  %v2342_v20 = vand.u32 2147483647, %v2214_v42  ;;  %v2466_v51 = vsub.f32 1.0, %v2338_v43 }
  0xa8   : > { %7375 = vst [vmem:[#allocation11_spill] sm:$0xff] %v4634_v44  ;;  %v488_v12 = vpack.c.bf16 %v4634_v44, %v4621_v28  ;;  %v405_v52 = vmax.f32 %v397_v45, 0.0  ;;  %v395_v53 = vand.u32 2147483647, %v387_v19  ;;  %v399_v54 = vsub.f32 1.0, %v391_v46 }
  0xa9   : > { %4228 = vset.pattern.permute.xlu1 %v7061_v2  ;;  %526 = vmatprep.subr.bf16.mxu0 %v486_v48  ;;  %v409_v55 = vmax.f32 %v401_v49, 0.0  ;;  %v2470_v24 = vsub.f32 1.0, %v2342_v20  ;;  %v4648_v56 = vmax.f32 %v2466_v51, 0.0  ;;  %v2216_v57 = vsub.f32 %v4616_v17, %v4558_v3 }
  0xaa   : > { %589 = vmatprep.subr.bf16.mxu1 %v488_v12  ;;  %1413 = vperm.xlu1 %4228, %v258_v18   ;;  %v403_v10 = vsub.f32 1.0, %v395_v53  ;;  %v407_v11 = vmax.f32 %v399_v54, 0.0  ;;  %v2340_v13 = vand.u32 2147483647, %v2212_v33  ;;  %v450_v21 = vsub.f32 %v4563_v5, %v4565_v6 }
  0xab   : > { %v485_v22 = vpack.c.bf16 %v409_v55, %v405_v52  ;;  %v4657_v23 = vmax.f32 %v2470_v24, 0.0  ;;  %v4660_v32 = vmul.f32 %v4648_v56, %v405_v52  ;;  %v2344_v26 = vand.u32 2147483647, %v2216_v57  ;;  %v4662_v34 = vpop.permute.xlu0 %720 }
  0xac   : > { %v411_v35 = vmax.f32 %v403_v10, 0.0  ;;  %v2468_v18 = vsub.f32 1.0, %v2340_v13  ;;  %v454_v36 = vsub.f32 %v4592_v25, %v4565_v6  ;;  %v458_v37 = vand.u32 2147483647, %v450_v21 }
  0xad   : > { %7376 = vst [vmem:[#allocation12_spill] sm:$0xff] %v4660_v32  ;;  %527 = vmatpush1.bf16.msra.mxu0 %v485_v22  ;;  %v4667_v33 = vmul.f32 %v4657_v23, %v409_v55  ;;  %v2472_v38 = vsub.f32 1.0, %v2344_v26  ;;  %v452_v39 = vsub.f32 %v4563_v5, %v4567_v7  ;;  %v456_v41 = vsub.f32 %v4592_v25, %v4567_v7 }
  0xae   : > { %v487_v42 = vpack.c.bf16 %v411_v35, %v407_v11  ;;  %v4673_v43 = vmax.f32 %v2468_v18, 0.0  ;;  %v462_v45 = vand.u32 2147483647, %v454_v36  ;;  %v466_v19 = vsub.f32 1.0, %v458_v37  ;;  %4229 = vset.pattern.permute.xlu1 %v7063_v1 }
  0xaf   : > { %7377 = vst [vmem:[#allocation13_spill] sm:$0xff] %v4667_v33  ;;  %v4676_v46 = vmax.f32 %v2472_v38, 0.0  ;;  %v460_v48 = vand.u32 2147483647, %v452_v39  ;;  %v464_v49 = vand.u32 2147483647, %v456_v41  ;;  %v449_v20 = vsub.f32 %v4563_v5, %v4569_v8  ;;  %785 = vperm.xlu1 %4229, %v4512_v27   ;;  %v4681_v51 = vpop.permute.xlu0 %740 }
  0xb0   : > { %590 = vmatpush1.bf16.msra.mxu1 %v487_v42  ;;  %v4684_v12 = vmul.f32 %v4673_v43, %v407_v11  ;;  %v470_v52 = vsub.f32 1.0, %v462_v45  ;;  %v4686_v53 = vmax.f32 %v466_v19, 0.0  ;;  %v453_v54 = vsub.f32 %v4592_v25, %v4569_v8 }
  0xb1   : > { %v4691_v55 = vmul.f32 %v4676_v46, %v411_v35  ;;  %v468_v24 = vsub.f32 1.0, %v460_v48  ;;  %v472_v57 = vsub.f32 1.0, %v464_v49  ;;  %v457_v10 = vand.u32 2147483647, %v449_v20 }
  0xb2   : > { %7378 = vst [vmem:[#allocation14_spill] sm:$0xff] %v4684_v12  ;;  %v4693_v13 = vmax.f32 %v470_v52, 0.0  ;;  %v461_v27 = vand.u32 2147483647, %v453_v54  ;;  %v451_v21 = vsub.f32 %v4563_v5, %v4571_v9  ;;  %v455_v11 = vsub.f32 %v4592_v25, %v4571_v9 }
  0xb3   : > { %7379 = vst [vmem:[#allocation15_spill] sm:$0xff] %v4691_v55  ;;  %v4699_v22 = vmax.f32 %v468_v24, 0.0  ;;  %v4701_v26 = vmax.f32 %v472_v57, 0.0  ;;  %v465_v18 = vsub.f32 1.0, %v457_v10  ;;  %v809_v35 = vsub.f32 %v4561_v4, %v4546_v59  ;;  %4230 = vset.pattern.permute.xlu1 %v7061_v2  ;;  %v4706_v36 = vpop.permute.xlu0 %760  ;;  %v4727_v10 = vpop.permute.xlu1 %665 }
  0xb4   : > { %v490_v37 = vpack.c.bf16 %v4693_v13, %v4686_v53  ;;  %v469_v5 = vsub.f32 1.0, %v461_v27  ;;  %v459_v38 = vand.u32 2147483647, %v451_v21  ;;  %v463_v39 = vand.u32 2147483647, %v455_v11  ;;  %1417 = vperm.xlu1 %4230, %v4450_v14  }
  0xb5   : > { %v492_v25 = vpack.c.bf16 %v4701_v26, %v4699_v22  ;;  %v4713_v41 = vmax.f32 %v465_v18, 0.0  ;;  %v813_v42 = vsub.f32 %v4616_v17, %v4546_v59  ;;  %v937_v45 = vand.u32 2147483647, %v809_v35 }
  0xb6   : > { %528 = vmatprep.subr.bf16.mxu0 %v490_v37  ;;  %v4717_v19 = vmax.f32 %v469_v5, 0.0  ;;  %v467_v48 = vsub.f32 1.0, %v459_v38  ;;  %v471_v49 = vsub.f32 1.0, %v463_v39  ;;  %v811_v20 = vsub.f32 %v4561_v4, %v4548_v60  ;;  %v4236_v38 = vld [vmem:[%s7058_s3] sm:$0xff]  }
  0xb7   : > { %591 = vmatprep.subr.bf16.mxu1 %v492_v25  ;;  %v941_v52 = vand.u32 2147483647, %v813_v42  ;;  %v1065_v14 = vsub.f32 1.0, %v937_v45  ;;  %v815_v54 = vsub.f32 %v4616_v17, %v4548_v60  ;;  %v808_v24 = vsub.f32 %v4561_v4, %v4544_v58  ;;  %v4725_v57 = vpop.permute.xlu0 %780 }
  0xb8   : > { %v489_v27 = vpack.c.bf16 %v4717_v19, %v4713_v41  ;;  %v4731_v21 = vmax.f32 %v467_v48, 0.0  ;;  %v4733_v11 = vmax.f32 %v471_v49, 0.0  ;;  %v939_v18 = vand.u32 2147483647, %v811_v20  ;;  %4231 = vset.pattern.permute.xlu1 %v7063_v1  ;;  %v262_v49 = vld [vmem:[%s7056_s1 + $0xe8] sm:$0xff] }
  0xb9   : > { %v1069_v35 = vsub.f32 1.0, %v941_v52  ;;  %v1193_v37 = vmax.f32 %v1065_v14, 0.0  ;;  %v943_v5 = vand.u32 2147483647, %v815_v54  ;;  %v812_v39 = vsub.f32 %v4616_v17, %v4544_v58  ;;  %790 = vperm.xlu1 %4231, %v4522_v29  }
  0xba   : > { %529 = vmatpush1.bf16.msra.mxu0 %v489_v27  ;;  %v491_v25 = vpack.c.bf16 %v4733_v11, %v4731_v21  ;;  %v1067_v42 = vsub.f32 1.0, %v939_v18  ;;  %v936_v45 = vand.u32 2147483647, %v808_v24  ;;  %v810_v48 = vsub.f32 %v4561_v4, %v4556_v0 }
  0xbb   : > { %v1197_v20 = vmax.f32 %v1069_v35, 0.0  ;;  %v1921_v52 = vmul.f32 %v1193_v37, %v4686_v53  ;;  %v1071_v14 = vsub.f32 1.0, %v943_v5  ;;  %v940_v54 = vand.u32 2147483647, %v812_v39  ;;  %v4750_v2 = vpop.permute.xlu0 %800  ;;  %v4758_v37 = vpop.permute.xlu1 %1321 }
  0xbc   : > { %592 = vmatpush1.bf16.msra.mxu1 %v491_v25  ;;  %v1195_v29 = vmax.f32 %v1067_v42, 0.0  ;;  %v1064_v27 = vsub.f32 1.0, %v936_v45  ;;  %v814_v24 = vsub.f32 %v4616_v17, %v4556_v0  ;;  %v938_v18 = vand.u32 2147483647, %v810_v48  ;;  %7380 = vst [vmem:[#allocation16_spill] sm:$0xff] %v4758_v37 }
  0xbd   : > { %v1925_v1 = vmul.f32 %v1197_v20, %v4693_v13  ;;  %v1199_v55 = vmax.f32 %v1071_v14, 0.0  ;;  %4104 = vmatmul.mubr.msk.bf16.vlgmr.msra.gmra.mrb[0].mxu0 %vm514_vm0, %v4236_v38  ;;  %v1068_v12 = vsub.f32 1.0, %v940_v54  ;;  %795 = vperm.xlu1 %4231, %v262_v49   ;;  %v817_v35 = vsub.f32 %v4606_v50, %v4546_v59 }
  0xbe   : > { %v1923_v5 = vmul.f32 %v1195_v29, %v4699_v22  ;;  %v1192_v39 = vmax.f32 %v1064_v27, 0.0  ;;  %v942_v25 = vand.u32 2147483647, %v814_v24  ;;  %v1066_v42 = vsub.f32 1.0, %v938_v18 }
  0xbf   : > { %v7381_v45 = vmov 0   ;;  %v2049_v48 = vpack.c.bf16 %v1925_v1, %v1921_v52  ;;  %v1927_v20 = vmul.f32 %v1199_v55, %v4701_v26  ;;  %4107 = vmatmul.mubr.msk.bf16.vlgmr.msra.gmra.mrb[0].mxu1 %vm514_vm0, %v4236_v38  ;;  %v1196_v14 = vmax.f32 %v1068_v12, 0.0 }
  0xc0   : > { %566 = vmatprep.mubr.bf16.mxu0 %v7381_v45  ;;  %v821_v54 = vsub.f32 %v4727_v10, %v4546_v59  ;;  %v1920_v33 = vmul.f32 %v1192_v39, %v4713_v41  ;;  %v1070_v32 = vsub.f32 1.0, %v942_v25  ;;  %v1194_v44 = vmax.f32 %v1066_v42, 0.0  ;;  %v4767_v28 = vpop.permute.xlu0 %1325  ;;  %629 = vmatprep.mubr.bf16.mxu1 %v7381_v45 }
  0xc1   : > { %7382 = vst [vmem:[#allocation17_spill] sm:$0xff] %v4767_v28  ;;  %v945_v29 = vand.u32 2147483647, %v817_v35  ;;  %2124 = vmatprep.subr.bf16.mxu0 %v2049_v48  ;;  %v2051_v27 = vpack.c.bf16 %v1927_v20, %v1923_v5  ;;  %v1924_v1 = vmul.f32 %v1196_v14, %v4717_v19  ;;  %v7383_v55 = vmov 1  }
  0xc2   : > { %4232 = vset.pattern.permute.xlu1 %v7383_v55  ;;  %v949_v38 = vand.u32 2147483647, %v821_v54  ;;  %v1441_v12 = vsub.f32 %v4758_v37, %v4565_v6  ;;  %v1198_v52 = vmax.f32 %v1070_v32, 0.0  ;;  %v1922_v24 = vmul.f32 %v1194_v44, %v4731_v21 }
  0xc3   : > { %1429 = vperm.xlu1 %4232, %v262_v49   ;;  %v1073_v18 = vsub.f32 1.0, %v945_v29  ;;  %v1445_v35 = vsub.f32 %v4767_v28, %v4565_v6  ;;  %2167 = vmatprep.subr.bf16.mxu1 %v2051_v27  ;;  %v2048_v39 = vpack.c.bf16 %v1924_v1, %v1920_v33  ;;  %v819_v42 = vsub.f32 %v4606_v50, %v4548_v60  ;;  %v4784_v33 = vpop.permute.xlu1 %670 }
  0xc4   : > { %v1077_v25 = vsub.f32 1.0, %v949_v38  ;;  %v1561_v5 = vand.u32 2147483647, %v1441_v12  ;;  %v1926_v48 = vmul.f32 %v1198_v52, %v4733_v11  ;;  %v823_v32 = vsub.f32 %v4727_v10, %v4548_v60  ;;  %7384 = vst [vmem:[#allocation18_spill] sm:$0xff] %v4784_v33 }
  0xc5   : > { %v1201_v20 = vmax.f32 %v1073_v18, 0.0  ;;  %v1565_v14 = vand.u32 2147483647, %v1445_v35  ;;  %2125 = vmatpush1.bf16.msra.mxu0 %v2048_v39  ;;  %v947_v54 = vand.u32 2147483647, %v819_v42  ;;  %v1443_v29 = vsub.f32 %v4758_v37, %v4567_v7 }
  0xc6   : > { %v1205_v44 = vmax.f32 %v1077_v25, 0.0  ;;  %v1681_v49 = vsub.f32 1.0, %v1561_v5  ;;  %v2050_v27 = vpack.c.bf16 %v1926_v48, %v1922_v24  ;;  %v951_v38 = vand.u32 2147483647, %v823_v32 }
  0xc7   : > { %4234 = vset.pattern.permute.xlu1 %v7381_v45  ;;  %v1685_v1 = vsub.f32 1.0, %v1565_v14  ;;  %v1447_v12 = vsub.f32 %v4767_v28, %v4567_v7  ;;  %v1075_v18 = vsub.f32 1.0, %v947_v54  ;;  %v1563_v35 = vand.u32 2147483647, %v1443_v29 }
  0xc8   : > { %805 = vperm.xlu1 %4234, %v4529_v30   ;;  %v4790_v52 = vmax.f32 %v1681_v49, 0.0  ;;  %v816_v39 = vsub.f32 %v4606_v50, %v4544_v58  ;;  %2168 = vmatpush1.bf16.msra.mxu1 %v2050_v27  ;;  %v1079_v24 = vsub.f32 1.0, %v951_v38  ;;  %v820_v42 = vsub.f32 %v4727_v10, %v4544_v58 }
  0xc9   : > { %v4794_v25 = vmax.f32 %v1685_v1, 0.0  ;;  %v1567_v5 = vand.u32 2147483647, %v1447_v12  ;;  %v1203_v14 = vmax.f32 %v1075_v18, 0.0  ;;  %v1683_v32 = vsub.f32 1.0, %v1563_v35 }
  0xca   : > { %v1929_v48 = vmul.f32 %v4790_v52, %v1201_v20  ;;  %v944_v30 = vand.u32 2147483647, %v816_v39  ;;  %v1207_v54 = vmax.f32 %v1079_v24, 0.0  ;;  %v948_v40 = vand.u32 2147483647, %v820_v42  ;;  %v4807_v20 = vpop.permute.xlu1 %675 }
  0xcb   : > { %7385 = vst [vmem:[#allocation19_spill] sm:$0xff] %v4794_v25  ;;  %v1933_v49 = vmul.f32 %v4794_v25, %v1205_v44  ;;  %v1687_v29 = vsub.f32 1.0, %v1567_v5  ;;  %v4801_v27 = vmax.f32 %v1683_v32, 0.0  ;;  %v1440_v38 = vsub.f32 %v4758_v37, %v4569_v8  ;;  %7387 = vst [vmem:[#allocation21_spill] sm:$0xff] %v4807_v20 }
  0xcc   : > { %4235 = vset.pattern.permute.xlu1 %v7383_v55  ;;  %v1072_v1 = vsub.f32 1.0, %v944_v30  ;;  %v1444_v12 = vsub.f32 %v4767_v28, %v4569_v8  ;;  %v1076_v35 = vsub.f32 1.0, %v948_v40  ;;  %v818_v55 = vsub.f32 %v4606_v50, %v4556_v0 }
  0xcd   : > { %7386 = vst [vmem:[#allocation20_spill] sm:$0xff] %v4801_v27  ;;  %1433 = vperm.xlu1 %4235, %v4457_v15   ;;  %v2053_v18 = vpack.c.bf16 %v1933_v49, %v1929_v48  ;;  %v4810_v44 = vmax.f32 %v1687_v29, 0.0  ;;  %v1931_v39 = vmul.f32 %v4801_v27, %v1203_v14  ;;  %v1560_v5 = vand.u32 2147483647, %v1440_v38 }
  0xce   : > { %v1200_v24 = vmax.f32 %v1072_v1, 0.0  ;;  %v1564_v42 = vand.u32 2147483647, %v1444_v12  ;;  %v1204_v30 = vmax.f32 %v1076_v35, 0.0  ;;  %v822_v16 = vsub.f32 %v4727_v10, %v4556_v0 }
  0xcf   : > { %7388 = vst [vmem:[#allocation22_spill] sm:$0xff] %v4810_v44  ;;  %2126 = vmatprep.subr.bf16.mxu0 %v2053_v18  ;;  %v1935_v32 = vmul.f32 %v4810_v44, %v1207_v54  ;;  %v946_v15 = vand.u32 2147483647, %v818_v55  ;;  %v1680_v48 = vsub.f32 1.0, %v1560_v5  ;;  %v1442_v40 = vsub.f32 %v4758_v37, %v4571_v9  ;;  %v4824_v54 = vpop.permute.xlu0 %1329 }
  0xd0   : > { %v1684_v49 = vsub.f32 1.0, %v1564_v42  ;;  %v1446_v29 = vsub.f32 %v4767_v28, %v4571_v9  ;;  %v950_v1 = vand.u32 2147483647, %v822_v16  ;;  %v825_v12 = vsub.f32 %v4784_v33, %v4546_v59  ;;  %7389 = vst [vmem:[#allocation23_spill] sm:$0xff] %v4824_v54  ;;  %v4830_v42 = vpop.permute.xlu1 %1333 }
  0xd1   : > { %v2055_v14 = vpack.c.bf16 %v1935_v32, %v1931_v39  ;;  %v1074_v38 = vsub.f32 1.0, %v946_v15  ;;  %v4826_v18 = vmax.f32 %v1680_v48, 0.0  ;;  %v1562_v55 = vand.u32 2147483647, %v1442_v40  ;;  %7392 = vst [vmem:[#allocation26_spill] sm:$0xff] %v4830_v42 }
  0xd2   : > { %v4828_v35 = vmax.f32 %v1684_v49, 0.0  ;;  %v1566_v5 = vand.u32 2147483647, %v1446_v29  ;;  %v1078_v37 = vsub.f32 1.0, %v950_v1  ;;  %v829_v16 = vsub.f32 %v4807_v20, %v4546_v59 }
  0xd3   : > { %7390 = vst [vmem:[#allocation24_spill] sm:$0xff] %v4826_v18  ;;  %2169 = vmatprep.subr.bf16.mxu1 %v2055_v14  ;;  %v1202_v44 = vmax.f32 %v1074_v38, 0.0  ;;  %v953_v39 = vand.u32 2147483647, %v825_v12  ;;  %v1928_v32 = vmul.f32 %v4826_v18, %v1200_v24  ;;  %v1682_v28 = vsub.f32 1.0, %v1562_v55 }
  0xd4   : > { %7391 = vst [vmem:[#allocation25_spill] sm:$0xff] %v4828_v35  ;;  %v1932_v15 = vmul.f32 %v4828_v35, %v1204_v30  ;;  %v1686_v48 = vsub.f32 1.0, %v1566_v5  ;;  %v1206_v27 = vmax.f32 %v1078_v37, 0.0  ;;  %v957_v49 = vand.u32 2147483647, %v829_v16  ;;  %v4864_v35 = vpop.permute.xlu1 %685 }
  0xd5   : > { %v1081_v25 = vsub.f32 1.0, %v953_v39  ;;  %v1449_v40 = vsub.f32 %v4824_v54, %v4565_v6  ;;  %v4838_v14 = vmax.f32 %v1682_v28, 0.0  ;;  %v1453_v38 = vsub.f32 %v4830_v42, %v4565_v6  ;;  %7397 = vst [vmem:[#allocation31_spill] sm:$0xff] %v4864_v35 }
  0xd6   : > { %v2052_v29 = vpack.c.bf16 %v1932_v15, %v1928_v32  ;;  %v4840_v1 = vmax.f32 %v1686_v48, 0.0  ;;  %v1085_v12 = vsub.f32 1.0, %v957_v49  ;;  %v827_v30 = vsub.f32 %v4784_v33, %v4548_v60 }
  0xd7   : > { %7393 = vst [vmem:[#allocation27_spill] sm:$0xff] %v4838_v14  ;;  %v1209_v24 = vmax.f32 %v1081_v25, 0.0  ;;  %v1569_v18 = vand.u32 2147483647, %v1449_v40  ;;  %v1930_v37 = vmul.f32 %v4838_v14, %v1202_v44  ;;  %v1573_v5 = vand.u32 2147483647, %v1453_v38 }
  0xd8   : > { %7394 = vst [vmem:[#allocation28_spill] sm:$0xff] %v4840_v1  ;;  %2127 = vmatpush1.bf16.msra.mxu0 %v2052_v29  ;;  %v1934_v55 = vmul.f32 %v4840_v1, %v1206_v27  ;;  %v831_v28 = vsub.f32 %v4807_v20, %v4548_v60  ;;  %v1213_v16 = vmax.f32 %v1085_v12, 0.0  ;;  %v955_v32 = vand.u32 2147483647, %v827_v30 }
  0xd9   : > { %v1689_v39 = vsub.f32 1.0, %v1569_v18  ;;  %v1451_v15 = vsub.f32 %v4824_v54, %v4567_v7  ;;  %v1693_v48 = vsub.f32 1.0, %v1573_v5  ;;  %v1455_v40 = vsub.f32 %v4830_v42, %v4567_v7 }
  0xda   : > { %v2054_v25 = vpack.c.bf16 %v1934_v55, %v1930_v37  ;;  %v959_v49 = vand.u32 2147483647, %v831_v28  ;;  %v1083_v44 = vsub.f32 1.0, %v955_v32  ;;  %v824_v38 = vsub.f32 %v4784_v33, %v4544_v58 }
  0xdb   : > { %v4854_v29 = vmax.f32 %v1689_v39, 0.0  ;;  %v1571_v27 = vand.u32 2147483647, %v1451_v15  ;;  %v4858_v12 = vmax.f32 %v1693_v48, 0.0  ;;  %v1575_v30 = vand.u32 2147483647, %v1455_v40 }
  0xdc   : > { %2170 = vmatpush1.bf16.msra.mxu1 %v2054_v25  ;;  %v1087_v18 = vsub.f32 1.0, %v959_v49  ;;  %v828_v37 = vsub.f32 %v4807_v20, %v4544_v58  ;;  %v1211_v5 = vmax.f32 %v1083_v44, 0.0  ;;  %v952_v1 = vand.u32 2147483647, %v824_v38 }
  0xdd   : > { %7395 = vst [vmem:[#allocation29_spill] sm:$0xff] %v4854_v29  ;;  %7396 = vst [vmem:[#allocation30_spill] sm:$0xff] %v4858_v12  ;;  %v1937_v55 = vmul.f32 %v4854_v29, %v1209_v24  ;;  %v1691_v28 = vsub.f32 1.0, %v1571_v27  ;;  %v1941_v39 = vmul.f32 %v4858_v12, %v1213_v16  ;;  %v1695_v15 = vsub.f32 1.0, %v1575_v30 }
  0xde   : > { %v1215_v32 = vmax.f32 %v1087_v18, 0.0  ;;  %v956_v14 = vand.u32 2147483647, %v828_v37  ;;  %v1080_v48 = vsub.f32 1.0, %v952_v1  ;;  %v1448_v49 = vsub.f32 %v4824_v54, %v4569_v8 }
  0xdf   : > { %v4866_v25 = vmax.f32 %v1691_v28, 0.0  ;;  %v1452_v40 = vsub.f32 %v4830_v42, %v4569_v8  ;;  %v2057_v24 = vpack.c.bf16 %v1941_v39, %v1937_v55  ;;  %v4872_v44 = vmax.f32 %v1695_v15, 0.0 }
  0xe0   : > { %v1084_v27 = vsub.f32 1.0, %v956_v14  ;;  %v826_v16 = vsub.f32 %v4784_v33, %v4556_v0  ;;  %v1208_v18 = vmax.f32 %v1080_v48, 0.0  ;;  %v1568_v30 = vand.u32 2147483647, %v1448_v49 }
  0xe1   : > { %7398 = vst [vmem:[#allocation32_spill] sm:$0xff] %v4866_v25  ;;  %7399 = vst [vmem:[#allocation33_spill] sm:$0xff] %v4872_v44  ;;  %v1939_v38 = vmul.f32 %v4866_v25, %v1211_v5  ;;  %v1572_v37 = vand.u32 2147483647, %v1452_v40  ;;  %2128 = vmatprep.subr.bf16.mxu0 %v2057_v24  ;;  %v1943_v1 = vmul.f32 %v4872_v44, %v1215_v32  ;;  %v4886_v32 = vpop.permute.xlu1 %1337 }
  0xe2   : > { %v1212_v28 = vmax.f32 %v1084_v27, 0.0  ;;  %v830_v12 = vsub.f32 %v4807_v20, %v4556_v0  ;;  %v954_v29 = vand.u32 2147483647, %v826_v16  ;;  %v1688_v55 = vsub.f32 1.0, %v1568_v30  ;;  %7400 = vst [vmem:[#allocation34_spill] sm:$0xff] %v4886_v32 }
  0xe3   : > { %v1692_v39 = vsub.f32 1.0, %v1572_v37  ;;  %v1450_v14 = vsub.f32 %v4824_v54, %v4571_v9  ;;  %v1454_v15 = vsub.f32 %v4830_v42, %v4571_v9  ;;  %v2059_v5 = vpack.c.bf16 %v1943_v1, %v1939_v38  ;;  %v4892_v37 = vpop.permute.xlu0 %1341 }
  0xe4   : > { %v958_v48 = vand.u32 2147483647, %v830_v12  ;;  %v1082_v49 = vsub.f32 1.0, %v954_v29  ;;  %v833_v40 = vsub.f32 %v4623_v31, %v4546_v59  ;;  %v4888_v24 = vmax.f32 %v1688_v55, 0.0  ;;  %7403 = vst [vmem:[#allocation37_spill] sm:$0xff] %v4892_v37 }
  0xe5   : > { %v4890_v27 = vmax.f32 %v1692_v39, 0.0  ;;  %v1570_v16 = vand.u32 2147483647, %v1450_v14  ;;  %v1574_v30 = vand.u32 2147483647, %v1454_v15  ;;  %2171 = vmatprep.subr.bf16.mxu1 %v2059_v5  ;;  %v837_v12 = vsub.f32 %v4864_v35, %v4546_v59 }
  0xe6   : > { %7401 = vst [vmem:[#allocation35_spill] sm:$0xff] %v4888_v24  ;;  %v1086_v54 = vsub.f32 1.0, %v958_v48  ;;  %v1210_v44 = vmax.f32 %v1082_v49, 0.0  ;;  %v961_v29 = vand.u32 2147483647, %v833_v40  ;;  %v1936_v38 = vmul.f32 %v4888_v24, %v1208_v18 }
  0xe7   : > { %7402 = vst [vmem:[#allocation36_spill] sm:$0xff] %v4890_v27  ;;  %v1940_v1 = vmul.f32 %v4890_v27, %v1212_v28  ;;  %v1690_v42 = vsub.f32 1.0, %v1570_v16  ;;  %v1694_v55 = vsub.f32 1.0, %v1574_v30  ;;  %v965_v39 = vand.u32 2147483647, %v837_v12 }
  0xe8   : > { %v1214_v25 = vmax.f32 %v1086_v54, 0.0  ;;  %v1089_v20 = vsub.f32 1.0, %v961_v29  ;;  %v1457_v14 = vsub.f32 %v4886_v32, %v4565_v6  ;;  %v1461_v49 = vsub.f32 %v4892_v37, %v4565_v6 }
  0xe9   : > { %v2056_v15 = vpack.c.bf16 %v1940_v1, %v1936_v38  ;;  %v4900_v5 = vmax.f32 %v1690_v42, 0.0  ;;  %v4902_v48 = vmax.f32 %v1694_v55, 0.0  ;;  %v1093_v40 = vsub.f32 1.0, %v965_v39 }
  0xea   : > { %v1217_v18 = vmax.f32 %v1089_v20, 0.0  ;;  %v1577_v24 = vand.u32 2147483647, %v1457_v14  ;;  %v835_v28 = vsub.f32 %v4623_v31, %v4548_v60  ;;  %v1581_v30 = vand.u32 2147483647, %v1461_v49  ;;  %v4914_v20 = vpop.permute.xlu1 %690 }
  0xeb   : > { %7404 = vst [vmem:[#allocation38_spill] sm:$0xff] %v4900_v5  ;;  %7405 = vst [vmem:[#allocation39_spill] sm:$0xff] %v4902_v48  ;;  %2129 = vmatpush1.bf16.msra.mxu0 %v2056_v15  ;;  %v1938_v54 = vmul.f32 %v4900_v5, %v1210_v44  ;;  %v1942_v16 = vmul.f32 %v4902_v48, %v1214_v25  ;;  %v839_v42 = vsub.f32 %v4864_v35, %v4548_v60 }
  0xec   : > { %v1221_v12 = vmax.f32 %v1093_v40, 0.0  ;;  %v1697_v29 = vsub.f32 1.0, %v1577_v24  ;;  %v963_v38 = vand.u32 2147483647, %v835_v28  ;;  %v1459_v1 = vsub.f32 %v4886_v32, %v4567_v7  ;;  %7406 = vst [vmem:[#allocation40_spill] sm:$0xff] %v4914_v20 }
  0xed   : > { %v2058_v55 = vpack.c.bf16 %v1942_v16, %v1938_v54  ;;  %v1701_v39 = vsub.f32 1.0, %v1581_v30  ;;  %v967_v14 = vand.u32 2147483647, %v839_v42  ;;  %v1463_v44 = vsub.f32 %v4892_v37, %v4567_v7 }
  0xee   : > { %v4918_v15 = vmax.f32 %v1697_v29, 0.0  ;;  %v1091_v25 = vsub.f32 1.0, %v963_v38  ;;  %v1579_v49 = vand.u32 2147483647, %v1459_v1  ;;  %v832_v40 = vsub.f32 %v4623_v31, %v4544_v58 }
  0xef   : > { %2172 = vmatpush1.bf16.msra.mxu1 %v2058_v55  ;;  %v4922_v24 = vmax.f32 %v1701_v39, 0.0  ;;  %v1095_v28 = vsub.f32 1.0, %v967_v14  ;;  %v1583_v48 = vand.u32 2147483647, %v1463_v44  ;;  %v836_v54 = vsub.f32 %v4864_v35, %v4544_v58  ;;  %v4934_v44 = vpop.permute.xlu1 %695 }
  0xf0   : > { %7407 = vst [vmem:[#allocation41_spill] sm:$0xff] %v4918_v15  ;;  %v1945_v16 = vmul.f32 %v4918_v15, %v1217_v18  ;;  %v1219_v30 = vmax.f32 %v1091_v25, 0.0  ;;  %v1699_v42 = vsub.f32 1.0, %v1579_v49  ;;  %v960_v5 = vand.u32 2147483647, %v832_v40  ;;  %7410 = vst [vmem:[#allocation44_spill] sm:$0xff] %v4934_v44 }
  0xf1   : > { %7408 = vst [vmem:[#allocation42_spill] sm:$0xff] %v4922_v24  ;;  %v1949_v29 = vmul.f32 %v4922_v24, %v1221_v12  ;;  %v1223_v38 = vmax.f32 %v1095_v28, 0.0  ;;  %v1703_v1 = vsub.f32 1.0, %v1583_v48  ;;  %v964_v27 = vand.u32 2147483647, %v836_v54 }
  0xf2   : > { %v4928_v33 = vmax.f32 %v1699_v42, 0.0  ;;  %v1088_v55 = vsub.f32 1.0, %v960_v5  ;;  %v1456_v39 = vsub.f32 %v4886_v32, %v4569_v8  ;;  %v1460_v14 = vsub.f32 %v4892_v37, %v4569_v8 }
  0xf3   : > { %v2061_v18 = vpack.c.bf16 %v1949_v29, %v1945_v16  ;;  %v4936_v25 = vmax.f32 %v1703_v1, 0.0  ;;  %v1092_v49 = vsub.f32 1.0, %v964_v27  ;;  %v834_v12 = vsub.f32 %v4623_v31, %v4556_v0 }
  0xf4   : > { %7409 = vst [vmem:[#allocation43_spill] sm:$0xff] %v4928_v33  ;;  %v1947_v48 = vmul.f32 %v4928_v33, %v1219_v30  ;;  %v1216_v40 = vmax.f32 %v1088_v55, 0.0  ;;  %v1576_v28 = vand.u32 2147483647, %v1456_v39  ;;  %v1580_v5 = vand.u32 2147483647, %v1460_v14 }
  0xf5   : > { %7411 = vst [vmem:[#allocation45_spill] sm:$0xff] %v4936_v25  ;;  %2130 = vmatprep.subr.bf16.mxu0 %v2061_v18  ;;  %v1951_v54 = vmul.f32 %v4936_v25, %v1223_v38  ;;  %v1220_v42 = vmax.f32 %v1092_v49, 0.0  ;;  %v838_v24 = vsub.f32 %v4864_v35, %v4556_v0  ;;  %v962_v15 = vand.u32 2147483647, %v834_v12  ;;  %v4950_v38 = vpop.permute.xlu0 %1345 }
  0xf6   : > { %v1696_v16 = vsub.f32 1.0, %v1576_v28  ;;  %v1700_v29 = vsub.f32 1.0, %v1580_v5  ;;  %v1458_v27 = vsub.f32 %v4886_v32, %v4571_v9  ;;  %v1462_v1 = vsub.f32 %v4892_v37, %v4571_v9  ;;  %7412 = vst [vmem:[#allocation46_spill] sm:$0xff] %v4950_v38  ;;  %v4956_v5 = vpop.permute.xlu1 %1349 }
  0xf7   : > { %v2063_v30 = vpack.c.bf16 %v1951_v54, %v1947_v48  ;;  %v966_v55 = vand.u32 2147483647, %v838_v24  ;;  %v1090_v39 = vsub.f32 1.0, %v962_v15  ;;  %v841_v14 = vsub.f32 %v4914_v20, %v4546_v59  ;;  %7415 = vst [vmem:[#allocation49_spill] sm:$0xff] %v4956_v5 }
  0xf8   : > { %v4952_v18 = vmax.f32 %v1696_v16, 0.0  ;;  %v4954_v49 = vmax.f32 %v1700_v29, 0.0  ;;  %v1578_v12 = vand.u32 2147483647, %v1458_v27  ;;  %v1582_v28 = vand.u32 2147483647, %v1462_v1 }
  0xf9   : > { %2173 = vmatprep.subr.bf16.mxu1 %v2063_v30  ;;  %v1094_v32 = vsub.f32 1.0, %v966_v55  ;;  %v1218_v25 = vmax.f32 %v1090_v39, 0.0  ;;  %v845_v24 = vsub.f32 %v4934_v44, %v4546_v59  ;;  %v969_v15 = vand.u32 2147483647, %v841_v14 }
  0xfa   : > { %7413 = vst [vmem:[#allocation47_spill] sm:$0xff] %v4952_v18  ;;  %7414 = vst [vmem:[#allocation48_spill] sm:$0xff] %v4954_v49  ;;  %v1944_v48 = vmul.f32 %v4952_v18, %v1216_v40  ;;  %v1948_v54 = vmul.f32 %v4954_v49, %v1220_v42  ;;  %v1698_v37 = vsub.f32 1.0, %v1578_v12  ;;  %v1702_v16 = vsub.f32 1.0, %v1582_v28  ;;  %v4990_v49 = vpop.permute.xlu1 %705 }
  0xfb   : > { %v1222_v33 = vmax.f32 %v1094_v32, 0.0  ;;  %v973_v29 = vand.u32 2147483647, %v845_v24  ;;  %v1097_v35 = vsub.f32 1.0, %v969_v15  ;;  %v1465_v27 = vsub.f32 %v4950_v38, %v4565_v6  ;;  %7420 = vst [vmem:[#allocation54_spill] sm:$0xff] %v4990_v49 }
  0xfc   : > { %v2060_v1 = vpack.c.bf16 %v1948_v54, %v1944_v48  ;;  %v4964_v30 = vmax.f32 %v1698_v37, 0.0  ;;  %v4966_v55 = vmax.f32 %v1702_v16, 0.0  ;;  %v1469_v39 = vsub.f32 %v4956_v5, %v4565_v6 }
  0xfd   : > { %v1101_v14 = vsub.f32 1.0, %v973_v29  ;;  %v1225_v40 = vmax.f32 %v1097_v35, 0.0  ;;  %v1585_v18 = vand.u32 2147483647, %v1465_v27  ;;  %v843_v42 = vsub.f32 %v4914_v20, %v4548_v60 }
  0xfe   : > { %7416 = vst [vmem:[#allocation50_spill] sm:$0xff] %v4964_v30  ;;  %7417 = vst [vmem:[#allocation51_spill] sm:$0xff] %v4966_v55  ;;  %2131 = vmatpush1.bf16.msra.mxu0 %v2060_v1  ;;  %v1946_v32 = vmul.f32 %v4964_v30, %v1218_v25  ;;  %v1950_v12 = vmul.f32 %v4966_v55, %v1222_v33  ;;  %v1589_v28 = vand.u32 2147483647, %v1469_v39 }
  0xff   : > { %v847_v37 = vsub.f32 %v4934_v44, %v4548_v60  ;;  %v1229_v24 = vmax.f32 %v1101_v14, 0.0  ;;  %v1705_v15 = vsub.f32 1.0, %v1585_v18  ;;  %v971_v48 = vand.u32 2147483647, %v843_v42 }
 0x100   : > { %v1467_v54 = vsub.f32 %v4950_v38, %v4567_v7  ;;  %v2062_v35 = vpack.c.bf16 %v1950_v12, %v1946_v32  ;;  %v1709_v16 = vsub.f32 1.0, %v1589_v28  ;;  %v1471_v27 = vsub.f32 %v4956_v5, %v4567_v7 }
 0x101   : > { %v975_v29 = vand.u32 2147483647, %v847_v37  ;;  %v4980_v1 = vmax.f32 %v1705_v15, 0.0  ;;  %v1099_v25 = vsub.f32 1.0, %v971_v48  ;;  %v840_v39 = vsub.f32 %v4914_v20, %v4544_v58 }
 0x102   : > { %v1587_v33 = vand.u32 2147483647, %v1467_v54  ;;  %2174 = vmatpush1.bf16.msra.mxu1 %v2062_v35  ;;  %v4984_v14 = vmax.f32 %v1709_v16, 0.0  ;;  %v1591_v42 = vand.u32 2147483647, %v1471_v27  ;;  %v844_v32 = vsub.f32 %v4934_v44, %v4544_v58 }
 0x103   : > { %7418 = vst [vmem:[#allocation52_spill] sm:$0xff] %v4980_v1  ;;  %v1103_v18 = vsub.f32 1.0, %v975_v29  ;;  %v1953_v12 = vmul.f32 %v4980_v1, %v1225_v40  ;;  %v1227_v28 = vmax.f32 %v1099_v25, 0.0  ;;  %v968_v55 = vand.u32 2147483647, %v840_v39 }
 0x104   : > { %7419 = vst [vmem:[#allocation53_spill] sm:$0xff] %v4984_v14  ;;  %v1707_v37 = vsub.f32 1.0, %v1587_v33  ;;  %v1957_v15 = vmul.f32 %v4984_v14, %v1229_v24  ;;  %v1711_v54 = vsub.f32 1.0, %v1591_v42  ;;  %v972_v30 = vand.u32 2147483647, %v844_v32 }
 0x105   : > { %v1231_v48 = vmax.f32 %v1103_v18, 0.0  ;;  %v1096_v16 = vsub.f32 1.0, %v968_v55  ;;  %v1464_v29 = vsub.f32 %v4950_v38, %v4569_v8  ;;  %v1468_v27 = vsub.f32 %v4956_v5, %v4569_v8 }
 0x106   : > { %v4992_v35 = vmax.f32 %v1707_v37, 0.0  ;;  %v2065_v40 = vpack.c.bf16 %v1957_v15, %v1953_v12  ;;  %v4998_v25 = vmax.f32 %v1711_v54, 0.0  ;;  %v1100_v33 = vsub.f32 1.0, %v972_v30 }
 0x107   : > { %v842_v24 = vsub.f32 %v4914_v20, %v4556_v0  ;;  %v1224_v18 = vmax.f32 %v1096_v16, 0.0  ;;  %v1584_v42 = vand.u32 2147483647, %v1464_v29  ;;  %v1588_v32 = vand.u32 2147483647, %v1468_v27 }
 0x108   : > { %7421 = vst [vmem:[#allocation55_spill] sm:$0xff] %v4992_v35  ;;  %7422 = vst [vmem:[#allocation56_spill] sm:$0xff] %v4998_v25  ;;  %v1955_v39 = vmul.f32 %v4992_v35, %v1227_v28  ;;  %2132 = vmatprep.subr.bf16.mxu0 %v2065_v40  ;;  %v1959_v55 = vmul.f32 %v4998_v25, %v1231_v48  ;;  %v1228_v37 = vmax.f32 %v1100_v33, 0.0  ;;  %v5012_v48 = vpop.permute.xlu1 %1353 }
 0x109   : > { %v846_v14 = vsub.f32 %v4934_v44, %v4556_v0  ;;  %v970_v1 = vand.u32 2147483647, %v842_v24  ;;  %v1704_v12 = vsub.f32 1.0, %v1584_v42  ;;  %v1708_v15 = vsub.f32 1.0, %v1588_v32  ;;  %7423 = vst [vmem:[#allocation57_spill] sm:$0xff] %v5012_v48  ;;  %v5018_v32 = vpop.permute.xlu0 %1357 }
 0x10a   : > { %v1466_v30 = vsub.f32 %v4950_v38, %v4571_v9  ;;  %v1470_v54 = vsub.f32 %v4956_v5, %v4571_v9  ;;  %v2067_v28 = vpack.c.bf16 %v1959_v55, %v1955_v39  ;;  %v849_v27 = vsub.f32 %v4641_v47, %v4546_v59  ;;  %7426 = vst [vmem:[#allocation60_spill] sm:$0xff] %v5018_v32 }
 0x10b   : > { %v974_v16 = vand.u32 2147483647, %v846_v14  ;;  %v1098_v29 = vsub.f32 1.0, %v970_v1  ;;  %v5014_v40 = vmax.f32 %v1704_v12, 0.0  ;;  %v5016_v33 = vmax.f32 %v1708_v15, 0.0 }
 0x10c   : > { %v1586_v24 = vand.u32 2147483647, %v1466_v30  ;;  %v1590_v42 = vand.u32 2147483647, %v1470_v54  ;;  %2175 = vmatprep.subr.bf16.mxu1 %v2067_v28  ;;  %v853_v14 = vsub.f32 %v4990_v49, %v4546_v59  ;;  %v977_v1 = vand.u32 2147483647, %v849_v27 }
 0x10d   : > { %7424 = vst [vmem:[#allocation58_spill] sm:$0xff] %v5014_v40  ;;  %7425 = vst [vmem:[#allocation59_spill] sm:$0xff] %v5016_v33  ;;  %v1102_v38 = vsub.f32 1.0, %v974_v16  ;;  %v1226_v25 = vmax.f32 %v1098_v29, 0.0  ;;  %v1952_v39 = vmul.f32 %v5014_v40, %v1224_v18  ;;  %v1956_v55 = vmul.f32 %v5016_v33, %v1228_v37 }
 0x10e   : > { %v1706_v5 = vsub.f32 1.0, %v1586_v24  ;;  %v1710_v12 = vsub.f32 1.0, %v1590_v42  ;;  %v981_v15 = vand.u32 2147483647, %v853_v14  ;;  %v1105_v44 = vsub.f32 1.0, %v977_v1 }
 0x10f   : > { %v1230_v35 = vmax.f32 %v1102_v38, 0.0  ;;  %v1473_v30 = vsub.f32 %v5012_v48, %v4565_v6  ;;  %v2064_v54 = vpack.c.bf16 %v1956_v55, %v1952_v39  ;;  %v1477_v29 = vsub.f32 %v5018_v32, %v4565_v6 }
 0x110   : > { %v5026_v28 = vmax.f32 %v1706_v5, 0.0  ;;  %v5028_v16 = vmax.f32 %v1710_v12, 0.0  ;;  %v1109_v27 = vsub.f32 1.0, %v981_v15  ;;  %v1233_v18 = vmax.f32 %v1105_v44, 0.0  ;;  %v5040_v44 = vpop.permute.xlu1 %710 }
 0x111   : > { %v1593_v40 = vand.u32 2147483647, %v1473_v30  ;;  %v851_v37 = vsub.f32 %v4641_v47, %v4548_v60  ;;  %2133 = vmatpush1.bf16.msra.mxu0 %v2064_v54  ;;  %v1597_v42 = vand.u32 2147483647, %v1477_v29  ;;  %v855_v5 = vsub.f32 %v4990_v49, %v4548_v60  ;;  %7429 = vst [vmem:[#allocation63_spill] sm:$0xff] %v5040_v44 }
 0x112   : > { %7427 = vst [vmem:[#allocation61_spill] sm:$0xff] %v5026_v28  ;;  %7428 = vst [vmem:[#allocation62_spill] sm:$0xff] %v5028_v16  ;;  %v1954_v38 = vmul.f32 %v5026_v28, %v1226_v25  ;;  %v1958_v24 = vmul.f32 %v5028_v16, %v1230_v35  ;;  %v1237_v14 = vmax.f32 %v1109_v27, 0.0  ;;  %v1475_v55 = vsub.f32 %v5012_v48, %v4567_v7 }
 0x113   : > { %v1713_v1 = vsub.f32 1.0, %v1593_v40  ;;  %v979_v39 = vand.u32 2147483647, %v851_v37  ;;  %v1717_v15 = vsub.f32 1.0, %v1597_v42  ;;  %v983_v30 = vand.u32 2147483647, %v855_v5 }
 0x114   : > { %v2066_v12 = vpack.c.bf16 %v1958_v24, %v1954_v38  ;;  %v1479_v25 = vsub.f32 %v5018_v32, %v4567_v7  ;;  %v1595_v29 = vand.u32 2147483647, %v1475_v55  ;;  %v848_v27 = vsub.f32 %v4641_v47, %v4544_v58 }
 0x115   : > { %v5044_v54 = vmax.f32 %v1713_v1, 0.0  ;;  %v1107_v35 = vsub.f32 1.0, %v979_v39  ;;  %v5048_v40 = vmax.f32 %v1717_v15, 0.0  ;;  %v1111_v37 = vsub.f32 1.0, %v983_v30 }
 0x116   : > { %2176 = vmatpush1.bf16.msra.mxu1 %v2066_v12  ;;  %v1599_v16 = vand.u32 2147483647, %v1479_v25  ;;  %v852_v38 = vsub.f32 %v4990_v49, %v4544_v58  ;;  %v1715_v5 = vsub.f32 1.0, %v1595_v29  ;;  %v976_v28 = vand.u32 2147483647, %v848_v27  ;;  %v5060_v25 = vpop.permute.xlu1 %715 }
 0x117   : > { %7430 = vst [vmem:[#allocation64_spill] sm:$0xff] %v5044_v54  ;;  %7431 = vst [vmem:[#allocation65_spill] sm:$0xff] %v5048_v40  ;;  %v1961_v24 = vmul.f32 %v5044_v54, %v1233_v18  ;;  %v1235_v42 = vmax.f32 %v1107_v35, 0.0  ;;  %v1965_v1 = vmul.f32 %v5048_v40, %v1237_v14  ;;  %v1239_v39 = vmax.f32 %v1111_v37, 0.0 }
 0x118   : > { %v1719_v55 = vsub.f32 1.0, %v1599_v16  ;;  %v980_v33 = vand.u32 2147483647, %v852_v38  ;;  %v5054_v20 = vmax.f32 %v1715_v5, 0.0  ;;  %v1104_v12 = vsub.f32 1.0, %v976_v28  ;;  %7433 = vst [vmem:[#allocation67_spill] sm:$0xff] %v5060_v25 }
 0x119   : > { %v1472_v15 = vsub.f32 %v5012_v48, %v4569_v8  ;;  %v1476_v30 = vsub.f32 %v5018_v32, %v4569_v8  ;;  %v2069_v18 = vpack.c.bf16 %v1965_v1, %v1961_v24  ;;  %v850_v14 = vsub.f32 %v4641_v47, %v4556_v0 }
 0x11a   : > { %7432 = vst [vmem:[#allocation66_spill] sm:$0xff] %v5054_v20  ;;  %v5062_v35 = vmax.f32 %v1719_v55, 0.0  ;;  %v1108_v29 = vsub.f32 1.0, %v980_v33  ;;  %v1963_v16 = vmul.f32 %v5054_v20, %v1235_v42  ;;  %v1232_v27 = vmax.f32 %v1104_v12, 0.0 }
 0x11b   : > { %v1592_v37 = vand.u32 2147483647, %v1472_v15  ;;  %v1596_v28 = vand.u32 2147483647, %v1476_v30  ;;  %2134 = vmatprep.subr.bf16.mxu0 %v2069_v18  ;;  %v854_v40 = vsub.f32 %v4990_v49, %v4556_v0  ;;  %v978_v54 = vand.u32 2147483647, %v850_v14 }
 0x11c   : > { %7434 = vst [vmem:[#allocation68_spill] sm:$0xff] %v5062_v35  ;;  %v1967_v38 = vmul.f32 %v5062_v35, %v1239_v39  ;;  %v1236_v5 = vmax.f32 %v1108_v29, 0.0  ;;  %v1474_v33 = vsub.f32 %v5012_v48, %v4571_v9  ;;  %v1478_v55 = vsub.f32 %v5018_v32, %v4571_v9  ;;  %v5076_v39 = vpop.permute.xlu0 %1361 }
 0x11d   : > { %v1712_v24 = vsub.f32 1.0, %v1592_v37  ;;  %v1716_v1 = vsub.f32 1.0, %v1596_v28  ;;  %v982_v12 = vand.u32 2147483647, %v854_v40  ;;  %v1106_v15 = vsub.f32 1.0, %v978_v54  ;;  %7435 = vst [vmem:[#allocation69_spill] sm:$0xff] %v5076_v39  ;;  %v5082_v28 = vpop.permute.xlu1 %1365 }
 0x11e   : > { %v2071_v42 = vpack.c.bf16 %v1967_v38, %v1963_v16  ;;  %v857_v30 = vsub.f32 %v5040_v44, %v4546_v59  ;;  %v1594_v14 = vand.u32 2147483647, %v1474_v33  ;;  %v1598_v37 = vand.u32 2147483647, %v1478_v55  ;;  %7438 = vst [vmem:[#allocation72_spill] sm:$0xff] %v5082_v28 }
 0x11f   : > { %v5078_v18 = vmax.f32 %v1712_v24, 0.0  ;;  %v5080_v29 = vmax.f32 %v1716_v1, 0.0  ;;  %v1110_v48 = vsub.f32 1.0, %v982_v12  ;;  %v1234_v35 = vmax.f32 %v1106_v15, 0.0 }
 0x120   : > { %2177 = vmatprep.subr.bf16.mxu1 %v2071_v42  ;;  %v861_v40 = vsub.f32 %v5060_v25, %v4546_v59  ;;  %v985_v54 = vand.u32 2147483647, %v857_v30  ;;  %v1714_v32 = vsub.f32 1.0, %v1594_v14  ;;  %v1718_v24 = vsub.f32 1.0, %v1598_v37 }
 0x121   : > { %7436 = vst [vmem:[#allocation70_spill] sm:$0xff] %v5078_v18  ;;  %7437 = vst [vmem:[#allocation71_spill] sm:$0xff] %v5080_v29  ;;  %v1960_v16 = vmul.f32 %v5078_v18, %v1232_v27  ;;  %v1964_v38 = vmul.f32 %v5080_v29, %v1236_v5  ;;  %v1238_v20 = vmax.f32 %v1110_v48, 0.0  ;;  %v1481_v33 = vsub.f32 %v5076_v39, %v4565_v6  ;;  %v5116_v29 = vpop.permute.xlu1 %725 }
 0x122   : > { %v989_v1 = vand.u32 2147483647, %v861_v40  ;;  %v1113_v49 = vsub.f32 1.0, %v985_v54  ;;  %v5090_v42 = vmax.f32 %v1714_v32, 0.0  ;;  %v5092_v12 = vmax.f32 %v1718_v24, 0.0 }
 0x123   : > { %v2068_v55 = vpack.c.bf16 %v1964_v38, %v1960_v16  ;;  %v1485_v15 = vsub.f32 %v5082_v28, %v4565_v6  ;;  %v1601_v18 = vand.u32 2147483647, %v1481_v33  ;;  %v859_v5 = vsub.f32 %v5040_v44, %v4548_v60 }
 0x124   : > { %7439 = vst [vmem:[#allocation73_spill] sm:$0xff] %v5090_v42  ;;  %7440 = vst [vmem:[#allocation74_spill] sm:$0xff] %v5092_v12  ;;  %v1117_v30 = vsub.f32 1.0, %v989_v1  ;;  %v1241_v27 = vmax.f32 %v1113_v49, 0.0  ;;  %v1962_v48 = vmul.f32 %v5090_v42, %v1234_v35  ;;  %v1966_v14 = vmul.f32 %v5092_v12, %v1238_v20 }
 0x125   : > { %2135 = vmatpush1.bf16.msra.mxu0 %v2068_v55  ;;  %v1605_v37 = vand.u32 2147483647, %v1485_v15  ;;  %v863_v32 = vsub.f32 %v5060_v25, %v4548_v60  ;;  %v1721_v54 = vsub.f32 1.0, %v1601_v18  ;;  %v987_v16 = vand.u32 2147483647, %v859_v5 }
 0x126   : > { %v1245_v40 = vmax.f32 %v1117_v30, 0.0  ;;  %v1483_v38 = vsub.f32 %v5076_v39, %v4567_v7  ;;  %v2070_v49 = vpack.c.bf16 %v1966_v14, %v1962_v48  ;;  %v1487_v33 = vsub.f32 %v5082_v28, %v4567_v7 }
 0x127   : > { %v1725_v24 = vsub.f32 1.0, %v1605_v37  ;;  %v991_v1 = vand.u32 2147483647, %v863_v32  ;;  %v5106_v55 = vmax.f32 %v1721_v54, 0.0  ;;  %v1115_v35 = vsub.f32 1.0, %v987_v16 }
 0x128   : > { %v1603_v20 = vand.u32 2147483647, %v1483_v38  ;;  %v856_v15 = vsub.f32 %v5040_v44, %v4544_v58  ;;  %2178 = vmatpush1.bf16.msra.mxu1 %v2070_v49  ;;  %v1607_v5 = vand.u32 2147483647, %v1487_v33  ;;  %v860_v48 = vsub.f32 %v5060_v25, %v4544_v58 }
 0x129   : > { %7441 = vst [vmem:[#allocation75_spill] sm:$0xff] %v5106_v55  ;;  %v5110_v30 = vmax.f32 %v1725_v24, 0.0  ;;  %v1119_v18 = vsub.f32 1.0, %v991_v1  ;;  %v1969_v14 = vmul.f32 %v5106_v55, %v1241_v27  ;;  %v1243_v37 = vmax.f32 %v1115_v35, 0.0 }
 0x12a   : > { %v1723_v32 = vsub.f32 1.0, %v1603_v20  ;;  %v984_v12 = vand.u32 2147483647, %v856_v15  ;;  %v1727_v38 = vsub.f32 1.0, %v1607_v5  ;;  %v988_v42 = vand.u32 2147483647, %v860_v48 }
 0x12b   : > { %7442 = vst [vmem:[#allocation76_spill] sm:$0xff] %v5110_v30  ;;  %v1973_v54 = vmul.f32 %v5110_v30, %v1245_v40  ;;  %v1247_v16 = vmax.f32 %v1119_v18, 0.0  ;;  %v1480_v1 = vsub.f32 %v5076_v39, %v4569_v8  ;;  %v1484_v33 = vsub.f32 %v5082_v28, %v4569_v8 }
 0x12c   : > { %v5118_v49 = vmax.f32 %v1723_v32, 0.0  ;;  %v1112_v24 = vsub.f32 1.0, %v984_v12  ;;  %v5124_v35 = vmax.f32 %v1727_v38, 0.0  ;;  %v1116_v20 = vsub.f32 1.0, %v988_v42 }
 0x12d   : > { %v2073_v27 = vpack.c.bf16 %v1973_v54, %v1969_v14  ;;  %v858_v40 = vsub.f32 %v5040_v44, %v4556_v0  ;;  %v1600_v5 = vand.u32 2147483647, %v1480_v1  ;;  %v1604_v48 = vand.u32 2147483647, %v1484_v33 }
 0x12e   : > { %7443 = vst [vmem:[#allocation77_spill] sm:$0xff] %v5118_v49  ;;  %7444 = vst [vmem:[#allocation78_spill] sm:$0xff] %v5124_v35  ;;  %v1971_v15 = vmul.f32 %v5118_v49, %v1243_v37  ;;  %v1240_v18 = vmax.f32 %v1112_v24, 0.0  ;;  %v1975_v12 = vmul.f32 %v5124_v35, %v1247_v16  ;;  %v1244_v32 = vmax.f32 %v1116_v20, 0.0  ;;  %v5138_v16 = vpop.permute.xlu1 %1369 }
 0x12f   : > { %2136 = vmatprep.subr.bf16.mxu0 %v2073_v27  ;;  %v862_v30 = vsub.f32 %v5060_v25, %v4556_v0  ;;  %v986_v55 = vand.u32 2147483647, %v858_v40  ;;  %v1720_v14 = vsub.f32 1.0, %v1600_v5  ;;  %v1724_v54 = vsub.f32 1.0, %v1604_v48  ;;  %7445 = vst [vmem:[#allocation79_spill] sm:$0xff] %v5138_v16  ;;  %v5144_v48 = vpop.permute.xlu0 %1373 }
 0x130   : > { %v1482_v42 = vsub.f32 %v5076_v39, %v4571_v9  ;;  %v1486_v38 = vsub.f32 %v5082_v28, %v4571_v9  ;;  %v2075_v37 = vpack.c.bf16 %v1975_v12, %v1971_v15  ;;  %v865_v33 = vsub.f32 %v4662_v34, %v4546_v59  ;;  %7448 = vst [vmem:[#allocation82_spill] sm:$0xff] %v5144_v48 }
 0x131   : > { %v990_v24 = vand.u32 2147483647, %v862_v30  ;;  %v1114_v1 = vsub.f32 1.0, %v986_v55  ;;  %v5140_v27 = vmax.f32 %v1720_v14, 0.0  ;;  %v5142_v20 = vmax.f32 %v1724_v54, 0.0 }
 0x132   : > { %v1602_v40 = vand.u32 2147483647, %v1482_v42  ;;  %v1606_v5 = vand.u32 2147483647, %v1486_v38  ;;  %2179 = vmatprep.subr.bf16.mxu1 %v2075_v37  ;;  %v869_v30 = vsub.f32 %v5116_v29, %v4546_v59  ;;  %v993_v55 = vand.u32 2147483647, %v865_v33 }
 0x133   : > { %7446 = vst [vmem:[#allocation80_spill] sm:$0xff] %v5140_v27  ;;  %7447 = vst [vmem:[#allocation81_spill] sm:$0xff] %v5142_v20  ;;  %v1118_v39 = vsub.f32 1.0, %v990_v24  ;;  %v1242_v35 = vmax.f32 %v1114_v1, 0.0  ;;  %v1968_v15 = vmul.f32 %v5140_v27, %v1240_v18  ;;  %v1972_v12 = vmul.f32 %v5142_v20, %v1244_v32 }
 0x134   : > { %v1722_v28 = vsub.f32 1.0, %v1602_v40  ;;  %v1726_v14 = vsub.f32 1.0, %v1606_v5  ;;  %v997_v54 = vand.u32 2147483647, %v869_v30  ;;  %v1121_v25 = vsub.f32 1.0, %v993_v55 }
 0x135   : > { %v1246_v49 = vmax.f32 %v1118_v39, 0.0  ;;  %v1489_v42 = vsub.f32 %v5138_v16, %v4565_v6  ;;  %v2072_v38 = vpack.c.bf16 %v1972_v12, %v1968_v15  ;;  %v1493_v1 = vsub.f32 %v5144_v48, %v4565_v6 }
 0x136   : > { %v5152_v37 = vmax.f32 %v1722_v28, 0.0  ;;  %v5154_v24 = vmax.f32 %v1726_v14, 0.0  ;;  %v1125_v33 = vsub.f32 1.0, %v997_v54  ;;  %v1249_v18 = vmax.f32 %v1121_v25, 0.0  ;;  %v5166_v14 = vpop.permute.xlu1 %730 }
 0x137   : > { %v1609_v27 = vand.u32 2147483647, %v1489_v42  ;;  %v867_v32 = vsub.f32 %v4662_v34, %v4548_v60  ;;  %2137 = vmatpush1.bf16.msra.mxu0 %v2072_v38  ;;  %v1613_v5 = vand.u32 2147483647, %v1493_v1  ;;  %v871_v28 = vsub.f32 %v5116_v29, %v4548_v60  ;;  %7451 = vst [vmem:[#allocation85_spill] sm:$0xff] %v5166_v14 }
 0x138   : > { %7449 = vst [vmem:[#allocation83_spill] sm:$0xff] %v5152_v37  ;;  %7450 = vst [vmem:[#allocation84_spill] sm:$0xff] %v5154_v24  ;;  %v1970_v39 = vmul.f32 %v5152_v37, %v1242_v35  ;;  %v1974_v40 = vmul.f32 %v5154_v24, %v1246_v49  ;;  %v1253_v30 = vmax.f32 %v1125_v33, 0.0  ;;  %v1491_v12 = vsub.f32 %v5138_v16, %v4567_v7 }
 0x139   : > { %v1729_v55 = vsub.f32 1.0, %v1609_v27  ;;  %v995_v15 = vand.u32 2147483647, %v867_v32  ;;  %v1733_v54 = vsub.f32 1.0, %v1613_v5  ;;  %v999_v42 = vand.u32 2147483647, %v871_v28 }
 0x13a   : > { %v2074_v25 = vpack.c.bf16 %v1974_v40, %v1970_v39  ;;  %v1495_v35 = vsub.f32 %v5144_v48, %v4567_v7  ;;  %v1611_v1 = vand.u32 2147483647, %v1491_v12  ;;  %v864_v33 = vsub.f32 %v4662_v34, %v4544_v58 }
 0x13b   : > { %v5170_v38 = vmax.f32 %v1729_v55, 0.0  ;;  %v1123_v49 = vsub.f32 1.0, %v995_v15  ;;  %v5174_v27 = vmax.f32 %v1733_v54, 0.0  ;;  %v1127_v32 = vsub.f32 1.0, %v999_v42 }
 0x13c   : > { %2180 = vmatpush1.bf16.msra.mxu1 %v2074_v25  ;;  %v1615_v24 = vand.u32 2147483647, %v1495_v35  ;;  %v868_v39 = vsub.f32 %v5116_v29, %v4544_v58  ;;  %v1731_v28 = vsub.f32 1.0, %v1611_v1  ;;  %v992_v37 = vand.u32 2147483647, %v864_v33  ;;  %v5186_v35 = vpop.permute.xlu1 %735 }
 0x13d   : > { %7452 = vst [vmem:[#allocation86_spill] sm:$0xff] %v5170_v38  ;;  %7453 = vst [vmem:[#allocation87_spill] sm:$0xff] %v5174_v27  ;;  %v1977_v40 = vmul.f32 %v5170_v38, %v1249_v18  ;;  %v1251_v5 = vmax.f32 %v1123_v49, 0.0  ;;  %v1981_v55 = vmul.f32 %v5174_v27, %v1253_v30  ;;  %v1255_v15 = vmax.f32 %v1127_v32, 0.0 }
 0x13e   : > { %v1735_v12 = vsub.f32 1.0, %v1615_v24  ;;  %v996_v20 = vand.u32 2147483647, %v868_v39  ;;  %v5180_v44 = vmax.f32 %v1731_v28, 0.0  ;;  %v1120_v25 = vsub.f32 1.0, %v992_v37  ;;  %7455 = vst [vmem:[#allocation89_spill] sm:$0xff] %v5186_v35 }
 0x13f   : > { %v1488_v54 = vsub.f32 %v5138_v16, %v4569_v8  ;;  %v1492_v42 = vsub.f32 %v5144_v48, %v4569_v8  ;;  %v2077_v18 = vpack.c.bf16 %v1981_v55, %v1977_v40  ;;  %v866_v30 = vsub.f32 %v4662_v34, %v4556_v0  ;;  %v4237_v39 = vld [vmem:[%s7058_s3 + $0x8] sm:$0xff]  }
 0x140   : > { %7454 = vst [vmem:[#allocation88_spill] sm:$0xff] %v5180_v44  ;;  %v5188_v49 = vmax.f32 %v1735_v12, 0.0  ;;  %v1124_v1 = vsub.f32 1.0, %v996_v20  ;;  %v1979_v24 = vmul.f32 %v5180_v44, %v1251_v5  ;;  %v1248_v33 = vmax.f32 %v1120_v25, 0.0  ;;  %4105 = vmatmul.mubr.msk.bf16.gmra.mrb[4].mxu0 %vm514_vm0, %v4237_v39  ;;  %4108 = vmatmul.mubr.msk.bf16.gmra.mrb[4].mxu1 %vm514_vm0, %v4237_v39  ;;  %v5215_v39 = vpop.permute.xlu1 %1381 }
 0x141   : > { %v1608_v32 = vand.u32 2147483647, %v1488_v54  ;;  %v1612_v37 = vand.u32 2147483647, %v1492_v42  ;;  %2138 = vmatprep.subr.bf16.mxu0 %v2077_v18  ;;  %v870_v40 = vsub.f32 %v5116_v29, %v4556_v0  ;;  %v994_v20 = vand.u32 2147483647, %v866_v30  ;;  %576 = vmatprep.mubr.bf16.mxu0 %v7381_v45 }
 0x142   : > { %7456 = vst [vmem:[#allocation90_spill] sm:$0xff] %v5188_v49  ;;  %v1983_v28 = vmul.f32 %v5188_v49, %v1255_v15  ;;  %v1252_v27 = vmax.f32 %v1124_v1, 0.0  ;;  %v1490_v5 = vsub.f32 %v5138_v16, %v4571_v9  ;;  %v1494_v25 = vsub.f32 %v5144_v48, %v4571_v9  ;;  %639 = vmatprep.mubr.bf16.mxu1 %v7381_v45  ;;  %v5209_v1 = vpop.permute.xlu0 %1377 }
 0x143   : > { %v1728_v55 = vsub.f32 1.0, %v1608_v32  ;;  %v1732_v12 = vsub.f32 1.0, %v1612_v37  ;;  %v998_v42 = vand.u32 2147483647, %v870_v40  ;;  %v1122_v15 = vsub.f32 1.0, %v994_v20  ;;  %7457 = vst [vmem:[#allocation91_spill] sm:$0xff] %v5209_v1 }
 0x144   : > { %v2079_v54 = vpack.c.bf16 %v1983_v28, %v1979_v24  ;;  %v873_v18 = vsub.f32 %v5166_v14, %v4546_v59  ;;  %v1610_v37 = vand.u32 2147483647, %v1490_v5  ;;  %v1614_v48 = vand.u32 2147483647, %v1494_v25  ;;  %7460 = vst [vmem:[#allocation94_spill] sm:$0xff] %v5215_v39 }
 0x145   : > { %v5211_v30 = vmax.f32 %v1728_v55, 0.0  ;;  %v5213_v32 = vmax.f32 %v1732_v12, 0.0  ;;  %v1126_v24 = vsub.f32 1.0, %v998_v42  ;;  %v1250_v28 = vmax.f32 %v1122_v15, 0.0 }
 0x146   : > { %2181 = vmatprep.subr.bf16.mxu1 %v2079_v54  ;;  %v877_v40 = vsub.f32 %v5186_v35, %v4546_v59  ;;  %v1001_v20 = vand.u32 2147483647, %v873_v18  ;;  %v1730_v49 = vsub.f32 1.0, %v1610_v37  ;;  %v1734_v55 = vsub.f32 1.0, %v1614_v48 }
 0x147   : > { %7458 = vst [vmem:[#allocation92_spill] sm:$0xff] %v5211_v30  ;;  %7459 = vst [vmem:[#allocation93_spill] sm:$0xff] %v5213_v32  ;;  %v1976_v16 = vmul.f32 %v5211_v30, %v1248_v33  ;;  %v1980_v45 = vmul.f32 %v5213_v32, %v1252_v27  ;;  %v1254_v44 = vmax.f32 %v1126_v24, 0.0  ;;  %v1497_v5 = vsub.f32 %v5209_v1, %v4565_v6  ;;  %v5249_v32 = vpop.permute.xlu1 %745 }
 0x148   : > { %v1005_v12 = vand.u32 2147483647, %v877_v40  ;;  %v1129_v38 = vsub.f32 1.0, %v1001_v20  ;;  %v5223_v54 = vmax.f32 %v1730_v49, 0.0  ;;  %v5225_v42 = vmax.f32 %v1734_v55, 0.0  ;;  %7465 = vst [vmem:[#allocation99_spill] sm:$0xff] %v5249_v32 }
 0x149   : > { %v2076_v25 = vpack.c.bf16 %v1980_v45, %v1976_v16  ;;  %v1501_v15 = vsub.f32 %v5215_v39, %v4565_v6  ;;  %v1617_v30 = vand.u32 2147483647, %v1497_v5  ;;  %v875_v48 = vsub.f32 %v5166_v14, %v4548_v60 }
 0x14a   : > { %7461 = vst [vmem:[#allocation95_spill] sm:$0xff] %v5223_v54  ;;  %7462 = vst [vmem:[#allocation96_spill] sm:$0xff] %v5225_v42  ;;  %v1133_v18 = vsub.f32 1.0, %v1005_v12  ;;  %v1257_v33 = vmax.f32 %v1129_v38, 0.0  ;;  %v1978_v27 = vmul.f32 %v5223_v54, %v1250_v28  ;;  %v1982_v37 = vmul.f32 %v5225_v42, %v1254_v44 }
 0x14b   : > { %2139 = vmatpush1.bf16.msra.mxu0 %v2076_v25  ;;  %v1621_v24 = vand.u32 2147483647, %v1501_v15  ;;  %v879_v16 = vsub.f32 %v5186_v35, %v4548_v60  ;;  %v1737_v40 = vsub.f32 1.0, %v1617_v30  ;;  %v1003_v20 = vand.u32 2147483647, %v875_v48 }
 0x14c   : > { %v1261_v49 = vmax.f32 %v1133_v18, 0.0  ;;  %v1499_v45 = vsub.f32 %v5209_v1, %v4567_v7  ;;  %v2078_v38 = vpack.c.bf16 %v1982_v37, %v1978_v27  ;;  %v1503_v5 = vsub.f32 %v5215_v39, %v4567_v7 }
 0x14d   : > { %v1741_v55 = vsub.f32 1.0, %v1621_v24  ;;  %v1007_v12 = vand.u32 2147483647, %v879_v16  ;;  %v5239_v25 = vmax.f32 %v1737_v40, 0.0  ;;  %v1131_v28 = vsub.f32 1.0, %v1003_v20 }
 0x14e   : > { %v1619_v44 = vand.u32 2147483647, %v1499_v45  ;;  %v872_v15 = vsub.f32 %v5166_v14, %v4544_v58  ;;  %2182 = vmatpush1.bf16.msra.mxu1 %v2078_v38  ;;  %v1623_v48 = vand.u32 2147483647, %v1503_v5  ;;  %v876_v27 = vsub.f32 %v5186_v35, %v4544_v58 }
 0x14f   : > { %7463 = vst [vmem:[#allocation97_spill] sm:$0xff] %v5239_v25  ;;  %v5243_v18 = vmax.f32 %v1741_v55, 0.0  ;;  %v1135_v30 = vsub.f32 1.0, %v1007_v12  ;;  %v1985_v37 = vmul.f32 %v5239_v25, %v1257_v33  ;;  %v1259_v24 = vmax.f32 %v1131_v28, 0.0  ;;  %v5286_v25 = vpop.permute.xlu0 %1389 }
 0x150   : > { %v1739_v16 = vsub.f32 1.0, %v1619_v44  ;;  %v1000_v42 = vand.u32 2147483647, %v872_v15  ;;  %v1743_v45 = vsub.f32 1.0, %v1623_v48  ;;  %v1004_v54 = vand.u32 2147483647, %v876_v27 }
 0x151   : > { %7464 = vst [vmem:[#allocation98_spill] sm:$0xff] %v5243_v18  ;;  %v1989_v40 = vmul.f32 %v5243_v18, %v1261_v49  ;;  %v1263_v20 = vmax.f32 %v1135_v30, 0.0  ;;  %v1496_v12 = vsub.f32 %v5209_v1, %v4569_v8  ;;  %v1500_v5 = vsub.f32 %v5215_v39, %v4569_v8  ;;  %7471 = vst [vmem:[#allocation105_spill] sm:$0xff] %v5286_v25 }
 0x152   : > { %v5251_v38 = vmax.f32 %v1739_v16, 0.0  ;;  %v1128_v55 = vsub.f32 1.0, %v1000_v42  ;;  %v5257_v28 = vmax.f32 %v1743_v45, 0.0  ;;  %v1132_v44 = vsub.f32 1.0, %v1004_v54  ;;  %v4238_v42 = vld [vmem:[%s7058_s3 + $0x10] sm:$0xff]  }
 0x153   : > { %v2081_v33 = vpack.c.bf16 %v1989_v40, %v1985_v37  ;;  %v874_v49 = vsub.f32 %v5166_v14, %v4556_v0  ;;  %v1616_v48 = vand.u32 2147483647, %v1496_v12  ;;  %v1620_v27 = vand.u32 2147483647, %v1500_v5  ;;  %4106 = vmatmul.mubr.msk.bf16.gmra.mrb[8].mxu0 %vm514_vm0, %v4238_v42  ;;  %4109 = vmatmul.mubr.msk.bf16.gmra.mrb[8].mxu1 %vm514_vm0, %v4238_v42 }
 0x154   : > { %7466 = vst [vmem:[#allocation100_spill] sm:$0xff] %v5251_v38  ;;  %7467 = vst [vmem:[#allocation101_spill] sm:$0xff] %v5257_v28  ;;  %v1987_v15 = vmul.f32 %v5251_v38, %v1259_v24  ;;  %v1256_v30 = vmax.f32 %v1128_v55, 0.0  ;;  %v1991_v16 = vmul.f32 %v5257_v28, %v1263_v20  ;;  %v1260_v18 = vmax.f32 %v1132_v44, 0.0  ;;  %v5276_v44 = vpop.permute.xlu1 %1385 }
 0x155   : > { %2140 = vmatprep.subr.bf16.mxu0 %v2081_v33  ;;  %v878_v37 = vsub.f32 %v5186_v35, %v4556_v0  ;;  %v1002_v54 = vand.u32 2147483647, %v874_v49  ;;  %v1736_v40 = vsub.f32 1.0, %v1616_v48  ;;  %v1740_v45 = vsub.f32 1.0, %v1620_v27  ;;  %7468 = vst [vmem:[#allocation102_spill] sm:$0xff] %v5276_v44 }
 0x156   : > { %v1498_v24 = vsub.f32 %v5209_v1, %v4571_v9  ;;  %v1502_v55 = vsub.f32 %v5215_v39, %v4571_v9  ;;  %v2083_v12 = vpack.c.bf16 %v1991_v16, %v1987_v15  ;;  %v881_v33 = vsub.f32 %v4681_v51, %v4546_v59 }
 0x157   : > { %v1006_v5 = vand.u32 2147483647, %v878_v37  ;;  %v1130_v20 = vsub.f32 1.0, %v1002_v54  ;;  %v5278_v49 = vmax.f32 %v1736_v40, 0.0  ;;  %v5280_v48 = vmax.f32 %v1740_v45, 0.0 }
 0x158   : > { %v1618_v27 = vand.u32 2147483647, %v1498_v24  ;;  %v1622_v1 = vand.u32 2147483647, %v1502_v55  ;;  %2183 = vmatprep.subr.bf16.mxu1 %v2083_v12  ;;  %v885_v42 = vsub.f32 %v5249_v32, %v4546_v59  ;;  %v1009_v15 = vand.u32 2147483647, %v881_v33 }
 0x159   : > { %7469 = vst [vmem:[#allocation103_spill] sm:$0xff] %v5278_v49  ;;  %7470 = vst [vmem:[#allocation104_spill] sm:$0xff] %v5280_v48  ;;  %v1134_v39 = vsub.f32 1.0, %v1006_v5  ;;  %v1258_v28 = vmax.f32 %v1130_v20, 0.0  ;;  %v1984_v16 = vmul.f32 %v5278_v49, %v1256_v30  ;;  %v1988_v37 = vmul.f32 %v5280_v48, %v1260_v18 }
 0x15a   : > { %v1738_v54 = vsub.f32 1.0, %v1618_v27  ;;  %v1742_v38 = vsub.f32 1.0, %v1622_v1  ;;  %v1013_v45 = vand.u32 2147483647, %v885_v42  ;;  %v1137_v35 = vsub.f32 1.0, %v1009_v15 }
 0x15b   : > { %v1262_v40 = vmax.f32 %v1134_v39, 0.0  ;;  %v1505_v24 = vsub.f32 %v5276_v44, %v4565_v6  ;;  %v2080_v55 = vpack.c.bf16 %v1988_v37, %v1984_v16  ;;  %v1509_v30 = vsub.f32 %v5286_v25, %v4565_v6 }
 0x15c   : > { %v5290_v12 = vmax.f32 %v1738_v54, 0.0  ;;  %v5292_v5 = vmax.f32 %v1742_v38, 0.0  ;;  %v1141_v20 = vsub.f32 1.0, %v1013_v45  ;;  %v1265_v18 = vmax.f32 %v1137_v35, 0.0  ;;  %v5304_v45 = vpop.permute.xlu1 %750 }
 0x15d   : > { %v1625_v33 = vand.u32 2147483647, %v1505_v24  ;;  %v883_v1 = vsub.f32 %v4681_v51, %v4548_v60  ;;  %2141 = vmatpush1.bf16.msra.mxu0 %v2080_v55  ;;  %v1629_v42 = vand.u32 2147483647, %v1509_v30  ;;  %v887_v15 = vsub.f32 %v5249_v32, %v4548_v60  ;;  %7474 = vst [vmem:[#allocation108_spill] sm:$0xff] %v5304_v45 }
 0x15e   : > { %7472 = vst [vmem:[#allocation106_spill] sm:$0xff] %v5290_v12  ;;  %7473 = vst [vmem:[#allocation107_spill] sm:$0xff] %v5292_v5  ;;  %v1986_v39 = vmul.f32 %v5290_v12, %v1258_v28  ;;  %v1990_v27 = vmul.f32 %v5292_v5, %v1262_v40  ;;  %v1269_v38 = vmax.f32 %v1141_v20, 0.0  ;;  %v1507_v54 = vsub.f32 %v5276_v44, %v4567_v7 }
 0x15f   : > { %v1745_v16 = vsub.f32 1.0, %v1625_v33  ;;  %v1011_v37 = vand.u32 2147483647, %v883_v1  ;;  %v1749_v24 = vsub.f32 1.0, %v1629_v42  ;;  %v1015_v48 = vand.u32 2147483647, %v887_v15 }
 0x160   : > { %v2082_v35 = vpack.c.bf16 %v1990_v27, %v1986_v39  ;;  %v1511_v28 = vsub.f32 %v5286_v25, %v4567_v7  ;;  %v1627_v30 = vand.u32 2147483647, %v1507_v54  ;;  %v880_v20 = vsub.f32 %v4681_v51, %v4544_v58 }
 0x161   : > { %v5308_v55 = vmax.f32 %v1745_v16, 0.0  ;;  %v1139_v40 = vsub.f32 1.0, %v1011_v37  ;;  %v5312_v33 = vmax.f32 %v1749_v24, 0.0  ;;  %v1143_v1 = vsub.f32 1.0, %v1015_v48 }
 0x162   : > { %2184 = vmatpush1.bf16.msra.mxu1 %v2082_v35  ;;  %v1631_v5 = vand.u32 2147483647, %v1511_v28  ;;  %v884_v39 = vsub.f32 %v5249_v32, %v4544_v58  ;;  %v1747_v15 = vsub.f32 1.0, %v1627_v30  ;;  %v1008_v12 = vand.u32 2147483647, %v880_v20  ;;  %v5324_v28 = vpop.permute.xlu1 %755 }
 0x163   : > { %7475 = vst [vmem:[#allocation109_spill] sm:$0xff] %v5308_v55  ;;  %7476 = vst [vmem:[#allocation110_spill] sm:$0xff] %v5312_v33  ;;  %v1993_v27 = vmul.f32 %v5308_v55, %v1265_v18  ;;  %v1267_v42 = vmax.f32 %v1139_v40, 0.0  ;;  %v1997_v16 = vmul.f32 %v5312_v33, %v1269_v38  ;;  %v1271_v37 = vmax.f32 %v1143_v1, 0.0 }
 0x164   : > { %v1751_v54 = vsub.f32 1.0, %v1631_v5  ;;  %v1012_v49 = vand.u32 2147483647, %v884_v39  ;;  %v5318_v14 = vmax.f32 %v1747_v15, 0.0  ;;  %v1136_v35 = vsub.f32 1.0, %v1008_v12  ;;  %7478 = vst [vmem:[#allocation112_spill] sm:$0xff] %v5324_v28 }
 0x165   : > { %v1504_v48 = vsub.f32 %v5276_v44, %v4569_v8  ;;  %v1508_v24 = vsub.f32 %v5286_v25, %v4569_v8  ;;  %v2085_v18 = vpack.c.bf16 %v1997_v16, %v1993_v27  ;;  %v882_v38 = vsub.f32 %v4681_v51, %v4556_v0 }
 0x166   : > { %7477 = vst [vmem:[#allocation111_spill] sm:$0xff] %v5318_v14  ;;  %v5326_v40 = vmax.f32 %v1751_v54, 0.0  ;;  %v1140_v30 = vsub.f32 1.0, %v1012_v49  ;;  %v1995_v5 = vmul.f32 %v5318_v14, %v1267_v42  ;;  %v1264_v20 = vmax.f32 %v1136_v35, 0.0 }
 0x167   : > { %v1624_v1 = vand.u32 2147483647, %v1504_v48  ;;  %v1628_v12 = vand.u32 2147483647, %v1508_v24  ;;  %2142 = vmatprep.subr.bf16.mxu0 %v2085_v18  ;;  %v886_v33 = vsub.f32 %v5249_v32, %v4556_v0  ;;  %v1010_v55 = vand.u32 2147483647, %v882_v38 }
 0x168   : > { %7479 = vst [vmem:[#allocation113_spill] sm:$0xff] %v5326_v40  ;;  %v1999_v39 = vmul.f32 %v5326_v40, %v1271_v37  ;;  %v1268_v15 = vmax.f32 %v1140_v30, 0.0  ;;  %v1506_v49 = vsub.f32 %v5276_v44, %v4571_v9  ;;  %v1510_v54 = vsub.f32 %v5286_v25, %v4571_v9 }
 0x169   : > { %v1744_v27 = vsub.f32 1.0, %v1624_v1  ;;  %v1748_v16 = vsub.f32 1.0, %v1628_v12  ;;  %v1014_v35 = vand.u32 2147483647, %v886_v33  ;;  %v1138_v48 = vsub.f32 1.0, %v1010_v55  ;;  %v5344_v1 = vpop.permute.xlu1 %1397  ;;  %v5348_v33 = vpop.permute.xlu0 %1393 }
 0x16a   : > { %v2087_v42 = vpack.c.bf16 %v1999_v39, %v1995_v5  ;;  %v889_v24 = vsub.f32 %v5304_v45, %v4546_v59  ;;  %v1626_v30 = vand.u32 2147483647, %v1506_v49  ;;  %v1630_v38 = vand.u32 2147483647, %v1510_v54  ;;  %7482 = vst [vmem:[#allocation116_spill] sm:$0xff] %v5344_v1  ;;  %7483 = vst [vmem:[#allocation117_spill] sm:$0xff] %v5348_v33 }
 0x16b   : > { %v5340_v37 = vmax.f32 %v1744_v27, 0.0  ;;  %v5342_v18 = vmax.f32 %v1748_v16, 0.0  ;;  %v1142_v12 = vsub.f32 1.0, %v1014_v35  ;;  %v1266_v44 = vmax.f32 %v1138_v48, 0.0  ;;  %v4241_v49 = vld [vmem:[%s7057_s2 + $0x4] ss:$8 sps:$4 sm:$0xff]  }
 0x16c   : > { %2185 = vmatprep.subr.bf16.mxu1 %v2087_v42  ;;  %v893_v25 = vsub.f32 %v5324_v28, %v4546_v59  ;;  %v1017_v5 = vand.u32 2147483647, %v889_v24  ;;  %v1746_v27 = vsub.f32 1.0, %v1626_v30  ;;  %v1750_v16 = vsub.f32 1.0, %v1630_v38  ;;  %2156 = vmatprep.mubr.bf16.mxu0 %v4241_v49 }
 0x16d   : > { %7480 = vst [vmem:[#allocation114_spill] sm:$0xff] %v5340_v37  ;;  %7481 = vst [vmem:[#allocation115_spill] sm:$0xff] %v5342_v18  ;;  %v1992_v55 = vmul.f32 %v5340_v37, %v1264_v20  ;;  %v1996_v39 = vmul.f32 %v5342_v18, %v1268_v15  ;;  %v1270_v54 = vmax.f32 %v1142_v12, 0.0  ;;  %v1513_v48 = vsub.f32 %v5348_v33, %v4565_v6  ;;  %v5383_v32 = vpop.permute.xlu1 %765 }
 0x16e   : > { %v1021_v42 = vand.u32 2147483647, %v893_v25  ;;  %v1145_v35 = vsub.f32 1.0, %v1017_v5  ;;  %v5357_v24 = vmax.f32 %v1746_v27, 0.0  ;;  %v5359_v14 = vmax.f32 %v1750_v16, 0.0  ;;  %2199 = vmatprep.mubr.bf16.mxu1 %v4241_v49  ;;  %7488 = vst [vmem:[#allocation122_spill] sm:$0xff] %v5383_v32 }
 0x16f   : > { %v2084_v40 = vpack.c.bf16 %v1996_v39, %v1992_v55  ;;  %v1517_v20 = vsub.f32 %v5344_v1, %v4565_v6  ;;  %v1633_v38 = vand.u32 2147483647, %v1513_v48  ;;  %v891_v25 = vsub.f32 %v5304_v45, %v4548_v60 }
 0x170   : > { %7484 = vst [vmem:[#allocation118_spill] sm:$0xff] %v5357_v24  ;;  %7485 = vst [vmem:[#allocation119_spill] sm:$0xff] %v5359_v14  ;;  %v1149_v15 = vsub.f32 1.0, %v1021_v42  ;;  %v1273_v30 = vmax.f32 %v1145_v35, 0.0  ;;  %v1994_v12 = vmul.f32 %v5357_v24, %v1266_v44  ;;  %v1998_v5 = vmul.f32 %v5359_v14, %v1270_v54 }
 0x171   : > { %2143 = vmatpush1.bf16.msra.mxu0 %v2084_v40  ;;  %v1637_v55 = vand.u32 2147483647, %v1517_v20  ;;  %v895_v39 = vsub.f32 %v5324_v28, %v4548_v60  ;;  %v1753_v16 = vsub.f32 1.0, %v1633_v38  ;;  %v1019_v18 = vand.u32 2147483647, %v891_v25 }
 0x172   : > { %v1277_v27 = vmax.f32 %v1149_v15, 0.0  ;;  %v1515_v49 = vsub.f32 %v5348_v33, %v4567_v7  ;;  %v2086_v42 = vpack.c.bf16 %v1998_v5, %v1994_v12  ;;  %v1519_v40 = vsub.f32 %v5344_v1, %v4567_v7 }
 0x173   : > { %v1757_v35 = vsub.f32 1.0, %v1637_v55  ;;  %v1023_v48 = vand.u32 2147483647, %v895_v39  ;;  %v5373_v37 = vmax.f32 %v1753_v16, 0.0  ;;  %v1147_v44 = vsub.f32 1.0, %v1019_v18 }
 0x174   : > { %v1635_v54 = vand.u32 2147483647, %v1515_v49  ;;  %v888_v20 = vsub.f32 %v5304_v45, %v4544_v58  ;;  %2186 = vmatpush1.bf16.msra.mxu1 %v2086_v42  ;;  %v1639_v25 = vand.u32 2147483647, %v1519_v40  ;;  %v892_v12 = vsub.f32 %v5324_v28, %v4544_v58 }
 0x175   : > { %7486 = vst [vmem:[#allocation120_spill] sm:$0xff] %v5373_v37  ;;  %v5377_v15 = vmax.f32 %v1757_v35, 0.0  ;;  %v1151_v38 = vsub.f32 1.0, %v1023_v48  ;;  %v2001_v5 = vmul.f32 %v5373_v37, %v1273_v30  ;;  %v1275_v55 = vmax.f32 %v1147_v44, 0.0 }
 0x176   : > { %v1755_v39 = vsub.f32 1.0, %v1635_v54  ;;  %v1016_v14 = vand.u32 2147483647, %v888_v20  ;;  %v1759_v49 = vsub.f32 1.0, %v1639_v25  ;;  %v1020_v24 = vand.u32 2147483647, %v892_v12 }
 0x177   : > { %7487 = vst [vmem:[#allocation121_spill] sm:$0xff] %v5377_v15  ;;  %v2005_v16 = vmul.f32 %v5377_v15, %v1277_v27  ;;  %v1279_v18 = vmax.f32 %v1151_v38, 0.0  ;;  %v1512_v48 = vsub.f32 %v5348_v33, %v4569_v8  ;;  %v1516_v40 = vsub.f32 %v5344_v1, %v4569_v8 }
 0x178   : > { %v5385_v42 = vmax.f32 %v1755_v39, 0.0  ;;  %v1144_v35 = vsub.f32 1.0, %v1016_v14  ;;  %v5391_v44 = vmax.f32 %v1759_v49, 0.0  ;;  %v1148_v54 = vsub.f32 1.0, %v1020_v24 }
 0x179   : > { %v2089_v30 = vpack.c.bf16 %v2005_v16, %v2001_v5  ;;  %v890_v27 = vsub.f32 %v5304_v45, %v4556_v0  ;;  %v1632_v25 = vand.u32 2147483647, %v1512_v48  ;;  %v1636_v12 = vand.u32 2147483647, %v1516_v40 }
 0x17a   : > { %7489 = vst [vmem:[#allocation123_spill] sm:$0xff] %v5385_v42  ;;  %7490 = vst [vmem:[#allocation124_spill] sm:$0xff] %v5391_v44  ;;  %v2003_v20 = vmul.f32 %v5385_v42, %v1275_v55  ;;  %v1272_v38 = vmax.f32 %v1144_v35, 0.0  ;;  %v2007_v14 = vmul.f32 %v5391_v44, %v1279_v18  ;;  %v1276_v39 = vmax.f32 %v1148_v54, 0.0  ;;  %v5405_v18 = vpop.permute.xlu1 %1401  ;;  %v5415_v42 = vpop.permute.xlu0 %1405 }
 0x17b   : > { %2144 = vmatprep.subr.bf16.mxu0 %v2089_v30  ;;  %v894_v15 = vsub.f32 %v5324_v28, %v4556_v0  ;;  %v1018_v37 = vand.u32 2147483647, %v890_v27  ;;  %v1752_v5 = vsub.f32 1.0, %v1632_v25  ;;  %v1756_v16 = vsub.f32 1.0, %v1636_v12  ;;  %7491 = vst [vmem:[#allocation125_spill] sm:$0xff] %v5405_v18  ;;  %7494 = vst [vmem:[#allocation128_spill] sm:$0xff] %v5415_v42 }
 0x17c   : > { %v1514_v24 = vsub.f32 %v5348_v33, %v4571_v9  ;;  %v1518_v49 = vsub.f32 %v5344_v1, %v4571_v9  ;;  %v2091_v55 = vpack.c.bf16 %v2007_v14, %v2003_v20  ;;  %v897_v40 = vsub.f32 %v4706_v36, %v4546_v59 }
 0x17d   : > { %v1022_v35 = vand.u32 2147483647, %v894_v15  ;;  %v1146_v48 = vsub.f32 1.0, %v1018_v37  ;;  %v5407_v30 = vmax.f32 %v1752_v5, 0.0  ;;  %v5409_v54 = vmax.f32 %v1756_v16, 0.0 }
 0x17e   : > { %v1634_v27 = vand.u32 2147483647, %v1514_v24  ;;  %v1638_v25 = vand.u32 2147483647, %v1518_v49  ;;  %2187 = vmatprep.subr.bf16.mxu1 %v2091_v55  ;;  %v901_v1 = vsub.f32 %v5383_v32, %v4546_v59  ;;  %v1025_v20 = vand.u32 2147483647, %v897_v40 }
 0x17f   : > { %7492 = vst [vmem:[#allocation126_spill] sm:$0xff] %v5407_v30  ;;  %7493 = vst [vmem:[#allocation127_spill] sm:$0xff] %v5409_v54  ;;  %v1150_v12 = vsub.f32 1.0, %v1022_v35  ;;  %v1274_v33 = vmax.f32 %v1146_v48, 0.0  ;;  %v2000_v37 = vmul.f32 %v5407_v30, %v1272_v38  ;;  %v2004_v15 = vmul.f32 %v5409_v54, %v1276_v39 }
 0x180   : > { %v1754_v14 = vsub.f32 1.0, %v1634_v27  ;;  %v1758_v44 = vsub.f32 1.0, %v1638_v25  ;;  %v1029_v16 = vand.u32 2147483647, %v901_v1  ;;  %v1153_v28 = vsub.f32 1.0, %v1025_v20 }
 0x181   : > { %v1278_v5 = vmax.f32 %v1150_v12, 0.0  ;;  %v1521_v24 = vsub.f32 %v5405_v18, %v4565_v6  ;;  %v2088_v49 = vpack.c.bf16 %v2004_v15, %v2000_v37  ;;  %v1525_v38 = vsub.f32 %v5415_v42, %v4565_v6 }
 0x182   : > { %v5419_v55 = vmax.f32 %v1754_v14, 0.0  ;;  %v5421_v35 = vmax.f32 %v1758_v44, 0.0  ;;  %v1157_v48 = vsub.f32 1.0, %v1029_v16  ;;  %v1281_v39 = vmax.f32 %v1153_v28, 0.0  ;;  %v5433_v16 = vpop.permute.xlu1 %770 }
 0x183   : > { %v1641_v40 = vand.u32 2147483647, %v1521_v24  ;;  %v899_v27 = vsub.f32 %v4706_v36, %v4548_v60  ;;  %2145 = vmatpush1.bf16.msra.mxu0 %v2088_v49  ;;  %v1645_v12 = vand.u32 2147483647, %v1525_v38  ;;  %v903_v20 = vsub.f32 %v5383_v32, %v4548_v60  ;;  %7497 = vst [vmem:[#allocation131_spill] sm:$0xff] %v5433_v16 }
 0x184   : > { %7495 = vst [vmem:[#allocation129_spill] sm:$0xff] %v5419_v55  ;;  %7496 = vst [vmem:[#allocation130_spill] sm:$0xff] %v5421_v35  ;;  %v2002_v1 = vmul.f32 %v5419_v55, %v1274_v33  ;;  %v2006_v25 = vmul.f32 %v5421_v35, %v1278_v5  ;;  %v1285_v44 = vmax.f32 %v1157_v48, 0.0  ;;  %v1523_v14 = vsub.f32 %v5405_v18, %v4567_v7 }
 0x185   : > { %v1761_v37 = vsub.f32 1.0, %v1641_v40  ;;  %v1027_v15 = vand.u32 2147483647, %v899_v27  ;;  %v1765_v24 = vsub.f32 1.0, %v1645_v12  ;;  %v1031_v54 = vand.u32 2147483647, %v903_v20 }
 0x186   : > { %v2090_v28 = vpack.c.bf16 %v2006_v25, %v2002_v1  ;;  %v1527_v33 = vsub.f32 %v5415_v42, %v4567_v7  ;;  %v1643_v38 = vand.u32 2147483647, %v1523_v14  ;;  %v896_v48 = vsub.f32 %v4706_v36, %v4544_v58 }
 0x187   : > { %v5437_v49 = vmax.f32 %v1761_v37, 0.0  ;;  %v1155_v5 = vsub.f32 1.0, %v1027_v15  ;;  %v5441_v40 = vmax.f32 %v1765_v24, 0.0  ;;  %v1159_v27 = vsub.f32 1.0, %v1031_v54 }
 0x188   : > { %2188 = vmatpush1.bf16.msra.mxu1 %v2090_v28  ;;  %v1647_v35 = vand.u32 2147483647, %v1527_v33  ;;  %v900_v1 = vsub.f32 %v5383_v32, %v4544_v58  ;;  %v1763_v20 = vsub.f32 1.0, %v1643_v38  ;;  %v1024_v55 = vand.u32 2147483647, %v896_v48  ;;  %v5453_v33 = vpop.permute.xlu1 %775 }
 0x189   : > { %7498 = vst [vmem:[#allocation132_spill] sm:$0xff] %v5437_v49  ;;  %7499 = vst [vmem:[#allocation133_spill] sm:$0xff] %v5441_v40  ;;  %v2009_v25 = vmul.f32 %v5437_v49, %v1281_v39  ;;  %v1283_v12 = vmax.f32 %v1155_v5, 0.0  ;;  %v2013_v37 = vmul.f32 %v5441_v40, %v1285_v44  ;;  %v1287_v15 = vmax.f32 %v1159_v27, 0.0 }
 0x18a   : > { %v1767_v14 = vsub.f32 1.0, %v1647_v35  ;;  %v1028_v30 = vand.u32 2147483647, %v900_v1  ;;  %v5447_v45 = vmax.f32 %v1763_v20, 0.0  ;;  %v1152_v28 = vsub.f32 1.0, %v1024_v55  ;;  %7501 = vst [vmem:[#allocation135_spill] sm:$0xff] %v5453_v33 }
 0x18b   : > { %v1520_v54 = vsub.f32 %v5405_v18, %v4569_v8  ;;  %v1524_v24 = vsub.f32 %v5415_v42, %v4569_v8  ;;  %v2093_v39 = vpack.c.bf16 %v2013_v37, %v2009_v25  ;;  %v898_v44 = vsub.f32 %v4706_v36, %v4556_v0 }
 0x18c   : > { %7500 = vst [vmem:[#allocation134_spill] sm:$0xff] %v5447_v45  ;;  %v5455_v5 = vmax.f32 %v1767_v14, 0.0  ;;  %v1156_v38 = vsub.f32 1.0, %v1028_v30  ;;  %v2011_v35 = vmul.f32 %v5447_v45, %v1283_v12  ;;  %v1280_v48 = vmax.f32 %v1152_v28, 0.0 }
 0x18d   : > { %v1640_v27 = vand.u32 2147483647, %v1520_v54  ;;  %v1644_v55 = vand.u32 2147483647, %v1524_v24  ;;  %2146 = vmatprep.subr.bf16.mxu0 %v2093_v39  ;;  %v902_v40 = vsub.f32 %v5383_v32, %v4556_v0  ;;  %v1026_v49 = vand.u32 2147483647, %v898_v44 }
 0x18e   : > { %7502 = vst [vmem:[#allocation136_spill] sm:$0xff] %v5455_v5  ;;  %v2015_v1 = vmul.f32 %v5455_v5, %v1287_v15  ;;  %v1284_v20 = vmax.f32 %v1156_v38, 0.0  ;;  %v1522_v30 = vsub.f32 %v5405_v18, %v4571_v9  ;;  %v1526_v14 = vsub.f32 %v5415_v42, %v4571_v9 }
 0x18f   : > { %v1760_v25 = vsub.f32 1.0, %v1640_v27  ;;  %v1764_v37 = vsub.f32 1.0, %v1644_v55  ;;  %v1030_v28 = vand.u32 2147483647, %v902_v40  ;;  %v1154_v54 = vsub.f32 1.0, %v1026_v49  ;;  %v5473_v27 = vpop.permute.xlu1 %1413  ;;  %v5477_v40 = vpop.permute.xlu0 %1409 }
 0x190   : > { %v2095_v12 = vpack.c.bf16 %v2015_v1, %v2011_v35  ;;  %v905_v24 = vsub.f32 %v5433_v16, %v4546_v59  ;;  %v1642_v38 = vand.u32 2147483647, %v1522_v30  ;;  %v1646_v44 = vand.u32 2147483647, %v1526_v14  ;;  %7505 = vst [vmem:[#allocation139_spill] sm:$0xff] %v5473_v27  ;;  %7506 = vst [vmem:[#allocation140_spill] sm:$0xff] %v5477_v40 }
 0x191   : > { %v5469_v15 = vmax.f32 %v1760_v25, 0.0  ;;  %v5471_v39 = vmax.f32 %v1764_v37, 0.0  ;;  %v1158_v55 = vsub.f32 1.0, %v1030_v28  ;;  %v1282_v18 = vmax.f32 %v1154_v54, 0.0 }
 0x192   : > { %2189 = vmatprep.subr.bf16.mxu1 %v2095_v12  ;;  %v909_v42 = vsub.f32 %v5453_v33, %v4546_v59  ;;  %v1033_v35 = vand.u32 2147483647, %v905_v24  ;;  %v1762_v25 = vsub.f32 1.0, %v1642_v38  ;;  %v1766_v37 = vsub.f32 1.0, %v1646_v44 }
 0x193   : > { %7503 = vst [vmem:[#allocation137_spill] sm:$0xff] %v5469_v15  ;;  %7504 = vst [vmem:[#allocation138_spill] sm:$0xff] %v5471_v39  ;;  %v2008_v49 = vmul.f32 %v5469_v15, %v1280_v48  ;;  %v2012_v1 = vmul.f32 %v5471_v39, %v1284_v20  ;;  %v1286_v5 = vmax.f32 %v1158_v55, 0.0  ;;  %v1529_v12 = vsub.f32 %v5477_v40, %v4565_v6  ;;  %v5509_v39 = vpop.permute.xlu1 %785 }
 0x194   : > { %v1037_v30 = vand.u32 2147483647, %v909_v42  ;;  %v1161_v14 = vsub.f32 1.0, %v1033_v35  ;;  %v5483_v54 = vmax.f32 %v1762_v25, 0.0  ;;  %v5485_v45 = vmax.f32 %v1766_v37, 0.0  ;;  %7511 = vst [vmem:[#allocation145_spill] sm:$0xff] %v5509_v39 }
 0x195   : > { %v2092_v28 = vpack.c.bf16 %v2012_v1, %v2008_v49  ;;  %v1533_v24 = vsub.f32 %v5473_v27, %v4565_v6  ;;  %v1649_v15 = vand.u32 2147483647, %v1529_v12  ;;  %v907_v20 = vsub.f32 %v5433_v16, %v4548_v60 }
 0x196   : > { %7507 = vst [vmem:[#allocation141_spill] sm:$0xff] %v5483_v54  ;;  %7508 = vst [vmem:[#allocation142_spill] sm:$0xff] %v5485_v45  ;;  %v1165_v32 = vsub.f32 1.0, %v1037_v30  ;;  %v1289_v48 = vmax.f32 %v1161_v14, 0.0  ;;  %v2010_v42 = vmul.f32 %v5483_v54, %v1282_v18  ;;  %v2014_v38 = vmul.f32 %v5485_v45, %v1286_v5 }
 0x197   : > { %2147 = vmatpush1.bf16.msra.mxu0 %v2092_v28  ;;  %v1653_v44 = vand.u32 2147483647, %v1533_v24  ;;  %v911_v55 = vsub.f32 %v5453_v33, %v4548_v60  ;;  %v1769_v49 = vsub.f32 1.0, %v1649_v15  ;;  %v1035_v1 = vand.u32 2147483647, %v907_v20 }
 0x198   : > { %v1293_v35 = vmax.f32 %v1165_v32, 0.0  ;;  %v1531_v25 = vsub.f32 %v5477_v40, %v4567_v7  ;;  %v2094_v37 = vpack.c.bf16 %v2014_v38, %v2010_v42  ;;  %v1535_v12 = vsub.f32 %v5473_v27, %v4567_v7 }
 0x199   : > { %v1773_v30 = vsub.f32 1.0, %v1653_v44  ;;  %v1039_v14 = vand.u32 2147483647, %v911_v55  ;;  %v5499_v28 = vmax.f32 %v1769_v49, 0.0  ;;  %v1163_v18 = vsub.f32 1.0, %v1035_v1 }
 0x19a   : > { %v1651_v5 = vand.u32 2147483647, %v1531_v25  ;;  %v904_v24 = vsub.f32 %v5433_v16, %v4544_v58  ;;  %2190 = vmatpush1.bf16.msra.mxu1 %v2094_v37  ;;  %v1655_v20 = vand.u32 2147483647, %v1535_v12  ;;  %v908_v42 = vsub.f32 %v5453_v33, %v4544_v58 }
 0x19b   : > { %7509 = vst [vmem:[#allocation143_spill] sm:$0xff] %v5499_v28  ;;  %v5503_v32 = vmax.f32 %v1773_v30, 0.0  ;;  %v1167_v15 = vsub.f32 1.0, %v1039_v14  ;;  %v2017_v38 = vmul.f32 %v5499_v28, %v1289_v48  ;;  %v1291_v44 = vmax.f32 %v1163_v18, 0.0 }
 0x19c   : > { %v1771_v55 = vsub.f32 1.0, %v1651_v5  ;;  %v1032_v45 = vand.u32 2147483647, %v904_v24  ;;  %v1775_v25 = vsub.f32 1.0, %v1655_v20  ;;  %v1036_v54 = vand.u32 2147483647, %v908_v42 }
 0x19d   : > { %7510 = vst [vmem:[#allocation144_spill] sm:$0xff] %v5503_v32  ;;  %v2021_v49 = vmul.f32 %v5503_v32, %v1293_v35  ;;  %v1295_v1 = vmax.f32 %v1167_v15, 0.0  ;;  %v1528_v14 = vsub.f32 %v5477_v40, %v4569_v8  ;;  %v1532_v12 = vsub.f32 %v5473_v27, %v4569_v8 }
 0x19e   : > { %v5511_v37 = vmax.f32 %v1771_v55, 0.0  ;;  %v1160_v30 = vsub.f32 1.0, %v1032_v45  ;;  %v5517_v18 = vmax.f32 %v1775_v25, 0.0  ;;  %v1164_v5 = vsub.f32 1.0, %v1036_v54 }
 0x19f   : > { %v2097_v48 = vpack.c.bf16 %v2021_v49, %v2017_v38  ;;  %v906_v35 = vsub.f32 %v5433_v16, %v4556_v0  ;;  %v1648_v20 = vand.u32 2147483647, %v1528_v14  ;;  %v1652_v42 = vand.u32 2147483647, %v1532_v12 }
 0x1a0   : > { %7512 = vst [vmem:[#allocation146_spill] sm:$0xff] %v5511_v37  ;;  %7513 = vst [vmem:[#allocation147_spill] sm:$0xff] %v5517_v18  ;;  %v2019_v24 = vmul.f32 %v5511_v37, %v1291_v44  ;;  %v1288_v15 = vmax.f32 %v1160_v30, 0.0  ;;  %v2023_v45 = vmul.f32 %v5517_v18, %v1295_v1  ;;  %v1292_v55 = vmax.f32 %v1164_v5, 0.0  ;;  %v5531_v1 = vpop.permute.xlu1 %1417  ;;  %v5541_v37 = vpop.permute.xlu0 %1421 }
 0x1a1   : > { %2148 = vmatprep.subr.bf16.mxu0 %v2097_v48  ;;  %v910_v32 = vsub.f32 %v5453_v33, %v4556_v0  ;;  %v1034_v28 = vand.u32 2147483647, %v906_v35  ;;  %v1768_v38 = vsub.f32 1.0, %v1648_v20  ;;  %v1772_v49 = vsub.f32 1.0, %v1652_v42  ;;  %7514 = vst [vmem:[#allocation148_spill] sm:$0xff] %v5531_v1  ;;  %7517 = vst [vmem:[#allocation151_spill] sm:$0xff] %v5541_v37 }
 0x1a2   : > { %v1530_v54 = vsub.f32 %v5477_v40, %v4571_v9  ;;  %v1534_v25 = vsub.f32 %v5473_v27, %v4571_v9  ;;  %v2099_v44 = vpack.c.bf16 %v2023_v45, %v2019_v24  ;;  %v913_v12 = vsub.f32 %v4725_v57, %v4546_v59 }
 0x1a3   : > { %v1038_v30 = vand.u32 2147483647, %v910_v32  ;;  %v1162_v14 = vsub.f32 1.0, %v1034_v28  ;;  %v5533_v48 = vmax.f32 %v1768_v38, 0.0  ;;  %v5535_v5 = vmax.f32 %v1772_v49, 0.0 }
 0x1a4   : > { %v1650_v35 = vand.u32 2147483647, %v1530_v54  ;;  %v1654_v20 = vand.u32 2147483647, %v1534_v25  ;;  %2191 = vmatprep.subr.bf16.mxu1 %v2099_v44  ;;  %v917_v27 = vsub.f32 %v5509_v39, %v4546_v59  ;;  %v1041_v24 = vand.u32 2147483647, %v913_v12 }
 0x1a5   : > { %7515 = vst [vmem:[#allocation149_spill] sm:$0xff] %v5533_v48  ;;  %7516 = vst [vmem:[#allocation150_spill] sm:$0xff] %v5535_v5  ;;  %v1166_v42 = vsub.f32 1.0, %v1038_v30  ;;  %v1290_v40 = vmax.f32 %v1162_v14, 0.0  ;;  %v2016_v28 = vmul.f32 %v5533_v48, %v1288_v15  ;;  %v2020_v32 = vmul.f32 %v5535_v5, %v1292_v55 }
 0x1a6   : > { %v1770_v45 = vsub.f32 1.0, %v1650_v35  ;;  %v1774_v18 = vsub.f32 1.0, %v1654_v20  ;;  %v1045_v49 = vand.u32 2147483647, %v917_v27  ;;  %v1169_v33 = vsub.f32 1.0, %v1041_v24 }
 0x1a7   : > { %v1294_v38 = vmax.f32 %v1166_v42, 0.0  ;;  %v1537_v54 = vsub.f32 %v5531_v1, %v4565_v6  ;;  %v2096_v25 = vpack.c.bf16 %v2020_v32, %v2016_v28  ;;  %v1541_v15 = vsub.f32 %v5541_v37, %v4565_v6 }
 0x1a8   : > { %v5545_v44 = vmax.f32 %v1770_v45, 0.0  ;;  %v5547_v30 = vmax.f32 %v1774_v18, 0.0  ;;  %v1173_v14 = vsub.f32 1.0, %v1045_v49  ;;  %v1297_v55 = vmax.f32 %v1169_v33, 0.0  ;;  %v5559_v49 = vpop.permute.xlu1 %790 }
 0x1a9   : > { %v1657_v12 = vand.u32 2147483647, %v1537_v54  ;;  %v915_v35 = vsub.f32 %v4725_v57, %v4548_v60  ;;  %2149 = vmatpush1.bf16.msra.mxu0 %v2096_v25  ;;  %v1661_v42 = vand.u32 2147483647, %v1541_v15  ;;  %v919_v24 = vsub.f32 %v5509_v39, %v4548_v60 }
 0x1aa   : > { %7518 = vst [vmem:[#allocation152_spill] sm:$0xff] %v5545_v44  ;;  %7519 = vst [vmem:[#allocation153_spill] sm:$0xff] %v5547_v30  ;;  %v2018_v27 = vmul.f32 %v5545_v44, %v1290_v40  ;;  %v2022_v20 = vmul.f32 %v5547_v30, %v1294_v38  ;;  %v1301_v18 = vmax.f32 %v1173_v14, 0.0  ;;  %v1539_v45 = vsub.f32 %v5531_v1, %v4567_v7 }
 0x1ab   : > { %v1777_v28 = vsub.f32 1.0, %v1657_v12  ;;  %v1043_v32 = vand.u32 2147483647, %v915_v35  ;;  %v1781_v54 = vsub.f32 1.0, %v1661_v42  ;;  %v1047_v5 = vand.u32 2147483647, %v919_v24 }
 0x1ac   : > { %v2098_v33 = vpack.c.bf16 %v2022_v20, %v2018_v27  ;;  %v1543_v40 = vsub.f32 %v5541_v37, %v4567_v7  ;;  %v1659_v15 = vand.u32 2147483647, %v1539_v45  ;;  %v912_v14 = vsub.f32 %v4725_v57, %v4544_v58 }
 0x1ad   : > { %v5563_v25 = vmax.f32 %v1777_v28, 0.0  ;;  %v1171_v38 = vsub.f32 1.0, %v1043_v32  ;;  %v5567_v12 = vmax.f32 %v1781_v54, 0.0  ;;  %v1175_v35 = vsub.f32 1.0, %v1047_v5 }
 0x1ae   : > { %2192 = vmatpush1.bf16.msra.mxu1 %v2098_v33  ;;  %v1663_v30 = vand.u32 2147483647, %v1543_v40  ;;  %v916_v27 = vsub.f32 %v5509_v39, %v4544_v58  ;;  %v1779_v24 = vsub.f32 1.0, %v1659_v15  ;;  %v1040_v44 = vand.u32 2147483647, %v912_v14  ;;  %v5579_v40 = vpop.permute.xlu1 %795 }
 0x1af   : > { %7520 = vst [vmem:[#allocation154_spill] sm:$0xff] %v5563_v25  ;;  %7521 = vst [vmem:[#allocation155_spill] sm:$0xff] %v5567_v12  ;;  %v2025_v20 = vmul.f32 %v5563_v25, %v1297_v55  ;;  %v1299_v42 = vmax.f32 %v1171_v38, 0.0  ;;  %v2029_v28 = vmul.f32 %v5567_v12, %v1301_v18  ;;  %v1303_v32 = vmax.f32 %v1175_v35, 0.0 }
 0x1b0   : > { %v1783_v45 = vsub.f32 1.0, %v1663_v30  ;;  %v1044_v48 = vand.u32 2147483647, %v916_v27  ;;  %v5573_v16 = vmax.f32 %v1779_v24, 0.0  ;;  %v1168_v33 = vsub.f32 1.0, %v1040_v44  ;;  %7523 = vst [vmem:[#allocation157_spill] sm:$0xff] %v5579_v40 }
 0x1b1   : > { %v1536_v5 = vsub.f32 %v5531_v1, %v4569_v8  ;;  %v1540_v54 = vsub.f32 %v5541_v37, %v4569_v8  ;;  %v2101_v55 = vpack.c.bf16 %v2029_v28, %v2025_v20  ;;  %v914_v18 = vsub.f32 %v4725_v57, %v4556_v0 }
 0x1b2   : > { %7522 = vst [vmem:[#allocation156_spill] sm:$0xff] %v5573_v16  ;;  %v5581_v38 = vmax.f32 %v1783_v45, 0.0  ;;  %v1172_v15 = vsub.f32 1.0, %v1044_v48  ;;  %v2027_v30 = vmul.f32 %v5573_v16, %v1299_v42  ;;  %v1296_v14 = vmax.f32 %v1168_v33, 0.0 }
 0x1b3   : > { %v1656_v35 = vand.u32 2147483647, %v1536_v5  ;;  %v1660_v44 = vand.u32 2147483647, %v1540_v54  ;;  %2150 = vmatprep.subr.bf16.mxu0 %v2101_v55  ;;  %v918_v12 = vsub.f32 %v5509_v39, %v4556_v0  ;;  %v1042_v25 = vand.u32 2147483647, %v914_v18 }
 0x1b4   : > { %7524 = vst [vmem:[#allocation158_spill] sm:$0xff] %v5581_v38  ;;  %v2031_v27 = vmul.f32 %v5581_v38, %v1303_v32  ;;  %v1300_v24 = vmax.f32 %v1172_v15, 0.0  ;;  %v1538_v48 = vsub.f32 %v5531_v1, %v4571_v9  ;;  %v1542_v45 = vsub.f32 %v5541_v37, %v4571_v9 }
 0x1b5   : > { %v1776_v20 = vsub.f32 1.0, %v1656_v35  ;;  %v1780_v28 = vsub.f32 1.0, %v1660_v44  ;;  %v1046_v33 = vand.u32 2147483647, %v918_v12  ;;  %v1170_v5 = vsub.f32 1.0, %v1042_v25  ;;  %v5599_v35 = vpop.permute.xlu1 %1429  ;;  %v5603_v12 = vpop.permute.xlu0 %1425 }
 0x1b6   : > { %v2103_v42 = vpack.c.bf16 %v2031_v27, %v2027_v30  ;;  %v921_v54 = vsub.f32 %v5559_v49, %v4546_v59  ;;  %v1658_v15 = vand.u32 2147483647, %v1538_v48  ;;  %v1662_v18 = vand.u32 2147483647, %v1542_v45  ;;  %7527 = vst [vmem:[#allocation161_spill] sm:$0xff] %v5599_v35  ;;  %7528 = vst [vmem:[#allocation162_spill] sm:$0xff] %v5603_v12 }
 0x1b7   : > { %v5595_v32 = vmax.f32 %v1776_v20, 0.0  ;;  %v5597_v55 = vmax.f32 %v1780_v28, 0.0  ;;  %v1174_v44 = vsub.f32 1.0, %v1046_v33  ;;  %v1298_v1 = vmax.f32 %v1170_v5, 0.0 }
 0x1b8   : > { %2193 = vmatprep.subr.bf16.mxu1 %v2103_v42  ;;  %v925_v37 = vsub.f32 %v5579_v40, %v4546_v59  ;;  %v1049_v30 = vand.u32 2147483647, %v921_v54  ;;  %v1778_v20 = vsub.f32 1.0, %v1658_v15  ;;  %v1782_v28 = vsub.f32 1.0, %v1662_v18 }
 0x1b9   : > { %7525 = vst [vmem:[#allocation159_spill] sm:$0xff] %v5595_v32  ;;  %7526 = vst [vmem:[#allocation160_spill] sm:$0xff] %v5597_v55  ;;  %v2024_v25 = vmul.f32 %v5595_v32, %v1296_v14  ;;  %v2028_v27 = vmul.f32 %v5597_v55, %v1300_v24  ;;  %v1302_v38 = vmax.f32 %v1174_v44, 0.0  ;;  %v1545_v42 = vsub.f32 %v5603_v12, %v4565_v6  ;;  %v5635_v55 = vpop.permute.xlu1 %805 }
 0x1ba   : > { %v1053_v48 = vand.u32 2147483647, %v925_v37  ;;  %v1177_v45 = vsub.f32 1.0, %v1049_v30  ;;  %v5609_v5 = vmax.f32 %v1778_v20, 0.0  ;;  %v5611_v16 = vmax.f32 %v1782_v28, 0.0 }
 0x1bb   : > { %v2100_v33 = vpack.c.bf16 %v2028_v27, %v2024_v25  ;;  %v1549_v54 = vsub.f32 %v5599_v35, %v4565_v6  ;;  %v1665_v32 = vand.u32 2147483647, %v1545_v42  ;;  %v923_v24 = vsub.f32 %v5559_v49, %v4548_v60 }
 0x1bc   : > { %7529 = vst [vmem:[#allocation163_spill] sm:$0xff] %v5609_v5  ;;  %7530 = vst [vmem:[#allocation164_spill] sm:$0xff] %v5611_v16  ;;  %v1181_v39 = vsub.f32 1.0, %v1053_v48  ;;  %v1305_v14 = vmax.f32 %v1177_v45, 0.0  ;;  %v2026_v37 = vmul.f32 %v5609_v5, %v1298_v1  ;;  %v2030_v15 = vmul.f32 %v5611_v16, %v1302_v38 }
 0x1bd   : > { %2151 = vmatpush1.bf16.msra.mxu0 %v2100_v33  ;;  %v1669_v18 = vand.u32 2147483647, %v1549_v54  ;;  %v927_v44 = vsub.f32 %v5579_v40, %v4548_v60  ;;  %v1785_v25 = vsub.f32 1.0, %v1665_v32  ;;  %v1051_v27 = vand.u32 2147483647, %v923_v24 }
 0x1be   : > { %v1309_v30 = vmax.f32 %v1181_v39, 0.0  ;;  %v1547_v20 = vsub.f32 %v5603_v12, %v4567_v7  ;;  %v2102_v28 = vpack.c.bf16 %v2030_v15, %v2026_v37  ;;  %v1551_v42 = vsub.f32 %v5599_v35, %v4567_v7 }
 0x1bf   : > { %v1789_v48 = vsub.f32 1.0, %v1669_v18  ;;  %v1055_v45 = vand.u32 2147483647, %v927_v44  ;;  %v5625_v33 = vmax.f32 %v1785_v25, 0.0  ;;  %v1179_v1 = vsub.f32 1.0, %v1051_v27 }
 0x1c0   : > { %v1667_v38 = vand.u32 2147483647, %v1547_v20  ;;  %v920_v54 = vsub.f32 %v5559_v49, %v4544_v58  ;;  %2194 = vmatpush1.bf16.msra.mxu1 %v2102_v28  ;;  %v1671_v24 = vand.u32 2147483647, %v1551_v42  ;;  %v924_v37 = vsub.f32 %v5579_v40, %v4544_v58 }
 0x1c1   : > { %7531 = vst [vmem:[#allocation165_spill] sm:$0xff] %v5625_v33  ;;  %v5629_v39 = vmax.f32 %v1789_v48, 0.0  ;;  %v1183_v32 = vsub.f32 1.0, %v1055_v45  ;;  %v2033_v15 = vmul.f32 %v5625_v33, %v1305_v14  ;;  %v1307_v18 = vmax.f32 %v1179_v1, 0.0 }
 0x1c2   : > { %v1787_v44 = vsub.f32 1.0, %v1667_v38  ;;  %v1048_v16 = vand.u32 2147483647, %v920_v54  ;;  %v1791_v20 = vsub.f32 1.0, %v1671_v24  ;;  %v1052_v5 = vand.u32 2147483647, %v924_v37 }
 0x1c3   : > { %7532 = vst [vmem:[#allocation166_spill] sm:$0xff] %v5629_v39  ;;  %v2037_v25 = vmul.f32 %v5629_v39, %v1309_v30  ;;  %v1311_v27 = vmax.f32 %v1183_v32, 0.0  ;;  %v1544_v45 = vsub.f32 %v5603_v12, %v4569_v8  ;;  %v1548_v42 = vsub.f32 %v5599_v35, %v4569_v8 }
 0x1c4   : > { %v5637_v28 = vmax.f32 %v1787_v44, 0.0  ;;  %v1176_v48 = vsub.f32 1.0, %v1048_v16  ;;  %v5643_v1 = vmax.f32 %v1791_v20, 0.0  ;;  %v1180_v38 = vsub.f32 1.0, %v1052_v5 }
 0x1c5   : > { %v2105_v14 = vpack.c.bf16 %v2037_v25, %v2033_v15  ;;  %v922_v30 = vsub.f32 %v5559_v49, %v4556_v0  ;;  %v1664_v24 = vand.u32 2147483647, %v1544_v45  ;;  %v1668_v37 = vand.u32 2147483647, %v1548_v42 }
 0x1c6   : > { %7533 = vst [vmem:[#allocation167_spill] sm:$0xff] %v5637_v28  ;;  %7534 = vst [vmem:[#allocation168_spill] sm:$0xff] %v5643_v1  ;;  %v2035_v54 = vmul.f32 %v5637_v28, %v1307_v18  ;;  %v1304_v32 = vmax.f32 %v1176_v48, 0.0  ;;  %v2039_v16 = vmul.f32 %v5643_v1, %v1311_v27  ;;  %v1308_v44 = vmax.f32 %v1180_v38, 0.0  ;;  %v5657_v27 = vpop.permute.xlu1 %1433 }
 0x1c7   : > { %2152 = vmatprep.subr.bf16.mxu0 %v2105_v14  ;;  %v926_v39 = vsub.f32 %v5579_v40, %v4556_v0  ;;  %v1050_v33 = vand.u32 2147483647, %v922_v30  ;;  %v1784_v15 = vsub.f32 1.0, %v1664_v24  ;;  %v1788_v25 = vsub.f32 1.0, %v1668_v37  ;;  %7535 = vst [vmem:[#allocation169_spill] sm:$0xff] %v5657_v27  ;;  %v5663_v37 = vpop.permute.xlu0 %1437 }
 0x1c8   : > { %v1546_v5 = vsub.f32 %v5603_v12, %v4571_v9  ;;  %v1550_v20 = vsub.f32 %v5599_v35, %v4571_v9  ;;  %v2107_v18 = vpack.c.bf16 %v2039_v16, %v2035_v54  ;;  %v929_v42 = vsub.f32 %v4750_v2, %v4546_v59  ;;  %7536 = vst [vmem:[#allocation170_spill] sm:$0xff] %v5663_v37 }
 0x1c9   : > { %v1054_v48 = vand.u32 2147483647, %v926_v39  ;;  %v1178_v45 = vsub.f32 1.0, %v1050_v33  ;;  %v5659_v14 = vmax.f32 %v1784_v15, 0.0  ;;  %v5661_v38 = vmax.f32 %v1788_v25, 0.0 }
 0x1ca   : > { %v1666_v30 = vand.u32 2147483647, %v1546_v5  ;;  %v1670_v24 = vand.u32 2147483647, %v1550_v20  ;;  %2195 = vmatprep.subr.bf16.mxu1 %v2107_v18  ;;  %v933_v39 = vsub.f32 %v5635_v55, %v4546_v59  ;;  %v1057_v33 = vand.u32 2147483647, %v929_v42 }
 0x1cb   : > { %v1182_v12 = vsub.f32 1.0, %v1054_v48  ;;  %v1306_v1 = vmax.f32 %v1178_v45, 0.0  ;;  %v2032_v54 = vmul.f32 %v5659_v14, %v1304_v32  ;;  %v2036_v16 = vmul.f32 %v5661_v38, %v1308_v44 }
 0x1cc   : > { %v1786_v35 = vsub.f32 1.0, %v1666_v30  ;;  %v1790_v15 = vsub.f32 1.0, %v1670_v24  ;;  %v1061_v25 = vand.u32 2147483647, %v933_v39  ;;  %v1185_v40 = vsub.f32 1.0, %v1057_v33 }
 0x1cd   : > { %v1310_v28 = vmax.f32 %v1182_v12, 0.0  ;;  %v1553_v5 = vsub.f32 %v5657_v27, %v4565_v6  ;;  %v2104_v20 = vpack.c.bf16 %v2036_v16, %v2032_v54  ;;  %v1557_v45 = vsub.f32 %v5663_v37, %v4565_v6 }
 0x1ce   : > { %v5671_v18 = vmax.f32 %v1786_v35, 0.0  ;;  %v5673_v48 = vmax.f32 %v1790_v15, 0.0  ;;  %v1189_v42 = vsub.f32 1.0, %v1061_v25  ;;  %v1313_v32 = vmax.f32 %v1185_v40, 0.0 }
 0x1cf   : > { %v1673_v59 = vand.u32 2147483647, %v1553_v5  ;;  %v931_v44 = vsub.f32 %v4750_v2, %v4548_v60  ;;  %2153 = vmatpush1.bf16.msra.mxu0 %v2104_v20  ;;  %v1677_v24 = vand.u32 2147483647, %v1557_v45  ;;  %v935_v35 = vsub.f32 %v5635_v55, %v4548_v60 }
 0x1d0   : > { %v2034_v12 = vmul.f32 %v5671_v18, %v1306_v1  ;;  %v2038_v30 = vmul.f32 %v5673_v48, %v1310_v28  ;;  %v1317_v39 = vmax.f32 %v1189_v42, 0.0  ;;  %v1555_v6 = vsub.f32 %v5657_v27, %v4567_v7 }
 0x1d1   : > { %v1793_v33 = vsub.f32 1.0, %v1673_v59  ;;  %v1059_v54 = vand.u32 2147483647, %v931_v44  ;;  %v1797_v16 = vsub.f32 1.0, %v1677_v24  ;;  %v1063_v15 = vand.u32 2147483647, %v935_v35 }
 0x1d2   : > { %v2106_v40 = vpack.c.bf16 %v2038_v30, %v2034_v12  ;;  %v1559_v25 = vsub.f32 %v5663_v37, %v4567_v7  ;;  %v1675_v28 = vand.u32 2147483647, %v1555_v6  ;;  %v928_v20 = vsub.f32 %v4750_v2, %v4544_v58 }
 0x1d3   : > { %v5687_v5 = vmax.f32 %v1793_v33, 0.0  ;;  %v1187_v1 = vsub.f32 1.0, %v1059_v54  ;;  %v5691_v45 = vmax.f32 %v1797_v16, 0.0  ;;  %v1191_v59 = vsub.f32 1.0, %v1063_v15 }
 0x1d4   : > { %2196 = vmatpush1.bf16.msra.mxu1 %v2106_v40  ;;  %v1679_v42 = vand.u32 2147483647, %v1559_v25  ;;  %v932_v44 = vsub.f32 %v5635_v55, %v4544_v58  ;;  %v1795_v24 = vsub.f32 1.0, %v1675_v28  ;;  %v1056_v7 = vand.u32 2147483647, %v928_v20 }
 0x1d5   : > { %v2041_v12 = vmul.f32 %v5687_v5, %v1313_v32  ;;  %v1315_v30 = vmax.f32 %v1187_v1, 0.0  ;;  %v2045_v35 = vmul.f32 %v5691_v45, %v1317_v39  ;;  %v1319_v33 = vmax.f32 %v1191_v59, 0.0 }
 0x1d6   : > { %v1799_v54 = vsub.f32 1.0, %v1679_v42  ;;  %v1060_v6 = vand.u32 2147483647, %v932_v44  ;;  %v5697_v60 = vmax.f32 %v1795_v24, 0.0  ;;  %v1184_v40 = vsub.f32 1.0, %v1056_v7 }
 0x1d7   : > { %v1552_v16 = vsub.f32 %v5657_v27, %v4569_v8  ;;  %v1556_v15 = vsub.f32 %v5663_v37, %v4569_v8  ;;  %v2109_v25 = vpack.c.bf16 %v2045_v35, %v2041_v12  ;;  %v930_v1 = vsub.f32 %v4750_v2, %v4556_v0 }
 0x1d8   : > { %v5703_v58 = vmax.f32 %v1799_v54, 0.0  ;;  %v1188_v32 = vsub.f32 1.0, %v1060_v6  ;;  %v2043_v39 = vmul.f32 %v5697_v60, %v1315_v30  ;;  %v1312_v28 = vmax.f32 %v1184_v40, 0.0 }
 0x1d9   : > { %v1672_v20 = vand.u32 2147483647, %v1552_v16  ;;  %v1676_v59 = vand.u32 2147483647, %v1556_v15  ;;  %2154 = vmatprep.subr.bf16.mxu0 %v2109_v25  ;;  %v934_v24 = vsub.f32 %v5635_v55, %v4556_v0  ;;  %v1058_v8 = vand.u32 2147483647, %v930_v1 }
 0x1da   : > { %v2047_v42 = vmul.f32 %v5703_v58, %v1319_v33  ;;  %v1316_v44 = vmax.f32 %v1188_v32, 0.0  ;;  %v1554_v35 = vsub.f32 %v5657_v27, %v4571_v9  ;;  %v1558_v54 = vsub.f32 %v5663_v37, %v4571_v9 }
 0x1db   : > { %v1792_v12 = vsub.f32 1.0, %v1672_v20  ;;  %v1796_v7 = vsub.f32 1.0, %v1676_v59  ;;  %v1062_v6 = vand.u32 2147483647, %v934_v24  ;;  %v1186_v40 = vsub.f32 1.0, %v1058_v8 }
 0x1dc   : > { %v2111_v30 = vpack.c.bf16 %v2047_v42, %v2043_v39  ;;  %v2211_v16 = vsub.f32 %v4561_v4, %v4552_v62  ;;  %v1674_v25 = vand.u32 2147483647, %v1554_v35  ;;  %v1678_v32 = vand.u32 2147483647, %v1558_v54 }
 0x1dd   : > { %v5717_v33 = vmax.f32 %v1792_v12, 0.0  ;;  %v5719_v15 = vmax.f32 %v1796_v7, 0.0  ;;  %v1190_v1 = vsub.f32 1.0, %v1062_v6  ;;  %v1314_v20 = vmax.f32 %v1186_v40, 0.0 }
 0x1de   : > { %2197 = vmatprep.subr.bf16.mxu1 %v2111_v30  ;;  %v2215_v59 = vsub.f32 %v4616_v17, %v4552_v62  ;;  %v2339_v27 = vand.u32 2147483647, %v2211_v16  ;;  %v1794_v42 = vsub.f32 1.0, %v1674_v25  ;;  %v1798_v24 = vsub.f32 1.0, %v1678_v32  ;;  %v4239_v16 = vld [vmem:[%s7057_s2] ss:$8 sps:$4 sm:$0xff]  }
 0x1df   : > { %v2040_v9 = vmul.f32 %v5717_v33, %v1312_v28  ;;  %v2044_v39 = vmul.f32 %v5719_v15, %v1316_v44  ;;  %v1318_v8 = vmax.f32 %v1190_v1, 0.0  ;;  %v2213_v7 = vsub.f32 %v4561_v4, %v4554_v63 }
 0x1e0   : > { %v2343_v12 = vand.u32 2147483647, %v2215_v59  ;;  %v2467_v37 = vsub.f32 1.0, %v2339_v27  ;;  %v5727_v54 = vmax.f32 %v1794_v42, 0.0  ;;  %v5729_v30 = vmax.f32 %v1798_v24, 0.0 }
 0x1e1   : > { %v2108_v35 = vpack.c.bf16 %v2044_v39, %v2040_v9  ;;  %v2217_v6 = vsub.f32 %v4616_v17, %v4554_v63  ;;  %v2341_v44 = vand.u32 2147483647, %v2213_v7  ;;  %v2722_v27 = vmul.f32 %v4648_v56, %v4713_v41 }
 0x1e2   : > { %v2471_v40 = vsub.f32 1.0, %v2343_v12  ;;  %v5733_v28 = vmax.f32 %v2467_v37, 0.0  ;;  %v2042_v4 = vmul.f32 %v5727_v54, %v1314_v20  ;;  %v2046_v25 = vmul.f32 %v5729_v30, %v1318_v8 }
 0x1e3   : > { %2155 = vmatpush1.bf16.msra.mxu0 %v2108_v35  ;;  %v2345_v32 = vand.u32 2147483647, %v2217_v6  ;;  %v2726_v17 = vmul.f32 %v4657_v23, %v4717_v19  ;;  %v2469_v59 = vsub.f32 1.0, %v2341_v44  ;;  %v2724_v9 = vmul.f32 %v4673_v43, %v4731_v21 }
 0x1e4   : > { %v5744_v1 = vmax.f32 %v2471_v40, 0.0  ;;  %v2723_v37 = vmul.f32 %v5733_v28, %v4686_v53  ;;  %v2110_v39 = vpack.c.bf16 %v2046_v25, %v2042_v4  ;;  %v2728_v20 = vmul.f32 %v4676_v46, %v4733_v11 }
 0x1e5   : > { %v2473_v56 = vsub.f32 1.0, %v2345_v32  ;;  %v2850_v41 = vpack.c.bf16 %v2726_v17, %v2722_v27  ;;  %v5754_v24 = vmax.f32 %v2469_v59, 0.0  ;;  %v2219_v23 = vsub.f32 %v4606_v50, %v4552_v62 }
 0x1e6   : > { %v2727_v42 = vmul.f32 %v5744_v1, %v4693_v13  ;;  %2157 = vmatmul.mubr.bf16.vlgmr.msra.gmra.mrb[12].mxu0 %v4239_v16  ;;  %v2223_v53 = vsub.f32 %v4727_v10, %v4552_v62  ;;  %2198 = vmatpush1.bf16.msra.mxu1 %v2110_v39  ;;  %v2852_v19 = vpack.c.bf16 %v2728_v20, %v2724_v9 }
 0x1e7   : > { %v5760_v43 = vmax.f32 %v2473_v56, 0.0  ;;  %v2221_v21 = vsub.f32 %v4606_v50, %v4554_v63  ;;  %v2225_v46 = vsub.f32 %v4727_v10, %v4554_v63  ;;  %v2725_v11 = vmul.f32 %v5754_v24, %v4699_v22 }
 0x1e8   : > { %v2851_v13 = vpack.c.bf16 %v2727_v42, %v2723_v37  ;;  %v2347_v8 = vand.u32 2147483647, %v2219_v23  ;;  %v2351_v12 = vand.u32 2147483647, %v2223_v53  ;;  %v2218_v40 = vsub.f32 %v4606_v50, %v4550_v61  ;;  %v7537_v42 = vld [vmem:[#allocation19_spill] sm:$0xff] }
 0x1e9   : > { %v2729_v7 = vmul.f32 %v5760_v43, %v4701_v26  ;;  %v2349_v35 = vand.u32 2147483647, %v2221_v21  ;;  %v2353_v6 = vand.u32 2147483647, %v2225_v46  ;;  %2200 = vmatmul.mubr.bf16.vlgmr.msra.gmra.mrb[12].mxu1 %v4239_v16  ;;  %v2222_v4 = vsub.f32 %v4727_v10, %v4550_v61  ;;  %v7538_v46 = vld [vmem:[#allocation20_spill] sm:$0xff] }
 0x1ea   : > { %2927 = vmatprep.subr.bf16.mxu0 %v2851_v13  ;;  %v2475_v44 = vsub.f32 1.0, %v2347_v8  ;;  %v2479_v27 = vsub.f32 1.0, %v2351_v12  ;;  %v2220_v22 = vsub.f32 %v4606_v50, %v4558_v3  ;;  %v2346_v26 = vand.u32 2147483647, %v2218_v40 }
 0x1eb   : > { %v2853_v25 = vpack.c.bf16 %v2729_v7, %v2725_v11  ;;  %2928 = vmatpush1.bf16.msra.mxu0 %v2850_v41  ;;  %v2477_v32 = vsub.f32 1.0, %v2349_v35  ;;  %v2481_v17 = vsub.f32 1.0, %v2353_v6  ;;  %v2350_v9 = vand.u32 2147483647, %v2222_v4 }
 0x1ec   : > { %v5776_v37 = vmax.f32 %v2475_v44, 0.0  ;;  %v5778_v59 = vmax.f32 %v2479_v27, 0.0  ;;  %v2224_v16 = vsub.f32 %v4727_v10, %v4558_v3  ;;  %v2474_v20 = vsub.f32 1.0, %v2346_v26  ;;  %v7539_v10 = vld [vmem:[#allocation22_spill] sm:$0xff]  ;;  %v7541_v44 = vld [vmem:[#allocation24_spill] sm:$0xff] }
 0x1ed   : > { %2970 = vmatprep.subr.bf16.mxu1 %v2853_v25  ;;  %v5782_v39 = vmax.f32 %v2477_v32, 0.0  ;;  %v5784_v56 = vmax.f32 %v2481_v17, 0.0  ;;  %v2348_v50 = vand.u32 2147483647, %v2220_v22  ;;  %v2478_v53 = vsub.f32 1.0, %v2350_v9  ;;  %v7542_v22 = vld [vmem:[#allocation21_spill] sm:$0xff] }
 0x1ee   : > { %2971 = vmatpush1.bf16.msra.mxu1 %v2852_v19  ;;  %v2731_v41 = vmul.f32 %v5776_v37, %v4790_v52  ;;  %v2735_v23 = vmul.f32 %v5778_v59, %v7537_v42  ;;  %v2352_v21 = vand.u32 2147483647, %v2224_v16  ;;  %v5794_v8 = vmax.f32 %v2474_v20, 0.0  ;;  %v7540_v52 = vld [vmem:[#allocation18_spill] sm:$0xff]  ;;  %v7543_v32 = vld [vmem:[#allocation25_spill] sm:$0xff]  ;;  %v7544_v20 = vld [vmem:[#allocation27_spill] sm:$0xff] }
 0x1ef   : > { %v2733_v13 = vmul.f32 %v5782_v39, %v7538_v46  ;;  %v2737_v11 = vmul.f32 %v5784_v56, %v7539_v10  ;;  %v2476_v12 = vsub.f32 1.0, %v2348_v50  ;;  %v5796_v35 = vmax.f32 %v2478_v53, 0.0 }
 0x1f0   : > { %v2855_v7 = vpack.c.bf16 %v2735_v23, %v2731_v41  ;;  %v2480_v19 = vsub.f32 1.0, %v2352_v21  ;;  %v2227_v6 = vsub.f32 %v7540_v52, %v4552_v62  ;;  %v2730_v27 = vmul.f32 %v5794_v8, %v7541_v44  ;;  %v7545_v21 = vld [vmem:[#allocation28_spill] sm:$0xff] }
 0x1f1   : > { %v2857_v40 = vpack.c.bf16 %v2737_v11, %v2733_v13  ;;  %v5802_v4 = vmax.f32 %v2476_v12, 0.0  ;;  %v2231_v25 = vsub.f32 %v7542_v22, %v4552_v62  ;;  %v2734_v17 = vmul.f32 %v5796_v35, %v7543_v32 }
 0x1f2   : > { %2929 = vmatprep.subr.bf16.mxu0 %v2855_v7  ;;  %v5808_v26 = vmax.f32 %v2480_v19, 0.0  ;;  %v2355_v9 = vand.u32 2147483647, %v2227_v6  ;;  %v2229_v16 = vsub.f32 %v7540_v52, %v4554_v63  ;;  %v2233_v42 = vsub.f32 %v7542_v22, %v4554_v63 }
 0x1f3   : > { %2972 = vmatprep.subr.bf16.mxu1 %v2857_v40  ;;  %v2732_v50 = vmul.f32 %v5802_v4, %v7544_v20  ;;  %v2359_v41 = vand.u32 2147483647, %v2231_v25  ;;  %v2226_v23 = vsub.f32 %v7540_v52, %v4550_v61  ;;  %v2854_v53 = vpack.c.bf16 %v2734_v17, %v2730_v27 }
 0x1f4   : > { %v2736_v46 = vmul.f32 %v5808_v26, %v7545_v21  ;;  %v2483_v13 = vsub.f32 1.0, %v2355_v9  ;;  %v2357_v10 = vand.u32 2147483647, %v2229_v16  ;;  %v2361_v12 = vand.u32 2147483647, %v2233_v42  ;;  %v7548_v16 = vld [vmem:[#allocation29_spill] sm:$0xff] }
 0x1f5   : > { %v2487_v11 = vsub.f32 1.0, %v2359_v41  ;;  %v2230_v7 = vsub.f32 %v7542_v22, %v4550_v61  ;;  %v2354_v19 = vand.u32 2147483647, %v2226_v23  ;;  %2930 = vmatpush1.bf16.msra.mxu0 %v2854_v53  ;;  %v2228_v25 = vsub.f32 %v7540_v52, %v4558_v3  ;;  %v7550_v23 = vld [vmem:[#allocation30_spill] sm:$0xff] }
 0x1f6   : > { %v2856_v6 = vpack.c.bf16 %v2736_v46, %v2732_v50  ;;  %v5822_v40 = vmax.f32 %v2483_v13, 0.0  ;;  %v2485_v44 = vsub.f32 1.0, %v2357_v10  ;;  %v2489_v32 = vsub.f32 1.0, %v2361_v12  ;;  %v7553_v13 = vld [vmem:[#allocation32_spill] sm:$0xff] }
 0x1f7   : > { %v5826_v27 = vmax.f32 %v2487_v11, 0.0  ;;  %v2358_v17 = vand.u32 2147483647, %v2230_v7  ;;  %v2482_v9 = vsub.f32 1.0, %v2354_v19  ;;  %v2232_v50 = vsub.f32 %v7542_v22, %v4558_v3 }
 0x1f8   : > { %7546 = vst [vmem:[#allocation19_spill] sm:$0xff] %v5822_v40  ;;  %2973 = vmatpush1.bf16.msra.mxu1 %v2856_v6  ;;  %v2739_v20 = vmul.f32 %v5822_v40, %v7548_v16  ;;  %v5830_v41 = vmax.f32 %v2485_v44, 0.0  ;;  %v2356_v42 = vand.u32 2147483647, %v2228_v25  ;;  %v5836_v21 = vmax.f32 %v2489_v32, 0.0  ;;  %v7554_v6 = vld [vmem:[#allocation33_spill] sm:$0xff] }
 0x1f9   : > { %7547 = vst [vmem:[#allocation20_spill] sm:$0xff] %v5826_v27  ;;  %v2743_v53 = vmul.f32 %v5826_v27, %v7550_v23  ;;  %v2486_v52 = vsub.f32 1.0, %v2358_v17  ;;  %v5838_v46 = vmax.f32 %v2482_v9, 0.0  ;;  %v2360_v11 = vand.u32 2147483647, %v2232_v50  ;;  %v7556_v25 = vld [vmem:[#allocation35_spill] sm:$0xff] }
 0x1fa   : > { %7549 = vst [vmem:[#allocation22_spill] sm:$0xff] %v5830_v41  ;;  %7551 = vst [vmem:[#allocation18_spill] sm:$0xff] %v5836_v21  ;;  %v2741_v10 = vmul.f32 %v5830_v41, %v7553_v13  ;;  %v2484_v12 = vsub.f32 1.0, %v2356_v42  ;;  %v2235_v7 = vsub.f32 %v4623_v31, %v4552_v62  ;;  %v2745_v22 = vmul.f32 %v5836_v21, %v7554_v6  ;;  %v7558_v16 = vld [vmem:[#allocation31_spill] sm:$0xff]  ;;  %v7559_v13 = vld [vmem:[#allocation36_spill] sm:$0xff] }
 0x1fb   : > { %7552 = vst [vmem:[#allocation24_spill] sm:$0xff] %v5838_v46  ;;  %v2859_v19 = vpack.c.bf16 %v2743_v53, %v2739_v20  ;;  %v5846_v44 = vmax.f32 %v2486_v52, 0.0  ;;  %v2738_v32 = vmul.f32 %v5838_v46, %v7556_v25  ;;  %v2488_v17 = vsub.f32 1.0, %v2360_v11  ;;  %v7561_v11 = vld [vmem:[#allocation38_spill] sm:$0xff] }
 0x1fc   : > { %v5850_v9 = vmax.f32 %v2484_v12, 0.0  ;;  %v2239_v23 = vsub.f32 %v7558_v16, %v4552_v62  ;;  %v2363_v50 = vand.u32 2147483647, %v2235_v7  ;;  %v2861_v42 = vpack.c.bf16 %v2745_v22, %v2741_v10 }
 0x1fd   : > { %7555 = vst [vmem:[#allocation21_spill] sm:$0xff] %v5846_v44  ;;  %2931 = vmatprep.subr.bf16.mxu0 %v2859_v19  ;;  %v2742_v20 = vmul.f32 %v5846_v44, %v7559_v13  ;;  %v2237_v53 = vsub.f32 %v4623_v31, %v4554_v63  ;;  %v2241_v52 = vsub.f32 %v7558_v16, %v4554_v63  ;;  %v5860_v6 = vmax.f32 %v2488_v17, 0.0  ;;  %v7562_v13 = vld [vmem:[#allocation39_spill] sm:$0xff] }
 0x1fe   : > { %7557 = vst [vmem:[#allocation25_spill] sm:$0xff] %v5850_v9  ;;  %v2740_v12 = vmul.f32 %v5850_v9, %v7561_v11  ;;  %v2367_v25 = vand.u32 2147483647, %v2239_v23  ;;  %v2491_v46 = vsub.f32 1.0, %v2363_v50  ;;  %2974 = vmatprep.subr.bf16.mxu1 %v2861_v42  ;;  %v2234_v22 = vsub.f32 %v4623_v31, %v4550_v61 }
 0x1ff   : > { %7560 = vst [vmem:[#allocation27_spill] sm:$0xff] %v5860_v6  ;;  %v2858_v7 = vpack.c.bf16 %v2742_v20, %v2738_v32  ;;  %v2365_v19 = vand.u32 2147483647, %v2237_v53  ;;  %v2369_v10 = vand.u32 2147483647, %v2241_v52  ;;  %v2744_v44 = vmul.f32 %v5860_v6, %v7562_v13  ;;  %v7565_v53 = vld [vmem:[#allocation41_spill] sm:$0xff] }
 0x200   : > { %v2495_v21 = vsub.f32 1.0, %v2367_v25  ;;  %v5868_v41 = vmax.f32 %v2491_v46, 0.0  ;;  %v2238_v17 = vsub.f32 %v7558_v16, %v4550_v61  ;;  %v2362_v50 = vand.u32 2147483647, %v2234_v22  ;;  %v7568_v22 = vld [vmem:[#allocation43_spill] sm:$0xff] }
 0x201   : > { %2932 = vmatpush1.bf16.msra.mxu0 %v2858_v7  ;;  %v2493_v11 = vsub.f32 1.0, %v2365_v19  ;;  %v2497_v23 = vsub.f32 1.0, %v2369_v10  ;;  %v2236_v32 = vsub.f32 %v4623_v31, %v4558_v3  ;;  %v2860_v42 = vpack.c.bf16 %v2744_v44, %v2740_v12  ;;  %v7566_v19 = vld [vmem:[#allocation42_spill] sm:$0xff] }
 0x202   : > { %7563 = vst [vmem:[#allocation28_spill] sm:$0xff] %v5868_v41  ;;  %v5874_v20 = vmax.f32 %v2495_v21, 0.0  ;;  %v2747_v52 = vmul.f32 %v5868_v41, %v7565_v53  ;;  %v2366_v13 = vand.u32 2147483647, %v2238_v17  ;;  %v2490_v6 = vsub.f32 1.0, %v2362_v50  ;;  %v7567_v21 = vld [vmem:[#allocation40_spill] sm:$0xff] }
 0x203   : > { %v5878_v25 = vmax.f32 %v2493_v11, 0.0  ;;  %v5880_v46 = vmax.f32 %v2497_v23, 0.0  ;;  %v2240_v7 = vsub.f32 %v7558_v16, %v4558_v3  ;;  %2975 = vmatpush1.bf16.msra.mxu1 %v2860_v42  ;;  %v2364_v44 = vand.u32 2147483647, %v2236_v32  ;;  %v7569_v11 = vld [vmem:[#allocation45_spill] sm:$0xff] }
 0x204   : > { %7564 = vst [vmem:[#allocation29_spill] sm:$0xff] %v5874_v20  ;;  %v2751_v10 = vmul.f32 %v5874_v20, %v7566_v19  ;;  %v2494_v31 = vsub.f32 1.0, %v2366_v13  ;;  %v2243_v12 = vsub.f32 %v7567_v21, %v4552_v62  ;;  %v5892_v53 = vmax.f32 %v2490_v6, 0.0  ;;  %v7572_v19 = vld [vmem:[#allocation44_spill] sm:$0xff]  ;;  %v7573_v20 = vld [vmem:[#allocation47_spill] sm:$0xff] }
 0x205   : > { %v2749_v17 = vmul.f32 %v5878_v25, %v7568_v22  ;;  %v2753_v23 = vmul.f32 %v5880_v46, %v7569_v11  ;;  %v2368_v50 = vand.u32 2147483647, %v2240_v7  ;;  %v2492_v42 = vsub.f32 1.0, %v2364_v44  ;;  %v7574_v22 = vld [vmem:[#allocation48_spill] sm:$0xff] }
 0x206   : > { %7570 = vst [vmem:[#allocation30_spill] sm:$0xff] %v5892_v53  ;;  %v2863_v41 = vpack.c.bf16 %v2751_v10, %v2747_v52  ;;  %v5894_v16 = vmax.f32 %v2494_v31, 0.0  ;;  %v2247_v13 = vsub.f32 %v7572_v19, %v4552_v62  ;;  %v2746_v9 = vmul.f32 %v5892_v53, %v7573_v20 }
 0x207   : > { %v2865_v32 = vpack.c.bf16 %v2753_v23, %v2749_v17  ;;  %v2496_v27 = vsub.f32 1.0, %v2368_v50  ;;  %v2371_v40 = vand.u32 2147483647, %v2243_v12  ;;  %v5902_v6 = vmax.f32 %v2492_v42, 0.0  ;;  %v7577_v12 = vld [vmem:[#allocation50_spill] sm:$0xff]  ;;  %v7578_v42 = vld [vmem:[#allocation51_spill] sm:$0xff] }
 0x208   : > { %7571 = vst [vmem:[#allocation32_spill] sm:$0xff] %v5894_v16  ;;  %2933 = vmatprep.subr.bf16.mxu0 %v2863_v41  ;;  %v2750_v11 = vmul.f32 %v5894_v16, %v7574_v22  ;;  %v2375_v7 = vand.u32 2147483647, %v2247_v13  ;;  %v2245_v52 = vsub.f32 %v7567_v21, %v4554_v63  ;;  %v2249_v44 = vsub.f32 %v7572_v19, %v4554_v63 }
 0x209   : > { %7575 = vst [vmem:[#allocation33_spill] sm:$0xff] %v5902_v6  ;;  %2976 = vmatprep.subr.bf16.mxu1 %v2865_v32  ;;  %v5906_v10 = vmax.f32 %v2496_v27, 0.0  ;;  %v2499_v31 = vsub.f32 1.0, %v2371_v40  ;;  %v2242_v20 = vsub.f32 %v7567_v21, %v4550_v61  ;;  %v2748_v17 = vmul.f32 %v5902_v6, %v7577_v12 }
 0x20a   : > { %v2862_v41 = vpack.c.bf16 %v2750_v11, %v2746_v9  ;;  %v2503_v23 = vsub.f32 1.0, %v2375_v7  ;;  %v2373_v50 = vand.u32 2147483647, %v2245_v52  ;;  %v2377_v27 = vand.u32 2147483647, %v2249_v44  ;;  %v7580_v7 = vld [vmem:[#allocation52_spill] sm:$0xff] }
 0x20b   : > { %7576 = vst [vmem:[#allocation35_spill] sm:$0xff] %v5906_v10  ;;  %v2752_v13 = vmul.f32 %v5906_v10, %v7578_v42  ;;  %v5916_v22 = vmax.f32 %v2499_v31, 0.0  ;;  %v2246_v40 = vsub.f32 %v7572_v19, %v4550_v61  ;;  %v2370_v53 = vand.u32 2147483647, %v2242_v20  ;;  %v7581_v31 = vld [vmem:[#allocation53_spill] sm:$0xff] }
 0x20c   : > { %2934 = vmatpush1.bf16.msra.mxu0 %v2862_v41  ;;  %v5920_v32 = vmax.f32 %v2503_v23, 0.0  ;;  %v2501_v16 = vsub.f32 1.0, %v2373_v50  ;;  %v2244_v9 = vsub.f32 %v7567_v21, %v4558_v3  ;;  %v2505_v12 = vsub.f32 1.0, %v2377_v27 }
 0x20d   : > { %v2864_v11 = vpack.c.bf16 %v2752_v13, %v2748_v17  ;;  %v2755_v52 = vmul.f32 %v5916_v22, %v7580_v7  ;;  %v2374_v42 = vand.u32 2147483647, %v2246_v40  ;;  %v2498_v6 = vsub.f32 1.0, %v2370_v53  ;;  %v7584_v13 = vld [vmem:[#allocation55_spill] sm:$0xff]  ;;  %v7586_v7 = vld [vmem:[#allocation56_spill] sm:$0xff] }
 0x20e   : > { %7579 = vst [vmem:[#allocation31_spill] sm:$0xff] %v5920_v32  ;;  %v2759_v44 = vmul.f32 %v5920_v32, %v7581_v31  ;;  %v5928_v10 = vmax.f32 %v2501_v16, 0.0  ;;  %v2248_v41 = vsub.f32 %v7572_v19, %v4558_v3  ;;  %v5932_v20 = vmax.f32 %v2505_v12, 0.0 }
 0x20f   : > { %2977 = vmatpush1.bf16.msra.mxu1 %v2864_v11  ;;  %v2502_v23 = vsub.f32 1.0, %v2374_v42  ;;  %v2372_v21 = vand.u32 2147483647, %v2244_v9  ;;  %v2251_v17 = vsub.f32 %v4641_v47, %v4552_v62  ;;  %v5938_v40 = vmax.f32 %v2498_v6, 0.0  ;;  %v7588_v11 = vld [vmem:[#allocation54_spill] sm:$0xff] }
 0x210   : > { %7582 = vst [vmem:[#allocation36_spill] sm:$0xff] %v5928_v10  ;;  %7583 = vst [vmem:[#allocation38_spill] sm:$0xff] %v5932_v20  ;;  %v2867_v50 = vpack.c.bf16 %v2759_v44, %v2755_v52  ;;  %v2757_v27 = vmul.f32 %v5928_v10, %v7584_v13  ;;  %v2376_v16 = vand.u32 2147483647, %v2248_v41  ;;  %v2761_v53 = vmul.f32 %v5932_v20, %v7586_v7  ;;  %v7589_v9 = vld [vmem:[#allocation58_spill] sm:$0xff]  ;;  %v7590_v41 = vld [vmem:[#allocation59_spill] sm:$0xff] }
 0x211   : > { %7585 = vst [vmem:[#allocation39_spill] sm:$0xff] %v5938_v40  ;;  %v5942_v31 = vmax.f32 %v2502_v23, 0.0  ;;  %v2500_v19 = vsub.f32 1.0, %v2372_v21  ;;  %v2255_v12 = vsub.f32 %v7588_v11, %v4552_v62  ;;  %v2754_v42 = vmul.f32 %v5938_v40, %v7589_v9 }
 0x212   : > { %2935 = vmatprep.subr.bf16.mxu0 %v2867_v50  ;;  %v2504_v52 = vsub.f32 1.0, %v2376_v16  ;;  %v2379_v44 = vand.u32 2147483647, %v2251_v17  ;;  %v2253_v6 = vsub.f32 %v4641_v47, %v4554_v63  ;;  %v2869_v13 = vpack.c.bf16 %v2761_v53, %v2757_v27  ;;  %v7593_v17 = vld [vmem:[#allocation61_spill] sm:$0xff]  ;;  %v4244_v53 = vld [vmem:[%s7057_s2 + $0x14] ss:$8 sps:$4 sm:$0xff]  }
 0x213   : > { %7587 = vst [vmem:[#allocation41_spill] sm:$0xff] %v5942_v31  ;;  %v2758_v10 = vmul.f32 %v5942_v31, %v7590_v41  ;;  %v5952_v7 = vmax.f32 %v2500_v19, 0.0  ;;  %v2383_v23 = vand.u32 2147483647, %v2255_v12  ;;  %v2257_v50 = vsub.f32 %v7588_v11, %v4554_v63  ;;  %v7594_v19 = vld [vmem:[#allocation62_spill] sm:$0xff]  ;;  %2959 = vmatprep.mubr.bf16.mxu0 %v4244_v53  ;;  %3002 = vmatprep.mubr.bf16.mxu1 %v4244_v53 }
 0x214   : > { %v5954_v21 = vmax.f32 %v2504_v52, 0.0  ;;  %v2507_v20 = vsub.f32 1.0, %v2379_v44  ;;  %v2381_v32 = vand.u32 2147483647, %v2253_v6  ;;  %2978 = vmatprep.subr.bf16.mxu1 %v2869_v13  ;;  %v2250_v27 = vsub.f32 %v4641_v47, %v4550_v61 }
 0x215   : > { %7591 = vst [vmem:[#allocation42_spill] sm:$0xff] %v5952_v7  ;;  %v2866_v16 = vpack.c.bf16 %v2758_v10, %v2754_v42  ;;  %v2756_v9 = vmul.f32 %v5952_v7, %v7593_v17  ;;  %v2511_v40 = vsub.f32 1.0, %v2383_v23  ;;  %v2385_v44 = vand.u32 2147483647, %v2257_v50  ;;  %v7597_v17 = vld [vmem:[#allocation64_spill] sm:$0xff] }
 0x216   : > { %7592 = vst [vmem:[#allocation40_spill] sm:$0xff] %v5954_v21  ;;  %v2760_v12 = vmul.f32 %v5954_v21, %v7594_v19  ;;  %v5967_v52 = vmax.f32 %v2507_v20, 0.0  ;;  %v2509_v6 = vsub.f32 1.0, %v2381_v32  ;;  %v2254_v42 = vsub.f32 %v7588_v11, %v4550_v61  ;;  %v7599_v32 = vld [vmem:[#allocation65_spill] sm:$0xff] }
 0x217   : > { %2936 = vmatpush1.bf16.msra.mxu0 %v2866_v16  ;;  %v5969_v10 = vmax.f32 %v2511_v40, 0.0  ;;  %v2378_v13 = vand.u32 2147483647, %v2250_v27  ;;  %v2252_v41 = vsub.f32 %v4641_v47, %v4558_v3  ;;  %v2513_v19 = vsub.f32 1.0, %v2385_v44  ;;  %v7601_v47 = vld [vmem:[#allocation66_spill] sm:$0xff]  ;;  %v7602_v44 = vld [vmem:[#allocation63_spill] sm:$0xff] }
 0x218   : > { %7595 = vst [vmem:[#allocation43_spill] sm:$0xff] %v5967_v52  ;;  %v2868_v23 = vpack.c.bf16 %v2760_v12, %v2756_v9  ;;  %v2763_v7 = vmul.f32 %v5967_v52, %v7597_v17  ;;  %v5977_v20 = vmax.f32 %v2509_v6, 0.0  ;;  %v2382_v50 = vand.u32 2147483647, %v2254_v42  ;;  %v7604_v42 = vld [vmem:[#allocation68_spill] sm:$0xff] }
 0x219   : > { %7596 = vst [vmem:[#allocation45_spill] sm:$0xff] %v5969_v10  ;;  %v2767_v40 = vmul.f32 %v5969_v10, %v7599_v32  ;;  %v2506_v16 = vsub.f32 1.0, %v2378_v13  ;;  %v2256_v27 = vsub.f32 %v7588_v11, %v4558_v3  ;;  %v5983_v21 = vmax.f32 %v2513_v19, 0.0  ;;  %v7605_v11 = vld [vmem:[#allocation67_spill] sm:$0xff] }
 0x21a   : > { %7598 = vst [vmem:[#allocation44_spill] sm:$0xff] %v5977_v20  ;;  %2979 = vmatpush1.bf16.msra.mxu1 %v2868_v23  ;;  %v2765_v9 = vmul.f32 %v5977_v20, %v7601_v47  ;;  %v2380_v12 = vand.u32 2147483647, %v2252_v41  ;;  %v2259_v6 = vsub.f32 %v7602_v44, %v4552_v62  ;;  %v2510_v53 = vsub.f32 1.0, %v2382_v50  ;;  %v7607_v41 = vld [vmem:[#allocation70_spill] sm:$0xff] }
 0x21b   : > { %7600 = vst [vmem:[#allocation47_spill] sm:$0xff] %v5983_v21  ;;  %v2871_v17 = vpack.c.bf16 %v2767_v40, %v2763_v7  ;;  %v5989_v52 = vmax.f32 %v2506_v16, 0.0  ;;  %v2384_v32 = vand.u32 2147483647, %v2256_v27  ;;  %v2769_v13 = vmul.f32 %v5983_v21, %v7604_v42 }
 0x21c   : > { %v2508_v10 = vsub.f32 1.0, %v2380_v12  ;;  %v2263_v23 = vsub.f32 %v7605_v11, %v4552_v62  ;;  %v2387_v19 = vand.u32 2147483647, %v2259_v6  ;;  %v5995_v31 = vmax.f32 %v2510_v53, 0.0  ;;  %v7609_v12 = vld [vmem:[#allocation71_spill] sm:$0xff]  ;;  %v7610_v53 = vld [vmem:[#allocation73_spill] sm:$0xff] }
 0x21d   : > { %7603 = vst [vmem:[#allocation48_spill] sm:$0xff] %v5989_v52  ;;  %2937 = vmatprep.subr.bf16.mxu0 %v2871_v17  ;;  %v2762_v47 = vmul.f32 %v5989_v52, %v7607_v41  ;;  %v2512_v20 = vsub.f32 1.0, %v2384_v32  ;;  %v2261_v7 = vsub.f32 %v7602_v44, %v4554_v63  ;;  %v2873_v40 = vpack.c.bf16 %v2769_v13, %v2765_v9  ;;  %v7611_v13 = vld [vmem:[#allocation74_spill] sm:$0xff] }
 0x21e   : > { %7606 = vst [vmem:[#allocation50_spill] sm:$0xff] %v5995_v31  ;;  %v6001_v50 = vmax.f32 %v2508_v10, 0.0  ;;  %v2391_v16 = vand.u32 2147483647, %v2263_v23  ;;  %v2515_v27 = vsub.f32 1.0, %v2387_v19  ;;  %v2766_v42 = vmul.f32 %v5995_v31, %v7609_v12  ;;  %v7613_v31 = vld [vmem:[#allocation75_spill] sm:$0xff] }
 0x21f   : > { %v6005_v21 = vmax.f32 %v2512_v20, 0.0  ;;  %v2265_v6 = vsub.f32 %v7605_v11, %v4554_v63  ;;  %v2389_v17 = vand.u32 2147483647, %v2261_v7  ;;  %2980 = vmatprep.subr.bf16.mxu1 %v2873_v40  ;;  %v2258_v10 = vsub.f32 %v7602_v44, %v4550_v61 }
 0x220   : > { %7608 = vst [vmem:[#allocation51_spill] sm:$0xff] %v6001_v50  ;;  %v2764_v32 = vmul.f32 %v6001_v50, %v7610_v53  ;;  %v2519_v41 = vsub.f32 1.0, %v2391_v16  ;;  %v6011_v52 = vmax.f32 %v2515_v27, 0.0  ;;  %v2870_v9 = vpack.c.bf16 %v2766_v42, %v2762_v47  ;;  %v7615_v42 = vld [vmem:[#allocation76_spill] sm:$0xff] }
 0x221   : > { %v2768_v23 = vmul.f32 %v6005_v21, %v7611_v13  ;;  %v2393_v20 = vand.u32 2147483647, %v2265_v6  ;;  %v2517_v19 = vsub.f32 1.0, %v2389_v17  ;;  %v2262_v40 = vsub.f32 %v7605_v11, %v4550_v61 }
 0x222   : > { %v6017_v12 = vmax.f32 %v2519_v41, 0.0  ;;  %v2771_v7 = vmul.f32 %v6011_v52, %v7613_v31  ;;  %v2386_v16 = vand.u32 2147483647, %v2258_v10  ;;  %2938 = vmatpush1.bf16.msra.mxu0 %v2870_v9  ;;  %v2260_v47 = vsub.f32 %v7602_v44, %v4558_v3  ;;  %v7617_v10 = vld [vmem:[#allocation77_spill] sm:$0xff] }
 0x223   : > { %v2872_v27 = vpack.c.bf16 %v2768_v23, %v2764_v32  ;;  %v2521_v53 = vsub.f32 1.0, %v2393_v20  ;;  %v6023_v50 = vmax.f32 %v2517_v19, 0.0  ;;  %v2390_v17 = vand.u32 2147483647, %v2262_v40  ;;  %v7619_v40 = vld [vmem:[#allocation78_spill] sm:$0xff] }
 0x224   : > { %7612 = vst [vmem:[#allocation52_spill] sm:$0xff] %v6017_v12  ;;  %v2775_v6 = vmul.f32 %v6017_v12, %v7615_v42  ;;  %v2514_v41 = vsub.f32 1.0, %v2386_v16  ;;  %v2264_v31 = vsub.f32 %v7605_v11, %v4558_v3  ;;  %v2388_v9 = vand.u32 2147483647, %v2260_v47  ;;  %v7621_v47 = vld [vmem:[#allocation80_spill] sm:$0xff] }
 0x225   : > { %7614 = vst [vmem:[#allocation53_spill] sm:$0xff] %v6023_v50  ;;  %2981 = vmatpush1.bf16.msra.mxu1 %v2872_v27  ;;  %v6031_v13 = vmax.f32 %v2521_v53, 0.0  ;;  %v2773_v32 = vmul.f32 %v6023_v50, %v7617_v10  ;;  %v2267_v23 = vsub.f32 %v4662_v34, %v4552_v62  ;;  %v2518_v44 = vsub.f32 1.0, %v2390_v17 }
 0x226   : > { %v2875_v20 = vpack.c.bf16 %v2775_v6, %v2771_v7  ;;  %v6037_v19 = vmax.f32 %v2514_v41, 0.0  ;;  %v2392_v42 = vand.u32 2147483647, %v2264_v31  ;;  %v2516_v12 = vsub.f32 1.0, %v2388_v9  ;;  %v7623_v9 = vld [vmem:[#allocation81_spill] sm:$0xff] }
 0x227   : > { %7616 = vst [vmem:[#allocation55_spill] sm:$0xff] %v6031_v13  ;;  %v2777_v16 = vmul.f32 %v6031_v13, %v7619_v40  ;;  %v2271_v11 = vsub.f32 %v5116_v29, %v4552_v62  ;;  %v2395_v27 = vand.u32 2147483647, %v2267_v23  ;;  %v6043_v53 = vmax.f32 %v2518_v44, 0.0  ;;  %v7625_v44 = vld [vmem:[#allocation83_spill] sm:$0xff] }
 0x228   : > { %7618 = vst [vmem:[#allocation56_spill] sm:$0xff] %v6037_v19  ;;  %2939 = vmatprep.subr.bf16.mxu0 %v2875_v20  ;;  %v2770_v10 = vmul.f32 %v6037_v19, %v7621_v47  ;;  %v2520_v50 = vsub.f32 1.0, %v2392_v42  ;;  %v2269_v7 = vsub.f32 %v4662_v34, %v4554_v63  ;;  %v6049_v17 = vmax.f32 %v2516_v12, 0.0 }
 0x229   : > { %7620 = vst [vmem:[#allocation54_spill] sm:$0xff] %v6043_v53  ;;  %v2877_v6 = vpack.c.bf16 %v2777_v16, %v2773_v32  ;;  %v2399_v41 = vand.u32 2147483647, %v2271_v11  ;;  %v2523_v31 = vsub.f32 1.0, %v2395_v27  ;;  %v2774_v40 = vmul.f32 %v6043_v53, %v7623_v9  ;;  %v7627_v16 = vld [vmem:[#allocation84_spill] sm:$0xff]  ;;  %v7629_v53 = vld [vmem:[#allocation86_spill] sm:$0xff] }
 0x22a   : > { %7622 = vst [vmem:[#allocation58_spill] sm:$0xff] %v6049_v17  ;;  %v6053_v13 = vmax.f32 %v2520_v50, 0.0  ;;  %v2273_v23 = vsub.f32 %v5116_v29, %v4554_v63  ;;  %v2397_v20 = vand.u32 2147483647, %v2269_v7  ;;  %v2772_v42 = vmul.f32 %v6049_v17, %v7625_v44 }
 0x22b   : > { %2982 = vmatprep.subr.bf16.mxu1 %v2877_v6  ;;  %v2527_v47 = vsub.f32 1.0, %v2399_v41  ;;  %v6059_v19 = vmax.f32 %v2523_v31, 0.0  ;;  %v2266_v12 = vsub.f32 %v4662_v34, %v4550_v61  ;;  %v2874_v32 = vpack.c.bf16 %v2774_v40, %v2770_v10  ;;  %v7631_v40 = vld [vmem:[#allocation87_spill] sm:$0xff] }
 0x22c   : > { %7624 = vst [vmem:[#allocation59_spill] sm:$0xff] %v6053_v13  ;;  %v2776_v11 = vmul.f32 %v6053_v13, %v7627_v16  ;;  %v2401_v50 = vand.u32 2147483647, %v2273_v23  ;;  %v2525_v27 = vsub.f32 1.0, %v2397_v20  ;;  %v2270_v6 = vsub.f32 %v5116_v29, %v4550_v61 }
 0x22d   : > { %7626 = vst [vmem:[#allocation61_spill] sm:$0xff] %v6059_v19  ;;  %v6065_v9 = vmax.f32 %v2527_v47, 0.0  ;;  %v2779_v7 = vmul.f32 %v6059_v19, %v7629_v53  ;;  %v2394_v41 = vand.u32 2147483647, %v2266_v12  ;;  %2940 = vmatpush1.bf16.msra.mxu0 %v2874_v32  ;;  %v2268_v10 = vsub.f32 %v4662_v34, %v4558_v3  ;;  %v7633_v12 = vld [vmem:[#allocation88_spill] sm:$0xff] }
 0x22e   : > { %v2876_v31 = vpack.c.bf16 %v2776_v11, %v2772_v42  ;;  %v2529_v44 = vsub.f32 1.0, %v2401_v50  ;;  %v6071_v17 = vmax.f32 %v2525_v27, 0.0  ;;  %v2398_v20 = vand.u32 2147483647, %v2270_v6  ;;  %v7634_v11 = vld [vmem:[#allocation85_spill] sm:$0xff]  ;;  %v7636_v6 = vld [vmem:[#allocation90_spill] sm:$0xff] }
 0x22f   : > { %7628 = vst [vmem:[#allocation62_spill] sm:$0xff] %v6065_v9  ;;  %v2783_v23 = vmul.f32 %v6065_v9, %v7631_v40  ;;  %v2522_v47 = vsub.f32 1.0, %v2394_v41  ;;  %v2272_v53 = vsub.f32 %v5116_v29, %v4558_v3  ;;  %v2396_v32 = vand.u32 2147483647, %v2268_v10  ;;  %v7637_v29 = vld [vmem:[#allocation89_spill] sm:$0xff]  ;;  %v7639_v10 = vld [vmem:[#allocation92_spill] sm:$0xff] }
 0x230   : > { %7630 = vst [vmem:[#allocation64_spill] sm:$0xff] %v6071_v17  ;;  %2983 = vmatpush1.bf16.msra.mxu1 %v2876_v31  ;;  %v6079_v16 = vmax.f32 %v2529_v44, 0.0  ;;  %v2781_v42 = vmul.f32 %v6071_v17, %v7633_v12  ;;  %v2275_v50 = vsub.f32 %v7634_v11, %v4552_v62  ;;  %v2526_v34 = vsub.f32 1.0, %v2398_v20 }
 0x231   : > { %v2879_v27 = vpack.c.bf16 %v2783_v23, %v2779_v7  ;;  %v6085_v19 = vmax.f32 %v2522_v47, 0.0  ;;  %v2400_v40 = vand.u32 2147483647, %v2272_v53  ;;  %v2524_v9 = vsub.f32 1.0, %v2396_v32  ;;  %v7641_v32 = vld [vmem:[#allocation93_spill] sm:$0xff] }
 0x232   : > { %7632 = vst [vmem:[#allocation65_spill] sm:$0xff] %v6079_v16  ;;  %v2785_v41 = vmul.f32 %v6079_v16, %v7636_v6  ;;  %v2279_v31 = vsub.f32 %v7637_v29, %v4552_v62  ;;  %v2403_v44 = vand.u32 2147483647, %v2275_v50  ;;  %v6091_v13 = vmax.f32 %v2526_v34, 0.0  ;;  %v7642_v34 = vld [vmem:[#allocation95_spill] sm:$0xff] }
 0x233   : > { %7635 = vst [vmem:[#allocation66_spill] sm:$0xff] %v6085_v19  ;;  %2941 = vmatprep.subr.bf16.mxu0 %v2879_v27  ;;  %v2778_v12 = vmul.f32 %v6085_v19, %v7639_v10  ;;  %v2528_v17 = vsub.f32 1.0, %v2400_v40  ;;  %v2277_v7 = vsub.f32 %v7634_v11, %v4554_v63  ;;  %v6097_v20 = vmax.f32 %v2524_v9, 0.0 }
 0x234   : > { %7638 = vst [vmem:[#allocation63_spill] sm:$0xff] %v6091_v13  ;;  %v2881_v23 = vpack.c.bf16 %v2785_v41, %v2781_v42  ;;  %v2407_v47 = vand.u32 2147483647, %v2279_v31  ;;  %v2531_v53 = vsub.f32 1.0, %v2403_v44  ;;  %v2782_v6 = vmul.f32 %v6091_v13, %v7641_v32  ;;  %v7644_v41 = vld [vmem:[#allocation96_spill] sm:$0xff]  ;;  %v7646_v13 = vld [vmem:[#allocation97_spill] sm:$0xff] }
 0x235   : > { %7640 = vst [vmem:[#allocation68_spill] sm:$0xff] %v6097_v20  ;;  %v6101_v16 = vmax.f32 %v2528_v17, 0.0  ;;  %v2281_v50 = vsub.f32 %v7637_v29, %v4554_v63  ;;  %v2405_v27 = vand.u32 2147483647, %v2277_v7  ;;  %v2780_v40 = vmul.f32 %v6097_v20, %v7642_v34 }
 0x236   : > { %2984 = vmatprep.subr.bf16.mxu1 %v2881_v23  ;;  %v2535_v10 = vsub.f32 1.0, %v2407_v47  ;;  %v6107_v19 = vmax.f32 %v2531_v53, 0.0  ;;  %v2274_v9 = vsub.f32 %v7634_v11, %v4550_v61  ;;  %v2878_v42 = vpack.c.bf16 %v2782_v6, %v2778_v12  ;;  %v7648_v6 = vld [vmem:[#allocation98_spill] sm:$0xff] }
 0x237   : > { %v2784_v31 = vmul.f32 %v6101_v16, %v7644_v41  ;;  %v2409_v17 = vand.u32 2147483647, %v2281_v50  ;;  %v2533_v44 = vsub.f32 1.0, %v2405_v27  ;;  %v2278_v23 = vsub.f32 %v7637_v29, %v4550_v61 }
 0x238   : > { %7643 = vst [vmem:[#allocation67_spill] sm:$0xff] %v6107_v19  ;;  %v6113_v32 = vmax.f32 %v2535_v10, 0.0  ;;  %v2787_v7 = vmul.f32 %v6107_v19, %v7646_v13  ;;  %v2402_v47 = vand.u32 2147483647, %v2274_v9  ;;  %2942 = vmatpush1.bf16.msra.mxu0 %v2878_v42  ;;  %v2276_v12 = vsub.f32 %v7634_v11, %v4558_v3  ;;  %v7650_v9 = vld [vmem:[#allocation100_spill] sm:$0xff] }
 0x239   : > { %v2880_v53 = vpack.c.bf16 %v2784_v31, %v2780_v40  ;;  %v2537_v34 = vsub.f32 1.0, %v2409_v17  ;;  %v6119_v20 = vmax.f32 %v2533_v44, 0.0  ;;  %v2406_v27 = vand.u32 2147483647, %v2278_v23  ;;  %v7652_v23 = vld [vmem:[#allocation101_spill] sm:$0xff] }
 0x23a   : > { %7645 = vst [vmem:[#allocation70_spill] sm:$0xff] %v6113_v32  ;;  %v2791_v50 = vmul.f32 %v6113_v32, %v7648_v6  ;;  %v2530_v10 = vsub.f32 1.0, %v2402_v47  ;;  %v2280_v13 = vsub.f32 %v7637_v29, %v4558_v3  ;;  %v2404_v42 = vand.u32 2147483647, %v2276_v12  ;;  %v7653_v29 = vld [vmem:[#allocation99_spill] sm:$0xff] }
 0x23b   : > { %7647 = vst [vmem:[#allocation71_spill] sm:$0xff] %v6119_v20  ;;  %2985 = vmatpush1.bf16.msra.mxu1 %v2880_v53  ;;  %v6127_v41 = vmax.f32 %v2537_v34, 0.0  ;;  %v2789_v40 = vmul.f32 %v6119_v20, %v7650_v9  ;;  %v2283_v31 = vsub.f32 %v4681_v51, %v4552_v62  ;;  %v2534_v11 = vsub.f32 1.0, %v2406_v27  ;;  %v7655_v12 = vld [vmem:[#allocation103_spill] sm:$0xff] }
 0x23c   : > { %v2883_v17 = vpack.c.bf16 %v2791_v50, %v2787_v7  ;;  %v6133_v44 = vmax.f32 %v2530_v10, 0.0  ;;  %v2408_v6 = vand.u32 2147483647, %v2280_v13  ;;  %v2532_v32 = vsub.f32 1.0, %v2404_v42  ;;  %v7657_v42 = vld [vmem:[#allocation104_spill] sm:$0xff] }
 0x23d   : > { %7649 = vst [vmem:[#allocation73_spill] sm:$0xff] %v6127_v41  ;;  %v2793_v47 = vmul.f32 %v6127_v41, %v7652_v23  ;;  %v2287_v53 = vsub.f32 %v7653_v29, %v4552_v62  ;;  %v2411_v34 = vand.u32 2147483647, %v2283_v31  ;;  %v6139_v19 = vmax.f32 %v2534_v11, 0.0  ;;  %v7659_v11 = vld [vmem:[#allocation106_spill] sm:$0xff] }
 0x23e   : > { %7651 = vst [vmem:[#allocation74_spill] sm:$0xff] %v6133_v44  ;;  %2943 = vmatprep.subr.bf16.mxu0 %v2883_v17  ;;  %v2786_v9 = vmul.f32 %v6133_v44, %v7655_v12  ;;  %v2536_v20 = vsub.f32 1.0, %v2408_v6  ;;  %v2285_v7 = vsub.f32 %v4681_v51, %v4554_v63  ;;  %v6145_v27 = vmax.f32 %v2532_v32, 0.0 }
 0x23f   : > { %7654 = vst [vmem:[#allocation75_spill] sm:$0xff] %v6139_v19  ;;  %v2885_v50 = vpack.c.bf16 %v2793_v47, %v2789_v40  ;;  %v2415_v10 = vand.u32 2147483647, %v2287_v53  ;;  %v2539_v13 = vsub.f32 1.0, %v2411_v34  ;;  %v2790_v23 = vmul.f32 %v6139_v19, %v7657_v42  ;;  %v7661_v47 = vld [vmem:[#allocation107_spill] sm:$0xff]  ;;  %v7663_v19 = vld [vmem:[#allocation109_spill] sm:$0xff] }
 0x240   : > { %7656 = vst [vmem:[#allocation76_spill] sm:$0xff] %v6145_v27  ;;  %v6149_v41 = vmax.f32 %v2536_v20, 0.0  ;;  %v2289_v31 = vsub.f32 %v7653_v29, %v4554_v63  ;;  %v2413_v17 = vand.u32 2147483647, %v2285_v7  ;;  %v2788_v6 = vmul.f32 %v6145_v27, %v7659_v11 }
 0x241   : > { %2986 = vmatprep.subr.bf16.mxu1 %v2885_v50  ;;  %v2543_v12 = vsub.f32 1.0, %v2415_v10  ;;  %v6155_v44 = vmax.f32 %v2539_v13, 0.0  ;;  %v2282_v32 = vsub.f32 %v4681_v51, %v4550_v61  ;;  %v2882_v40 = vpack.c.bf16 %v2790_v23, %v2786_v9  ;;  %v7665_v23 = vld [vmem:[#allocation110_spill] sm:$0xff] }
 0x242   : > { %7658 = vst [vmem:[#allocation77_spill] sm:$0xff] %v6149_v41  ;;  %v2792_v53 = vmul.f32 %v6149_v41, %v7661_v47  ;;  %v2417_v20 = vand.u32 2147483647, %v2289_v31  ;;  %v2541_v34 = vsub.f32 1.0, %v2413_v17  ;;  %v2286_v50 = vsub.f32 %v7653_v29, %v4550_v61 }
 0x243   : > { %7660 = vst [vmem:[#allocation78_spill] sm:$0xff] %v6155_v44  ;;  %v6161_v42 = vmax.f32 %v2543_v12, 0.0  ;;  %v2795_v7 = vmul.f32 %v6155_v44, %v7663_v19  ;;  %v2410_v10 = vand.u32 2147483647, %v2282_v32  ;;  %2944 = vmatpush1.bf16.msra.mxu0 %v2882_v40  ;;  %v2284_v9 = vsub.f32 %v4681_v51, %v4558_v3  ;;  %v7667_v32 = vld [vmem:[#allocation111_spill] sm:$0xff] }
 0x244   : > { %v2884_v13 = vpack.c.bf16 %v2792_v53, %v2788_v6  ;;  %v2545_v11 = vsub.f32 1.0, %v2417_v20  ;;  %v6167_v27 = vmax.f32 %v2541_v34, 0.0  ;;  %v2414_v17 = vand.u32 2147483647, %v2286_v50  ;;  %v7668_v53 = vld [vmem:[#allocation108_spill] sm:$0xff]  ;;  %v7670_v50 = vld [vmem:[#allocation113_spill] sm:$0xff] }
 0x245   : > { %7662 = vst [vmem:[#allocation80_spill] sm:$0xff] %v6161_v42  ;;  %v2799_v31 = vmul.f32 %v6161_v42, %v7665_v23  ;;  %v2538_v12 = vsub.f32 1.0, %v2410_v10  ;;  %v2288_v19 = vsub.f32 %v7653_v29, %v4558_v3  ;;  %v2412_v40 = vand.u32 2147483647, %v2284_v9  ;;  %v7671_v29 = vld [vmem:[#allocation112_spill] sm:$0xff]  ;;  %v7673_v9 = vld [vmem:[#allocation114_spill] sm:$0xff] }
 0x246   : > { %7664 = vst [vmem:[#allocation81_spill] sm:$0xff] %v6167_v27  ;;  %2987 = vmatpush1.bf16.msra.mxu1 %v2884_v13  ;;  %v6175_v47 = vmax.f32 %v2545_v11, 0.0  ;;  %v2797_v6 = vmul.f32 %v6167_v27, %v7667_v32  ;;  %v2291_v20 = vsub.f32 %v7668_v53, %v4552_v62  ;;  %v2542_v51 = vsub.f32 1.0, %v2414_v17 }
 0x247   : > { %v2887_v34 = vpack.c.bf16 %v2799_v31, %v2795_v7  ;;  %v6181_v44 = vmax.f32 %v2538_v12, 0.0  ;;  %v2416_v23 = vand.u32 2147483647, %v2288_v19  ;;  %v2540_v42 = vsub.f32 1.0, %v2412_v40  ;;  %v7675_v40 = vld [vmem:[#allocation115_spill] sm:$0xff] }
 0x248   : > { %7666 = vst [vmem:[#allocation83_spill] sm:$0xff] %v6175_v47  ;;  %v2801_v10 = vmul.f32 %v6175_v47, %v7670_v50  ;;  %v2295_v13 = vsub.f32 %v7671_v29, %v4552_v62  ;;  %v2419_v11 = vand.u32 2147483647, %v2291_v20  ;;  %v6187_v41 = vmax.f32 %v2542_v51, 0.0  ;;  %v7676_v51 = vld [vmem:[#allocation118_spill] sm:$0xff] }
 0x249   : > { %7669 = vst [vmem:[#allocation84_spill] sm:$0xff] %v6181_v44  ;;  %2945 = vmatprep.subr.bf16.mxu0 %v2887_v34  ;;  %v2794_v32 = vmul.f32 %v6181_v44, %v7673_v9  ;;  %v2544_v27 = vsub.f32 1.0, %v2416_v23  ;;  %v2293_v7 = vsub.f32 %v7668_v53, %v4554_v63  ;;  %v6193_v17 = vmax.f32 %v2540_v42, 0.0 }
 0x24a   : > { %7672 = vst [vmem:[#allocation86_spill] sm:$0xff] %v6187_v41  ;;  %v2889_v31 = vpack.c.bf16 %v2801_v10, %v2797_v6  ;;  %v2423_v12 = vand.u32 2147483647, %v2295_v13  ;;  %v2547_v19 = vsub.f32 1.0, %v2419_v11  ;;  %v2798_v50 = vmul.f32 %v6187_v41, %v7675_v40  ;;  %v7678_v10 = vld [vmem:[#allocation119_spill] sm:$0xff]  ;;  %v7680_v41 = vld [vmem:[#allocation120_spill] sm:$0xff] }
 0x24b   : > { %7674 = vst [vmem:[#allocation87_spill] sm:$0xff] %v6193_v17  ;;  %v6197_v47 = vmax.f32 %v2544_v27, 0.0  ;;  %v2297_v20 = vsub.f32 %v7671_v29, %v4554_v63  ;;  %v2421_v34 = vand.u32 2147483647, %v2293_v7  ;;  %v2796_v23 = vmul.f32 %v6193_v17, %v7676_v51 }
 0x24c   : > { %2988 = vmatprep.subr.bf16.mxu1 %v2889_v31  ;;  %v2551_v9 = vsub.f32 1.0, %v2423_v12  ;;  %v6203_v44 = vmax.f32 %v2547_v19, 0.0  ;;  %v2290_v42 = vsub.f32 %v7668_v53, %v4550_v61  ;;  %v2886_v6 = vpack.c.bf16 %v2798_v50, %v2794_v32  ;;  %v7682_v50 = vld [vmem:[#allocation121_spill] sm:$0xff] }
 0x24d   : > { %v2800_v13 = vmul.f32 %v6197_v47, %v7678_v10  ;;  %v2425_v27 = vand.u32 2147483647, %v2297_v20  ;;  %v2549_v11 = vsub.f32 1.0, %v2421_v34  ;;  %v2294_v31 = vsub.f32 %v7671_v29, %v4550_v61 }
 0x24e   : > { %7677 = vst [vmem:[#allocation88_spill] sm:$0xff] %v6203_v44  ;;  %v6209_v40 = vmax.f32 %v2551_v9, 0.0  ;;  %v2803_v7 = vmul.f32 %v6203_v44, %v7680_v41  ;;  %v2418_v12 = vand.u32 2147483647, %v2290_v42  ;;  %2946 = vmatpush1.bf16.msra.mxu0 %v2886_v6  ;;  %v2292_v32 = vsub.f32 %v7668_v53, %v4558_v3  ;;  %v7684_v42 = vld [vmem:[#allocation123_spill] sm:$0xff] }
 0x24f   : > { %v2888_v19 = vpack.c.bf16 %v2800_v13, %v2796_v23  ;;  %v2553_v51 = vsub.f32 1.0, %v2425_v27  ;;  %v6215_v17 = vmax.f32 %v2549_v11, 0.0  ;;  %v2422_v34 = vand.u32 2147483647, %v2294_v31  ;;  %v7686_v31 = vld [vmem:[#allocation124_spill] sm:$0xff] }
 0x250   : > { %7679 = vst [vmem:[#allocation85_spill] sm:$0xff] %v6209_v40  ;;  %v2807_v20 = vmul.f32 %v6209_v40, %v7682_v50  ;;  %v2546_v9 = vsub.f32 1.0, %v2418_v12  ;;  %v2296_v41 = vsub.f32 %v7671_v29, %v4558_v3  ;;  %v2420_v6 = vand.u32 2147483647, %v2292_v32  ;;  %v7687_v29 = vld [vmem:[#allocation122_spill] sm:$0xff] }
 0x251   : > { %7681 = vst [vmem:[#allocation90_spill] sm:$0xff] %v6215_v17  ;;  %2989 = vmatpush1.bf16.msra.mxu1 %v2888_v19  ;;  %v6223_v10 = vmax.f32 %v2553_v51, 0.0  ;;  %v2805_v23 = vmul.f32 %v6215_v17, %v7684_v42  ;;  %v2299_v13 = vsub.f32 %v4706_v36, %v4552_v62  ;;  %v2550_v53 = vsub.f32 1.0, %v2422_v34  ;;  %v7689_v32 = vld [vmem:[#allocation126_spill] sm:$0xff] }
 0x252   : > { %v2891_v27 = vpack.c.bf16 %v2807_v20, %v2803_v7  ;;  %v6229_v11 = vmax.f32 %v2546_v9, 0.0  ;;  %v2424_v50 = vand.u32 2147483647, %v2296_v41  ;;  %v2548_v40 = vsub.f32 1.0, %v2420_v6  ;;  %v7691_v6 = vld [vmem:[#allocation127_spill] sm:$0xff] }
 0x253   : > { %7683 = vst [vmem:[#allocation89_spill] sm:$0xff] %v6223_v10  ;;  %v2809_v12 = vmul.f32 %v6223_v10, %v7686_v31  ;;  %v2303_v19 = vsub.f32 %v7687_v29, %v4552_v62  ;;  %v2427_v51 = vand.u32 2147483647, %v2299_v13  ;;  %v6235_v44 = vmax.f32 %v2550_v53, 0.0  ;;  %v7693_v53 = vld [vmem:[#allocation129_spill] sm:$0xff] }
 0x254   : > { %7685 = vst [vmem:[#allocation92_spill] sm:$0xff] %v6229_v11  ;;  %2947 = vmatprep.subr.bf16.mxu0 %v2891_v27  ;;  %v2802_v42 = vmul.f32 %v6229_v11, %v7689_v32  ;;  %v2552_v17 = vsub.f32 1.0, %v2424_v50  ;;  %v2301_v7 = vsub.f32 %v4706_v36, %v4554_v63  ;;  %v6241_v34 = vmax.f32 %v2548_v40, 0.0 }
 0x255   : > { %7688 = vst [vmem:[#allocation93_spill] sm:$0xff] %v6235_v44  ;;  %v2893_v20 = vpack.c.bf16 %v2809_v12, %v2805_v23  ;;  %v2431_v9 = vand.u32 2147483647, %v2303_v19  ;;  %v2555_v41 = vsub.f32 1.0, %v2427_v51  ;;  %v2806_v31 = vmul.f32 %v6235_v44, %v7691_v6  ;;  %v7695_v12 = vld [vmem:[#allocation130_spill] sm:$0xff]  ;;  %v7697_v44 = vld [vmem:[#allocation132_spill] sm:$0xff] }
 0x256   : > { %7690 = vst [vmem:[#allocation95_spill] sm:$0xff] %v6241_v34  ;;  %v6245_v10 = vmax.f32 %v2552_v17, 0.0  ;;  %v2305_v13 = vsub.f32 %v7687_v29, %v4554_v63  ;;  %v2429_v27 = vand.u32 2147483647, %v2301_v7  ;;  %v2804_v50 = vmul.f32 %v6241_v34, %v7693_v53 }
 0x257   : > { %2990 = vmatprep.subr.bf16.mxu1 %v2893_v20  ;;  %v2559_v32 = vsub.f32 1.0, %v2431_v9  ;;  %v6251_v11 = vmax.f32 %v2555_v41, 0.0  ;;  %v2298_v40 = vsub.f32 %v4706_v36, %v4550_v61  ;;  %v2890_v23 = vpack.c.bf16 %v2806_v31, %v2802_v42  ;;  %v7699_v31 = vld [vmem:[#allocation133_spill] sm:$0xff] }
 0x258   : > { %7692 = vst [vmem:[#allocation96_spill] sm:$0xff] %v6245_v10  ;;  %v2808_v19 = vmul.f32 %v6245_v10, %v7695_v12  ;;  %v2433_v17 = vand.u32 2147483647, %v2305_v13  ;;  %v2557_v51 = vsub.f32 1.0, %v2429_v27  ;;  %v2302_v20 = vsub.f32 %v7687_v29, %v4550_v61 }
 0x259   : > { %7694 = vst [vmem:[#allocation97_spill] sm:$0xff] %v6251_v11  ;;  %v6257_v6 = vmax.f32 %v2559_v32, 0.0  ;;  %v2811_v7 = vmul.f32 %v6251_v11, %v7697_v44  ;;  %v2426_v9 = vand.u32 2147483647, %v2298_v40  ;;  %2948 = vmatpush1.bf16.msra.mxu0 %v2890_v23  ;;  %v2300_v42 = vsub.f32 %v4706_v36, %v4558_v3  ;;  %v7701_v40 = vld [vmem:[#allocation134_spill] sm:$0xff] }
 0x25a   : > { %v2892_v41 = vpack.c.bf16 %v2808_v19, %v2804_v50  ;;  %v2561_v53 = vsub.f32 1.0, %v2433_v17  ;;  %v6263_v34 = vmax.f32 %v2557_v51, 0.0  ;;  %v2430_v27 = vand.u32 2147483647, %v2302_v20  ;;  %v7702_v19 = vld [vmem:[#allocation131_spill] sm:$0xff]  ;;  %v7704_v20 = vld [vmem:[#allocation136_spill] sm:$0xff] }
 0x25b   : > { %7696 = vst [vmem:[#allocation98_spill] sm:$0xff] %v6257_v6  ;;  %v2815_v13 = vmul.f32 %v6257_v6, %v7699_v31  ;;  %v2554_v32 = vsub.f32 1.0, %v2426_v9  ;;  %v2304_v44 = vsub.f32 %v7687_v29, %v4558_v3  ;;  %v2428_v23 = vand.u32 2147483647, %v2300_v42  ;;  %v7705_v29 = vld [vmem:[#allocation135_spill] sm:$0xff]  ;;  %v7707_v42 = vld [vmem:[#allocation137_spill] sm:$0xff] }
 0x25c   : > { %7698 = vst [vmem:[#allocation100_spill] sm:$0xff] %v6263_v34  ;;  %2991 = vmatpush1.bf16.msra.mxu1 %v2892_v41  ;;  %v6271_v12 = vmax.f32 %v2561_v53, 0.0  ;;  %v2813_v50 = vmul.f32 %v6263_v34, %v7701_v40  ;;  %v2307_v17 = vsub.f32 %v7702_v19, %v4552_v62  ;;  %v2558_v36 = vsub.f32 1.0, %v2430_v27 }
 0x25d   : > { %v2895_v51 = vpack.c.bf16 %v2815_v13, %v2811_v7  ;;  %v6277_v11 = vmax.f32 %v2554_v32, 0.0  ;;  %v2432_v31 = vand.u32 2147483647, %v2304_v44  ;;  %v2556_v6 = vsub.f32 1.0, %v2428_v23  ;;  %v7709_v23 = vld [vmem:[#allocation138_spill] sm:$0xff] }
 0x25e   : > { %7700 = vst [vmem:[#allocation101_spill] sm:$0xff] %v6271_v12  ;;  %v2817_v9 = vmul.f32 %v6271_v12, %v7704_v20  ;;  %v2311_v41 = vsub.f32 %v7705_v29, %v4552_v62  ;;  %v2435_v53 = vand.u32 2147483647, %v2307_v17  ;;  %v6283_v10 = vmax.f32 %v2558_v36, 0.0  ;;  %v7710_v36 = vld [vmem:[#allocation141_spill] sm:$0xff] }
 0x25f   : > { %7703 = vst [vmem:[#allocation99_spill] sm:$0xff] %v6277_v11  ;;  %2949 = vmatprep.subr.bf16.mxu0 %v2895_v51  ;;  %v2810_v40 = vmul.f32 %v6277_v11, %v7707_v42  ;;  %v2560_v34 = vsub.f32 1.0, %v2432_v31  ;;  %v2309_v7 = vsub.f32 %v7702_v19, %v4554_v63  ;;  %v6289_v27 = vmax.f32 %v2556_v6, 0.0 }
 0x260   : > { %7706 = vst [vmem:[#allocation103_spill] sm:$0xff] %v6283_v10  ;;  %v2897_v13 = vpack.c.bf16 %v2817_v9, %v2813_v50  ;;  %v2439_v32 = vand.u32 2147483647, %v2311_v41  ;;  %v2563_v44 = vsub.f32 1.0, %v2435_v53  ;;  %v2814_v20 = vmul.f32 %v6283_v10, %v7709_v23  ;;  %v7712_v9 = vld [vmem:[#allocation142_spill] sm:$0xff]  ;;  %v7714_v10 = vld [vmem:[#allocation143_spill] sm:$0xff] }
 0x261   : > { %7708 = vst [vmem:[#allocation104_spill] sm:$0xff] %v6289_v27  ;;  %v6293_v12 = vmax.f32 %v2560_v34, 0.0  ;;  %v2313_v17 = vsub.f32 %v7705_v29, %v4554_v63  ;;  %v2437_v51 = vand.u32 2147483647, %v2309_v7  ;;  %v2812_v31 = vmul.f32 %v6289_v27, %v7710_v36 }
 0x262   : > { %2992 = vmatprep.subr.bf16.mxu1 %v2897_v13  ;;  %v2567_v42 = vsub.f32 1.0, %v2439_v32  ;;  %v6299_v11 = vmax.f32 %v2563_v44, 0.0  ;;  %v2306_v6 = vsub.f32 %v7702_v19, %v4550_v61  ;;  %v2894_v50 = vpack.c.bf16 %v2814_v20, %v2810_v40  ;;  %v7716_v20 = vld [vmem:[#allocation144_spill] sm:$0xff] }
 0x263   : > { %v2816_v41 = vmul.f32 %v6293_v12, %v7712_v9  ;;  %v2441_v34 = vand.u32 2147483647, %v2313_v17  ;;  %v2565_v53 = vsub.f32 1.0, %v2437_v51  ;;  %v2310_v13 = vsub.f32 %v7705_v29, %v4550_v61 }
 0x264   : > { %7711 = vst [vmem:[#allocation106_spill] sm:$0xff] %v6299_v11  ;;  %v6305_v23 = vmax.f32 %v2567_v42, 0.0  ;;  %v2819_v7 = vmul.f32 %v6299_v11, %v7714_v10  ;;  %v2434_v32 = vand.u32 2147483647, %v2306_v6  ;;  %2950 = vmatpush1.bf16.msra.mxu0 %v2894_v50  ;;  %v2308_v40 = vsub.f32 %v7702_v19, %v4558_v3  ;;  %v7718_v6 = vld [vmem:[#allocation146_spill] sm:$0xff] }
 0x265   : > { %v2896_v44 = vpack.c.bf16 %v2816_v41, %v2812_v31  ;;  %v2569_v36 = vsub.f32 1.0, %v2441_v34  ;;  %v6311_v27 = vmax.f32 %v2565_v53, 0.0  ;;  %v2438_v51 = vand.u32 2147483647, %v2310_v13  ;;  %v7720_v13 = vld [vmem:[#allocation147_spill] sm:$0xff] }
 0x266   : > { %7713 = vst [vmem:[#allocation107_spill] sm:$0xff] %v6305_v23  ;;  %v2823_v17 = vmul.f32 %v6305_v23, %v7716_v20  ;;  %v2562_v42 = vsub.f32 1.0, %v2434_v32  ;;  %v2312_v10 = vsub.f32 %v7705_v29, %v4558_v3  ;;  %v2436_v50 = vand.u32 2147483647, %v2308_v40  ;;  %v7721_v29 = vld [vmem:[#allocation145_spill] sm:$0xff] }
 0x267   : > { %7715 = vst [vmem:[#allocation109_spill] sm:$0xff] %v6311_v27  ;;  %2993 = vmatpush1.bf16.msra.mxu1 %v2896_v44  ;;  %v6319_v9 = vmax.f32 %v2569_v36, 0.0  ;;  %v2821_v31 = vmul.f32 %v6311_v27, %v7718_v6  ;;  %v2315_v41 = vsub.f32 %v4725_v57, %v4552_v62  ;;  %v2566_v19 = vsub.f32 1.0, %v2438_v51  ;;  %v7723_v40 = vld [vmem:[#allocation149_spill] sm:$0xff] }
 0x268   : > { %v2899_v34 = vpack.c.bf16 %v2823_v17, %v2819_v7  ;;  %v6325_v53 = vmax.f32 %v2562_v42, 0.0  ;;  %v2440_v20 = vand.u32 2147483647, %v2312_v10  ;;  %v2564_v23 = vsub.f32 1.0, %v2436_v50  ;;  %v7725_v50 = vld [vmem:[#allocation150_spill] sm:$0xff] }
 0x269   : > { %7717 = vst [vmem:[#allocation110_spill] sm:$0xff] %v6319_v9  ;;  %v2825_v32 = vmul.f32 %v6319_v9, %v7720_v13  ;;  %v2319_v44 = vsub.f32 %v7721_v29, %v4552_v62  ;;  %v2443_v36 = vand.u32 2147483647, %v2315_v41  ;;  %v6331_v11 = vmax.f32 %v2566_v19, 0.0  ;;  %v7726_v19 = vld [vmem:[#allocation152_spill] sm:$0xff] }
 0x26a   : > { %7719 = vst [vmem:[#allocation111_spill] sm:$0xff] %v6325_v53  ;;  %2951 = vmatprep.subr.bf16.mxu0 %v2899_v34  ;;  %v2818_v6 = vmul.f32 %v6325_v53, %v7723_v40  ;;  %v2568_v27 = vsub.f32 1.0, %v2440_v20  ;;  %v2317_v7 = vsub.f32 %v4725_v57, %v4554_v63  ;;  %v6337_v51 = vmax.f32 %v2564_v23, 0.0 }
 0x26b   : > { %7722 = vst [vmem:[#allocation108_spill] sm:$0xff] %v6331_v11  ;;  %v2901_v17 = vpack.c.bf16 %v2825_v32, %v2821_v31  ;;  %v2447_v42 = vand.u32 2147483647, %v2319_v44  ;;  %v2571_v10 = vsub.f32 1.0, %v2443_v36  ;;  %v2822_v13 = vmul.f32 %v6331_v11, %v7725_v50  ;;  %v7728_v32 = vld [vmem:[#allocation153_spill] sm:$0xff]  ;;  %v7730_v11 = vld [vmem:[#allocation154_spill] sm:$0xff] }
 0x26c   : > { %7724 = vst [vmem:[#allocation113_spill] sm:$0xff] %v6337_v51  ;;  %v6341_v9 = vmax.f32 %v2568_v27, 0.0  ;;  %v2321_v41 = vsub.f32 %v7721_v29, %v4554_v63  ;;  %v2445_v34 = vand.u32 2147483647, %v2317_v7  ;;  %v2820_v20 = vmul.f32 %v6337_v51, %v7726_v19 }
 0x26d   : > { %2994 = vmatprep.subr.bf16.mxu1 %v2901_v17  ;;  %v2575_v40 = vsub.f32 1.0, %v2447_v42  ;;  %v6347_v53 = vmax.f32 %v2571_v10, 0.0  ;;  %v2314_v23 = vsub.f32 %v4725_v57, %v4550_v61  ;;  %v2898_v31 = vpack.c.bf16 %v2822_v13, %v2818_v6  ;;  %v7732_v13 = vld [vmem:[#allocation155_spill] sm:$0xff] }
 0x26e   : > { %v2824_v44 = vmul.f32 %v6341_v9, %v7728_v32  ;;  %v2449_v27 = vand.u32 2147483647, %v2321_v41  ;;  %v2573_v36 = vsub.f32 1.0, %v2445_v34  ;;  %v2318_v17 = vsub.f32 %v7721_v29, %v4550_v61 }
 0x26f   : > { %7727 = vst [vmem:[#allocation112_spill] sm:$0xff] %v6347_v53  ;;  %v6353_v50 = vmax.f32 %v2575_v40, 0.0  ;;  %v2827_v7 = vmul.f32 %v6347_v53, %v7730_v11  ;;  %v2442_v42 = vand.u32 2147483647, %v2314_v23  ;;  %2952 = vmatpush1.bf16.msra.mxu0 %v2898_v31  ;;  %v2316_v6 = vsub.f32 %v4725_v57, %v4558_v3  ;;  %v7734_v23 = vld [vmem:[#allocation156_spill] sm:$0xff] }
 0x270   : > { %v2900_v10 = vpack.c.bf16 %v2824_v44, %v2820_v20  ;;  %v2577_v19 = vsub.f32 1.0, %v2449_v27  ;;  %v6359_v51 = vmax.f32 %v2573_v36, 0.0  ;;  %v2446_v34 = vand.u32 2147483647, %v2318_v17  ;;  %v7736_v17 = vld [vmem:[#allocation158_spill] sm:$0xff] }
 0x271   : > { %7729 = vst [vmem:[#allocation114_spill] sm:$0xff] %v6353_v50  ;;  %v2831_v41 = vmul.f32 %v6353_v50, %v7732_v13  ;;  %v2570_v40 = vsub.f32 1.0, %v2442_v42  ;;  %v2320_v11 = vsub.f32 %v7721_v29, %v4558_v3  ;;  %v2444_v31 = vand.u32 2147483647, %v2316_v6  ;;  %v7737_v29 = vld [vmem:[#allocation157_spill] sm:$0xff]  ;;  %v7739_v6 = vld [vmem:[#allocation159_spill] sm:$0xff] }
 0x272   : > { %7731 = vst [vmem:[#allocation115_spill] sm:$0xff] %v6359_v51  ;;  %2995 = vmatpush1.bf16.msra.mxu1 %v2900_v10  ;;  %v6367_v32 = vmax.f32 %v2577_v19, 0.0  ;;  %v2829_v20 = vmul.f32 %v6359_v51, %v7734_v23  ;;  %v2323_v44 = vsub.f32 %v5559_v49, %v4552_v62  ;;  %v2574_v57 = vsub.f32 1.0, %v2446_v34 }
 0x273   : > { %v2903_v27 = vpack.c.bf16 %v2831_v41, %v2827_v7  ;;  %v6373_v36 = vmax.f32 %v2570_v40, 0.0  ;;  %v2448_v13 = vand.u32 2147483647, %v2320_v11  ;;  %v2572_v50 = vsub.f32 1.0, %v2444_v31  ;;  %v7741_v31 = vld [vmem:[#allocation160_spill] sm:$0xff] }
 0x274   : > { %7733 = vst [vmem:[#allocation118_spill] sm:$0xff] %v6367_v32  ;;  %v2833_v42 = vmul.f32 %v6367_v32, %v7736_v17  ;;  %v2327_v10 = vsub.f32 %v7737_v29, %v4552_v62  ;;  %v2451_v19 = vand.u32 2147483647, %v2323_v44  ;;  %v6379_v53 = vmax.f32 %v2574_v57, 0.0  ;;  %v7742_v57 = vld [vmem:[#allocation163_spill] sm:$0xff] }
 0x275   : > { %7735 = vst [vmem:[#allocation119_spill] sm:$0xff] %v6373_v36  ;;  %2953 = vmatprep.subr.bf16.mxu0 %v2903_v27  ;;  %v2826_v23 = vmul.f32 %v6373_v36, %v7739_v6  ;;  %v2576_v51 = vsub.f32 1.0, %v2448_v13  ;;  %v2325_v7 = vsub.f32 %v5559_v49, %v4554_v63  ;;  %v6385_v34 = vmax.f32 %v2572_v50, 0.0 }
 0x276   : > { %7738 = vst [vmem:[#allocation120_spill] sm:$0xff] %v6379_v53  ;;  %v2905_v41 = vpack.c.bf16 %v2833_v42, %v2829_v20  ;;  %v2455_v40 = vand.u32 2147483647, %v2327_v10  ;;  %v2579_v11 = vsub.f32 1.0, %v2451_v19  ;;  %v2830_v17 = vmul.f32 %v6379_v53, %v7741_v31  ;;  %v7743_v42 = vld [vmem:[#allocation164_spill] sm:$0xff]  ;;  %v7745_v53 = vld [vmem:[#allocation165_spill] sm:$0xff] }
 0x277   : > { %7740 = vst [vmem:[#allocation121_spill] sm:$0xff] %v6385_v34  ;;  %v6389_v32 = vmax.f32 %v2576_v51, 0.0  ;;  %v2329_v44 = vsub.f32 %v7737_v29, %v4554_v63  ;;  %v2453_v27 = vand.u32 2147483647, %v2325_v7  ;;  %v2828_v13 = vmul.f32 %v6385_v34, %v7742_v57 }
 0x278   : > { %2996 = vmatprep.subr.bf16.mxu1 %v2905_v41  ;;  %v2583_v6 = vsub.f32 1.0, %v2455_v40  ;;  %v6395_v36 = vmax.f32 %v2579_v11, 0.0  ;;  %v2322_v50 = vsub.f32 %v5559_v49, %v4550_v61  ;;  %v2902_v20 = vpack.c.bf16 %v2830_v17, %v2826_v23  ;;  %v7746_v17 = vld [vmem:[#allocation166_spill] sm:$0xff] }
 0x279   : > { %v2832_v10 = vmul.f32 %v6389_v32, %v7743_v42  ;;  %v2457_v51 = vand.u32 2147483647, %v2329_v44  ;;  %v2581_v19 = vsub.f32 1.0, %v2453_v27  ;;  %v2326_v41 = vsub.f32 %v7737_v29, %v4550_v61 }
 0x27a   : > { %v6401_v31 = vmax.f32 %v2583_v6, 0.0  ;;  %v2835_v7 = vmul.f32 %v6395_v36, %v7745_v53  ;;  %v2450_v40 = vand.u32 2147483647, %v2322_v50  ;;  %2954 = vmatpush1.bf16.msra.mxu0 %v2902_v20  ;;  %v2324_v23 = vsub.f32 %v5559_v49, %v4558_v3  ;;  %v7747_v50 = vld [vmem:[#allocation167_spill] sm:$0xff] }
 0x27b   : > { %v2904_v11 = vpack.c.bf16 %v2832_v10, %v2828_v13  ;;  %v2585_v57 = vsub.f32 1.0, %v2457_v51  ;;  %v6407_v34 = vmax.f32 %v2581_v19, 0.0  ;;  %v2454_v27 = vand.u32 2147483647, %v2326_v41  ;;  %v7748_v41 = vld [vmem:[#allocation168_spill] sm:$0xff] }
 0x27c   : > { %7744 = vst [vmem:[#allocation123_spill] sm:$0xff] %v6401_v31  ;;  %v2839_v44 = vmul.f32 %v6401_v31, %v7746_v17  ;;  %v2578_v6 = vsub.f32 1.0, %v2450_v40  ;;  %v2328_v53 = vsub.f32 %v7737_v29, %v4558_v3  ;;  %v2452_v20 = vand.u32 2147483647, %v2324_v23 }
 0x27d   : > { %2997 = vmatpush1.bf16.msra.mxu1 %v2904_v11  ;;  %v6415_v42 = vmax.f32 %v2585_v57, 0.0  ;;  %v2837_v13 = vmul.f32 %v6407_v34, %v7747_v50  ;;  %v2331_v10 = vsub.f32 %v4750_v2, %v4552_v62  ;;  %v2582_v49 = vsub.f32 1.0, %v2454_v27 }
 0x27e   : > { %v2907_v51 = vpack.c.bf16 %v2839_v44, %v2835_v7  ;;  %v6421_v19 = vmax.f32 %v2578_v6, 0.0  ;;  %v2456_v17 = vand.u32 2147483647, %v2328_v53  ;;  %v2580_v31 = vsub.f32 1.0, %v2452_v20 }
 0x27f   : > { %v2841_v40 = vmul.f32 %v6415_v42, %v7748_v41  ;;  %v2335_v29 = vsub.f32 %v5635_v55, %v4552_v62  ;;  %v2459_v11 = vand.u32 2147483647, %v2331_v10  ;;  %v6427_v57 = vmax.f32 %v2582_v49, 0.0 }
 0x280   : > { %2955 = vmatprep.subr.bf16.mxu0 %v2907_v51  ;;  %v2834_v23 = vmul.f32 %v6421_v19, %v5659_v14  ;;  %v2584_v50 = vsub.f32 1.0, %v2456_v17  ;;  %v2333_v7 = vsub.f32 %v4750_v2, %v4554_v63  ;;  %v6433_v27 = vmax.f32 %v2580_v31, 0.0 }
 0x281   : > { %v2909_v44 = vpack.c.bf16 %v2841_v40, %v2837_v13  ;;  %v2463_v6 = vand.u32 2147483647, %v2335_v29  ;;  %v2587_v53 = vsub.f32 1.0, %v2459_v11  ;;  %v2838_v20 = vmul.f32 %v6427_v57, %v5661_v38 }
 0x282   : > { %v6437_v62 = vmax.f32 %v2584_v50, 0.0  ;;  %v2337_v10 = vsub.f32 %v5635_v55, %v4554_v63  ;;  %v2461_v51 = vand.u32 2147483647, %v2333_v7  ;;  %v2836_v14 = vmul.f32 %v6433_v27, %v5671_v18 }
 0x283   : > { %2998 = vmatprep.subr.bf16.mxu1 %v2909_v44  ;;  %v2591_v49 = vsub.f32 1.0, %v2463_v6  ;;  %v6443_v17 = vmax.f32 %v2587_v53, 0.0  ;;  %v2330_v31 = vsub.f32 %v4750_v2, %v4550_v61  ;;  %v2906_v13 = vpack.c.bf16 %v2838_v20, %v2834_v23 }
 0x284   : > { %v2840_v38 = vmul.f32 %v6437_v62, %v5673_v48  ;;  %v2465_v41 = vand.u32 2147483647, %v2337_v10  ;;  %v2589_v40 = vsub.f32 1.0, %v2461_v51  ;;  %v2334_v18 = vsub.f32 %v5635_v55, %v4550_v61  ;;  %v7749_v51 = vld [vmem:[#allocation8_spill] sm:$0xff] }
 0x285   : > { %v6449_v29 = vmax.f32 %v2591_v49, 0.0  ;;  %v2843_v63 = vmul.f32 %v6443_v17, %v5687_v5  ;;  %v2458_v11 = vand.u32 2147483647, %v2330_v31  ;;  %2956 = vmatpush1.bf16.msra.mxu0 %v2906_v13  ;;  %v2332_v23 = vsub.f32 %v4750_v2, %v4558_v3 }
 0x286   : > { %v2908_v50 = vpack.c.bf16 %v2840_v38, %v2836_v14  ;;  %v2593_v7 = vsub.f32 1.0, %v2465_v41  ;;  %v6455_v44 = vmax.f32 %v2589_v40, 0.0  ;;  %v2462_v6 = vand.u32 2147483647, %v2334_v18  ;;  %v7751_v41 = vld [vmem:[#allocation9_spill] sm:$0xff]  ;;  %v7752_v18 = vld [vmem:[#allocation11_spill] sm:$0xff] }
 0x287   : > { %v2847_v48 = vmul.f32 %v6449_v29, %v5691_v45  ;;  %v2586_v53 = vsub.f32 1.0, %v2458_v11  ;;  %v2336_v5 = vsub.f32 %v5635_v55, %v4558_v3  ;;  %v2460_v10 = vand.u32 2147483647, %v2332_v23  ;;  %v7750_v3 = vld [vmem:[#allocation10_spill] sm:$0xff]  ;;  %v7754_v23 = vld [vmem:[#allocation12_spill] sm:$0xff] }
 0x288   : > { %2999 = vmatpush1.bf16.msra.mxu1 %v2908_v50  ;;  %v6463_v20 = vmax.f32 %v2593_v7, 0.0  ;;  %v2845_v61 = vmul.f32 %v6455_v44, %v5697_v60  ;;  %v3494_v14 = vmul.f32 %v5733_v28, %v7749_v51  ;;  %v2590_v2 = vsub.f32 1.0, %v2462_v6  ;;  %v7760_v51 = vld [vmem:[#allocation16_spill] sm:$0xff] }
 0x289   : > { %v2911_v49 = vpack.c.bf16 %v2847_v48, %v2843_v63  ;;  %v6469_v31 = vmax.f32 %v2586_v53, 0.0  ;;  %v2464_v45 = vand.u32 2147483647, %v2336_v5  ;;  %v2588_v38 = vsub.f32 1.0, %v2460_v10  ;;  %v7755_v48 = vld [vmem:[#allocation13_spill] sm:$0xff]  ;;  %v7757_v5 = vld [vmem:[#allocation14_spill] sm:$0xff] }
 0x28a   : > { %v2849_v13 = vmul.f32 %v6463_v20, %v5703_v58  ;;  %v3498_v55 = vmul.f32 %v5744_v1, %v7750_v3  ;;  %v3496_v40 = vmul.f32 %v5754_v24, %v7751_v41  ;;  %v6477_v60 = vmax.f32 %v2590_v2, 0.0  ;;  %v7758_v10 = vld [vmem:[#allocation15_spill] sm:$0xff] }
 0x28b   : > { %2957 = vmatprep.subr.bf16.mxu0 %v2911_v49  ;;  %v2842_v28 = vmul.f32 %v6469_v31, %v5717_v33  ;;  %v2592_v63 = vsub.f32 1.0, %v2464_v45  ;;  %v3500_v11 = vmul.f32 %v5760_v43, %v7752_v18  ;;  %v6483_v7 = vmax.f32 %v2588_v38, 0.0  ;;  %v7762_v45 = vld [vmem:[#allocation7_spill] sm:$0xff] }
 0x28c   : > { %v2913_v50 = vpack.c.bf16 %v2849_v13, %v2845_v61  ;;  %v3622_v58 = vpack.c.bf16 %v3498_v55, %v3494_v14  ;;  %v3621_v1 = vpack.c.bf16 %v7755_v48, %v7754_v23  ;;  %v2846_v24 = vmul.f32 %v6477_v60, %v5719_v15  ;;  %v7759_v61 = vld [vmem:[#allocation6_spill] sm:$0xff]  ;;  %v7761_v14 = vld [vmem:[#allocation17_spill] sm:$0xff]  ;;  %v4242_v3 = vld [vmem:[%s7057_s2 + $0x10] ss:$8 sps:$4 sm:$0xff]  }
 0x28d   : > { %7753 = vst [vmem:[#allocation124_spill] sm:$0xff] %v6483_v7  ;;  %v6489_v6 = vmax.f32 %v2592_v63, 0.0  ;;  %v3624_v53 = vpack.c.bf16 %v3500_v11, %v3496_v40  ;;  %v3623_v33 = vpack.c.bf16 %v7758_v10, %v7757_v5  ;;  %v2844_v43 = vmul.f32 %v6483_v7, %v5727_v54  ;;  %v7763_v55 = vld [vmem:[#allocation5_spill] sm:$0xff] }
 0x28e   : > { %3000 = vmatprep.subr.bf16.mxu1 %v2913_v50  ;;  %v3014_v49 = vsub.f32 %v7760_v51, %v7759_v61  ;;  %v3018_v2 = vsub.f32 %v7761_v14, %v7759_v61  ;;  %v3016_v13 = vsub.f32 %v7760_v51, %v7762_v45  ;;  %v2910_v15 = vpack.c.bf16 %v2846_v24, %v2842_v28 }
 0x28f   : > { %7756 = vst [vmem:[#allocation122_spill] sm:$0xff] %v6489_v6  ;;  %v2848_v38 = vmul.f32 %v6489_v6, %v5729_v30  ;;  %v3020_v54 = vsub.f32 %v7761_v14, %v7762_v45  ;;  %v3013_v41 = vsub.f32 %v7760_v51, %v7763_v55  ;;  %v3017_v11 = vsub.f32 %v7761_v14, %v7763_v55 }
 0x290   : > { %v3134_v40 = vand.u32 2147483647, %v3014_v49  ;;  %v3138_v63 = vand.u32 2147483647, %v3018_v2  ;;  %v3136_v18 = vand.u32 2147483647, %v3016_v13  ;;  %2958 = vmatpush1.bf16.msra.mxu0 %v2910_v15  ;;  %v3015_v23 = vsub.f32 %v7760_v51, %v4556_v0 }
 0x291   : > { %v2912_v28 = vpack.c.bf16 %v2848_v38, %v2844_v43  ;;  %v3140_v50 = vand.u32 2147483647, %v3020_v54  ;;  %v3133_v30 = vand.u32 2147483647, %v3013_v41  ;;  %3698 = vmatprep.subr.bf16.mxu0 %v3622_v58  ;;  %v3137_v10 = vand.u32 2147483647, %v3017_v11 }
 0x292   : > { %v3254_v48 = vsub.f32 1.0, %v3134_v40  ;;  %v3258_v24 = vsub.f32 1.0, %v3138_v63  ;;  %v3256_v5 = vsub.f32 1.0, %v3136_v18  ;;  %v3019_v2 = vsub.f32 %v7761_v14, %v4556_v0 }
 0x293   : > { %3001 = vmatpush1.bf16.msra.mxu1 %v2912_v28  ;;  %v3260_v6 = vsub.f32 1.0, %v3140_v50  ;;  %v3253_v49 = vsub.f32 1.0, %v3133_v30  ;;  %v3135_v13 = vand.u32 2147483647, %v3015_v23  ;;  %2960 = vmatmul.mubr.bf16.vlgmr.msra.gmra.mrb[16].mxu0 %v4242_v3  ;;  %v3257_v54 = vsub.f32 1.0, %v3137_v10  ;;  %v7764_v23 = vld [vmem:[#allocation23_spill] sm:$0xff] }
 0x294   : > { %3741 = vmatprep.subr.bf16.mxu1 %v3624_v53  ;;  %v3374_v43 = vmax.f32 %v3254_v48, 0.0  ;;  %v3378_v15 = vmax.f32 %v3258_v24, 0.0  ;;  %v3376_v38 = vmax.f32 %v3256_v5, 0.0  ;;  %3699 = vmatpush1.bf16.msra.mxu0 %v3621_v1  ;;  %v3139_v41 = vand.u32 2147483647, %v3019_v2 }
 0x295   : > { %v3380_v51 = vmax.f32 %v3260_v6, 0.0  ;;  %v3373_v58 = vmax.f32 %v3253_v49, 0.0  ;;  %v3255_v40 = vsub.f32 1.0, %v3135_v13  ;;  %v3377_v14 = vmax.f32 %v3257_v54, 0.0 }
 0x296   : > { %3003 = vmatmul.mubr.bf16.vlgmr.msra.gmra.mrb[16].mxu1 %v4242_v3  ;;  %v3502_v63 = vmul.f32 %v3374_v43, %v5776_v37  ;;  %v3506_v18 = vmul.f32 %v3378_v15, %v5778_v59  ;;  %v3504_v11 = vmul.f32 %v3376_v38, %v5782_v39  ;;  %v3259_v50 = vsub.f32 1.0, %v3139_v41  ;;  %v7765_v37 = vld [vmem:[#allocation26_spill] sm:$0xff] }
 0x297   : > { %3742 = vmatpush1.bf16.msra.mxu1 %v3623_v33  ;;  %v3508_v53 = vmul.f32 %v3380_v51, %v5784_v56  ;;  %v3501_v28 = vmul.f32 %v3373_v58, %v5794_v8  ;;  %v3375_v30 = vmax.f32 %v3255_v40, 0.0  ;;  %v3505_v6 = vmul.f32 %v3377_v14, %v5796_v35 }
 0x298   : > { %v3626_v1 = vpack.c.bf16 %v3506_v18, %v3502_v63  ;;  %v3022_v3 = vsub.f32 %v7764_v23, %v7759_v61  ;;  %v3026_v48 = vsub.f32 %v7765_v37, %v7759_v61  ;;  %v3379_v24 = vmax.f32 %v3259_v50, 0.0  ;;  %v7766_v50 = vld [vmem:[#allocation19_spill] sm:$0xff] }
 0x299   : > { %v3628_v59 = vpack.c.bf16 %v3508_v53, %v3504_v11  ;;  %v3503_v39 = vmul.f32 %v3375_v30, %v5802_v4  ;;  %v3024_v56 = vsub.f32 %v7764_v23, %v7762_v45  ;;  %v3625_v8 = vpack.c.bf16 %v3505_v6, %v3501_v28 }
 0x29a   : > { %3700 = vmatprep.subr.bf16.mxu0 %v3626_v1  ;;  %v3142_v33 = vand.u32 2147483647, %v3022_v3  ;;  %v3146_v5 = vand.u32 2147483647, %v3026_v48  ;;  %v3028_v35 = vsub.f32 %v7765_v37, %v7762_v45  ;;  %v3507_v10 = vmul.f32 %v3379_v24, %v5808_v26  ;;  %v7767_v1 = vld [vmem:[#allocation20_spill] sm:$0xff]  ;;  %v7768_v48 = vld [vmem:[#allocation22_spill] sm:$0xff] }
 0x29b   : > { %3743 = vmatprep.subr.bf16.mxu1 %v3628_v59  ;;  %v3144_v49 = vand.u32 2147483647, %v3024_v56  ;;  %v3021_v2 = vsub.f32 %v7764_v23, %v7763_v55  ;;  %v3025_v4 = vsub.f32 %v7765_v37, %v7763_v55  ;;  %3701 = vmatpush1.bf16.msra.mxu0 %v3625_v8  ;;  %v3023_v38 = vsub.f32 %v7764_v23, %v4556_v0 }
 0x29c   : > { %v3262_v13 = vsub.f32 1.0, %v3142_v33  ;;  %v3266_v43 = vsub.f32 1.0, %v3146_v5  ;;  %v3148_v15 = vand.u32 2147483647, %v3028_v35  ;;  %v3627_v54 = vpack.c.bf16 %v3507_v10, %v3503_v39  ;;  %v7769_v33 = vld [vmem:[#allocation18_spill] sm:$0xff] }
 0x29d   : > { %v3264_v51 = vsub.f32 1.0, %v3144_v49  ;;  %v3141_v58 = vand.u32 2147483647, %v3021_v2  ;;  %v3145_v41 = vand.u32 2147483647, %v3025_v4  ;;  %v3027_v18 = vsub.f32 %v7765_v37, %v4556_v0  ;;  %v7770_v35 = vld [vmem:[#allocation34_spill] sm:$0xff] }
 0x29e   : > { %v3382_v40 = vmax.f32 %v3262_v13, 0.0  ;;  %v3386_v26 = vmax.f32 %v3266_v43, 0.0  ;;  %v3268_v63 = vsub.f32 1.0, %v3148_v15  ;;  %3744 = vmatpush1.bf16.msra.mxu1 %v3627_v54  ;;  %v3143_v28 = vand.u32 2147483647, %v3023_v38  ;;  %v7771_v49 = vld [vmem:[#allocation24_spill] sm:$0xff] }
 0x29f   : > { %v3384_v11 = vmax.f32 %v3264_v51, 0.0  ;;  %v3261_v14 = vsub.f32 1.0, %v3141_v58  ;;  %v3265_v53 = vsub.f32 1.0, %v3145_v41  ;;  %v3147_v3 = vand.u32 2147483647, %v3027_v18  ;;  %v7772_v4 = vld [vmem:[#allocation21_spill] sm:$0xff] }
 0x2a0   : > { %v3510_v30 = vmul.f32 %v3382_v40, %v7766_v50  ;;  %v3514_v6 = vmul.f32 %v3386_v26, %v7767_v1  ;;  %v3388_v23 = vmax.f32 %v3268_v63, 0.0  ;;  %v3263_v56 = vsub.f32 1.0, %v3143_v28  ;;  %v7773_v15 = vld [vmem:[#allocation37_spill] sm:$0xff] }
 0x2a1   : > { %v3512_v59 = vmul.f32 %v3384_v11, %v7768_v48  ;;  %v3381_v24 = vmax.f32 %v3261_v14, 0.0  ;;  %v3385_v39 = vmax.f32 %v3265_v53, 0.0  ;;  %v3267_v37 = vsub.f32 1.0, %v3147_v3  ;;  %v7774_v26 = vld [vmem:[#allocation25_spill] sm:$0xff]  ;;  %v7775_v14 = vld [vmem:[#allocation27_spill] sm:$0xff] }
 0x2a2   : > { %v3630_v8 = vpack.c.bf16 %v3514_v6, %v3510_v30  ;;  %v3516_v5 = vmul.f32 %v3388_v23, %v7769_v33  ;;  %v3030_v10 = vsub.f32 %v7770_v35, %v7759_v61  ;;  %v3383_v43 = vmax.f32 %v3263_v56, 0.0 }
 0x2a3   : > { %v3509_v2 = vmul.f32 %v3381_v24, %v7771_v49  ;;  %v3513_v13 = vmul.f32 %v3385_v39, %v7772_v4  ;;  %v3034_v38 = vsub.f32 %v7773_v15, %v7759_v61  ;;  %v3387_v51 = vmax.f32 %v3267_v37, 0.0  ;;  %v7776_v37 = vld [vmem:[#allocation28_spill] sm:$0xff] }
 0x2a4   : > { %3702 = vmatprep.subr.bf16.mxu0 %v3630_v8  ;;  %v3632_v54 = vpack.c.bf16 %v3516_v5, %v3512_v59  ;;  %v3150_v58 = vand.u32 2147483647, %v3030_v10  ;;  %v3032_v41 = vsub.f32 %v7770_v35, %v7762_v45  ;;  %v3511_v63 = vmul.f32 %v3383_v43, %v7774_v26 }
 0x2a5   : > { %v3629_v40 = vpack.c.bf16 %v3513_v13, %v3509_v2  ;;  %v3154_v18 = vand.u32 2147483647, %v3034_v38  ;;  %v3036_v11 = vsub.f32 %v7773_v15, %v7762_v45  ;;  %v3515_v53 = vmul.f32 %v3387_v51, %v7775_v14  ;;  %v7777_v13 = vld [vmem:[#allocation29_spill] sm:$0xff]  ;;  %v7779_v14 = vld [vmem:[#allocation30_spill] sm:$0xff] }
 0x2a6   : > { %3745 = vmatprep.subr.bf16.mxu1 %v3632_v54  ;;  %v3270_v28 = vsub.f32 1.0, %v3150_v58  ;;  %v3152_v50 = vand.u32 2147483647, %v3032_v41  ;;  %v3029_v30 = vsub.f32 %v7770_v35, %v7763_v55  ;;  %v3033_v23 = vsub.f32 %v7773_v15, %v7763_v55 }
 0x2a7   : > { %3703 = vmatpush1.bf16.msra.mxu0 %v3629_v40  ;;  %v3274_v1 = vsub.f32 1.0, %v3154_v18  ;;  %v3156_v6 = vand.u32 2147483647, %v3036_v11  ;;  %v3031_v3 = vsub.f32 %v7770_v35, %v4556_v0  ;;  %v3631_v48 = vpack.c.bf16 %v3515_v53, %v3511_v63  ;;  %v7778_v40 = vld [vmem:[#allocation46_spill] sm:$0xff] }
 0x2a8   : > { %v3390_v59 = vmax.f32 %v3270_v28, 0.0  ;;  %v3272_v24 = vsub.f32 1.0, %v3152_v50  ;;  %v3149_v39 = vand.u32 2147483647, %v3029_v30  ;;  %v3153_v33 = vand.u32 2147483647, %v3033_v23 }
 0x2a9   : > { %v3394_v56 = vmax.f32 %v3274_v1, 0.0  ;;  %v3276_v8 = vsub.f32 1.0, %v3156_v6  ;;  %v3035_v5 = vsub.f32 %v7773_v15, %v4556_v0  ;;  %3746 = vmatpush1.bf16.msra.mxu1 %v3631_v48  ;;  %v3151_v4 = vand.u32 2147483647, %v3031_v3  ;;  %v7780_v50 = vld [vmem:[#allocation49_spill] sm:$0xff] }
 0x2aa   : > { %v3518_v10 = vmul.f32 %v3390_v59, %v7776_v37  ;;  %v3392_v49 = vmax.f32 %v3272_v24, 0.0  ;;  %v3269_v2 = vsub.f32 1.0, %v3149_v39  ;;  %v3273_v35 = vsub.f32 1.0, %v3153_v33  ;;  %v7782_v59 = vld [vmem:[#allocation33_spill] sm:$0xff]  ;;  %v7783_v33 = vld [vmem:[#allocation35_spill] sm:$0xff] }
 0x2ab   : > { %v3522_v43 = vmul.f32 %v3394_v56, %v7777_v13  ;;  %v3396_v38 = vmax.f32 %v3276_v8, 0.0  ;;  %v3155_v54 = vand.u32 2147483647, %v3035_v5  ;;  %v3271_v41 = vsub.f32 1.0, %v3151_v4 }
 0x2ac   : > { %v3520_v51 = vmul.f32 %v3392_v49, %v5878_v25  ;;  %v3389_v58 = vmax.f32 %v3269_v2, 0.0  ;;  %v3038_v26 = vsub.f32 %v7778_v40, %v7759_v61  ;;  %v3393_v18 = vmax.f32 %v3273_v35, 0.0  ;;  %v7781_v25 = vld [vmem:[#allocation32_spill] sm:$0xff] }
 0x2ad   : > { %v3634_v63 = vpack.c.bf16 %v3522_v43, %v3518_v10  ;;  %v3524_v15 = vmul.f32 %v3396_v38, %v5880_v46  ;;  %v3275_v11 = vsub.f32 1.0, %v3155_v54  ;;  %v3391_v28 = vmax.f32 %v3271_v41, 0.0 }
 0x2ae   : > { %v3517_v53 = vmul.f32 %v3389_v58, %v7779_v14  ;;  %v3042_v30 = vsub.f32 %v7780_v50, %v7759_v61  ;;  %v3158_v1 = vand.u32 2147483647, %v3038_v26  ;;  %v3521_v23 = vmul.f32 %v3393_v18, %v7781_v25  ;;  %v7784_v14 = vld [vmem:[#allocation31_spill] sm:$0xff] }
 0x2af   : > { %3704 = vmatprep.subr.bf16.mxu0 %v3634_v63  ;;  %v3636_v6 = vpack.c.bf16 %v3524_v15, %v3520_v51  ;;  %v3395_v3 = vmax.f32 %v3275_v11, 0.0  ;;  %v3040_v48 = vsub.f32 %v7778_v40, %v7762_v45  ;;  %v3519_v24 = vmul.f32 %v3391_v28, %v7782_v59  ;;  %v7787_v59 = vld [vmem:[#allocation38_spill] sm:$0xff] }
 0x2b0   : > { %v3162_v46 = vand.u32 2147483647, %v3042_v30  ;;  %v3278_v39 = vsub.f32 1.0, %v3158_v1  ;;  %v3044_v56 = vsub.f32 %v7780_v50, %v7762_v45  ;;  %v3633_v8 = vpack.c.bf16 %v3521_v23, %v3517_v53  ;;  %v7785_v1 = vld [vmem:[#allocation57_spill] sm:$0xff] }
 0x2b1   : > { %3747 = vmatprep.subr.bf16.mxu1 %v3636_v6  ;;  %v3523_v5 = vmul.f32 %v3395_v3, %v7783_v33  ;;  %v3160_v37 = vand.u32 2147483647, %v3040_v48  ;;  %v3037_v10 = vsub.f32 %v7778_v40, %v7763_v55  ;;  %v3041_v13 = vsub.f32 %v7780_v50, %v7763_v55 }
 0x2b2   : > { %v3282_v49 = vsub.f32 1.0, %v3162_v46  ;;  %v3398_v2 = vmax.f32 %v3278_v39, 0.0  ;;  %v3164_v4 = vand.u32 2147483647, %v3044_v56  ;;  %3705 = vmatpush1.bf16.msra.mxu0 %v3633_v8  ;;  %v3039_v54 = vsub.f32 %v7778_v40, %v4556_v0  ;;  %v7786_v40 = vld [vmem:[#allocation36_spill] sm:$0xff]  ;;  %v7789_v56 = vld [vmem:[#allocation39_spill] sm:$0xff] }
 0x2b3   : > { %v3635_v43 = vpack.c.bf16 %v3523_v5, %v3519_v24  ;;  %v3280_v38 = vsub.f32 1.0, %v3160_v37  ;;  %v3157_v35 = vand.u32 2147483647, %v3037_v10  ;;  %v3161_v26 = vand.u32 2147483647, %v3041_v13  ;;  %v7788_v39 = vld [vmem:[#allocation60_spill] sm:$0xff] }
 0x2b4   : > { %v3402_v51 = vmax.f32 %v3282_v49, 0.0  ;;  %v3526_v58 = vmul.f32 %v3398_v2, %v5916_v22  ;;  %v3284_v41 = vsub.f32 1.0, %v3164_v4  ;;  %v3043_v18 = vsub.f32 %v7780_v50, %v4556_v0  ;;  %v7790_v49 = vld [vmem:[#allocation41_spill] sm:$0xff] }
 0x2b5   : > { %3748 = vmatpush1.bf16.msra.mxu1 %v3635_v43  ;;  %v3400_v63 = vmax.f32 %v3280_v38, 0.0  ;;  %v3277_v15 = vsub.f32 1.0, %v3157_v35  ;;  %v3159_v11 = vand.u32 2147483647, %v3039_v54  ;;  %v3281_v30 = vsub.f32 1.0, %v3161_v26  ;;  %v7791_v35 = vld [vmem:[#allocation42_spill] sm:$0xff] }
 0x2b6   : > { %v3530_v53 = vmul.f32 %v3402_v51, %v7784_v14  ;;  %v3404_v28 = vmax.f32 %v3284_v41, 0.0  ;;  %v3046_v6 = vsub.f32 %v7785_v1, %v7759_v61  ;;  %v3163_v22 = vand.u32 2147483647, %v3043_v18  ;;  %v4247_v43 = vld [vmem:[%s7057_s2 + $0x24] ss:$8 sps:$4 sm:$0xff]   ;;  %v7792_v18 = vld [vmem:[#allocation40_spill] sm:$0xff] }
 0x2b7   : > { %v3528_v25 = vmul.f32 %v3400_v63, %v7786_v40  ;;  %v3397_v23 = vmax.f32 %v3277_v15, 0.0  ;;  %v3279_v3 = vsub.f32 1.0, %v3159_v11  ;;  %v3401_v46 = vmax.f32 %v3281_v30, 0.0  ;;  %3730 = vmatprep.mubr.bf16.mxu0 %v4247_v43  ;;  %3773 = vmatprep.mubr.bf16.mxu1 %v4247_v43  ;;  %v6611_v30 = vpop.f32.mrb[0].mxu0 }
 0x2b8   : > { %v3638_v48 = vpack.c.bf16 %v3530_v53, %v3526_v58  ;;  %v3532_v24 = vmul.f32 %v3404_v28, %v7787_v59  ;;  %v3050_v50 = vsub.f32 %v7788_v39, %v7759_v61  ;;  %v3283_v33 = vsub.f32 1.0, %v3163_v22 }
 0x2b9   : > { %v3525_v8 = vmul.f32 %v3397_v23, %v7789_v56  ;;  %v3399_v5 = vmax.f32 %v3279_v3, 0.0  ;;  %v3166_v37 = vand.u32 2147483647, %v3046_v6  ;;  %v3529_v2 = vmul.f32 %v3401_v46, %v7790_v49  ;;  %v6613_v6 = vpop.f32.mrb[0].mxu1  ;;  %v6617_v3 = vpop.f32.mrb[1].mxu0 }
 0x2ba   : > { %3706 = vmatprep.subr.bf16.mxu0 %v3638_v48  ;;  %v3640_v10 = vpack.c.bf16 %v3532_v24, %v3528_v25  ;;  %v3170_v4 = vand.u32 2147483647, %v3050_v50  ;;  %v3048_v13 = vsub.f32 %v7785_v1, %v7762_v45  ;;  %v3403_v38 = vmax.f32 %v3283_v33, 0.0  ;;  %v6619_v48 = vpop.f32.mrb[1].mxu1  ;;  %v7793_v24 = vld [vmem:[#allocation43_spill] sm:$0xff] }
 0x2bb   : > { %v3527_v54 = vmul.f32 %v3399_v5, %v7791_v35  ;;  %v3286_v51 = vsub.f32 1.0, %v3166_v37  ;;  %v3052_v58 = vsub.f32 %v7788_v39, %v7762_v45  ;;  %v3637_v41 = vpack.c.bf16 %v3529_v2, %v3525_v8  ;;  %v6622_v8 = vpop.f32.mrb[2].mxu0  ;;  %v6624_v33 = vpop.f32.mrb[2].mxu1  ;;  %v7794_v5 = vld [vmem:[#allocation45_spill] sm:$0xff] }
 0x2bc   : > { %3749 = vmatprep.subr.bf16.mxu1 %v3640_v10  ;;  %v3290_v26 = vsub.f32 1.0, %v3170_v4  ;;  %v3168_v63 = vand.u32 2147483647, %v3048_v13  ;;  %v3045_v15 = vsub.f32 %v7785_v1, %v7763_v55  ;;  %v3531_v11 = vmul.f32 %v3403_v38, %v7792_v18  ;;  %v6629_v2 = vpop.f32.mrb[3].mxu0  ;;  %v6631_v4 = vpop.f32.mrb[3].mxu1  ;;  %v7795_v35 = vld [vmem:[#allocation69_spill] sm:$0xff] }
 0x2bd   : > { %v3406_v14 = vmax.f32 %v3286_v51, 0.0  ;;  %v3172_v53 = vand.u32 2147483647, %v3052_v58  ;;  %v3049_v28 = vsub.f32 %v7788_v39, %v7763_v55  ;;  %3707 = vmatpush1.bf16.msra.mxu0 %v3637_v41  ;;  %v3047_v22 = vsub.f32 %v7785_v1, %v4556_v0  ;;  %v6635_v51 = vpop.f32.mrb[4].mxu0  ;;  %v6637_v58 = vpop.f32.mrb[4].mxu1 }
 0x2be   : > { %v3410_v40 = vmax.f32 %v3290_v26, 0.0  ;;  %v3288_v25 = vsub.f32 1.0, %v3168_v63  ;;  %v3165_v23 = vand.u32 2147483647, %v3045_v15  ;;  %v3639_v59 = vpack.c.bf16 %v3531_v11, %v3527_v54  ;;  %7796 = vst [vmem:[#allocation126_spill] sm:$0xff] %v6635_v51  ;;  %7797 = vst [vmem:[#allocation127_spill] sm:$0xff] %v6637_v58 }
 0x2bf   : > { %v3534_v46 = vmul.f32 %v3406_v14, %v7793_v24  ;;  %v3292_v50 = vsub.f32 1.0, %v3172_v53  ;;  %v3169_v56 = vand.u32 2147483647, %v3049_v28  ;;  %v3051_v1 = vsub.f32 %v7788_v39, %v4556_v0  ;;  %v7798_v26 = vld [vmem:[#allocation44_spill] sm:$0xff]  ;;  %v6640_v18 = vpop.f32.mrb[5].mxu0  ;;  %v6642_v11 = vpop.f32.mrb[5].mxu1 }
 0x2c0   : > { %v3538_v37 = vmul.f32 %v3410_v40, %v7794_v5  ;;  %v3408_v10 = vmax.f32 %v3288_v25, 0.0  ;;  %v3285_v49 = vsub.f32 1.0, %v3165_v23  ;;  %3750 = vmatpush1.bf16.msra.mxu1 %v3639_v59  ;;  %v3167_v38 = vand.u32 2147483647, %v3047_v22  ;;  %7799 = vst [vmem:[#allocation129_spill] sm:$0xff] %v6640_v18  ;;  %7800 = vst [vmem:[#allocation130_spill] sm:$0xff] %v6642_v11 }
 0x2c1   : > { %v3412_v13 = vmax.f32 %v3292_v50, 0.0  ;;  %v3289_v43 = vsub.f32 1.0, %v3169_v56  ;;  %v3054_v54 = vsub.f32 %v7795_v35, %v7759_v61  ;;  %v3171_v39 = vand.u32 2147483647, %v3051_v1  ;;  %v7801_v14 = vld [vmem:[#allocation47_spill] sm:$0xff]  ;;  %v7802_v25 = vld [vmem:[#allocation72_spill] sm:$0xff] }
 0x2c2   : > { %v3642_v41 = vpack.c.bf16 %v3538_v37, %v3534_v46  ;;  %v3536_v63 = vmul.f32 %v3408_v10, %v7798_v26  ;;  %v3405_v15 = vmax.f32 %v3285_v49, 0.0  ;;  %v3287_v40 = vsub.f32 1.0, %v3167_v38  ;;  %v6647_v22 = vpop.f32.mrb[6].mxu0  ;;  %v6649_v59 = vpop.f32.mrb[6].mxu1  ;;  %v7805_v24 = vld [vmem:[#allocation48_spill] sm:$0xff]  ;;  %v7808_v1 = vld [vmem:[#allocation50_spill] sm:$0xff] }
 0x2c3   : > { %v3540_v53 = vmul.f32 %v3412_v13, %v7801_v14  ;;  %v3409_v28 = vmax.f32 %v3289_v43, 0.0  ;;  %v3058_v23 = vsub.f32 %v7802_v25, %v7759_v61  ;;  %7803 = vst [vmem:[#allocation132_spill] sm:$0xff] %v6647_v22  ;;  %7804 = vst [vmem:[#allocation133_spill] sm:$0xff] %v6649_v59  ;;  %v3291_v50 = vsub.f32 1.0, %v3171_v39  ;;  %v6654_v37 = vpop.f32.mrb[7].mxu0  ;;  %v6656_v10 = vpop.f32.mrb[7].mxu1 }
 0x2c4   : > { %3708 = vmatprep.subr.bf16.mxu0 %v3642_v41  ;;  %v3533_v46 = vmul.f32 %v3405_v15, %v7805_v24  ;;  %v3174_v56 = vand.u32 2147483647, %v3054_v54  ;;  %v3056_v5 = vsub.f32 %v7795_v35, %v7762_v45  ;;  %7806 = vst [vmem:[#allocation134_spill] sm:$0xff] %v6654_v37  ;;  %7807 = vst [vmem:[#allocation131_spill] sm:$0xff] %v6656_v10  ;;  %v3407_v43 = vmax.f32 %v3287_v40, 0.0  ;;  %v6659_v26 = vpop.f32.mrb[8].mxu0 }
 0x2c5   : > { %v3644_v49 = vpack.c.bf16 %v3540_v53, %v3536_v63  ;;  %v3537_v13 = vmul.f32 %v3409_v28, %v7808_v1  ;;  %v3178_v38 = vand.u32 2147483647, %v3058_v23  ;;  %7809 = vst [vmem:[#allocation136_spill] sm:$0xff] %v6659_v26  ;;  %v6661_v14 = vpop.f32.mrb[8].mxu1  ;;  %v3411_v41 = vmax.f32 %v3291_v50, 0.0  ;;  %v6665_v24 = vpop.f32.mrb[9].mxu0 }
 0x2c6   : > { %7810 = vst [vmem:[#allocation135_spill] sm:$0xff] %v6661_v14  ;;  %v3294_v15 = vsub.f32 1.0, %v3174_v56  ;;  %v3060_v54 = vsub.f32 %v7802_v25, %v7762_v45  ;;  %v3176_v39 = vand.u32 2147483647, %v3056_v5  ;;  %7811 = vst [vmem:[#allocation137_spill] sm:$0xff] %v6665_v24  ;;  %v6667_v59 = vpop.f32.mrb[9].mxu1  ;;  %v3053_v23 = vsub.f32 %v7795_v35, %v7763_v55 }
 0x2c7   : > { %7812 = vst [vmem:[#allocation138_spill] sm:$0xff] %v6667_v59  ;;  %3751 = vmatprep.subr.bf16.mxu1 %v3644_v49  ;;  %v3641_v63 = vpack.c.bf16 %v3537_v13, %v3533_v46  ;;  %v7813_v53 = vld [vmem:[#allocation51_spill] sm:$0xff]  ;;  %v3298_v40 = vsub.f32 1.0, %v3178_v38  ;;  %v6672_v1 = vpop.f32.mrb[10].mxu0  ;;  %v6674_v50 = vpop.f32.mrb[10].mxu1  ;;  %v3539_v56 = vmul.f32 %v3411_v41, %v6005_v21  ;;  %v3057_v49 = vsub.f32 %v7802_v25, %v7763_v55 }
 0x2c8   : > { %v3535_v28 = vmul.f32 %v3407_v43, %v7813_v53  ;;  %7814 = vst [vmem:[#allocation141_spill] sm:$0xff] %v6672_v1  ;;  %7815 = vst [vmem:[#allocation142_spill] sm:$0xff] %v6674_v50  ;;  %v3414_v14 = vmax.f32 %v3294_v15, 0.0  ;;  %v3180_v5 = vand.u32 2147483647, %v3060_v54  ;;  %v3296_v26 = vsub.f32 1.0, %v3176_v39 }
 0x2c9   : > { %v6677_v24 = vpop.f32.mrb[11].mxu0  ;;  %v6679_v59 = vpop.f32.mrb[11].mxu1  ;;  %3709 = vmatpush1.bf16.msra.mxu0 %v3641_v63  ;;  %v3418_v46 = vmax.f32 %v3298_v40, 0.0  ;;  %v3173_v13 = vand.u32 2147483647, %v3053_v23  ;;  %v3055_v43 = vsub.f32 %v7795_v35, %v4556_v0  ;;  %v7818_v40 = vld [vmem:[#allocation52_spill] sm:$0xff]  ;;  %v3059_v35 = vsub.f32 %v7802_v25, %v4556_v0 }
 0x2ca   : > { %7816 = vst [vmem:[#allocation143_spill] sm:$0xff] %v6677_v24  ;;  %7817 = vst [vmem:[#allocation144_spill] sm:$0xff] %v6679_v59  ;;  %v6685_v38 = vpop.f32.mrb[12].mxu0  ;;  %v6687_v53 = vpop.f32.mrb[12].mxu1  ;;  %v3643_v21 = vpack.c.bf16 %v3539_v56, %v3535_v28  ;;  %v3542_v41 = vmul.f32 %v3414_v14, %v6011_v52  ;;  %v3300_v15 = vsub.f32 1.0, %v3180_v5  ;;  %v3416_v54 = vmax.f32 %v3296_v26, 0.0 }
 0x2cb   : > { %v6690_v39 = vpop.f32.mrb[13].mxu0  ;;  %v6692_v63 = vpop.f32.mrb[13].mxu1  ;;  %v3546_v59 = vmul.f32 %v3418_v46, %v7818_v40  ;;  %v3177_v50 = vand.u32 2147483647, %v3057_v49  ;;  %v3293_v23 = vsub.f32 1.0, %v3173_v13  ;;  %v7819_v52 = vld [vmem:[#allocation53_spill] sm:$0xff] }
 0x2cc   : > { %v6697_v24 = vpop.f32.mrb[14].mxu0  ;;  %v6699_v1 = vpop.f32.mrb[14].mxu1  ;;  %3752 = vmatpush1.bf16.msra.mxu1 %v3643_v21  ;;  %v3420_v28 = vmax.f32 %v3300_v15, 0.0  ;;  %v3544_v14 = vmul.f32 %v3416_v54, %v7819_v52  ;;  %v3175_v26 = vand.u32 2147483647, %v3055_v43  ;;  %v7820_v56 = vld [vmem:[#allocation79_spill] sm:$0xff] }
 0x2cd   : > { %v3062_v5 = vsub.f32 %v7820_v56, %v7759_v61  ;;  %v6704_v10 = vpop.f32.mrb[15].mxu0  ;;  %v6706_v46 = vpop.f32.mrb[15].mxu1  ;;  %v3646_v49 = vpack.c.bf16 %v3546_v59, %v3542_v41  ;;  %v3297_v13 = vsub.f32 1.0, %v3177_v50  ;;  %v3413_v40 = vmax.f32 %v3293_v23, 0.0  ;;  %v7821_v37 = vld [vmem:[#allocation55_spill] sm:$0xff]  ;;  %v7822_v21 = vld [vmem:[#allocation82_spill] sm:$0xff] }
 0x2ce   : > { %v3179_v25 = vand.u32 2147483647, %v3059_v35  ;;  %v3548_v11 = vmul.f32 %v3420_v28, %v7821_v37  ;;  %v3295_v22 = vsub.f32 1.0, %v3175_v26  ;;  %v3066_v15 = vsub.f32 %v7822_v21, %v7759_v61  ;;  %v7823_v54 = vld [vmem:[#allocation56_spill] sm:$0xff]  ;;  %v7824_v23 = vld [vmem:[#allocation54_spill] sm:$0xff] }
 0x2cf   : > { %v3182_v58 = vand.u32 2147483647, %v3062_v5  ;;  %3710 = vmatprep.subr.bf16.mxu0 %v3646_v49  ;;  %v3417_v43 = vmax.f32 %v3297_v13, 0.0  ;;  %v3541_v52 = vmul.f32 %v3413_v40, %v7823_v54  ;;  %v3064_v51 = vsub.f32 %v7820_v56, %v7762_v45  ;;  %v7825_v5 = vld [vmem:[#allocation58_spill] sm:$0xff] }
 0x2d0   : > { %v3299_v18 = vsub.f32 1.0, %v3179_v25  ;;  %v3648_v7 = vpack.c.bf16 %v3548_v11, %v3544_v14  ;;  %v3415_v59 = vmax.f32 %v3295_v22, 0.0  ;;  %v3186_v50 = vand.u32 2147483647, %v3066_v15  ;;  %v7826_v11 = vld [vmem:[#allocation59_spill] sm:$0xff] }
 0x2d1   : > { %v3302_v41 = vsub.f32 1.0, %v3182_v58  ;;  %v3545_v35 = vmul.f32 %v3417_v43, %v7824_v23  ;;  %v3068_v28 = vsub.f32 %v7822_v21, %v7762_v45  ;;  %v3184_v26 = vand.u32 2147483647, %v3064_v51  ;;  %v7827_v43 = vld [vmem:[#allocation61_spill] sm:$0xff] }
 0x2d2   : > { %v3419_v37 = vmax.f32 %v3299_v18, 0.0  ;;  %3753 = vmatprep.subr.bf16.mxu1 %v3648_v7  ;;  %v3543_v49 = vmul.f32 %v3415_v59, %v7825_v5  ;;  %v3306_v13 = vsub.f32 1.0, %v3186_v50  ;;  %v3061_v25 = vsub.f32 %v7820_v56, %v7763_v55  ;;  %v7828_v5 = vld [vmem:[#allocation62_spill] sm:$0xff] }
 0x2d3   : > { %v3422_v40 = vmax.f32 %v3302_v41, 0.0  ;;  %v3645_v54 = vpack.c.bf16 %v3545_v35, %v3541_v52  ;;  %v3188_v14 = vand.u32 2147483647, %v3068_v28  ;;  %v3304_v58 = vsub.f32 1.0, %v3184_v26 }
 0x2d4   : > { %v3547_v22 = vmul.f32 %v3419_v37, %v7826_v11  ;;  %v3426_v15 = vmax.f32 %v3306_v13, 0.0  ;;  %v3065_v23 = vsub.f32 %v7822_v21, %v7763_v55  ;;  %v3181_v51 = vand.u32 2147483647, %v3061_v25  ;;  %v7829_v13 = vld [vmem:[#allocation64_spill] sm:$0xff]  ;;  %v7830_v25 = vld [vmem:[#allocation91_spill] sm:$0xff] }
 0x2d5   : > { %v3550_v18 = vmul.f32 %v3422_v40, %v7827_v43  ;;  %3711 = vmatpush1.bf16.msra.mxu0 %v3645_v54  ;;  %v3308_v59 = vsub.f32 1.0, %v3188_v14  ;;  %v3424_v50 = vmax.f32 %v3304_v58, 0.0  ;;  %v3063_v41 = vsub.f32 %v7820_v56, %v4556_v0  ;;  %v7831_v56 = vld [vmem:[#allocation65_spill] sm:$0xff] }
 0x2d6   : > { %v3647_v7 = vpack.c.bf16 %v3547_v22, %v3543_v49  ;;  %v3554_v52 = vmul.f32 %v3426_v15, %v7828_v5  ;;  %v3185_v35 = vand.u32 2147483647, %v3065_v23  ;;  %v3301_v37 = vsub.f32 1.0, %v3181_v51  ;;  %v7832_v23 = vld [vmem:[#allocation94_spill] sm:$0xff] }
 0x2d7   : > { %v3067_v28 = vsub.f32 %v7822_v21, %v4556_v0  ;;  %v3428_v26 = vmax.f32 %v3308_v59, 0.0  ;;  %v3552_v40 = vmul.f32 %v3424_v50, %v7829_v13  ;;  %v3183_v11 = vand.u32 2147483647, %v3063_v41 }
 0x2d8   : > { %3754 = vmatpush1.bf16.msra.mxu1 %v3647_v7  ;;  %v3070_v49 = vsub.f32 %v7830_v25, %v7759_v61  ;;  %v3650_v54 = vpack.c.bf16 %v3554_v52, %v3550_v18  ;;  %v3305_v22 = vsub.f32 1.0, %v3185_v35  ;;  %v3421_v14 = vmax.f32 %v3301_v37, 0.0  ;;  %v7833_v7 = vld [vmem:[#allocation66_spill] sm:$0xff]  ;;  %v7834_v37 = vld [vmem:[#allocation63_spill] sm:$0xff] }
 0x2d9   : > { %v3187_v58 = vand.u32 2147483647, %v3067_v28  ;;  %v3556_v43 = vmul.f32 %v3428_v26, %v7831_v56  ;;  %v3303_v15 = vsub.f32 1.0, %v3183_v11  ;;  %v3074_v51 = vsub.f32 %v7832_v23, %v7759_v61 }
 0x2da   : > { %v3190_v5 = vand.u32 2147483647, %v3070_v49  ;;  %3712 = vmatprep.subr.bf16.mxu0 %v3650_v54  ;;  %v3425_v21 = vmax.f32 %v3305_v22, 0.0  ;;  %v3549_v59 = vmul.f32 %v3421_v14, %v7833_v7  ;;  %v3072_v41 = vsub.f32 %v7830_v25, %v7762_v45  ;;  %v7835_v49 = vld [vmem:[#allocation68_spill] sm:$0xff] }
 0x2db   : > { %v3307_v50 = vsub.f32 1.0, %v3187_v58  ;;  %v3652_v13 = vpack.c.bf16 %v3556_v43, %v3552_v40  ;;  %v3423_v18 = vmax.f32 %v3303_v15, 0.0  ;;  %v3194_v52 = vand.u32 2147483647, %v3074_v51 }
 0x2dc   : > { %v3310_v35 = vsub.f32 1.0, %v3190_v5  ;;  %v3553_v28 = vmul.f32 %v3425_v21, %v7834_v37  ;;  %v3076_v11 = vsub.f32 %v7832_v23, %v7762_v45  ;;  %v3192_v56 = vand.u32 2147483647, %v3072_v41  ;;  %v7836_v5 = vld [vmem:[#allocation67_spill] sm:$0xff]  ;;  %v7837_v37 = vld [vmem:[#allocation70_spill] sm:$0xff] }
 0x2dd   : > { %v3427_v26 = vmax.f32 %v3307_v50, 0.0  ;;  %3755 = vmatprep.subr.bf16.mxu1 %v3652_v13  ;;  %v3551_v54 = vmul.f32 %v3423_v18, %v7835_v49  ;;  %v3314_v22 = vsub.f32 1.0, %v3194_v52  ;;  %v3069_v58 = vsub.f32 %v7830_v25, %v7763_v55 }
 0x2de   : > { %v3430_v14 = vmax.f32 %v3310_v35, 0.0  ;;  %v3649_v7 = vpack.c.bf16 %v3553_v28, %v3549_v59  ;;  %v3196_v43 = vand.u32 2147483647, %v3076_v11  ;;  %v3312_v15 = vsub.f32 1.0, %v3192_v56  ;;  %v7838_v56 = vld [vmem:[#allocation71_spill] sm:$0xff] }
 0x2df   : > { %v3555_v40 = vmul.f32 %v3427_v26, %v6101_v16  ;;  %v3434_v51 = vmax.f32 %v3314_v22, 0.0  ;;  %v3073_v50 = vsub.f32 %v7832_v23, %v7763_v55  ;;  %v3189_v41 = vand.u32 2147483647, %v3069_v58 }
 0x2e0   : > { %v3558_v21 = vmul.f32 %v3430_v14, %v7836_v5  ;;  %3713 = vmatpush1.bf16.msra.mxu0 %v3649_v7  ;;  %v3316_v18 = vsub.f32 1.0, %v3196_v43  ;;  %v3432_v52 = vmax.f32 %v3312_v15, 0.0  ;;  %v3071_v35 = vsub.f32 %v7830_v25, %v4556_v0  ;;  %v7839_v14 = vld [vmem:[#allocation102_spill] sm:$0xff]  ;;  %v7840_v25 = vld [vmem:[#allocation73_spill] sm:$0xff] }
 0x2e1   : > { %v3651_v13 = vpack.c.bf16 %v3555_v40, %v3551_v54  ;;  %v3562_v59 = vmul.f32 %v3434_v51, %v7837_v37  ;;  %v3193_v28 = vand.u32 2147483647, %v3073_v50  ;;  %v3309_v16 = vsub.f32 1.0, %v3189_v41  ;;  %v7841_v5 = vld [vmem:[#allocation105_spill] sm:$0xff] }
 0x2e2   : > { %v3075_v26 = vsub.f32 %v7832_v23, %v4556_v0  ;;  %v3436_v11 = vmax.f32 %v3316_v18, 0.0  ;;  %v3560_v49 = vmul.f32 %v3432_v52, %v7838_v56  ;;  %v3191_v22 = vand.u32 2147483647, %v3071_v35 }
 0x2e3   : > { %3756 = vmatpush1.bf16.msra.mxu1 %v3651_v13  ;;  %v3078_v54 = vsub.f32 %v7839_v14, %v7759_v61  ;;  %v3654_v58 = vpack.c.bf16 %v3562_v59, %v3558_v21  ;;  %v3313_v7 = vsub.f32 1.0, %v3193_v28  ;;  %v3429_v40 = vmax.f32 %v3309_v16, 0.0  ;;  %v7842_v13 = vld [vmem:[#allocation74_spill] sm:$0xff]  ;;  %v7843_v16 = vld [vmem:[#allocation75_spill] sm:$0xff] }
 0x2e4   : > { %v3195_v43 = vand.u32 2147483647, %v3075_v26  ;;  %v3564_v15 = vmul.f32 %v3436_v11, %v7840_v25  ;;  %v3311_v51 = vsub.f32 1.0, %v3191_v22  ;;  %v3082_v50 = vsub.f32 %v7841_v5, %v7759_v61 }
 0x2e5   : > { %v3198_v41 = vand.u32 2147483647, %v3078_v54  ;;  %3714 = vmatprep.subr.bf16.mxu0 %v3654_v58  ;;  %v3433_v23 = vmax.f32 %v3313_v7, 0.0  ;;  %v3557_v18 = vmul.f32 %v3429_v40, %v7842_v13  ;;  %v3080_v35 = vsub.f32 %v7839_v14, %v7762_v45  ;;  %v7844_v54 = vld [vmem:[#allocation76_spill] sm:$0xff] }
 0x2e6   : > { %v3315_v52 = vsub.f32 1.0, %v3195_v43  ;;  %v3656_v37 = vpack.c.bf16 %v3564_v15, %v3560_v49  ;;  %v3431_v21 = vmax.f32 %v3311_v51, 0.0  ;;  %v3202_v59 = vand.u32 2147483647, %v3082_v50  ;;  %v7845_v49 = vld [vmem:[#allocation77_spill] sm:$0xff] }
 0x2e7   : > { %v3318_v28 = vsub.f32 1.0, %v3198_v41  ;;  %v3561_v26 = vmul.f32 %v3433_v23, %v7843_v16  ;;  %v3084_v56 = vsub.f32 %v7841_v5, %v7762_v45  ;;  %v3200_v22 = vand.u32 2147483647, %v3080_v35  ;;  %v7846_v23 = vld [vmem:[#allocation78_spill] sm:$0xff]  ;;  %v7847_v16 = vld [vmem:[#allocation80_spill] sm:$0xff] }
 0x2e8   : > { %v3435_v11 = vmax.f32 %v3315_v52, 0.0  ;;  %3757 = vmatprep.subr.bf16.mxu1 %v3656_v37  ;;  %v3559_v58 = vmul.f32 %v3431_v21, %v7844_v54  ;;  %v3322_v7 = vsub.f32 1.0, %v3202_v59  ;;  %v3077_v43 = vsub.f32 %v7839_v14, %v7763_v55  ;;  %v7848_v54 = vld [vmem:[#allocation81_spill] sm:$0xff] }
 0x2e9   : > { %v3438_v40 = vmax.f32 %v3318_v28, 0.0  ;;  %v3653_v25 = vpack.c.bf16 %v3561_v26, %v3557_v18  ;;  %v3204_v51 = vand.u32 2147483647, %v3084_v56  ;;  %v3320_v50 = vsub.f32 1.0, %v3200_v22 }
 0x2ea   : > { %v3563_v15 = vmul.f32 %v3435_v11, %v7845_v49  ;;  %v3442_v41 = vmax.f32 %v3322_v7, 0.0  ;;  %v3081_v52 = vsub.f32 %v7841_v5, %v7763_v55  ;;  %v3197_v35 = vand.u32 2147483647, %v3077_v43  ;;  %v7849_v43 = vld [vmem:[#allocation117_spill] sm:$0xff] }
 0x2eb   : > { %v3566_v13 = vmul.f32 %v3438_v40, %v7846_v23  ;;  %3715 = vmatpush1.bf16.msra.mxu0 %v3653_v25  ;;  %v3324_v21 = vsub.f32 1.0, %v3204_v51  ;;  %v3440_v59 = vmax.f32 %v3320_v50, 0.0  ;;  %v3079_v28 = vsub.f32 %v7839_v14, %v4556_v0  ;;  %v7850_v14 = vld [vmem:[#allocation83_spill] sm:$0xff]  ;;  %v7851_v23 = vld [vmem:[#allocation116_spill] sm:$0xff] }
 0x2ec   : > { %v3655_v37 = vpack.c.bf16 %v3563_v15, %v3559_v58  ;;  %v3570_v18 = vmul.f32 %v3442_v41, %v7847_v16  ;;  %v3201_v26 = vand.u32 2147483647, %v3081_v52  ;;  %v3317_v11 = vsub.f32 1.0, %v3197_v35 }
 0x2ed   : > { %v3083_v56 = vsub.f32 %v7841_v5, %v4556_v0  ;;  %v3444_v22 = vmax.f32 %v3324_v21, 0.0  ;;  %v3568_v7 = vmul.f32 %v3440_v59, %v7848_v54  ;;  %v3199_v40 = vand.u32 2147483647, %v3079_v28 }
 0x2ee   : > { %3758 = vmatpush1.bf16.msra.mxu1 %v3655_v37  ;;  %v3086_v58 = vsub.f32 %v7849_v43, %v7759_v61  ;;  %v3658_v25 = vpack.c.bf16 %v3570_v18, %v3566_v13  ;;  %v3321_v49 = vsub.f32 1.0, %v3201_v26  ;;  %v3437_v15 = vmax.f32 %v3317_v11, 0.0  ;;  %v7852_v37 = vld [vmem:[#allocation84_spill] sm:$0xff]  ;;  %v7853_v11 = vld [vmem:[#allocation86_spill] sm:$0xff] }
 0x2ef   : > { %v3203_v51 = vand.u32 2147483647, %v3083_v56  ;;  %v3572_v50 = vmul.f32 %v3444_v22, %v7850_v14  ;;  %v3319_v41 = vsub.f32 1.0, %v3199_v40  ;;  %v3090_v52 = vsub.f32 %v7851_v23, %v7759_v61 }
 0x2f0   : > { %v3206_v35 = vand.u32 2147483647, %v3086_v58  ;;  %3716 = vmatprep.subr.bf16.mxu0 %v3658_v25  ;;  %v3441_v5 = vmax.f32 %v3321_v49, 0.0  ;;  %v3565_v21 = vmul.f32 %v3437_v15, %v7852_v37  ;;  %v3088_v28 = vsub.f32 %v7849_v43, %v7762_v45  ;;  %v7854_v58 = vld [vmem:[#allocation87_spill] sm:$0xff] }
 0x2f1   : > { %v3323_v59 = vsub.f32 1.0, %v3203_v51  ;;  %v3660_v16 = vpack.c.bf16 %v3572_v50, %v3568_v7  ;;  %v3439_v13 = vmax.f32 %v3319_v41, 0.0  ;;  %v3210_v18 = vand.u32 2147483647, %v3090_v52 }
 0x2f2   : > { %v3326_v26 = vsub.f32 1.0, %v3206_v35  ;;  %v3569_v56 = vmul.f32 %v3441_v5, %v7853_v11  ;;  %v3092_v54 = vsub.f32 %v7851_v23, %v7762_v45  ;;  %v3208_v40 = vand.u32 2147483647, %v3088_v28  ;;  %v7855_v35 = vld [vmem:[#allocation88_spill] sm:$0xff] }
 0x2f3   : > { %v3443_v22 = vmax.f32 %v3323_v59, 0.0  ;;  %3759 = vmatprep.subr.bf16.mxu1 %v3660_v16  ;;  %v3567_v25 = vmul.f32 %v3439_v13, %v7854_v58  ;;  %v3330_v49 = vsub.f32 1.0, %v3210_v18  ;;  %v3085_v51 = vsub.f32 %v7849_v43, %v7763_v55 }
 0x2f4   : > { %v3446_v15 = vmax.f32 %v3326_v26, 0.0  ;;  %v3657_v14 = vpack.c.bf16 %v3569_v56, %v3565_v21  ;;  %v3212_v50 = vand.u32 2147483647, %v3092_v54  ;;  %v3328_v41 = vsub.f32 1.0, %v3208_v40  ;;  %v7856_v26 = vld [vmem:[#allocation85_spill] sm:$0xff]  ;;  %v7857_v54 = vld [vmem:[#allocation90_spill] sm:$0xff] }
 0x2f5   : > { %v3571_v7 = vmul.f32 %v3443_v22, %v6197_v47  ;;  %v3450_v52 = vmax.f32 %v3330_v49, 0.0  ;;  %v3089_v37 = vsub.f32 %v7851_v23, %v7763_v55  ;;  %v3205_v59 = vand.u32 2147483647, %v3085_v51  ;;  %v7858_v49 = vld [vmem:[#allocation125_spill] sm:$0xff] }
 0x2f6   : > { %v3574_v5 = vmul.f32 %v3446_v15, %v7855_v35  ;;  %3717 = vmatpush1.bf16.msra.mxu0 %v3657_v14  ;;  %v3332_v16 = vsub.f32 1.0, %v3212_v50  ;;  %v3448_v13 = vmax.f32 %v3328_v41, 0.0  ;;  %v3087_v18 = vsub.f32 %v7849_v43, %v4556_v0  ;;  %v7859_v43 = vld [vmem:[#allocation89_spill] sm:$0xff] }
 0x2f7   : > { %v3659_v28 = vpack.c.bf16 %v3571_v7, %v3567_v25  ;;  %v3578_v21 = vmul.f32 %v3450_v52, %v7856_v26  ;;  %v3209_v11 = vand.u32 2147483647, %v3089_v37  ;;  %v3325_v47 = vsub.f32 1.0, %v3205_v59  ;;  %v7860_v52 = vld [vmem:[#allocation128_spill] sm:$0xff] }
 0x2f8   : > { %v3091_v56 = vsub.f32 %v7851_v23, %v4556_v0  ;;  %v3452_v22 = vmax.f32 %v3332_v16, 0.0  ;;  %v3576_v40 = vmul.f32 %v3448_v13, %v7857_v54  ;;  %v3207_v58 = vand.u32 2147483647, %v3087_v18  ;;  %v7861_v59 = vld [vmem:[#allocation92_spill] sm:$0xff] }
 0x2f9   : > { %3760 = vmatpush1.bf16.msra.mxu1 %v3659_v28  ;;  %v3094_v25 = vsub.f32 %v7858_v49, %v7759_v61  ;;  %v3662_v15 = vpack.c.bf16 %v3578_v21, %v3574_v5  ;;  %v3329_v51 = vsub.f32 1.0, %v3209_v11  ;;  %v3445_v14 = vmax.f32 %v3325_v47, 0.0  ;;  %v7862_v11 = vld [vmem:[#allocation93_spill] sm:$0xff] }
 0x2fa   : > { %v3211_v7 = vand.u32 2147483647, %v3091_v56  ;;  %v3580_v50 = vmul.f32 %v3452_v22, %v7859_v43  ;;  %v3327_v41 = vsub.f32 1.0, %v3207_v58  ;;  %v3098_v35 = vsub.f32 %v7860_v52, %v7759_v61  ;;  %v7863_v58 = vld [vmem:[#allocation95_spill] sm:$0xff] }
 0x2fb   : > { %v3214_v37 = vand.u32 2147483647, %v3094_v25  ;;  %3718 = vmatprep.subr.bf16.mxu0 %v3662_v15  ;;  %v3449_v23 = vmax.f32 %v3329_v51, 0.0  ;;  %v3573_v28 = vmul.f32 %v3445_v14, %v7861_v59  ;;  %v3096_v13 = vsub.f32 %v7858_v49, %v7762_v45 }
 0x2fc   : > { %v3331_v16 = vsub.f32 1.0, %v3211_v7  ;;  %v3664_v18 = vpack.c.bf16 %v3580_v50, %v3576_v40  ;;  %v3447_v5 = vmax.f32 %v3327_v41, 0.0  ;;  %v3218_v26 = vand.u32 2147483647, %v3098_v35  ;;  %v7864_v40 = vld [vmem:[#allocation96_spill] sm:$0xff] }
 0x2fd   : > { %v3334_v21 = vsub.f32 1.0, %v3214_v37  ;;  %v3577_v47 = vmul.f32 %v3449_v23, %v7862_v11  ;;  %v3100_v22 = vsub.f32 %v7860_v52, %v7762_v45  ;;  %v3216_v54 = vand.u32 2147483647, %v3096_v13  ;;  %v7865_v37 = vld [vmem:[#allocation97_spill] sm:$0xff] }
 0x2fe   : > { %v3451_v56 = vmax.f32 %v3331_v16, 0.0  ;;  %3761 = vmatprep.subr.bf16.mxu1 %v3664_v18  ;;  %v3575_v25 = vmul.f32 %v3447_v5, %v7863_v58  ;;  %v3338_v15 = vsub.f32 1.0, %v3218_v26  ;;  %v3093_v14 = vsub.f32 %v7858_v49, %v7763_v55 }
 0x2ff   : > { %v3454_v51 = vmax.f32 %v3334_v21, 0.0  ;;  %v3661_v7 = vpack.c.bf16 %v3577_v47, %v3573_v28  ;;  %v3220_v50 = vand.u32 2147483647, %v3100_v22  ;;  %v3336_v41 = vsub.f32 1.0, %v3216_v54  ;;  %v7866_v21 = vld [vmem:[#allocation98_spill] sm:$0xff]  ;;  %v7867_v54 = vld [vmem:[#allocation100_spill] sm:$0xff] }
 0x300   : > { %v3579_v43 = vmul.f32 %v3451_v56, %v7864_v40  ;;  %v3458_v35 = vmax.f32 %v3338_v15, 0.0  ;;  %v3097_v59 = vsub.f32 %v7860_v52, %v7763_v55  ;;  %v3213_v16 = vand.u32 2147483647, %v3093_v14 }
 0x301   : > { %v3582_v23 = vmul.f32 %v3454_v51, %v7865_v37  ;;  %3719 = vmatpush1.bf16.msra.mxu0 %v3661_v7  ;;  %v3340_v18 = vsub.f32 1.0, %v3220_v50  ;;  %v3456_v5 = vmax.f32 %v3336_v41, 0.0  ;;  %v3095_v26 = vsub.f32 %v7858_v49, %v4556_v0  ;;  %v7868_v51 = vld [vmem:[#allocation140_spill] sm:$0xff]  ;;  %v7869_v49 = vld [vmem:[#allocation101_spill] sm:$0xff] }
 0x302   : > { %v3663_v13 = vpack.c.bf16 %v3579_v43, %v3575_v25  ;;  %v3586_v28 = vmul.f32 %v3458_v35, %v7866_v21  ;;  %v3217_v11 = vand.u32 2147483647, %v3097_v59  ;;  %v3333_v47 = vsub.f32 1.0, %v3213_v16  ;;  %v7870_v35 = vld [vmem:[#allocation139_spill] sm:$0xff] }
 0x303   : > { %v3099_v56 = vsub.f32 %v7860_v52, %v4556_v0  ;;  %v3460_v22 = vmax.f32 %v3340_v18, 0.0  ;;  %v3584_v58 = vmul.f32 %v3456_v5, %v7867_v54  ;;  %v3215_v15 = vand.u32 2147483647, %v3095_v26  ;;  %v7871_v16 = vld [vmem:[#allocation99_spill] sm:$0xff] }
 0x304   : > { %3762 = vmatpush1.bf16.msra.mxu1 %v3663_v13  ;;  %v3102_v25 = vsub.f32 %v7868_v51, %v7759_v61  ;;  %v3666_v14 = vpack.c.bf16 %v3586_v28, %v3582_v23  ;;  %v3337_v7 = vsub.f32 1.0, %v3217_v11  ;;  %v3453_v40 = vmax.f32 %v3333_v47, 0.0  ;;  %v7872_v11 = vld [vmem:[#allocation103_spill] sm:$0xff] }
 0x305   : > { %v3219_v43 = vand.u32 2147483647, %v3099_v56  ;;  %v3588_v50 = vmul.f32 %v3460_v22, %v7869_v49  ;;  %v3335_v41 = vsub.f32 1.0, %v3215_v15  ;;  %v3106_v37 = vsub.f32 %v7870_v35, %v7759_v61  ;;  %v7873_v15 = vld [vmem:[#allocation104_spill] sm:$0xff] }
 0x306   : > { %v3222_v59 = vand.u32 2147483647, %v3102_v25  ;;  %3720 = vmatprep.subr.bf16.mxu0 %v3666_v14  ;;  %v3457_v52 = vmax.f32 %v3337_v7, 0.0  ;;  %v3581_v13 = vmul.f32 %v3453_v40, %v7871_v16  ;;  %v3104_v5 = vsub.f32 %v7868_v51, %v7762_v45 }
 0x307   : > { %v3339_v18 = vsub.f32 1.0, %v3219_v43  ;;  %v3668_v26 = vpack.c.bf16 %v3588_v50, %v3584_v58  ;;  %v3455_v23 = vmax.f32 %v3335_v41, 0.0  ;;  %v3226_v21 = vand.u32 2147483647, %v3106_v37  ;;  %v7874_v37 = vld [vmem:[#allocation106_spill] sm:$0xff] }
 0x308   : > { %v3342_v28 = vsub.f32 1.0, %v3222_v59  ;;  %v3585_v47 = vmul.f32 %v3457_v52, %v7872_v11  ;;  %v3108_v22 = vsub.f32 %v7870_v35, %v7762_v45  ;;  %v3224_v54 = vand.u32 2147483647, %v3104_v5 }
 0x309   : > { %v3459_v56 = vmax.f32 %v3339_v18, 0.0  ;;  %3763 = vmatprep.subr.bf16.mxu1 %v3668_v26  ;;  %v3583_v25 = vmul.f32 %v3455_v23, %v7873_v15  ;;  %v3346_v14 = vsub.f32 1.0, %v3226_v21  ;;  %v3101_v40 = vsub.f32 %v7868_v51, %v7763_v55  ;;  %v7875_v21 = vld [vmem:[#allocation107_spill] sm:$0xff]  ;;  %v7877_v15 = vld [vmem:[#allocation148_spill] sm:$0xff] }
 0x30a   : > { %v3462_v7 = vmax.f32 %v3342_v28, 0.0  ;;  %v3665_v43 = vpack.c.bf16 %v3585_v47, %v3581_v13  ;;  %v3228_v49 = vand.u32 2147483647, %v3108_v22  ;;  %v3344_v50 = vsub.f32 1.0, %v3224_v54 }
 0x30b   : > { %v3587_v58 = vmul.f32 %v3459_v56, %v6293_v12  ;;  %v3466_v41 = vmax.f32 %v3346_v14, 0.0  ;;  %v3105_v52 = vsub.f32 %v7870_v35, %v7763_v55  ;;  %v3221_v16 = vand.u32 2147483647, %v3101_v40  ;;  %v7876_v56 = vld [vmem:[#allocation109_spill] sm:$0xff] }
 0x30c   : > { %v3590_v59 = vmul.f32 %v3462_v7, %v7874_v37  ;;  %3721 = vmatpush1.bf16.msra.mxu0 %v3665_v43  ;;  %v3348_v5 = vsub.f32 1.0, %v3228_v49  ;;  %v3464_v26 = vmax.f32 %v3344_v50, 0.0  ;;  %v3103_v23 = vsub.f32 %v7868_v51, %v4556_v0  ;;  %v7878_v51 = vld [vmem:[#allocation110_spill] sm:$0xff]  ;;  %v7879_v50 = vld [vmem:[#allocation151_spill] sm:$0xff] }
 0x30d   : > { %v3667_v18 = vpack.c.bf16 %v3587_v58, %v3583_v25  ;;  %v3594_v13 = vmul.f32 %v3466_v41, %v7875_v21  ;;  %v3225_v28 = vand.u32 2147483647, %v3105_v52  ;;  %v3341_v12 = vsub.f32 1.0, %v3221_v16  ;;  %v7880_v52 = vld [vmem:[#allocation111_spill] sm:$0xff] }
 0x30e   : > { %v3107_v11 = vsub.f32 %v7870_v35, %v4556_v0  ;;  %v3468_v47 = vmax.f32 %v3348_v5, 0.0  ;;  %v3592_v22 = vmul.f32 %v3464_v26, %v7876_v56  ;;  %v3223_v54 = vand.u32 2147483647, %v3103_v23  ;;  %v7882_v56 = vld [vmem:[#allocation113_spill] sm:$0xff] }
 0x30f   : > { %3764 = vmatpush1.bf16.msra.mxu1 %v3667_v18  ;;  %v3110_v25 = vsub.f32 %v7877_v15, %v7759_v61  ;;  %v3670_v14 = vpack.c.bf16 %v3594_v13, %v3590_v59  ;;  %v3345_v7 = vsub.f32 1.0, %v3225_v28  ;;  %v3461_v40 = vmax.f32 %v3341_v12, 0.0  ;;  %v7881_v13 = vld [vmem:[#allocation108_spill] sm:$0xff] }
 0x310   : > { %v3227_v43 = vand.u32 2147483647, %v3107_v11  ;;  %v3596_v58 = vmul.f32 %v3468_v47, %v7878_v51  ;;  %v3343_v49 = vsub.f32 1.0, %v3223_v54  ;;  %v3114_v41 = vsub.f32 %v7879_v50, %v7759_v61 }
 0x311   : > { %v3230_v37 = vand.u32 2147483647, %v3110_v25  ;;  %3722 = vmatprep.subr.bf16.mxu0 %v3670_v14  ;;  %v3465_v35 = vmax.f32 %v3345_v7, 0.0  ;;  %v3589_v16 = vmul.f32 %v3461_v40, %v7880_v52  ;;  %v3112_v5 = vsub.f32 %v7877_v15, %v7762_v45 }
 0x312   : > { %v3347_v18 = vsub.f32 1.0, %v3227_v43  ;;  %v3672_v26 = vpack.c.bf16 %v3596_v58, %v3592_v22  ;;  %v3463_v59 = vmax.f32 %v3343_v49, 0.0  ;;  %v3234_v23 = vand.u32 2147483647, %v3114_v41  ;;  %v7883_v49 = vld [vmem:[#allocation112_spill] sm:$0xff] }
 0x313   : > { %v3350_v21 = vsub.f32 1.0, %v3230_v37  ;;  %v3593_v28 = vmul.f32 %v3465_v35, %v7881_v13  ;;  %v3116_v11 = vsub.f32 %v7879_v50, %v7762_v45  ;;  %v3232_v47 = vand.u32 2147483647, %v3112_v5 }
 0x314   : > { %v3467_v12 = vmax.f32 %v3347_v18, 0.0  ;;  %3765 = vmatprep.subr.bf16.mxu1 %v3672_v26  ;;  %v3591_v54 = vmul.f32 %v3463_v59, %v7882_v56  ;;  %v3354_v25 = vsub.f32 1.0, %v3234_v23  ;;  %v3109_v7 = vsub.f32 %v7877_v15, %v7763_v55  ;;  %v7884_v59 = vld [vmem:[#allocation114_spill] sm:$0xff] }
 0x315   : > { %v3470_v14 = vmax.f32 %v3350_v21, 0.0  ;;  %v3669_v40 = vpack.c.bf16 %v3593_v28, %v3589_v16  ;;  %v3236_v43 = vand.u32 2147483647, %v3116_v11  ;;  %v3352_v51 = vsub.f32 1.0, %v3232_v47  ;;  %v7885_v28 = vld [vmem:[#allocation115_spill] sm:$0xff]  ;;  %v7886_v47 = vld [vmem:[#allocation162_spill] sm:$0xff] }
 0x316   : > { %v3595_v22 = vmul.f32 %v3467_v12, %v6341_v9  ;;  %v3474_v58 = vmax.f32 %v3354_v25, 0.0  ;;  %v3113_v37 = vsub.f32 %v7879_v50, %v7763_v55  ;;  %v3229_v35 = vand.u32 2147483647, %v3109_v7 }
 0x317   : > { %v3598_v41 = vmul.f32 %v3470_v14, %v7883_v49  ;;  %3723 = vmatpush1.bf16.msra.mxu0 %v3669_v40  ;;  %v3356_v18 = vsub.f32 1.0, %v3236_v43  ;;  %v3472_v5 = vmax.f32 %v3352_v51, 0.0  ;;  %v3111_v26 = vsub.f32 %v7877_v15, %v4556_v0  ;;  %v7887_v15 = vld [vmem:[#allocation118_spill] sm:$0xff]  ;;  %v7888_v43 = vld [vmem:[#allocation161_spill] sm:$0xff]  ;;  %v7889_v49 = vld [vmem:[#allocation119_spill] sm:$0xff] }
 0x318   : > { %v3671_v52 = vpack.c.bf16 %v3595_v22, %v3591_v54  ;;  %v3602_v16 = vmul.f32 %v3474_v58, %v7884_v59  ;;  %v3233_v23 = vand.u32 2147483647, %v3113_v37  ;;  %v3349_v9 = vsub.f32 1.0, %v3229_v35  ;;  %v7890_v59 = vld [vmem:[#allocation120_spill] sm:$0xff] }
 0x319   : > { %v3115_v21 = vsub.f32 %v7879_v50, %v4556_v0  ;;  %v3476_v13 = vmax.f32 %v3356_v18, 0.0  ;;  %v3600_v12 = vmul.f32 %v3472_v5, %v7885_v28  ;;  %v3231_v11 = vand.u32 2147483647, %v3111_v26 }
 0x31a   : > { %3766 = vmatpush1.bf16.msra.mxu1 %v3671_v52  ;;  %v3118_v56 = vsub.f32 %v7886_v47, %v7759_v61  ;;  %v3674_v54 = vpack.c.bf16 %v3602_v16, %v3598_v41  ;;  %v3353_v25 = vsub.f32 1.0, %v3233_v23  ;;  %v3469_v14 = vmax.f32 %v3349_v9, 0.0 }
 0x31b   : > { %v3235_v7 = vand.u32 2147483647, %v3115_v21  ;;  %v3604_v40 = vmul.f32 %v3476_v13, %v7887_v15  ;;  %v3351_v22 = vsub.f32 1.0, %v3231_v11  ;;  %v3122_v51 = vsub.f32 %v7888_v43, %v7759_v61  ;;  %v7891_v13 = vld [vmem:[#allocation121_spill] sm:$0xff] }
 0x31c   : > { %v3238_v58 = vand.u32 2147483647, %v3118_v56  ;;  %3724 = vmatprep.subr.bf16.mxu0 %v3674_v54  ;;  %v3473_v50 = vmax.f32 %v3353_v25, 0.0  ;;  %v3597_v37 = vmul.f32 %v3469_v14, %v7889_v49  ;;  %v3120_v52 = vsub.f32 %v7886_v47, %v7762_v45 }
 0x31d   : > { %v3355_v35 = vsub.f32 1.0, %v3235_v7  ;;  %v3676_v18 = vpack.c.bf16 %v3604_v40, %v3600_v12  ;;  %v3471_v41 = vmax.f32 %v3351_v22, 0.0  ;;  %v3242_v5 = vand.u32 2147483647, %v3122_v51 }
 0x31e   : > { %v3358_v26 = vsub.f32 1.0, %v3238_v58  ;;  %v3601_v16 = vmul.f32 %v3473_v50, %v7890_v59  ;;  %v3124_v9 = vsub.f32 %v7888_v43, %v7762_v45  ;;  %v3240_v21 = vand.u32 2147483647, %v3120_v52  ;;  %v7892_v52 = vld [vmem:[#allocation123_spill] sm:$0xff]  ;;  %v7893_v59 = vld [vmem:[#allocation169_spill] sm:$0xff] }
 0x31f   : > { %v3475_v23 = vmax.f32 %v3355_v35, 0.0  ;;  %3767 = vmatprep.subr.bf16.mxu1 %v3676_v18  ;;  %v3599_v28 = vmul.f32 %v3471_v41, %v7891_v13  ;;  %v3362_v11 = vsub.f32 1.0, %v3242_v5  ;;  %v3117_v54 = vsub.f32 %v7886_v47, %v7763_v55 }
 0x320   : > { %v3478_v56 = vmax.f32 %v3358_v26, 0.0  ;;  %v3673_v25 = vpack.c.bf16 %v3601_v16, %v3597_v37  ;;  %v3244_v14 = vand.u32 2147483647, %v3124_v9  ;;  %v3360_v7 = vsub.f32 1.0, %v3240_v21 }
 0x321   : > { %v3603_v12 = vmul.f32 %v3475_v23, %v6389_v32  ;;  %v3482_v15 = vmax.f32 %v3362_v11, 0.0  ;;  %v3121_v22 = vsub.f32 %v7888_v43, %v7763_v55  ;;  %v3237_v51 = vand.u32 2147483647, %v3117_v54  ;;  %v7894_v11 = vld [vmem:[#allocation170_spill] sm:$0xff] }
 0x322   : > { %v3606_v40 = vmul.f32 %v3478_v56, %v6395_v36  ;;  %3725 = vmatpush1.bf16.msra.mxu0 %v3673_v25  ;;  %v3364_v50 = vsub.f32 1.0, %v3244_v14  ;;  %v3480_v49 = vmax.f32 %v3360_v7, 0.0  ;;  %v3119_v35 = vsub.f32 %v7886_v47, %v4556_v0 }
 0x323   : > { %v3675_v58 = vpack.c.bf16 %v3603_v12, %v3599_v28  ;;  %v3610_v37 = vmul.f32 %v3482_v15, %v7892_v52  ;;  %v3241_v18 = vand.u32 2147483647, %v3121_v22  ;;  %v3357_v32 = vsub.f32 1.0, %v3237_v51 }
 0x324   : > { %v3123_v41 = vsub.f32 %v7888_v43, %v4556_v0  ;;  %v3484_v36 = vmax.f32 %v3364_v50, 0.0  ;;  %v3608_v5 = vmul.f32 %v3480_v49, %v6407_v34  ;;  %v3239_v26 = vand.u32 2147483647, %v3119_v35 }
 0x325   : > { %3768 = vmatpush1.bf16.msra.mxu1 %v3675_v58  ;;  %v3126_v16 = vsub.f32 %v7893_v59, %v7759_v61  ;;  %v3678_v23 = vpack.c.bf16 %v3610_v37, %v3606_v40  ;;  %v3361_v9 = vsub.f32 1.0, %v3241_v18  ;;  %v3477_v21 = vmax.f32 %v3357_v32, 0.0 }
 0x326   : > { %v3243_v13 = vand.u32 2147483647, %v3123_v41  ;;  %v3612_v47 = vmul.f32 %v3484_v36, %v6415_v42  ;;  %v3359_v28 = vsub.f32 1.0, %v3239_v26  ;;  %v3130_v56 = vsub.f32 %v7894_v11, %v7759_v61 }
 0x327   : > { %v3246_v54 = vand.u32 2147483647, %v3126_v16  ;;  %3726 = vmatprep.subr.bf16.mxu0 %v3678_v23  ;;  %v3481_v43 = vmax.f32 %v3361_v9, 0.0  ;;  %v3605_v25 = vmul.f32 %v3477_v21, %v6421_v19  ;;  %v3128_v12 = vsub.f32 %v7893_v59, %v7762_v45 }
 0x328   : > { %v3363_v34 = vsub.f32 1.0, %v3243_v13  ;;  %v3680_v14 = vpack.c.bf16 %v3612_v47, %v3608_v5  ;;  %v3479_v7 = vmax.f32 %v3359_v28, 0.0  ;;  %v3250_v15 = vand.u32 2147483647, %v3130_v56 }
 0x329   : > { %v3366_v40 = vsub.f32 1.0, %v3246_v54  ;;  %v3609_v22 = vmul.f32 %v3481_v43, %v6427_v57  ;;  %v3132_v51 = vsub.f32 %v7894_v11, %v7762_v45  ;;  %v3248_v61 = vand.u32 2147483647, %v3128_v12 }
 0x32a   : > { %v3483_v42 = vmax.f32 %v3363_v34, 0.0  ;;  %3769 = vmatprep.subr.bf16.mxu1 %v3680_v14  ;;  %v3607_v58 = vmul.f32 %v3479_v7, %v6433_v27  ;;  %v3370_v50 = vsub.f32 1.0, %v3250_v15  ;;  %v3125_v49 = vsub.f32 %v7893_v59, %v7763_v55  ;;  %v7896_v15 = vld [vmem:[#allocation122_spill] sm:$0xff] }
 0x32b   : > { %v3486_v19 = vmax.f32 %v3366_v40, 0.0  ;;  %v3677_v35 = vpack.c.bf16 %v3609_v22, %v3605_v25  ;;  %v3252_v37 = vand.u32 2147483647, %v3132_v51  ;;  %v3368_v18 = vsub.f32 1.0, %v3248_v61  ;;  %v7898_v22 = vld [vmem:[#allocation129_spill] sm:$0xff]  ;;  %v7899_v61 = vld [vmem:[#allocation127_spill] sm:$0xff] }
 0x32c   : > { %v3611_v52 = vmul.f32 %v3483_v42, %v6437_v62  ;;  %v3490_v32 = vmax.f32 %v3370_v50, 0.0  ;;  %v3129_v45 = vsub.f32 %v7894_v11, %v7763_v55  ;;  %v3245_v41 = vand.u32 2147483647, %v3125_v49 }
 0x32d   : > { %v3614_v57 = vmul.f32 %v3486_v19, %v6443_v17  ;;  %3727 = vmatpush1.bf16.msra.mxu0 %v3677_v35  ;;  %v3372_v27 = vsub.f32 1.0, %v3252_v37  ;;  %v3488_v5 = vmax.f32 %v3368_v18, 0.0  ;;  %v3127_v26 = vsub.f32 %v7893_v59, %v4556_v0  ;;  %v7900_v19 = vld [vmem:[#allocation132_spill] sm:$0xff] }
 0x32e   : > { %v3679_v36 = vpack.c.bf16 %v3611_v52, %v3607_v58  ;;  %v3618_v16 = vmul.f32 %v3490_v32, %v6449_v29  ;;  %v3249_v23 = vand.u32 2147483647, %v3129_v45  ;;  %v3365_v62 = vsub.f32 1.0, %v3245_v41  ;;  %v7901_v52 = vld [vmem:[#allocation130_spill] sm:$0xff]  ;;  %v7903_v41 = vld [vmem:[#allocation133_spill] sm:$0xff] }
 0x32f   : > { %v3131_v9 = vsub.f32 %v7894_v11, %v4556_v0  ;;  %v3492_v17 = vmax.f32 %v3372_v27, 0.0  ;;  %v3616_v21 = vmul.f32 %v3488_v5, %v6455_v44  ;;  %v3247_v55 = vand.u32 2147483647, %v3127_v26  ;;  %v7902_v32 = vld [vmem:[#allocation134_spill] sm:$0xff]  ;;  %v7904_v26 = vld [vmem:[#allocation131_spill] sm:$0xff] }
 0x330   : > { %3770 = vmatpush1.bf16.msra.mxu1 %v3679_v36  ;;  %v3788_v13 = vmul.f32 %v6685_v38, %v6611_v30  ;;  %v3682_v47 = vpack.c.bf16 %v3618_v16, %v3614_v57  ;;  %v3369_v28 = vsub.f32 1.0, %v3249_v23  ;;  %v3485_v56 = vmax.f32 %v3365_v62, 0.0 }
 0x331   : > { %v3251_v54 = vand.u32 2147483647, %v3131_v9  ;;  %v3620_v59 = vmul.f32 %v3492_v17, %v6463_v20  ;;  %v3367_v29 = vsub.f32 1.0, %v3247_v55  ;;  %v3790_v43 = vmul.f32 %v6687_v53, %v6613_v6 }
 0x332   : > { %v3789_v0 = vmul.f32 %v6690_v39, %v6617_v3  ;;  %3728 = vmatprep.subr.bf16.mxu0 %v3682_v47  ;;  %v3489_v11 = vmax.f32 %v3369_v28, 0.0  ;;  %v3613_v44 = vmul.f32 %v3485_v56, %v6469_v31  ;;  %v3791_v30 = vmul.f32 %v6692_v63, %v6619_v48  ;;  %v7895_v39 = vld [vmem:[#allocation124_spill] sm:$0xff]  ;;  %v7906_v28 = vld [vmem:[#allocation137_spill] sm:$0xff] }
 0x333   : > { %v3371_v25 = vsub.f32 1.0, %v3251_v54  ;;  %v3684_v38 = vpack.c.bf16 %v3620_v59, %v3616_v21  ;;  %v3487_v34 = vmax.f32 %v3367_v29, 0.0  ;;  %v3792_v20 = vmul.f32 %v6697_v24, %v6622_v8  ;;  %v7905_v21 = vld [vmem:[#allocation136_spill] sm:$0xff]  ;;  %v7907_v59 = vld [vmem:[#allocation135_spill] sm:$0xff] }
 0x334   : > { %v3794_v12 = vmul.f32 %v6699_v1, %v6624_v33  ;;  %v3617_v6 = vmul.f32 %v3489_v11, %v6477_v60  ;;  %v3793_v3 = vmul.f32 %v6704_v10, %v6629_v2  ;;  %v3795_v31 = vmul.f32 %v6706_v46, %v6631_v4  ;;  %v4245_v60 = vld [vmem:[%s7057_s2 + $0x20] ss:$8 sps:$4 sm:$0xff]  }
 0x335   : > { %v3491_v53 = vmax.f32 %v3371_v25, 0.0  ;;  %3771 = vmatprep.subr.bf16.mxu1 %v3684_v38  ;;  %v3615_v48 = vmul.f32 %v3487_v34, %v7895_v39  ;;  %v4136_v63 = vpack.c.bf16 %v3792_v20, %v3788_v13  ;;  %v7897_v4 = vld [vmem:[#allocation126_spill] sm:$0xff]  ;;  %v4314_v9 = vmov 0.0   ;;  %v7910_v34 = vld [vmem:[#allocation143_spill] sm:$0xff]  ;;  %v7912_v39 = vld [vmem:[#allocation144_spill] sm:$0xff] }
 0x336   : > { %v4148_v14 = vpack.c.bf16 %v3794_v12, %v3790_v43  ;;  %v3681_v7 = vpack.c.bf16 %v3617_v6, %v3613_v44  ;;  %v4134_v24 = vpack.c.bf16 %v3793_v3, %v3789_v0  ;;  %v4146_v40 = vpack.c.bf16 %v3795_v31, %v3791_v30  ;;  %v7908_v0 = vld [vmem:[#allocation141_spill] sm:$0xff]  ;;  %v7909_v25 = vld [vmem:[#allocation138_spill] sm:$0xff] }
 0x337   : > { %v3619_v8 = vmul.f32 %v3491_v53, %v7896_v15  ;;  %v7911_v6 = vld [vmem:[#allocation142_spill] sm:$0xff] }
 0x338   : > { %3729 = vmatpush1.bf16.msra.mxu0 %v3681_v7  ;;  %v3784_v7 = vld [vmem:[%s7059_s4] sm:$0xff]  ;;  %v3785_v15 = vld [vmem:[%s7059_s4 + $0x8] sm:$0xff] }
 0x339   : > { %v3683_v33 = vpack.c.bf16 %v3619_v8, %v3615_v48  ;;  %4135 = vmatprep.subr.bf16.mxu0 %v4134_v24  ;;  %v3786_v8 = vld [vmem:[%s7059_s4 + $0x10] sm:$0xff]  ;;  %v3787_v24 = vld [vmem:[%s7059_s4 + $0x18] sm:$0xff] }
 0x33b   : > { %3772 = vmatpush1.bf16.msra.mxu1 %v3683_v33  ;;  %3731 = vmatmul.mubr.bf16.vlgmr.msra.gmra.mrb[20].mxu0 %v4245_v60 }
 0x33c   : > { %4147 = vmatprep.subr.bf16.mxu1 %v4146_v40  ;;  %4137 = vmatpush1.bf16.msra.mxu0 %v4136_v63 }
 0x33d   : > { %3888 = vmatprep.mubr.f32.mxu0 %v4314_v9 }
 0x33e   : > { %3774 = vmatmul.mubr.bf16.vlgmr.msra.gmra.mrb[20].mxu1 %v4245_v60 }
 0x33f   : > { %4149 = vmatpush1.bf16.msra.mxu1 %v4148_v14  ;;  %3977 = vmatprep.mubr.f32.mxu1 %v4314_v9 }
 0x366   : > { %v2961_v2 = vpop.f32.mrb[16].mxu0 }
 0x367   : > { %v3796_v10 = vmul.f32 %v2961_v2, %v7897_v4  ;;  %v2963_v1 = vpop.f32.mrb[17].mxu0 }
 0x368   : > { %v3797_v42 = vmul.f32 %v2963_v1, %v7898_v22  ;;  %v2965_v51 = vpop.f32.mrb[18].mxu0 }
 0x369   : > { %v3004_v46 = vpop.f32.mrb[16].mxu1  ;;  %v3800_v49 = vmul.f32 %v2965_v51, %v7900_v19  ;;  %v2967_v35 = vpop.f32.mrb[19].mxu0 }
 0x36a   : > { %v3798_v58 = vmul.f32 %v3004_v46, %v7899_v61  ;;  %v3006_v50 = vpop.f32.mrb[17].mxu1  ;;  %v3801_v57 = vmul.f32 %v2967_v35, %v7902_v32 }
 0x36b   : > { %v3799_v37 = vmul.f32 %v3006_v50, %v7901_v52  ;;  %v3008_v18 = vpop.f32.mrb[18].mxu1  ;;  %v4140_v45 = vpack.c.bf16 %v3800_v49, %v3796_v10 }
 0x36c   : > { %v3802_v36 = vmul.f32 %v3008_v18, %v7903_v41  ;;  %v3010_v27 = vpop.f32.mrb[19].mxu1  ;;  %v4138_v5 = vpack.c.bf16 %v3801_v57, %v3797_v42 }
 0x36d   : > { %v3803_v16 = vmul.f32 %v3010_v27, %v7904_v26 }
 0x36e   : > { %v4152_v23 = vpack.c.bf16 %v3802_v36, %v3798_v58  ;;  %4139 = vmatprep.subr.bf16.mxu0 %v4138_v5 }
 0x36f   : > { %v4150_v62 = vpack.c.bf16 %v3803_v16, %v3799_v37  ;;  %4141 = vmatpush1.bf16.msra.mxu0 %v4140_v45 }
 0x371   : > { %4151 = vmatprep.subr.bf16.mxu1 %v4150_v62 }
 0x372   : > { %4153 = vmatpush1.bf16.msra.mxu1 %v4152_v23 }
 0x40e   : > { %v3732_v17 = vpop.f32.mrb[20].mxu0 }
 0x40f   : > { %v3804_v55 = vmul.f32 %v3732_v17, %v7905_v21  ;;  %v3734_v13 = vpop.f32.mrb[21].mxu0 }
 0x410   : > { %v3805_v56 = vmul.f32 %v3734_v13, %v7906_v28  ;;  %v3736_v54 = vpop.f32.mrb[22].mxu0 }
 0x411   : > { %v3775_v47 = vpop.f32.mrb[20].mxu1  ;;  %v3808_v11 = vmul.f32 %v3736_v54, %v7908_v0  ;;  %v3738_v44 = vpop.f32.mrb[23].mxu0 }
 0x412   : > { %v3806_v29 = vmul.f32 %v3775_v47, %v7907_v59  ;;  %v3777_v43 = vpop.f32.mrb[21].mxu1  ;;  %v3809_v20 = vmul.f32 %v3738_v44, %v7910_v34 }
 0x413   : > { %v3807_v30 = vmul.f32 %v3777_v43, %v7909_v25  ;;  %v3779_v38 = vpop.f32.mrb[22].mxu1  ;;  %v4144_v12 = vpack.c.bf16 %v3808_v11, %v3804_v55 }
 0x414   : > { %v3810_v53 = vmul.f32 %v3779_v38, %v7911_v6  ;;  %v3781_v3 = vpop.f32.mrb[23].mxu1  ;;  %v4142_v31 = vpack.c.bf16 %v3809_v20, %v3805_v56 }
 0x415   : > { %v3811_v48 = vmul.f32 %v3781_v3, %v7912_v39 }
 0x416   : > { %v4156_v63 = vpack.c.bf16 %v3810_v53, %v3806_v29  ;;  %4143 = vmatprep.subr.bf16.mxu0 %v4142_v31 }
 0x417   : > { %v4154_v14 = vpack.c.bf16 %v3811_v48, %v3807_v30  ;;  %4145 = vmatpush1.bf16.msra.mxu0 %v4144_v12 }
 0x419   : > { %4155 = vmatprep.subr.bf16.mxu1 %v4154_v14 }
 0x41a   : > { %4157 = vmatpush1.bf16.msra.mxu1 %v4156_v63  ;;  %4120 = vmatmul.mubr.msk.f32.vlgmr.msra.gmra.mrb[24].mxu0 %vm514_vm0, %v3784_v7 }
 0x41b   : > { %3894 = vmatprep.mubr.f32.mxu0 %v4314_v9 }
 0x41d   : > { %4124 = vmatmul.mubr.msk.f32.vlgmr.msra.gmra.mrb[24].mxu1 %vm514_vm0, %v3784_v7 }
 0x41e   : > { %3983 = vmatprep.mubr.f32.mxu1 %v4314_v9  ;;  %4121 = vmatmul.mubr.msk.f32.gmra.mrb[26].mxu0 %vm514_vm0, %v3785_v15 }
 0x41f   : > { %3900 = vmatprep.mubr.f32.mxu0 %v4314_v9 }
 0x421   : > { %4125 = vmatmul.mubr.msk.f32.gmra.mrb[26].mxu1 %vm514_vm0, %v3785_v15 }
 0x422   : > { %3989 = vmatprep.mubr.f32.mxu1 %v4314_v9  ;;  %4122 = vmatmul.mubr.msk.f32.gmra.mrb[28].mxu0 %vm514_vm0, %v3786_v8 }
 0x423   : > { %3906 = vmatprep.mubr.f32.mxu0 %v4314_v9 }
 0x425   : > { %4126 = vmatmul.mubr.msk.f32.gmra.mrb[28].mxu1 %vm514_vm0, %v3786_v8 }
 0x426   : > { %3995 = vmatprep.mubr.f32.mxu1 %v4314_v9  ;;  %4123 = vmatmul.mubr.msk.f32.gmra.mrb[30].mxu0 %vm514_vm0, %v3787_v24 }
 0x429   : > { %4127 = vmatmul.mubr.msk.f32.gmra.mrb[30].mxu1 %vm514_vm0, %v3787_v24 }
 0x4ed   : > { %v3890_v40 = vpop.f32.mrb[24].mxu0 }
 0x4ee   : > { %4002 = vst [vmem:[%s6985_s6] sm:$0xff] %v3890_v40  ;;  %v3892_v60 = vpop.f32.mrb[25].mxu0 }
 0x4ef   : > { %4003 = vst [vmem:[%s6985_s6 + $0x8] sm:$0xff] %v3892_v60 }
 0x4f0   : > { %v3979_v33 = vpop.f32.mrb[24].mxu1 }
 0x4f1   : > { %4004 = vst [vmem:[%s6985_s6 + $0x10] sm:$0xff] %v3979_v33  ;;  %v3981_v2 = vpop.f32.mrb[25].mxu1  ;;  %v3896_v4 = vpop.f32.mrb[26].mxu0 }
 0x4f2   : > { %4005 = vst [vmem:[%s6985_s6 + $0x18] sm:$0xff] %v3981_v2  ;;  %4006 = vst [vmem:[%s6985_s6 + $0x20] sm:$0xff] %v3896_v4  ;;  %v3898_v10 = vpop.f32.mrb[27].mxu0 }
 0x4f3   : > { %4007 = vst [vmem:[%s6985_s6 + $0x28] sm:$0xff] %v3898_v10 }
 0x4f4   : > { %v3985_v1 = vpop.f32.mrb[26].mxu1 }
 0x4f5   : > { %4008 = vst [vmem:[%s6985_s6 + $0x30] sm:$0xff] %v3985_v1  ;;  %v3987_v46 = vpop.f32.mrb[27].mxu1  ;;  %v3902_v22 = vpop.f32.mrb[28].mxu0 }
 0x4f6   : > { %4009 = vst [vmem:[%s6985_s6 + $0x38] sm:$0xff] %v3987_v46  ;;  %4010 = vst [vmem:[%s6985_s6 + $0x40] sm:$0xff] %v3902_v22  ;;  %v3904_v42 = vpop.f32.mrb[29].mxu0 }
 0x4f7   : > { %4011 = vst [vmem:[%s6985_s6 + $0x48] sm:$0xff] %v3904_v42 }
 0x4f8   : > { %v3991_v51 = vpop.f32.mrb[28].mxu1 }
 0x4f9   : > { %4012 = vst [vmem:[%s6985_s6 + $0x50] sm:$0xff] %v3991_v51  ;;  %v3993_v61 = vpop.f32.mrb[29].mxu1  ;;  %v3908_v58 = vpop.f32.mrb[30].mxu0 }
 0x4fa   : > { %4013 = vst [vmem:[%s6985_s6 + $0x58] sm:$0xff] %v3993_v61  ;;  %4014 = vst [vmem:[%s6985_s6 + $0x60] sm:$0xff] %v3908_v58  ;;  %v3910_v50 = vpop.f32.mrb[31].mxu0 }
 0x4fb   : > { %4015 = vst [vmem:[%s6985_s6 + $0x68] sm:$0xff] %v3910_v50 }
 0x4fc   : > { %v3997_v19 = vpop.f32.mrb[30].mxu1 }
 0x4fd   : > { %4016 = vst [vmem:[%s6985_s6 + $0x70] sm:$0xff] %v3997_v19  ;;  %v3999_v49 = vpop.f32.mrb[31].mxu1 }
 0x4fe   : > { %4017 = vst [vmem:[%s6985_s6 + $0x78] sm:$0xff] %v3999_v49 }
 0x4ff   : > { %4261 = shalt.err (!%p4258_p3)
}
 0x500   : > { %s4262_s16 = scalar_lea.hbm %s7004_s11, 2048  ;;  %s4266_s25 = scalar_lea.hbm %s7060_s5, 4096 }
 0x501   : > { %p4263_p4 = scmp.ne.s32.totalorder %s7004_s11, %s4262_s16  ;;  %p4267_p9 = scmp.lt.u32.totalorder %s7004_s11, %s7060_s5 }
 0x502   : > { %p4268_p10 = scmp.lt.u32.totalorder %s4266_s25, %s4262_s16  ;;  %p4270_p12 = scmp.lt.u32.totalorder %s4262_s16, %s7004_s11 }
 0x503   : > { %p4264_p7 = pnand %p4263_p4, %p4387_p5 }
 0x504   : > { %p4269_p11 = por %p4268_p10, %p4267_p9 }
 0x505   : > { %p4265_p8 = pneg %p4264_p7 }
 0x506   : > { %p4271_p13 = por %p4270_p12, %p4269_p11 }
 0x508   : > { %p4272_p0 = pnand %p4271_p13, %p4265_p8 }
 0x50a   : > { %4275 = shalt.err (!%p4272_p0)
}
 0x50b   : > { %s4316_s6 = smov 512   ;;  %s4317_s7 = smov 1024  }
 0x50c   : > { %s4318_s9 = smov 32  }
 0x50d   : > { %4158 = dma.vmem_to_hbm [thread:$0]  (%p4387_p5), %s7007_s8, 2048, %s7004_s11, %s7014_s22, %s4316_s6, %s4317_s7, %s4318_s9  }
 0x50e PF: > { %p4164_p1 = scmp.ge.s32.totalorder %s4310_s21, 2  ;;  %s4047_s10 = sand.u32 1, %s4298_s18  }
 0x50f   : > { %s4048_s12 = scalar_lea.sflag [#allocation3], %s4047_s10 }
 0x510   : > { %p4161_p2 = pnand %p4164_p1, %p4391_p6 }
 0x512   : > { %4293 = dma.done.wait (!%p4161_p2), %s4048_s12, 2048  }
 0x513   : > { %4295 = vsyncadd (!%p4161_p2), %s4048_s12, 4294965248  ;;  %p15_p3 = scmp.ge.s32.totalorder %s4374_s24, 4   ;;  %s7913_s18 = smov %s4302_s19 }
 0x514   : > { %s7914_s19 = smov %s4306_s20  ;;  %s7915_s20 = smov %s4385_s27 }
 0x515   : > { %s7916_s21 = smov %s4374_s24  ;;  %17 = sbr.rel (!%p15_p3) target bundleno = 3 (0x3), region = 77 }
 0x51c   :  { %4053 = vsyncpa [#allocation3], 1 }
 0x51d   :  { %4055 = vsyncpa [#allocation3 + $0x1], 1 }

// kernel: tpu_custom_call.1
= control target key start
LH: loop header
LB: loop body
LE: loop exit
PB: predicated region body
PF: predicated region fallthrough
CT: control target
= control target key end

     0   :  { %10 = vsyncpa [#allocation3], 0  ;;  %s7055_s0 = inlined_call_operand.vmem [shape: f32[3,1024], index: 0, kind: input, shape index: {}]   ;;  %s7056_s1 = inlined_call_operand.vmem [shape: f32[256,2], index: 1, kind: input, shape index: {}]   ;;  %s7057_s2 = inlined_call_operand.vmem [shape: bf16[3,16,256], index: 2, kind: input, shape index: {}]   ;;  %s7058_s3 = inlined_call_operand.vmem [shape: bf16[48,48], index: 3, kind: input, shape index: {}]   ;;  %s7059_s4 = inlined_call_operand.vmem [shape: f32[32,48], index: 4, kind: input, shape index: {}]   ;;  %s7060_s5 = inlined_call_operand.hbm [shape: f32[32,1024], index: 5, kind: output, shape index: {}]  }
   0x1   :  { %12 = vsyncpa [#allocation3 + $0x1], 0  ;;  %s4349_s18 = smov 0   ;;  %s4351_s19 = smov 0  }
   0x2   :  { %s4353_s20 = smov 0   ;;  %s4355_s21 = smov 0  }
   0x3 LB: > { %s4370_s22 = sadd.s32 4294967295, %s4310_s21   ;;  %s4094_s23 = sadd.s32 4294967294, %s4310_s21   ;;  %s4310_s21 = sphi %s4355_s21, %s7916_s21   ;;  %s4306_s20 = sphi %s4353_s20, %s7915_s20   ;;  %s4302_s19 = sphi %s4351_s19, %s7914_s19   ;;  %s4298_s18 = sphi %s4349_s18, %s7913_s18  }
   0x4   : > { %s4374_s24 = sadd.s32 1, %s4310_s21   ;;  %s135_s25 = sadd.s32 1, %s4306_s20 }
   0x5   : > { %s132_s26 = ssub.s32 %s4310_s21, %s4374_s24  ;;  %p145_p0 = scmp.ne.s32.totalorder %s4306_s20, %s4302_s19 }
   0x6   : > { %p133_p1 = scmp.eq.s32.totalorder %s132_s26, 0  ;;  %p146_p2 = scmp.eq.s32.totalorder %s4370_s22, 1 }
   0x7   : > { %p151_p3 = scmp.ne.s32.totalorder %s4302_s19, %s4298_s18  ;;  %p152_p4 = scmp.eq.s32.totalorder %s4094_s23, 1 }
   0x8   : > { %s4385_s27 = scalar_select %p133_p1, %s4306_s20, %s135_s25  }
   0x9   : > { %p4387_p5 = por %p146_p2, %p145_p0  ;;  %p4391_p6 = por %p152_p4, %p151_p3 }
   0xa   : > { %p4097_p7 = scmp.ge.s32.totalorder %s4310_s21, 1  ;;  %p191_p8 = scmp.lt.s32.totalorder %s4310_s21, 3 }
   0xc   : > { %p192_p9 = pnand %p4097_p7, %p191_p8 }
   0xe   : > { %195 = sbr.rel (%p192_p9) target bundleno = 1294 (0x50e), region = 40 }
  0x15   : > { %v233_v0 = vld [vmem:[%s7056_s1] sm:$0xff]  ;;  %v7063_v1 = vmov 0   ;;  %v7061_v2 = vmov 1   ;;  %v234_v3 = vld [vmem:[%s7056_s1 + $0x8] sm:$0xff]  ;;  %v236_v4 = vld [vmem:[%s7056_s1 + $0x18] sm:$0xff]  ;;  %s4099_s13 = sshll.u32 %s4370_s22, 2  ;;  %v277_v31 = vlaneseq }
  0x16   : > { %4204 = vset.pattern.permute.xlu1 %v7063_v1  ;;  %4203 = vset.pattern.permute.xlu0 %v7061_v2  ;;  %v235_v5 = vld [vmem:[%s7056_s1 + $0x10] sm:$0xff]  ;;  %v237_v8 = vld [vmem:[%s7056_s1 + $0x20] sm:$0xff]  ;;  %v238_v10 = vld [vmem:[%s7056_s1 + $0x28] sm:$0xff]  ;;  %p220_p10 = scmp.lt.s32.totalorder %s4099_s13, 7  ;;  %vm514_vm0 = vcmask 392192   ;;  %s216_s26 = sand.u32 1, %s4302_s19  }
  0x17   : > { %651 = vperm.xlu1 %4204, %v233_v0   ;;  %267 = vperm.xlu0 %4203, %v233_v0   ;;  %v239_v6 = vld [vmem:[%s7056_s1 + $0x30] sm:$0xff]  ;;  %v240_v13 = vld [vmem:[%s7056_s1 + $0x38] sm:$0xff]  ;;  %v241_v16 = vld [vmem:[%s7056_s1 + $0x40] sm:$0xff]  ;;  %v278_v34 = vshrl.u32 %v277_v31, 7  ;;  %s4098_s30 = sshll.u32 %s216_s26, 7  ;;  %s4133_s7 = sshll.u32 %s4370_s22, 9 }
  0x18   : > { %556 = vmatprep.mubr.bf16.mxu0 %v7063_v1  ;;  %619 = vmatprep.mubr.bf16.mxu1 %v7063_v1  ;;  %v243_v7 = vld [vmem:[%s7056_s1 + $0x50] sm:$0xff]  ;;  %v242_v17 = vld [vmem:[%s7056_s1 + $0x48] sm:$0xff]  ;;  %v244_v18 = vld [vmem:[%s7056_s1 + $0x58] sm:$0xff]  ;;  %s7918_s13 = smov (!%p220_p10, %s4099_s13), 7  ;;  %s6985_s6 = scalar_lea.vmem [#allocation2], %s4098_s30 }
  0x19   : > { %v247_v9 = vld [vmem:[%s7056_s1 + $0x70] sm:$0xff]  ;;  %v245_v19 = vld [vmem:[%s7056_s1 + $0x60] sm:$0xff]  ;;  %v248_v20 = vld [vmem:[%s7056_s1 + $0x78] sm:$0xff]  ;;  %s4100_s16 = sshll.u32 %s7918_s13, 2  ;;  %v279_v38 = vsub.s32 2, %v278_v34  ;;  %v347_v40 = vsub.s32 1, %v278_v34  ;;  %s7004_s11 = scalar_lea.hbm %s7060_s5, %s4133_s7 }
  0x1a   : > { %v4434_v11 = vld [vmem:[%s7056_s1 + $0x90] sm:$0xff]  ;;  %v246_v21 = vld [vmem:[%s7056_s1 + $0x68] sm:$0xff]  ;;  %v249_v22 = vld [vmem:[%s7056_s1 + $0x80] sm:$0xff]  ;;  %s223_s25 = scalar_lea.vmem %s7055_s0, %s4100_s16  ;;  %v351_v41 = vsub.s32 5, %v278_v34  ;;  %v283_v43 = vsub.s32 6, %v278_v34  ;;  %v415_v44 = vsub.s32 0, %v278_v34 }
  0x1b   : > { %655 = vperm.xlu1 %4204, %v234_v3   ;;  %272 = vperm.xlu0 %4203, %v234_v3   ;;  %v4441_v12 = vld [vmem:[%s7056_s1 + $0xb0] sm:$0xff]  ;;  %v252_v23 = vld [vmem:[%s7056_s1 + $0x98] sm:$0xff]  ;;  %v253_v24 = vld [vmem:[%s7056_s1 + $0xa0] sm:$0xff]  ;;  %v419_v45 = vsub.s32 4, %v278_v34  ;;  %s4032_s8 = sshll.u32 %s6985_s6, 4  ;;  %s7014_s22 = scalar_lea.sflag [#allocation3], %s216_s26  ;;  %s7007_s8 = int_to_ptr.vmem [resolvable:$true] %s4032_s8 }
  0x1c   : > { %v4450_v14 = vld [vmem:[%s7056_s1 + $0xd0] sm:$0xff]  ;;  %v4499_v25 = vld [vmem:[%s7056_s1 + $0xb8] sm:$0xff]  ;;  %v4505_v26 = vld [vmem:[%s7056_s1 + $0xc0] sm:$0xff]  ;;  %s4248_s12 = scalar_lea.vmem %s7007_s8, 2048  ;;  %s4315_s13 = smov [#allocation2]  }
  0x1d   : > { %v4457_v15 = vld [vmem:[%s7056_s1 + $0xf0] sm:$0xff]  ;;  %v4512_v27 = vld [vmem:[%s7056_s1 + $0xd8] sm:$0xff]  ;;  %v250_v28 = vld [vmem:[%s7056_s1 + $0x88] sm:$0xff]  ;;  %p4249_p11 = scmp.ne.s32.totalorder %s7007_s8, %s4248_s12  ;;  %s4252_s14 = sshll.u32 %s4315_s13, 4  ;;  %s4253_s14 = int_to_ptr.vmem [resolvable:$false] %s4252_s14 }
  0x1e   : > { %v4522_v29 = vld [vmem:[%s7056_s1 + $0xe0] sm:$0xff]  ;;  %v4529_v30 = vld [vmem:[%s7056_s1 + $0xf8] sm:$0xff]  ;;  %v228_v33 = vld [vmem:[%s223_s25 + $0x8] sm:$0x77]  ;;  %s4254_s15 = scalar_lea.vmem %s4253_s14, 4096  ;;  %p4255_p0 = scmp.lt.s32.totalorder %s7007_s8, %s4253_s14 }
  0x1f   : > { %665 = vperm.xlu1 %4204, %v236_v4   ;;  %4205 = vset.pattern.permute.xlu0 %v7063_v1  ;;  %v227_v32 = vld [vmem:[%s223_s25] sm:$0x77]  ;;  %v230_v36 = vadd.f32 1.0, %v228_v33  ;;  %v254_v37 = vld [vmem:[%s7056_s1 + $0xa8] sm:$0xff]  ;;  %p4250_p12 = pnand %p4249_p11, %p4387_p5  ;;  %p4256_p1 = scmp.lt.s32.totalorder %s4254_s15, %s4248_s12 }
  0x20   : > { %660 = vperm.xlu0 %4205, %v235_v5   ;;  %v229_v35 = vadd.f32 1.0, %v227_v32 }
  0x21   : > { %v232_v42 = vmul.f32 7.5, %v230_v36  ;;  %p4251_p13 = pneg %p4250_p12  ;;  %p4257_p2 = por %p4256_p1, %p4255_p0 }
  0x22   : > { %v231_v39 = vmul.f32 7.5, %v229_v35 }
  0x23   : > { %4206 = vset.pattern.permute.xlu1 %v7061_v2  ;;  %v360_v48 = vrot.slane %v232_v42, %v351_v41  ;;  %v292_v51 = vrot.slane %v232_v42, %v283_v43  ;;  %v356_v52 = vrot.slane %v232_v42, %v347_v40  ;;  %v288_v53 = vrot.slane %v232_v42, %v279_v38  ;;  %p4258_p3 = pnand %p4257_p2, %p4251_p13 }
  0x24   : > { %1321 = vperm.xlu1 %4206, %v235_v5   ;;  %680 = vperm.xlu0 %4205, %v239_v6   ;;  %v348_v46 = vrot.slane %v231_v39, %v347_v40  ;;  %v352_v47 = vrot.slane %v231_v39, %v351_v41  ;;  %v280_v49 = vrot.slane %v231_v39, %v279_v38 }
  0x25   : > { %v284_v50 = vrot.slane %v231_v39, %v283_v43  ;;  %v420_v54 = vrot.slane %v231_v39, %v419_v45  ;;  %v428_v55 = vrot.slane %v232_v42, %v419_v45  ;;  %v416_v56 = vrot.slane %v231_v39, %v415_v44 }
  0x26   : > { %v424_v57 = vrot.slane %v232_v42, %v415_v44  ;;  %v4544_v58 = vrot.slane %v348_v46, %v347_v40  ;;  %v4546_v59 = vrot.slane %v352_v47, %v347_v40  ;;  %v4548_v60 = vrot.slane %v360_v48, %v347_v40 }
  0x27   : > { %v4550_v61 = vrot.slane %v280_v49, %v279_v38  ;;  %v4552_v62 = vrot.slane %v284_v50, %v279_v38  ;;  %v4554_v63 = vrot.slane %v292_v51, %v279_v38  ;;  %v4556_v0 = vrot.slane %v356_v52, %v347_v40 }
  0x28   : > { %4207 = vset.pattern.permute.xlu1 %v7063_v1  ;;  %700 = vperm.xlu0 %4205, %v243_v7   ;;  %7369 = vst [vmem:[#allocation5_spill] sm:$0xff] %v4544_v58  ;;  %7370 = vst [vmem:[#allocation6_spill] sm:$0xff] %v4546_v59  ;;  %v4558_v3 = vrot.slane %v288_v53, %v279_v38 }
  0x29   : > { %670 = vperm.xlu1 %4207, %v237_v8   ;;  %7371 = vst [vmem:[#allocation7_spill] sm:$0xff] %v4548_v60 }
  0x2c   : > { %720 = vperm.xlu0 %4205, %v247_v9  }
  0x2d   : > { %675 = vperm.xlu1 %4207, %v238_v10  }
  0x30   : > { %740 = vperm.xlu0 %4205, %v4434_v11  }
  0x31   : > { %4208 = vset.pattern.permute.xlu1 %v7061_v2 }
  0x32   : > { %1333 = vperm.xlu1 %4208, %v238_v10  }
  0x34   : > { %760 = vperm.xlu0 %4205, %v4441_v12  }
  0x36   : > { %4209 = vset.pattern.permute.xlu1 %v7063_v1 }
  0x37   : > { %685 = vperm.xlu1 %4209, %v240_v13  }
  0x38   : > { %780 = vperm.xlu0 %4205, %v4450_v14  }
  0x3b   : > { %4210 = vset.pattern.permute.xlu1 %v7061_v2 }
  0x3c   : > { %1337 = vperm.xlu1 %4210, %v239_v6   ;;  %800 = vperm.xlu0 %4205, %v4457_v15   ;;  %v4565_v6 = vrot.slane %v420_v54, %v415_v44 }
  0x40   : > { %4211 = vset.pattern.permute.xlu1 %v7063_v1  ;;  %4233 = vset.pattern.permute.xlu0 %v7061_v2 }
  0x41   : > { %690 = vperm.xlu1 %4211, %v241_v16   ;;  %1325 = vperm.xlu0 %4233, %v236_v4  }
  0x45   : > { %695 = vperm.xlu1 %4211, %v242_v17   ;;  %1329 = vperm.xlu0 %4233, %v237_v8   ;;  %v4569_v8 = vrot.slane %v416_v56, %v415_v44 }
  0x49   : > { %4212 = vset.pattern.permute.xlu1 %v7061_v2  ;;  %1341 = vperm.xlu0 %4233, %v240_v13  }
  0x4a   : > { %1349 = vperm.xlu1 %4212, %v242_v17  }
  0x4d   : > { %1345 = vperm.xlu0 %4233, %v241_v16  }
  0x4e   : > { %4213 = vset.pattern.permute.xlu1 %v7063_v1 }
  0x4f   : > { %705 = vperm.xlu1 %4213, %v244_v18  }
  0x51   : > { %1357 = vperm.xlu0 %4233, %v244_v18  }
  0x53   : > { %4214 = vset.pattern.permute.xlu1 %v7061_v2 }
  0x54   : > { %1353 = vperm.xlu1 %4214, %v243_v7   ;;  %v4567_v7 = vrot.slane %v428_v55, %v415_v44 }
  0x55   : > { %1361 = vperm.xlu0 %4233, %v245_v19  }
  0x58   : > { %4215 = vset.pattern.permute.xlu1 %v7063_v1 }
  0x59   : > { %710 = vperm.xlu1 %4215, %v245_v19   ;;  %1373 = vperm.xlu0 %4233, %v248_v20  }
  0x5d   : > { %715 = vperm.xlu1 %4215, %v246_v21   ;;  %1377 = vperm.xlu0 %4233, %v249_v22  }
  0x61   : > { %4216 = vset.pattern.permute.xlu1 %v7061_v2  ;;  %1389 = vperm.xlu0 %4233, %v252_v23  }
  0x62   : > { %1365 = vperm.xlu1 %4216, %v246_v21  }
  0x65   : > { %1393 = vperm.xlu0 %4233, %v253_v24  }
  0x66   : > { %4217 = vset.pattern.permute.xlu1 %v7063_v1 }
  0x67   : > { %725 = vperm.xlu1 %4217, %v248_v20  }
  0x69   : > { %1405 = vperm.xlu0 %4233, %v4499_v25  }
  0x6b   : > { %4218 = vset.pattern.permute.xlu1 %v7061_v2 }
  0x6c   : > { %1369 = vperm.xlu1 %4218, %v247_v9   ;;  %v4571_v9 = vrot.slane %v424_v57, %v415_v44 }
  0x6d   : > { %1409 = vperm.xlu0 %4233, %v4505_v26  }
  0x70   : > { %4219 = vset.pattern.permute.xlu1 %v7063_v1 }
  0x71   : > { %730 = vperm.xlu1 %4219, %v249_v22   ;;  %1421 = vperm.xlu0 %4233, %v4512_v27  }
  0x75   : > { %735 = vperm.xlu1 %4219, %v250_v28   ;;  %1425 = vperm.xlu0 %4233, %v4522_v29  }
  0x79   : > { %4220 = vset.pattern.permute.xlu1 %v7061_v2  ;;  %1437 = vperm.xlu0 %4233, %v4529_v30  }
  0x7a   : > { %1381 = vperm.xlu1 %4220, %v250_v28  }
  0x7e   : > { %4221 = vset.pattern.permute.xlu1 %v7063_v1 }
  0x7f   : > { %745 = vperm.xlu1 %4221, %v252_v23  }
  0x83   : > { %4222 = vset.pattern.permute.xlu1 %v7061_v2 }
  0x84   : > { %1385 = vperm.xlu1 %4222, %v4434_v11  }
  0x88   : > { %4223 = vset.pattern.permute.xlu1 %v7063_v1 }
  0x89   : > { %750 = vperm.xlu1 %4223, %v253_v24  }
  0x8d   : > { %755 = vperm.xlu1 %4223, %v254_v37  }
  0x91   : > { %4224 = vset.pattern.permute.xlu1 %v7061_v2 }
  0x92   : > { %1397 = vperm.xlu1 %4224, %v254_v37  }
  0x96   : > { %4225 = vset.pattern.permute.xlu1 %v7063_v1  ;;  %v4561_v4 = vpop.permute.xlu1 %651  ;;  %v4563_v5 = vpop.permute.xlu0 %267 }
  0x97   : > { %765 = vperm.xlu1 %4225, %v4499_v25   ;;  %v314_v10 = vsub.f32 %v4563_v5, %v4552_v62  ;;  %v316_v11 = vsub.f32 %v4563_v5, %v4554_v63  ;;  %v313_v13 = vsub.f32 %v4563_v5, %v4550_v61  ;;  %v315_v16 = vsub.f32 %v4563_v5, %v4558_v3 }
  0x98   : > { %v382_v17 = vsub.f32 %v4563_v5, %v4546_v59  ;;  %v384_v18 = vsub.f32 %v4563_v5, %v4548_v60  ;;  %v381_v19 = vsub.f32 %v4563_v5, %v4544_v58  ;;  %v2210_v20 = vsub.f32 %v4561_v4, %v4550_v61 }
  0x99   : > { %v322_v21 = vand.u32 2147483647, %v314_v10  ;;  %v324_v22 = vand.u32 2147483647, %v316_v11  ;;  %v321_v23 = vand.u32 2147483647, %v313_v13  ;;  %v383_v24 = vsub.f32 %v4563_v5, %v4556_v0 }
  0x9a   : > { %v4592_v25 = vpop.permute.xlu0 %272  ;;  %v323_v28 = vand.u32 2147483647, %v315_v16  ;;  %v390_v31 = vand.u32 2147483647, %v382_v17  ;;  %v392_v32 = vand.u32 2147483647, %v384_v18  ;;  %v2212_v33 = vsub.f32 %v4561_v4, %v4558_v3  ;;  %v4616_v17 = vpop.permute.xlu1 %655 }
  0x9b   : > { %4226 = vset.pattern.permute.xlu1 %v7061_v2  ;;  %v318_v34 = vsub.f32 %v4592_v25, %v4552_v62  ;;  %v330_v35 = vsub.f32 1.0, %v322_v21  ;;  %v320_v36 = vsub.f32 %v4592_v25, %v4554_v63  ;;  %v332_v37 = vsub.f32 1.0, %v324_v22  ;;  %v258_v18 = vld [vmem:[%s7056_s1 + $0xc8] sm:$0xff] }
  0x9c   : > { %1401 = vperm.xlu1 %4226, %v4441_v12   ;;  %v317_v38 = vsub.f32 %v4592_v25, %v4550_v61  ;;  %v329_v39 = vsub.f32 1.0, %v321_v23  ;;  %v319_v40 = vsub.f32 %v4592_v25, %v4558_v3  ;;  %v331_v41 = vsub.f32 1.0, %v323_v28 }
  0x9d   : > { %v326_v42 = vand.u32 2147483647, %v318_v34  ;;  %v338_v43 = vmax.f32 %v330_v35, 0.0  ;;  %v328_v44 = vand.u32 2147483647, %v320_v36  ;;  %v340_v45 = vmax.f32 %v332_v37, 0.0 }
  0x9e   : > { %v325_v46 = vand.u32 2147483647, %v317_v38  ;;  %v337_v47 = vmax.f32 %v329_v39, 0.0  ;;  %v327_v48 = vand.u32 2147483647, %v319_v40  ;;  %v339_v49 = vmax.f32 %v331_v41, 0.0 }
  0x9f   : > { %v4606_v50 = vpop.permute.xlu0 %660  ;;  %v334_v51 = vsub.f32 1.0, %v326_v42  ;;  %v336_v12 = vsub.f32 1.0, %v328_v44  ;;  %v386_v52 = vsub.f32 %v4592_v25, %v4546_v59  ;;  %v398_v53 = vsub.f32 1.0, %v390_v31 }
  0xa0   : > { %4227 = vset.pattern.permute.xlu1 %v7063_v1  ;;  %v333_v54 = vsub.f32 1.0, %v325_v46  ;;  %v335_v55 = vsub.f32 1.0, %v327_v48  ;;  %v388_v56 = vsub.f32 %v4592_v25, %v4548_v60  ;;  %v400_v57 = vsub.f32 1.0, %v392_v32 }
  0xa1   : > { %770 = vperm.xlu1 %4227, %v4505_v26   ;;  %v342_v10 = vmax.f32 %v334_v51, 0.0  ;;  %v344_v11 = vmax.f32 %v336_v12, 0.0  ;;  %v394_v13 = vand.u32 2147483647, %v386_v52  ;;  %v4614_v16 = vmax.f32 %v398_v53, 0.0 }
  0xa2   : > { %v341_v21 = vmax.f32 %v333_v54, 0.0  ;;  %v343_v22 = vmax.f32 %v335_v55, 0.0  ;;  %v396_v23 = vand.u32 2147483647, %v388_v56  ;;  %v4621_v28 = vmax.f32 %v400_v57, 0.0 }
  0xa3   : > { %7372 = vst [vmem:[#allocation8_spill] sm:$0xff] %v4614_v16  ;;  %v4623_v31 = vpop.permute.xlu0 %680  ;;  %v482_v32 = vpack.c.bf16 %v342_v10, %v338_v43  ;;  %v484_v26 = vpack.c.bf16 %v344_v11, %v340_v45  ;;  %v402_v34 = vsub.f32 1.0, %v394_v13  ;;  %v385_v35 = vsub.f32 %v4592_v25, %v4544_v58 }
  0xa4   : > { %7373 = vst [vmem:[#allocation9_spill] sm:$0xff] %v4621_v28  ;;  %v481_v36 = vpack.c.bf16 %v341_v21, %v337_v47  ;;  %v483_v37 = vpack.c.bf16 %v343_v22, %v339_v49  ;;  %v404_v38 = vsub.f32 1.0, %v396_v23  ;;  %v389_v39 = vand.u32 2147483647, %v381_v19 }
  0xa5   : > { %775 = vperm.xlu1 %4227, %v258_v18   ;;  %524 = vmatprep.subr.bf16.mxu0 %v482_v32  ;;  %v4627_v40 = vmax.f32 %v402_v34, 0.0  ;;  %v393_v41 = vand.u32 2147483647, %v385_v35  ;;  %v2214_v42 = vsub.f32 %v4616_v17, %v4550_v61  ;;  %v2338_v43 = vand.u32 2147483647, %v2210_v20 }
  0xa6   : > { %587 = vmatprep.subr.bf16.mxu1 %v484_v26  ;;  %525 = vmatpush1.bf16.msra.mxu0 %v481_v36  ;;  %v4634_v44 = vmax.f32 %v404_v38, 0.0  ;;  %v397_v45 = vsub.f32 1.0, %v389_v39  ;;  %v387_v19 = vsub.f32 %v4592_v25, %v4556_v0  ;;  %v391_v46 = vand.u32 2147483647, %v383_v24 }
  0xa7   : > { %7374 = vst [vmem:[#allocation10_spill] sm:$0xff] %v4627_v40  ;;  %588 = vmatpush1.bf16.msra.mxu1 %v483_v37  ;;  %v4641_v47 = vpop.permute.xlu0 %700  ;;  %v486_v48 = vpack.c.bf16 %v4627_v40, %v4614_v16  ;;  %v401_v49 = vsub.f32 1.0, %v393_v41  ;;  %v2342_v20 = vand.u32 2147483647, %v2214_v42  ;;  %v2466_v51 = vsub.f32 1.0, %v2338_v43 }
  0xa8   : > { %7375 = vst [vmem:[#allocation11_spill] sm:$0xff] %v4634_v44  ;;  %v488_v12 = vpack.c.bf16 %v4634_v44, %v4621_v28  ;;  %v405_v52 = vmax.f32 %v397_v45, 0.0  ;;  %v395_v53 = vand.u32 2147483647, %v387_v19  ;;  %v399_v54 = vsub.f32 1.0, %v391_v46 }
  0xa9   : > { %4228 = vset.pattern.permute.xlu1 %v7061_v2  ;;  %526 = vmatprep.subr.bf16.mxu0 %v486_v48  ;;  %v409_v55 = vmax.f32 %v401_v49, 0.0  ;;  %v2470_v24 = vsub.f32 1.0, %v2342_v20  ;;  %v4648_v56 = vmax.f32 %v2466_v51, 0.0  ;;  %v2216_v57 = vsub.f32 %v4616_v17, %v4558_v3 }
  0xaa   : > { %589 = vmatprep.subr.bf16.mxu1 %v488_v12  ;;  %1413 = vperm.xlu1 %4228, %v258_v18   ;;  %v403_v10 = vsub.f32 1.0, %v395_v53  ;;  %v407_v11 = vmax.f32 %v399_v54, 0.0  ;;  %v2340_v13 = vand.u32 2147483647, %v2212_v33  ;;  %v450_v21 = vsub.f32 %v4563_v5, %v4565_v6 }
  0xab   : > { %v485_v22 = vpack.c.bf16 %v409_v55, %v405_v52  ;;  %v4657_v23 = vmax.f32 %v2470_v24, 0.0  ;;  %v4660_v32 = vmul.f32 %v4648_v56, %v405_v52  ;;  %v2344_v26 = vand.u32 2147483647, %v2216_v57  ;;  %v4662_v34 = vpop.permute.xlu0 %720 }
  0xac   : > { %v411_v35 = vmax.f32 %v403_v10, 0.0  ;;  %v2468_v18 = vsub.f32 1.0, %v2340_v13  ;;  %v454_v36 = vsub.f32 %v4592_v25, %v4565_v6  ;;  %v458_v37 = vand.u32 2147483647, %v450_v21 }
  0xad   : > { %7376 = vst [vmem:[#allocation12_spill] sm:$0xff] %v4660_v32  ;;  %527 = vmatpush1.bf16.msra.mxu0 %v485_v22  ;;  %v4667_v33 = vmul.f32 %v4657_v23, %v409_v55  ;;  %v2472_v38 = vsub.f32 1.0, %v2344_v26  ;;  %v452_v39 = vsub.f32 %v4563_v5, %v4567_v7  ;;  %v456_v41 = vsub.f32 %v4592_v25, %v4567_v7 }
  0xae   : > { %v487_v42 = vpack.c.bf16 %v411_v35, %v407_v11  ;;  %v4673_v43 = vmax.f32 %v2468_v18, 0.0  ;;  %v462_v45 = vand.u32 2147483647, %v454_v36  ;;  %v466_v19 = vsub.f32 1.0, %v458_v37  ;;  %4229 = vset.pattern.permute.xlu1 %v7063_v1 }
  0xaf   : > { %7377 = vst [vmem:[#allocation13_spill] sm:$0xff] %v4667_v33  ;;  %v4676_v46 = vmax.f32 %v2472_v38, 0.0  ;;  %v460_v48 = vand.u32 2147483647, %v452_v39  ;;  %v464_v49 = vand.u32 2147483647, %v456_v41  ;;  %v449_v20 = vsub.f32 %v4563_v5, %v4569_v8  ;;  %785 = vperm.xlu1 %4229, %v4512_v27   ;;  %v4681_v51 = vpop.permute.xlu0 %740 }
  0xb0   : > { %590 = vmatpush1.bf16.msra.mxu1 %v487_v42  ;;  %v4684_v12 = vmul.f32 %v4673_v43, %v407_v11  ;;  %v470_v52 = vsub.f32 1.0, %v462_v45  ;;  %v4686_v53 = vmax.f32 %v466_v19, 0.0  ;;  %v453_v54 = vsub.f32 %v4592_v25, %v4569_v8 }
  0xb1   : > { %v4691_v55 = vmul.f32 %v4676_v46, %v411_v35  ;;  %v468_v24 = vsub.f32 1.0, %v460_v48  ;;  %v472_v57 = vsub.f32 1.0, %v464_v49  ;;  %v457_v10 = vand.u32 2147483647, %v449_v20 }
  0xb2   : > { %7378 = vst [vmem:[#allocation14_spill] sm:$0xff] %v4684_v12  ;;  %v4693_v13 = vmax.f32 %v470_v52, 0.0  ;;  %v461_v27 = vand.u32 2147483647, %v453_v54  ;;  %v451_v21 = vsub.f32 %v4563_v5, %v4571_v9  ;;  %v455_v11 = vsub.f32 %v4592_v25, %v4571_v9 }
  0xb3   : > { %7379 = vst [vmem:[#allocation15_spill] sm:$0xff] %v4691_v55  ;;  %v4699_v22 = vmax.f32 %v468_v24, 0.0  ;;  %v4701_v26 = vmax.f32 %v472_v57, 0.0  ;;  %v465_v18 = vsub.f32 1.0, %v457_v10  ;;  %v809_v35 = vsub.f32 %v4561_v4, %v4546_v59  ;;  %4230 = vset.pattern.permute.xlu1 %v7061_v2  ;;  %v4706_v36 = vpop.permute.xlu0 %760  ;;  %v4727_v10 = vpop.permute.xlu1 %665 }
  0xb4   : > { %v490_v37 = vpack.c.bf16 %v4693_v13, %v4686_v53  ;;  %v469_v5 = vsub.f32 1.0, %v461_v27  ;;  %v459_v38 = vand.u32 2147483647, %v451_v21  ;;  %v463_v39 = vand.u32 2147483647, %v455_v11  ;;  %1417 = vperm.xlu1 %4230, %v4450_v14  }
  0xb5   : > { %v492_v25 = vpack.c.bf16 %v4701_v26, %v4699_v22  ;;  %v4713_v41 = vmax.f32 %v465_v18, 0.0  ;;  %v813_v42 = vsub.f32 %v4616_v17, %v4546_v59  ;;  %v937_v45 = vand.u32 2147483647, %v809_v35 }
  0xb6   : > { %528 = vmatprep.subr.bf16.mxu0 %v490_v37  ;;  %v4717_v19 = vmax.f32 %v469_v5, 0.0  ;;  %v467_v48 = vsub.f32 1.0, %v459_v38  ;;  %v471_v49 = vsub.f32 1.0, %v463_v39  ;;  %v811_v20 = vsub.f32 %v4561_v4, %v4548_v60  ;;  %v4236_v38 = vld [vmem:[%s7058_s3] sm:$0xff]  }
  0xb7   : > { %591 = vmatprep.subr.bf16.mxu1 %v492_v25  ;;  %v941_v52 = vand.u32 2147483647, %v813_v42  ;;  %v1065_v14 = vsub.f32 1.0, %v937_v45  ;;  %v815_v54 = vsub.f32 %v4616_v17, %v4548_v60  ;;  %v808_v24 = vsub.f32 %v4561_v4, %v4544_v58  ;;  %v4725_v57 = vpop.permute.xlu0 %780 }
  0xb8   : > { %v489_v27 = vpack.c.bf16 %v4717_v19, %v4713_v41  ;;  %v4731_v21 = vmax.f32 %v467_v48, 0.0  ;;  %v4733_v11 = vmax.f32 %v471_v49, 0.0  ;;  %v939_v18 = vand.u32 2147483647, %v811_v20  ;;  %4231 = vset.pattern.permute.xlu1 %v7063_v1  ;;  %v262_v49 = vld [vmem:[%s7056_s1 + $0xe8] sm:$0xff] }
  0xb9   : > { %v1069_v35 = vsub.f32 1.0, %v941_v52  ;;  %v1193_v37 = vmax.f32 %v1065_v14, 0.0  ;;  %v943_v5 = vand.u32 2147483647, %v815_v54  ;;  %v812_v39 = vsub.f32 %v4616_v17, %v4544_v58  ;;  %790 = vperm.xlu1 %4231, %v4522_v29  }
  0xba   : > { %529 = vmatpush1.bf16.msra.mxu0 %v489_v27  ;;  %v491_v25 = vpack.c.bf16 %v4733_v11, %v4731_v21  ;;  %v1067_v42 = vsub.f32 1.0, %v939_v18  ;;  %v936_v45 = vand.u32 2147483647, %v808_v24  ;;  %v810_v48 = vsub.f32 %v4561_v4, %v4556_v0 }
  0xbb   : > { %v1197_v20 = vmax.f32 %v1069_v35, 0.0  ;;  %v1921_v52 = vmul.f32 %v1193_v37, %v4686_v53  ;;  %v1071_v14 = vsub.f32 1.0, %v943_v5  ;;  %v940_v54 = vand.u32 2147483647, %v812_v39  ;;  %v4750_v2 = vpop.permute.xlu0 %800  ;;  %v4758_v37 = vpop.permute.xlu1 %1321 }
  0xbc   : > { %592 = vmatpush1.bf16.msra.mxu1 %v491_v25  ;;  %v1195_v29 = vmax.f32 %v1067_v42, 0.0  ;;  %v1064_v27 = vsub.f32 1.0, %v936_v45  ;;  %v814_v24 = vsub.f32 %v4616_v17, %v4556_v0  ;;  %v938_v18 = vand.u32 2147483647, %v810_v48  ;;  %7380 = vst [vmem:[#allocation16_spill] sm:$0xff] %v4758_v37 }
  0xbd   : > { %v1925_v1 = vmul.f32 %v1197_v20, %v4693_v13  ;;  %v1199_v55 = vmax.f32 %v1071_v14, 0.0  ;;  %4104 = vmatmul.mubr.msk.bf16.vlgmr.msra.gmra.mrb[0].mxu0 %vm514_vm0, %v4236_v38  ;;  %v1068_v12 = vsub.f32 1.0, %v940_v54  ;;  %795 = vperm.xlu1 %4231, %v262_v49   ;;  %v817_v35 = vsub.f32 %v4606_v50, %v4546_v59 }
  0xbe   : > { %v1923_v5 = vmul.f32 %v1195_v29, %v4699_v22  ;;  %v1192_v39 = vmax.f32 %v1064_v27, 0.0  ;;  %v942_v25 = vand.u32 2147483647, %v814_v24  ;;  %v1066_v42 = vsub.f32 1.0, %v938_v18 }
  0xbf   : > { %v7381_v45 = vmov 0   ;;  %v2049_v48 = vpack.c.bf16 %v1925_v1, %v1921_v52  ;;  %v1927_v20 = vmul.f32 %v1199_v55, %v4701_v26  ;;  %4107 = vmatmul.mubr.msk.bf16.vlgmr.msra.gmra.mrb[0].mxu1 %vm514_vm0, %v4236_v38  ;;  %v1196_v14 = vmax.f32 %v1068_v12, 0.0 }
  0xc0   : > { %566 = vmatprep.mubr.bf16.mxu0 %v7381_v45  ;;  %v821_v54 = vsub.f32 %v4727_v10, %v4546_v59  ;;  %v1920_v33 = vmul.f32 %v1192_v39, %v4713_v41  ;;  %v1070_v32 = vsub.f32 1.0, %v942_v25  ;;  %v1194_v44 = vmax.f32 %v1066_v42, 0.0  ;;  %v4767_v28 = vpop.permute.xlu0 %1325  ;;  %629 = vmatprep.mubr.bf16.mxu1 %v7381_v45 }
  0xc1   : > { %7382 = vst [vmem:[#allocation17_spill] sm:$0xff] %v4767_v28  ;;  %v945_v29 = vand.u32 2147483647, %v817_v35  ;;  %2124 = vmatprep.subr.bf16.mxu0 %v2049_v48  ;;  %v2051_v27 = vpack.c.bf16 %v1927_v20, %v1923_v5  ;;  %v1924_v1 = vmul.f32 %v1196_v14, %v4717_v19  ;;  %v7383_v55 = vmov 1  }
  0xc2   : > { %4232 = vset.pattern.permute.xlu1 %v7383_v55  ;;  %v949_v38 = vand.u32 2147483647, %v821_v54  ;;  %v1441_v12 = vsub.f32 %v4758_v37, %v4565_v6  ;;  %v1198_v52 = vmax.f32 %v1070_v32, 0.0  ;;  %v1922_v24 = vmul.f32 %v1194_v44, %v4731_v21 }
  0xc3   : > { %1429 = vperm.xlu1 %4232, %v262_v49   ;;  %v1073_v18 = vsub.f32 1.0, %v945_v29  ;;  %v1445_v35 = vsub.f32 %v4767_v28, %v4565_v6  ;;  %2167 = vmatprep.subr.bf16.mxu1 %v2051_v27  ;;  %v2048_v39 = vpack.c.bf16 %v1924_v1, %v1920_v33  ;;  %v819_v42 = vsub.f32 %v4606_v50, %v4548_v60  ;;  %v4784_v33 = vpop.permute.xlu1 %670 }
  0xc4   : > { %v1077_v25 = vsub.f32 1.0, %v949_v38  ;;  %v1561_v5 = vand.u32 2147483647, %v1441_v12  ;;  %v1926_v48 = vmul.f32 %v1198_v52, %v4733_v11  ;;  %v823_v32 = vsub.f32 %v4727_v10, %v4548_v60  ;;  %7384 = vst [vmem:[#allocation18_spill] sm:$0xff] %v4784_v33 }
  0xc5   : > { %v1201_v20 = vmax.f32 %v1073_v18, 0.0  ;;  %v1565_v14 = vand.u32 2147483647, %v1445_v35  ;;  %2125 = vmatpush1.bf16.msra.mxu0 %v2048_v39  ;;  %v947_v54 = vand.u32 2147483647, %v819_v42  ;;  %v1443_v29 = vsub.f32 %v4758_v37, %v4567_v7 }
  0xc6   : > { %v1205_v44 = vmax.f32 %v1077_v25, 0.0  ;;  %v1681_v49 = vsub.f32 1.0, %v1561_v5  ;;  %v2050_v27 = vpack.c.bf16 %v1926_v48, %v1922_v24  ;;  %v951_v38 = vand.u32 2147483647, %v823_v32 }
  0xc7   : > { %4234 = vset.pattern.permute.xlu1 %v7381_v45  ;;  %v1685_v1 = vsub.f32 1.0, %v1565_v14  ;;  %v1447_v12 = vsub.f32 %v4767_v28, %v4567_v7  ;;  %v1075_v18 = vsub.f32 1.0, %v947_v54  ;;  %v1563_v35 = vand.u32 2147483647, %v1443_v29 }
  0xc8   : > { %805 = vperm.xlu1 %4234, %v4529_v30   ;;  %v4790_v52 = vmax.f32 %v1681_v49, 0.0  ;;  %v816_v39 = vsub.f32 %v4606_v50, %v4544_v58  ;;  %2168 = vmatpush1.bf16.msra.mxu1 %v2050_v27  ;;  %v1079_v24 = vsub.f32 1.0, %v951_v38  ;;  %v820_v42 = vsub.f32 %v4727_v10, %v4544_v58 }
  0xc9   : > { %v4794_v25 = vmax.f32 %v1685_v1, 0.0  ;;  %v1567_v5 = vand.u32 2147483647, %v1447_v12  ;;  %v1203_v14 = vmax.f32 %v1075_v18, 0.0  ;;  %v1683_v32 = vsub.f32 1.0, %v1563_v35 }
  0xca   : > { %v1929_v48 = vmul.f32 %v4790_v52, %v1201_v20  ;;  %v944_v30 = vand.u32 2147483647, %v816_v39  ;;  %v1207_v54 = vmax.f32 %v1079_v24, 0.0  ;;  %v948_v40 = vand.u32 2147483647, %v820_v42  ;;  %v4807_v20 = vpop.permute.xlu1 %675 }
  0xcb   : > { %7385 = vst [vmem:[#allocation19_spill] sm:$0xff] %v4794_v25  ;;  %v1933_v49 = vmul.f32 %v4794_v25, %v1205_v44  ;;  %v1687_v29 = vsub.f32 1.0, %v1567_v5  ;;  %v4801_v27 = vmax.f32 %v1683_v32, 0.0  ;;  %v1440_v38 = vsub.f32 %v4758_v37, %v4569_v8  ;;  %7387 = vst [vmem:[#allocation21_spill] sm:$0xff] %v4807_v20 }
  0xcc   : > { %4235 = vset.pattern.permute.xlu1 %v7383_v55  ;;  %v1072_v1 = vsub.f32 1.0, %v944_v30  ;;  %v1444_v12 = vsub.f32 %v4767_v28, %v4569_v8  ;;  %v1076_v35 = vsub.f32 1.0, %v948_v40  ;;  %v818_v55 = vsub.f32 %v4606_v50, %v4556_v0 }
  0xcd   : > { %7386 = vst [vmem:[#allocation20_spill] sm:$0xff] %v4801_v27  ;;  %1433 = vperm.xlu1 %4235, %v4457_v15   ;;  %v2053_v18 = vpack.c.bf16 %v1933_v49, %v1929_v48  ;;  %v4810_v44 = vmax.f32 %v1687_v29, 0.0  ;;  %v1931_v39 = vmul.f32 %v4801_v27, %v1203_v14  ;;  %v1560_v5 = vand.u32 2147483647, %v1440_v38 }
  0xce   : > { %v1200_v24 = vmax.f32 %v1072_v1, 0.0  ;;  %v1564_v42 = vand.u32 2147483647, %v1444_v12  ;;  %v1204_v30 = vmax.f32 %v1076_v35, 0.0  ;;  %v822_v16 = vsub.f32 %v4727_v10, %v4556_v0 }
  0xcf   : > { %7388 = vst [vmem:[#allocation22_spill] sm:$0xff] %v4810_v44  ;;  %2126 = vmatprep.subr.bf16.mxu0 %v2053_v18  ;;  %v1935_v32 = vmul.f32 %v4810_v44, %v1207_v54  ;;  %v946_v15 = vand.u32 2147483647, %v818_v55  ;;  %v1680_v48 = vsub.f32 1.0, %v1560_v5  ;;  %v1442_v40 = vsub.f32 %v4758_v37, %v4571_v9  ;;  %v4824_v54 = vpop.permute.xlu0 %1329 }
  0xd0   : > { %v1684_v49 = vsub.f32 1.0, %v1564_v42  ;;  %v1446_v29 = vsub.f32 %v4767_v28, %v4571_v9  ;;  %v950_v1 = vand.u32 2147483647, %v822_v16  ;;  %v825_v12 = vsub.f32 %v4784_v33, %v4546_v59  ;;  %7389 = vst [vmem:[#allocation23_spill] sm:$0xff] %v4824_v54  ;;  %v4830_v42 = vpop.permute.xlu1 %1333 }
  0xd1   : > { %v2055_v14 = vpack.c.bf16 %v1935_v32, %v1931_v39  ;;  %v1074_v38 = vsub.f32 1.0, %v946_v15  ;;  %v4826_v18 = vmax.f32 %v1680_v48, 0.0  ;;  %v1562_v55 = vand.u32 2147483647, %v1442_v40  ;;  %7392 = vst [vmem:[#allocation26_spill] sm:$0xff] %v4830_v42 }
  0xd2   : > { %v4828_v35 = vmax.f32 %v1684_v49, 0.0  ;;  %v1566_v5 = vand.u32 2147483647, %v1446_v29  ;;  %v1078_v37 = vsub.f32 1.0, %v950_v1  ;;  %v829_v16 = vsub.f32 %v4807_v20, %v4546_v59 }
  0xd3   : > { %7390 = vst [vmem:[#allocation24_spill] sm:$0xff] %v4826_v18  ;;  %2169 = vmatprep.subr.bf16.mxu1 %v2055_v14  ;;  %v1202_v44 = vmax.f32 %v1074_v38, 0.0  ;;  %v953_v39 = vand.u32 2147483647, %v825_v12  ;;  %v1928_v32 = vmul.f32 %v4826_v18, %v1200_v24  ;;  %v1682_v28 = vsub.f32 1.0, %v1562_v55 }
  0xd4   : > { %7391 = vst [vmem:[#allocation25_spill] sm:$0xff] %v4828_v35  ;;  %v1932_v15 = vmul.f32 %v4828_v35, %v1204_v30  ;;  %v1686_v48 = vsub.f32 1.0, %v1566_v5  ;;  %v1206_v27 = vmax.f32 %v1078_v37, 0.0  ;;  %v957_v49 = vand.u32 2147483647, %v829_v16  ;;  %v4864_v35 = vpop.permute.xlu1 %685 }
  0xd5   : > { %v1081_v25 = vsub.f32 1.0, %v953_v39  ;;  %v1449_v40 = vsub.f32 %v4824_v54, %v4565_v6  ;;  %v4838_v14 = vmax.f32 %v1682_v28, 0.0  ;;  %v1453_v38 = vsub.f32 %v4830_v42, %v4565_v6  ;;  %7397 = vst [vmem:[#allocation31_spill] sm:$0xff] %v4864_v35 }
  0xd6   : > { %v2052_v29 = vpack.c.bf16 %v1932_v15, %v1928_v32  ;;  %v4840_v1 = vmax.f32 %v1686_v48, 0.0  ;;  %v1085_v12 = vsub.f32 1.0, %v957_v49  ;;  %v827_v30 = vsub.f32 %v4784_v33, %v4548_v60 }
  0xd7   : > { %7393 = vst [vmem:[#allocation27_spill] sm:$0xff] %v4838_v14  ;;  %v1209_v24 = vmax.f32 %v1081_v25, 0.0  ;;  %v1569_v18 = vand.u32 2147483647, %v1449_v40  ;;  %v1930_v37 = vmul.f32 %v4838_v14, %v1202_v44  ;;  %v1573_v5 = vand.u32 2147483647, %v1453_v38 }
  0xd8   : > { %7394 = vst [vmem:[#allocation28_spill] sm:$0xff] %v4840_v1  ;;  %2127 = vmatpush1.bf16.msra.mxu0 %v2052_v29  ;;  %v1934_v55 = vmul.f32 %v4840_v1, %v1206_v27  ;;  %v831_v28 = vsub.f32 %v4807_v20, %v4548_v60  ;;  %v1213_v16 = vmax.f32 %v1085_v12, 0.0  ;;  %v955_v32 = vand.u32 2147483647, %v827_v30 }
  0xd9   : > { %v1689_v39 = vsub.f32 1.0, %v1569_v18  ;;  %v1451_v15 = vsub.f32 %v4824_v54, %v4567_v7  ;;  %v1693_v48 = vsub.f32 1.0, %v1573_v5  ;;  %v1455_v40 = vsub.f32 %v4830_v42, %v4567_v7 }
  0xda   : > { %v2054_v25 = vpack.c.bf16 %v1934_v55, %v1930_v37  ;;  %v959_v49 = vand.u32 2147483647, %v831_v28  ;;  %v1083_v44 = vsub.f32 1.0, %v955_v32  ;;  %v824_v38 = vsub.f32 %v4784_v33, %v4544_v58 }
  0xdb   : > { %v4854_v29 = vmax.f32 %v1689_v39, 0.0  ;;  %v1571_v27 = vand.u32 2147483647, %v1451_v15  ;;  %v4858_v12 = vmax.f32 %v1693_v48, 0.0  ;;  %v1575_v30 = vand.u32 2147483647, %v1455_v40 }
  0xdc   : > { %2170 = vmatpush1.bf16.msra.mxu1 %v2054_v25  ;;  %v1087_v18 = vsub.f32 1.0, %v959_v49  ;;  %v828_v37 = vsub.f32 %v4807_v20, %v4544_v58  ;;  %v1211_v5 = vmax.f32 %v1083_v44, 0.0  ;;  %v952_v1 = vand.u32 2147483647, %v824_v38 }
  0xdd   : > { %7395 = vst [vmem:[#allocation29_spill] sm:$0xff] %v4854_v29  ;;  %7396 = vst [vmem:[#allocation30_spill] sm:$0xff] %v4858_v12  ;;  %v1937_v55 = vmul.f32 %v4854_v29, %v1209_v24  ;;  %v1691_v28 = vsub.f32 1.0, %v1571_v27  ;;  %v1941_v39 = vmul.f32 %v4858_v12, %v1213_v16  ;;  %v1695_v15 = vsub.f32 1.0, %v1575_v30 }
  0xde   : > { %v1215_v32 = vmax.f32 %v1087_v18, 0.0  ;;  %v956_v14 = vand.u32 2147483647, %v828_v37  ;;  %v1080_v48 = vsub.f32 1.0, %v952_v1  ;;  %v1448_v49 = vsub.f32 %v4824_v54, %v4569_v8 }
  0xdf   : > { %v4866_v25 = vmax.f32 %v1691_v28, 0.0  ;;  %v1452_v40 = vsub.f32 %v4830_v42, %v4569_v8  ;;  %v2057_v24 = vpack.c.bf16 %v1941_v39, %v1937_v55  ;;  %v4872_v44 = vmax.f32 %v1695_v15, 0.0 }
  0xe0   : > { %v1084_v27 = vsub.f32 1.0, %v956_v14  ;;  %v826_v16 = vsub.f32 %v4784_v33, %v4556_v0  ;;  %v1208_v18 = vmax.f32 %v1080_v48, 0.0  ;;  %v1568_v30 = vand.u32 2147483647, %v1448_v49 }
  0xe1   : > { %7398 = vst [vmem:[#allocation32_spill] sm:$0xff] %v4866_v25  ;;  %7399 = vst [vmem:[#allocation33_spill] sm:$0xff] %v4872_v44  ;;  %v1939_v38 = vmul.f32 %v4866_v25, %v1211_v5  ;;  %v1572_v37 = vand.u32 2147483647, %v1452_v40  ;;  %2128 = vmatprep.subr.bf16.mxu0 %v2057_v24  ;;  %v1943_v1 = vmul.f32 %v4872_v44, %v1215_v32  ;;  %v4886_v32 = vpop.permute.xlu1 %1337 }
  0xe2   : > { %v1212_v28 = vmax.f32 %v1084_v27, 0.0  ;;  %v830_v12 = vsub.f32 %v4807_v20, %v4556_v0  ;;  %v954_v29 = vand.u32 2147483647, %v826_v16  ;;  %v1688_v55 = vsub.f32 1.0, %v1568_v30  ;;  %7400 = vst [vmem:[#allocation34_spill] sm:$0xff] %v4886_v32 }
  0xe3   : > { %v1692_v39 = vsub.f32 1.0, %v1572_v37  ;;  %v1450_v14 = vsub.f32 %v4824_v54, %v4571_v9  ;;  %v1454_v15 = vsub.f32 %v4830_v42, %v4571_v9  ;;  %v2059_v5 = vpack.c.bf16 %v1943_v1, %v1939_v38  ;;  %v4892_v37 = vpop.permute.xlu0 %1341 }
  0xe4   : > { %v958_v48 = vand.u32 2147483647, %v830_v12  ;;  %v1082_v49 = vsub.f32 1.0, %v954_v29  ;;  %v833_v40 = vsub.f32 %v4623_v31, %v4546_v59  ;;  %v4888_v24 = vmax.f32 %v1688_v55, 0.0  ;;  %7403 = vst [vmem:[#allocation37_spill] sm:$0xff] %v4892_v37 }
  0xe5   : > { %v4890_v27 = vmax.f32 %v1692_v39, 0.0  ;;  %v1570_v16 = vand.u32 2147483647, %v1450_v14  ;;  %v1574_v30 = vand.u32 2147483647, %v1454_v15  ;;  %2171 = vmatprep.subr.bf16.mxu1 %v2059_v5  ;;  %v837_v12 = vsub.f32 %v4864_v35, %v4546_v59 }
  0xe6   : > { %7401 = vst [vmem:[#allocation35_spill] sm:$0xff] %v4888_v24  ;;  %v1086_v54 = vsub.f32 1.0, %v958_v48  ;;  %v1210_v44 = vmax.f32 %v1082_v49, 0.0  ;;  %v961_v29 = vand.u32 2147483647, %v833_v40  ;;  %v1936_v38 = vmul.f32 %v4888_v24, %v1208_v18 }
  0xe7   : > { %7402 = vst [vmem:[#allocation36_spill] sm:$0xff] %v4890_v27  ;;  %v1940_v1 = vmul.f32 %v4890_v27, %v1212_v28  ;;  %v1690_v42 = vsub.f32 1.0, %v1570_v16  ;;  %v1694_v55 = vsub.f32 1.0, %v1574_v30  ;;  %v965_v39 = vand.u32 2147483647, %v837_v12 }
  0xe8   : > { %v1214_v25 = vmax.f32 %v1086_v54, 0.0  ;;  %v1089_v20 = vsub.f32 1.0, %v961_v29  ;;  %v1457_v14 = vsub.f32 %v4886_v32, %v4565_v6  ;;  %v1461_v49 = vsub.f32 %v4892_v37, %v4565_v6 }
  0xe9   : > { %v2056_v15 = vpack.c.bf16 %v1940_v1, %v1936_v38  ;;  %v4900_v5 = vmax.f32 %v1690_v42, 0.0  ;;  %v4902_v48 = vmax.f32 %v1694_v55, 0.0  ;;  %v1093_v40 = vsub.f32 1.0, %v965_v39 }
  0xea   : > { %v1217_v18 = vmax.f32 %v1089_v20, 0.0  ;;  %v1577_v24 = vand.u32 2147483647, %v1457_v14  ;;  %v835_v28 = vsub.f32 %v4623_v31, %v4548_v60  ;;  %v1581_v30 = vand.u32 2147483647, %v1461_v49  ;;  %v4914_v20 = vpop.permute.xlu1 %690 }
  0xeb   : > { %7404 = vst [vmem:[#allocation38_spill] sm:$0xff] %v4900_v5  ;;  %7405 = vst [vmem:[#allocation39_spill] sm:$0xff] %v4902_v48  ;;  %2129 = vmatpush1.bf16.msra.mxu0 %v2056_v15  ;;  %v1938_v54 = vmul.f32 %v4900_v5, %v1210_v44  ;;  %v1942_v16 = vmul.f32 %v4902_v48, %v1214_v25  ;;  %v839_v42 = vsub.f32 %v4864_v35, %v4548_v60 }
  0xec   : > { %v1221_v12 = vmax.f32 %v1093_v40, 0.0  ;;  %v1697_v29 = vsub.f32 1.0, %v1577_v24  ;;  %v963_v38 = vand.u32 2147483647, %v835_v28  ;;  %v1459_v1 = vsub.f32 %v4886_v32, %v4567_v7  ;;  %7406 = vst [vmem:[#allocation40_spill] sm:$0xff] %v4914_v20 }
  0xed   : > { %v2058_v55 = vpack.c.bf16 %v1942_v16, %v1938_v54  ;;  %v1701_v39 = vsub.f32 1.0, %v1581_v30  ;;  %v967_v14 = vand.u32 2147483647, %v839_v42  ;;  %v1463_v44 = vsub.f32 %v4892_v37, %v4567_v7 }
  0xee   : > { %v4918_v15 = vmax.f32 %v1697_v29, 0.0  ;;  %v1091_v25 = vsub.f32 1.0, %v963_v38  ;;  %v1579_v49 = vand.u32 2147483647, %v1459_v1  ;;  %v832_v40 = vsub.f32 %v4623_v31, %v4544_v58 }
  0xef   : > { %2172 = vmatpush1.bf16.msra.mxu1 %v2058_v55  ;;  %v4922_v24 = vmax.f32 %v1701_v39, 0.0  ;;  %v1095_v28 = vsub.f32 1.0, %v967_v14  ;;  %v1583_v48 = vand.u32 2147483647, %v1463_v44  ;;  %v836_v54 = vsub.f32 %v4864_v35, %v4544_v58  ;;  %v4934_v44 = vpop.permute.xlu1 %695 }
  0xf0   : > { %7407 = vst [vmem:[#allocation41_spill] sm:$0xff] %v4918_v15  ;;  %v1945_v16 = vmul.f32 %v4918_v15, %v1217_v18  ;;  %v1219_v30 = vmax.f32 %v1091_v25, 0.0  ;;  %v1699_v42 = vsub.f32 1.0, %v1579_v49  ;;  %v960_v5 = vand.u32 2147483647, %v832_v40  ;;  %7410 = vst [vmem:[#allocation44_spill] sm:$0xff] %v4934_v44 }
  0xf1   : > { %7408 = vst [vmem:[#allocation42_spill] sm:$0xff] %v4922_v24  ;;  %v1949_v29 = vmul.f32 %v4922_v24, %v1221_v12  ;;  %v1223_v38 = vmax.f32 %v1095_v28, 0.0  ;;  %v1703_v1 = vsub.f32 1.0, %v1583_v48  ;;  %v964_v27 = vand.u32 2147483647, %v836_v54 }
  0xf2   : > { %v4928_v33 = vmax.f32 %v1699_v42, 0.0  ;;  %v1088_v55 = vsub.f32 1.0, %v960_v5  ;;  %v1456_v39 = vsub.f32 %v4886_v32, %v4569_v8  ;;  %v1460_v14 = vsub.f32 %v4892_v37, %v4569_v8 }
  0xf3   : > { %v2061_v18 = vpack.c.bf16 %v1949_v29, %v1945_v16  ;;  %v4936_v25 = vmax.f32 %v1703_v1, 0.0  ;;  %v1092_v49 = vsub.f32 1.0, %v964_v27  ;;  %v834_v12 = vsub.f32 %v4623_v31, %v4556_v0 }
  0xf4   : > { %7409 = vst [vmem:[#allocation43_spill] sm:$0xff] %v4928_v33  ;;  %v1947_v48 = vmul.f32 %v4928_v33, %v1219_v30  ;;  %v1216_v40 = vmax.f32 %v1088_v55, 0.0  ;;  %v1576_v28 = vand.u32 2147483647, %v1456_v39  ;;  %v1580_v5 = vand.u32 2147483647, %v1460_v14 }
  0xf5   : > { %7411 = vst [vmem:[#allocation45_spill] sm:$0xff] %v4936_v25  ;;  %2130 = vmatprep.subr.bf16.mxu0 %v2061_v18  ;;  %v1951_v54 = vmul.f32 %v4936_v25, %v1223_v38  ;;  %v1220_v42 = vmax.f32 %v1092_v49, 0.0  ;;  %v838_v24 = vsub.f32 %v4864_v35, %v4556_v0  ;;  %v962_v15 = vand.u32 2147483647, %v834_v12  ;;  %v4950_v38 = vpop.permute.xlu0 %1345 }
  0xf6   : > { %v1696_v16 = vsub.f32 1.0, %v1576_v28  ;;  %v1700_v29 = vsub.f32 1.0, %v1580_v5  ;;  %v1458_v27 = vsub.f32 %v4886_v32, %v4571_v9  ;;  %v1462_v1 = vsub.f32 %v4892_v37, %v4571_v9  ;;  %7412 = vst [vmem:[#allocation46_spill] sm:$0xff] %v4950_v38  ;;  %v4956_v5 = vpop.permute.xlu1 %1349 }
  0xf7   : > { %v2063_v30 = vpack.c.bf16 %v1951_v54, %v1947_v48  ;;  %v966_v55 = vand.u32 2147483647, %v838_v24  ;;  %v1090_v39 = vsub.f32 1.0, %v962_v15  ;;  %v841_v14 = vsub.f32 %v4914_v20, %v4546_v59  ;;  %7415 = vst [vmem:[#allocation49_spill] sm:$0xff] %v4956_v5 }
  0xf8   : > { %v4952_v18 = vmax.f32 %v1696_v16, 0.0  ;;  %v4954_v49 = vmax.f32 %v1700_v29, 0.0  ;;  %v1578_v12 = vand.u32 2147483647, %v1458_v27  ;;  %v1582_v28 = vand.u32 2147483647, %v1462_v1 }
  0xf9   : > { %2173 = vmatprep.subr.bf16.mxu1 %v2063_v30  ;;  %v1094_v32 = vsub.f32 1.0, %v966_v55  ;;  %v1218_v25 = vmax.f32 %v1090_v39, 0.0  ;;  %v845_v24 = vsub.f32 %v4934_v44, %v4546_v59  ;;  %v969_v15 = vand.u32 2147483647, %v841_v14 }
  0xfa   : > { %7413 = vst [vmem:[#allocation47_spill] sm:$0xff] %v4952_v18  ;;  %7414 = vst [vmem:[#allocation48_spill] sm:$0xff] %v4954_v49  ;;  %v1944_v48 = vmul.f32 %v4952_v18, %v1216_v40  ;;  %v1948_v54 = vmul.f32 %v4954_v49, %v1220_v42  ;;  %v1698_v37 = vsub.f32 1.0, %v1578_v12  ;;  %v1702_v16 = vsub.f32 1.0, %v1582_v28  ;;  %v4990_v49 = vpop.permute.xlu1 %705 }
  0xfb   : > { %v1222_v33 = vmax.f32 %v1094_v32, 0.0  ;;  %v973_v29 = vand.u32 2147483647, %v845_v24  ;;  %v1097_v35 = vsub.f32 1.0, %v969_v15  ;;  %v1465_v27 = vsub.f32 %v4950_v38, %v4565_v6  ;;  %7420 = vst [vmem:[#allocation54_spill] sm:$0xff] %v4990_v49 }
  0xfc   : > { %v2060_v1 = vpack.c.bf16 %v1948_v54, %v1944_v48  ;;  %v4964_v30 = vmax.f32 %v1698_v37, 0.0  ;;  %v4966_v55 = vmax.f32 %v1702_v16, 0.0  ;;  %v1469_v39 = vsub.f32 %v4956_v5, %v4565_v6 }
  0xfd   : > { %v1101_v14 = vsub.f32 1.0, %v973_v29  ;;  %v1225_v40 = vmax.f32 %v1097_v35, 0.0  ;;  %v1585_v18 = vand.u32 2147483647, %v1465_v27  ;;  %v843_v42 = vsub.f32 %v4914_v20, %v4548_v60 }
  0xfe   : > { %7416 = vst [vmem:[#allocation50_spill] sm:$0xff] %v4964_v30  ;;  %7417 = vst [vmem:[#allocation51_spill] sm:$0xff] %v4966_v55  ;;  %2131 = vmatpush1.bf16.msra.mxu0 %v2060_v1  ;;  %v1946_v32 = vmul.f32 %v4964_v30, %v1218_v25  ;;  %v1950_v12 = vmul.f32 %v4966_v55, %v1222_v33  ;;  %v1589_v28 = vand.u32 2147483647, %v1469_v39 }
  0xff   : > { %v847_v37 = vsub.f32 %v4934_v44, %v4548_v60  ;;  %v1229_v24 = vmax.f32 %v1101_v14, 0.0  ;;  %v1705_v15 = vsub.f32 1.0, %v1585_v18  ;;  %v971_v48 = vand.u32 2147483647, %v843_v42 }
 0x100   : > { %v1467_v54 = vsub.f32 %v4950_v38, %v4567_v7  ;;  %v2062_v35 = vpack.c.bf16 %v1950_v12, %v1946_v32  ;;  %v1709_v16 = vsub.f32 1.0, %v1589_v28  ;;  %v1471_v27 = vsub.f32 %v4956_v5, %v4567_v7 }
 0x101   : > { %v975_v29 = vand.u32 2147483647, %v847_v37  ;;  %v4980_v1 = vmax.f32 %v1705_v15, 0.0  ;;  %v1099_v25 = vsub.f32 1.0, %v971_v48  ;;  %v840_v39 = vsub.f32 %v4914_v20, %v4544_v58 }
 0x102   : > { %v1587_v33 = vand.u32 2147483647, %v1467_v54  ;;  %2174 = vmatpush1.bf16.msra.mxu1 %v2062_v35  ;;  %v4984_v14 = vmax.f32 %v1709_v16, 0.0  ;;  %v1591_v42 = vand.u32 2147483647, %v1471_v27  ;;  %v844_v32 = vsub.f32 %v4934_v44, %v4544_v58 }
 0x103   : > { %7418 = vst [vmem:[#allocation52_spill] sm:$0xff] %v4980_v1  ;;  %v1103_v18 = vsub.f32 1.0, %v975_v29  ;;  %v1953_v12 = vmul.f32 %v4980_v1, %v1225_v40  ;;  %v1227_v28 = vmax.f32 %v1099_v25, 0.0  ;;  %v968_v55 = vand.u32 2147483647, %v840_v39 }
 0x104   : > { %7419 = vst [vmem:[#allocation53_spill] sm:$0xff] %v4984_v14  ;;  %v1707_v37 = vsub.f32 1.0, %v1587_v33  ;;  %v1957_v15 = vmul.f32 %v4984_v14, %v1229_v24  ;;  %v1711_v54 = vsub.f32 1.0, %v1591_v42  ;;  %v972_v30 = vand.u32 2147483647, %v844_v32 }
 0x105   : > { %v1231_v48 = vmax.f32 %v1103_v18, 0.0  ;;  %v1096_v16 = vsub.f32 1.0, %v968_v55  ;;  %v1464_v29 = vsub.f32 %v4950_v38, %v4569_v8  ;;  %v1468_v27 = vsub.f32 %v4956_v5, %v4569_v8 }
 0x106   : > { %v4992_v35 = vmax.f32 %v1707_v37, 0.0  ;;  %v2065_v40 = vpack.c.bf16 %v1957_v15, %v1953_v12  ;;  %v4998_v25 = vmax.f32 %v1711_v54, 0.0  ;;  %v1100_v33 = vsub.f32 1.0, %v972_v30 }
 0x107   : > { %v842_v24 = vsub.f32 %v4914_v20, %v4556_v0  ;;  %v1224_v18 = vmax.f32 %v1096_v16, 0.0  ;;  %v1584_v42 = vand.u32 2147483647, %v1464_v29  ;;  %v1588_v32 = vand.u32 2147483647, %v1468_v27 }
 0x108   : > { %7421 = vst [vmem:[#allocation55_spill] sm:$0xff] %v4992_v35  ;;  %7422 = vst [vmem:[#allocation56_spill] sm:$0xff] %v4998_v25  ;;  %v1955_v39 = vmul.f32 %v4992_v35, %v1227_v28  ;;  %2132 = vmatprep.subr.bf16.mxu0 %v2065_v40  ;;  %v1959_v55 = vmul.f32 %v4998_v25, %v1231_v48  ;;  %v1228_v37 = vmax.f32 %v1100_v33, 0.0  ;;  %v5012_v48 = vpop.permute.xlu1 %1353 }
 0x109   : > { %v846_v14 = vsub.f32 %v4934_v44, %v4556_v0  ;;  %v970_v1 = vand.u32 2147483647, %v842_v24  ;;  %v1704_v12 = vsub.f32 1.0, %v1584_v42  ;;  %v1708_v15 = vsub.f32 1.0, %v1588_v32  ;;  %7423 = vst [vmem:[#allocation57_spill] sm:$0xff] %v5012_v48  ;;  %v5018_v32 = vpop.permute.xlu0 %1357 }
 0x10a   : > { %v1466_v30 = vsub.f32 %v4950_v38, %v4571_v9  ;;  %v1470_v54 = vsub.f32 %v4956_v5, %v4571_v9  ;;  %v2067_v28 = vpack.c.bf16 %v1959_v55, %v1955_v39  ;;  %v849_v27 = vsub.f32 %v4641_v47, %v4546_v59  ;;  %7426 = vst [vmem:[#allocation60_spill] sm:$0xff] %v5018_v32 }
 0x10b   : > { %v974_v16 = vand.u32 2147483647, %v846_v14  ;;  %v1098_v29 = vsub.f32 1.0, %v970_v1  ;;  %v5014_v40 = vmax.f32 %v1704_v12, 0.0  ;;  %v5016_v33 = vmax.f32 %v1708_v15, 0.0 }
 0x10c   : > { %v1586_v24 = vand.u32 2147483647, %v1466_v30  ;;  %v1590_v42 = vand.u32 2147483647, %v1470_v54  ;;  %2175 = vmatprep.subr.bf16.mxu1 %v2067_v28  ;;  %v853_v14 = vsub.f32 %v4990_v49, %v4546_v59  ;;  %v977_v1 = vand.u32 2147483647, %v849_v27 }
 0x10d   : > { %7424 = vst [vmem:[#allocation58_spill] sm:$0xff] %v5014_v40  ;;  %7425 = vst [vmem:[#allocation59_spill] sm:$0xff] %v5016_v33  ;;  %v1102_v38 = vsub.f32 1.0, %v974_v16  ;;  %v1226_v25 = vmax.f32 %v1098_v29, 0.0  ;;  %v1952_v39 = vmul.f32 %v5014_v40, %v1224_v18  ;;  %v1956_v55 = vmul.f32 %v5016_v33, %v1228_v37 }
 0x10e   : > { %v1706_v5 = vsub.f32 1.0, %v1586_v24  ;;  %v1710_v12 = vsub.f32 1.0, %v1590_v42  ;;  %v981_v15 = vand.u32 2147483647, %v853_v14  ;;  %v1105_v44 = vsub.f32 1.0, %v977_v1 }
 0x10f   : > { %v1230_v35 = vmax.f32 %v1102_v38, 0.0  ;;  %v1473_v30 = vsub.f32 %v5012_v48, %v4565_v6  ;;  %v2064_v54 = vpack.c.bf16 %v1956_v55, %v1952_v39  ;;  %v1477_v29 = vsub.f32 %v5018_v32, %v4565_v6 }
 0x110   : > { %v5026_v28 = vmax.f32 %v1706_v5, 0.0  ;;  %v5028_v16 = vmax.f32 %v1710_v12, 0.0  ;;  %v1109_v27 = vsub.f32 1.0, %v981_v15  ;;  %v1233_v18 = vmax.f32 %v1105_v44, 0.0  ;;  %v5040_v44 = vpop.permute.xlu1 %710 }
 0x111   : > { %v1593_v40 = vand.u32 2147483647, %v1473_v30  ;;  %v851_v37 = vsub.f32 %v4641_v47, %v4548_v60  ;;  %2133 = vmatpush1.bf16.msra.mxu0 %v2064_v54  ;;  %v1597_v42 = vand.u32 2147483647, %v1477_v29  ;;  %v855_v5 = vsub.f32 %v4990_v49, %v4548_v60  ;;  %7429 = vst [vmem:[#allocation63_spill] sm:$0xff] %v5040_v44 }
 0x112   : > { %7427 = vst [vmem:[#allocation61_spill] sm:$0xff] %v5026_v28  ;;  %7428 = vst [vmem:[#allocation62_spill] sm:$0xff] %v5028_v16  ;;  %v1954_v38 = vmul.f32 %v5026_v28, %v1226_v25  ;;  %v1958_v24 = vmul.f32 %v5028_v16, %v1230_v35  ;;  %v1237_v14 = vmax.f32 %v1109_v27, 0.0  ;;  %v1475_v55 = vsub.f32 %v5012_v48, %v4567_v7 }
 0x113   : > { %v1713_v1 = vsub.f32 1.0, %v1593_v40  ;;  %v979_v39 = vand.u32 2147483647, %v851_v37  ;;  %v1717_v15 = vsub.f32 1.0, %v1597_v42  ;;  %v983_v30 = vand.u32 2147483647, %v855_v5 }
 0x114   : > { %v2066_v12 = vpack.c.bf16 %v1958_v24, %v1954_v38  ;;  %v1479_v25 = vsub.f32 %v5018_v32, %v4567_v7  ;;  %v1595_v29 = vand.u32 2147483647, %v1475_v55  ;;  %v848_v27 = vsub.f32 %v4641_v47, %v4544_v58 }
 0x115   : > { %v5044_v54 = vmax.f32 %v1713_v1, 0.0  ;;  %v1107_v35 = vsub.f32 1.0, %v979_v39  ;;  %v5048_v40 = vmax.f32 %v1717_v15, 0.0  ;;  %v1111_v37 = vsub.f32 1.0, %v983_v30 }
 0x116   : > { %2176 = vmatpush1.bf16.msra.mxu1 %v2066_v12  ;;  %v1599_v16 = vand.u32 2147483647, %v1479_v25  ;;  %v852_v38 = vsub.f32 %v4990_v49, %v4544_v58  ;;  %v1715_v5 = vsub.f32 1.0, %v1595_v29  ;;  %v976_v28 = vand.u32 2147483647, %v848_v27  ;;  %v5060_v25 = vpop.permute.xlu1 %715 }
 0x117   : > { %7430 = vst [vmem:[#allocation64_spill] sm:$0xff] %v5044_v54  ;;  %7431 = vst [vmem:[#allocation65_spill] sm:$0xff] %v5048_v40  ;;  %v1961_v24 = vmul.f32 %v5044_v54, %v1233_v18  ;;  %v1235_v42 = vmax.f32 %v1107_v35, 0.0  ;;  %v1965_v1 = vmul.f32 %v5048_v40, %v1237_v14  ;;  %v1239_v39 = vmax.f32 %v1111_v37, 0.0 }
 0x118   : > { %v1719_v55 = vsub.f32 1.0, %v1599_v16  ;;  %v980_v33 = vand.u32 2147483647, %v852_v38  ;;  %v5054_v20 = vmax.f32 %v1715_v5, 0.0  ;;  %v1104_v12 = vsub.f32 1.0, %v976_v28  ;;  %7433 = vst [vmem:[#allocation67_spill] sm:$0xff] %v5060_v25 }
 0x119   : > { %v1472_v15 = vsub.f32 %v5012_v48, %v4569_v8  ;;  %v1476_v30 = vsub.f32 %v5018_v32, %v4569_v8  ;;  %v2069_v18 = vpack.c.bf16 %v1965_v1, %v1961_v24  ;;  %v850_v14 = vsub.f32 %v4641_v47, %v4556_v0 }
 0x11a   : > { %7432 = vst [vmem:[#allocation66_spill] sm:$0xff] %v5054_v20  ;;  %v5062_v35 = vmax.f32 %v1719_v55, 0.0  ;;  %v1108_v29 = vsub.f32 1.0, %v980_v33  ;;  %v1963_v16 = vmul.f32 %v5054_v20, %v1235_v42  ;;  %v1232_v27 = vmax.f32 %v1104_v12, 0.0 }
 0x11b   : > { %v1592_v37 = vand.u32 2147483647, %v1472_v15  ;;  %v1596_v28 = vand.u32 2147483647, %v1476_v30  ;;  %2134 = vmatprep.subr.bf16.mxu0 %v2069_v18  ;;  %v854_v40 = vsub.f32 %v4990_v49, %v4556_v0  ;;  %v978_v54 = vand.u32 2147483647, %v850_v14 }
 0x11c   : > { %7434 = vst [vmem:[#allocation68_spill] sm:$0xff] %v5062_v35  ;;  %v1967_v38 = vmul.f32 %v5062_v35, %v1239_v39  ;;  %v1236_v5 = vmax.f32 %v1108_v29, 0.0  ;;  %v1474_v33 = vsub.f32 %v5012_v48, %v4571_v9  ;;  %v1478_v55 = vsub.f32 %v5018_v32, %v4571_v9  ;;  %v5076_v39 = vpop.permute.xlu0 %1361 }
 0x11d   : > { %v1712_v24 = vsub.f32 1.0, %v1592_v37  ;;  %v1716_v1 = vsub.f32 1.0, %v1596_v28  ;;  %v982_v12 = vand.u32 2147483647, %v854_v40  ;;  %v1106_v15 = vsub.f32 1.0, %v978_v54  ;;  %7435 = vst [vmem:[#allocation69_spill] sm:$0xff] %v5076_v39  ;;  %v5082_v28 = vpop.permute.xlu1 %1365 }
 0x11e   : > { %v2071_v42 = vpack.c.bf16 %v1967_v38, %v1963_v16  ;;  %v857_v30 = vsub.f32 %v5040_v44, %v4546_v59  ;;  %v1594_v14 = vand.u32 2147483647, %v1474_v33  ;;  %v1598_v37 = vand.u32 2147483647, %v1478_v55  ;;  %7438 = vst [vmem:[#allocation72_spill] sm:$0xff] %v5082_v28 }
 0x11f   : > { %v5078_v18 = vmax.f32 %v1712_v24, 0.0  ;;  %v5080_v29 = vmax.f32 %v1716_v1, 0.0  ;;  %v1110_v48 = vsub.f32 1.0, %v982_v12  ;;  %v1234_v35 = vmax.f32 %v1106_v15, 0.0 }
 0x120   : > { %2177 = vmatprep.subr.bf16.mxu1 %v2071_v42  ;;  %v861_v40 = vsub.f32 %v5060_v25, %v4546_v59  ;;  %v985_v54 = vand.u32 2147483647, %v857_v30  ;;  %v1714_v32 = vsub.f32 1.0, %v1594_v14  ;;  %v1718_v24 = vsub.f32 1.0, %v1598_v37 }
 0x121   : > { %7436 = vst [vmem:[#allocation70_spill] sm:$0xff] %v5078_v18  ;;  %7437 = vst [vmem:[#allocation71_spill] sm:$0xff] %v5080_v29  ;;  %v1960_v16 = vmul.f32 %v5078_v18, %v1232_v27  ;;  %v1964_v38 = vmul.f32 %v5080_v29, %v1236_v5  ;;  %v1238_v20 = vmax.f32 %v1110_v48, 0.0  ;;  %v1481_v33 = vsub.f32 %v5076_v39, %v4565_v6  ;;  %v5116_v29 = vpop.permute.xlu1 %725 }
 0x122   : > { %v989_v1 = vand.u32 2147483647, %v861_v40  ;;  %v1113_v49 = vsub.f32 1.0, %v985_v54  ;;  %v5090_v42 = vmax.f32 %v1714_v32, 0.0  ;;  %v5092_v12 = vmax.f32 %v1718_v24, 0.0 }
 0x123   : > { %v2068_v55 = vpack.c.bf16 %v1964_v38, %v1960_v16  ;;  %v1485_v15 = vsub.f32 %v5082_v28, %v4565_v6  ;;  %v1601_v18 = vand.u32 2147483647, %v1481_v33  ;;  %v859_v5 = vsub.f32 %v5040_v44, %v4548_v60 }
 0x124   : > { %7439 = vst [vmem:[#allocation73_spill] sm:$0xff] %v5090_v42  ;;  %7440 = vst [vmem:[#allocation74_spill] sm:$0xff] %v5092_v12  ;;  %v1117_v30 = vsub.f32 1.0, %v989_v1  ;;  %v1241_v27 = vmax.f32 %v1113_v49, 0.0  ;;  %v1962_v48 = vmul.f32 %v5090_v42, %v1234_v35  ;;  %v1966_v14 = vmul.f32 %v5092_v12, %v1238_v20 }
 0x125   : > { %2135 = vmatpush1.bf16.msra.mxu0 %v2068_v55  ;;  %v1605_v37 = vand.u32 2147483647, %v1485_v15  ;;  %v863_v32 = vsub.f32 %v5060_v25, %v4548_v60  ;;  %v1721_v54 = vsub.f32 1.0, %v1601_v18  ;;  %v987_v16 = vand.u32 2147483647, %v859_v5 }
 0x126   : > { %v1245_v40 = vmax.f32 %v1117_v30, 0.0  ;;  %v1483_v38 = vsub.f32 %v5076_v39, %v4567_v7  ;;  %v2070_v49 = vpack.c.bf16 %v1966_v14, %v1962_v48  ;;  %v1487_v33 = vsub.f32 %v5082_v28, %v4567_v7 }
 0x127   : > { %v1725_v24 = vsub.f32 1.0, %v1605_v37  ;;  %v991_v1 = vand.u32 2147483647, %v863_v32  ;;  %v5106_v55 = vmax.f32 %v1721_v54, 0.0  ;;  %v1115_v35 = vsub.f32 1.0, %v987_v16 }
 0x128   : > { %v1603_v20 = vand.u32 2147483647, %v1483_v38  ;;  %v856_v15 = vsub.f32 %v5040_v44, %v4544_v58  ;;  %2178 = vmatpush1.bf16.msra.mxu1 %v2070_v49  ;;  %v1607_v5 = vand.u32 2147483647, %v1487_v33  ;;  %v860_v48 = vsub.f32 %v5060_v25, %v4544_v58 }
 0x129   : > { %7441 = vst [vmem:[#allocation75_spill] sm:$0xff] %v5106_v55  ;;  %v5110_v30 = vmax.f32 %v1725_v24, 0.0  ;;  %v1119_v18 = vsub.f32 1.0, %v991_v1  ;;  %v1969_v14 = vmul.f32 %v5106_v55, %v1241_v27  ;;  %v1243_v37 = vmax.f32 %v1115_v35, 0.0 }
 0x12a   : > { %v1723_v32 = vsub.f32 1.0, %v1603_v20  ;;  %v984_v12 = vand.u32 2147483647, %v856_v15  ;;  %v1727_v38 = vsub.f32 1.0, %v1607_v5  ;;  %v988_v42 = vand.u32 2147483647, %v860_v48 }
 0x12b   : > { %7442 = vst [vmem:[#allocation76_spill] sm:$0xff] %v5110_v30  ;;  %v1973_v54 = vmul.f32 %v5110_v30, %v1245_v40  ;;  %v1247_v16 = vmax.f32 %v1119_v18, 0.0  ;;  %v1480_v1 = vsub.f32 %v5076_v39, %v4569_v8  ;;  %v1484_v33 = vsub.f32 %v5082_v28, %v4569_v8 }
 0x12c   : > { %v5118_v49 = vmax.f32 %v1723_v32, 0.0  ;;  %v1112_v24 = vsub.f32 1.0, %v984_v12  ;;  %v5124_v35 = vmax.f32 %v1727_v38, 0.0  ;;  %v1116_v20 = vsub.f32 1.0, %v988_v42 }
 0x12d   : > { %v2073_v27 = vpack.c.bf16 %v1973_v54, %v1969_v14  ;;  %v858_v40 = vsub.f32 %v5040_v44, %v4556_v0  ;;  %v1600_v5 = vand.u32 2147483647, %v1480_v1  ;;  %v1604_v48 = vand.u32 2147483647, %v1484_v33 }
 0x12e   : > { %7443 = vst [vmem:[#allocation77_spill] sm:$0xff] %v5118_v49  ;;  %7444 = vst [vmem:[#allocation78_spill] sm:$0xff] %v5124_v35  ;;  %v1971_v15 = vmul.f32 %v5118_v49, %v1243_v37  ;;  %v1240_v18 = vmax.f32 %v1112_v24, 0.0  ;;  %v1975_v12 = vmul.f32 %v5124_v35, %v1247_v16  ;;  %v1244_v32 = vmax.f32 %v1116_v20, 0.0  ;;  %v5138_v16 = vpop.permute.xlu1 %1369 }
 0x12f   : > { %2136 = vmatprep.subr.bf16.mxu0 %v2073_v27  ;;  %v862_v30 = vsub.f32 %v5060_v25, %v4556_v0  ;;  %v986_v55 = vand.u32 2147483647, %v858_v40  ;;  %v1720_v14 = vsub.f32 1.0, %v1600_v5  ;;  %v1724_v54 = vsub.f32 1.0, %v1604_v48  ;;  %7445 = vst [vmem:[#allocation79_spill] sm:$0xff] %v5138_v16  ;;  %v5144_v48 = vpop.permute.xlu0 %1373 }
 0x130   : > { %v1482_v42 = vsub.f32 %v5076_v39, %v4571_v9  ;;  %v1486_v38 = vsub.f32 %v5082_v28, %v4571_v9  ;;  %v2075_v37 = vpack.c.bf16 %v1975_v12, %v1971_v15  ;;  %v865_v33 = vsub.f32 %v4662_v34, %v4546_v59  ;;  %7448 = vst [vmem:[#allocation82_spill] sm:$0xff] %v5144_v48 }
 0x131   : > { %v990_v24 = vand.u32 2147483647, %v862_v30  ;;  %v1114_v1 = vsub.f32 1.0, %v986_v55  ;;  %v5140_v27 = vmax.f32 %v1720_v14, 0.0  ;;  %v5142_v20 = vmax.f32 %v1724_v54, 0.0 }
 0x132   : > { %v1602_v40 = vand.u32 2147483647, %v1482_v42  ;;  %v1606_v5 = vand.u32 2147483647, %v1486_v38  ;;  %2179 = vmatprep.subr.bf16.mxu1 %v2075_v37  ;;  %v869_v30 = vsub.f32 %v5116_v29, %v4546_v59  ;;  %v993_v55 = vand.u32 2147483647, %v865_v33 }
 0x133   : > { %7446 = vst [vmem:[#allocation80_spill] sm:$0xff] %v5140_v27  ;;  %7447 = vst [vmem:[#allocation81_spill] sm:$0xff] %v5142_v20  ;;  %v1118_v39 = vsub.f32 1.0, %v990_v24  ;;  %v1242_v35 = vmax.f32 %v1114_v1, 0.0  ;;  %v1968_v15 = vmul.f32 %v5140_v27, %v1240_v18  ;;  %v1972_v12 = vmul.f32 %v5142_v20, %v1244_v32 }
 0x134   : > { %v1722_v28 = vsub.f32 1.0, %v1602_v40  ;;  %v1726_v14 = vsub.f32 1.0, %v1606_v5  ;;  %v997_v54 = vand.u32 2147483647, %v869_v30  ;;  %v1121_v25 = vsub.f32 1.0, %v993_v55 }
 0x135   : > { %v1246_v49 = vmax.f32 %v1118_v39, 0.0  ;;  %v1489_v42 = vsub.f32 %v5138_v16, %v4565_v6  ;;  %v2072_v38 = vpack.c.bf16 %v1972_v12, %v1968_v15  ;;  %v1493_v1 = vsub.f32 %v5144_v48, %v4565_v6 }
 0x136   : > { %v5152_v37 = vmax.f32 %v1722_v28, 0.0  ;;  %v5154_v24 = vmax.f32 %v1726_v14, 0.0  ;;  %v1125_v33 = vsub.f32 1.0, %v997_v54  ;;  %v1249_v18 = vmax.f32 %v1121_v25, 0.0  ;;  %v5166_v14 = vpop.permute.xlu1 %730 }
 0x137   : > { %v1609_v27 = vand.u32 2147483647, %v1489_v42  ;;  %v867_v32 = vsub.f32 %v4662_v34, %v4548_v60  ;;  %2137 = vmatpush1.bf16.msra.mxu0 %v2072_v38  ;;  %v1613_v5 = vand.u32 2147483647, %v1493_v1  ;;  %v871_v28 = vsub.f32 %v5116_v29, %v4548_v60  ;;  %7451 = vst [vmem:[#allocation85_spill] sm:$0xff] %v5166_v14 }
 0x138   : > { %7449 = vst [vmem:[#allocation83_spill] sm:$0xff] %v5152_v37  ;;  %7450 = vst [vmem:[#allocation84_spill] sm:$0xff] %v5154_v24  ;;  %v1970_v39 = vmul.f32 %v5152_v37, %v1242_v35  ;;  %v1974_v40 = vmul.f32 %v5154_v24, %v1246_v49  ;;  %v1253_v30 = vmax.f32 %v1125_v33, 0.0  ;;  %v1491_v12 = vsub.f32 %v5138_v16, %v4567_v7 }
 0x139   : > { %v1729_v55 = vsub.f32 1.0, %v1609_v27  ;;  %v995_v15 = vand.u32 2147483647, %v867_v32  ;;  %v1733_v54 = vsub.f32 1.0, %v1613_v5  ;;  %v999_v42 = vand.u32 2147483647, %v871_v28 }
 0x13a   : > { %v2074_v25 = vpack.c.bf16 %v1974_v40, %v1970_v39  ;;  %v1495_v35 = vsub.f32 %v5144_v48, %v4567_v7  ;;  %v1611_v1 = vand.u32 2147483647, %v1491_v12  ;;  %v864_v33 = vsub.f32 %v4662_v34, %v4544_v58 }
 0x13b   : > { %v5170_v38 = vmax.f32 %v1729_v55, 0.0  ;;  %v1123_v49 = vsub.f32 1.0, %v995_v15  ;;  %v5174_v27 = vmax.f32 %v1733_v54, 0.0  ;;  %v1127_v32 = vsub.f32 1.0, %v999_v42 }
 0x13c   : > { %2180 = vmatpush1.bf16.msra.mxu1 %v2074_v25  ;;  %v1615_v24 = vand.u32 2147483647, %v1495_v35  ;;  %v868_v39 = vsub.f32 %v5116_v29, %v4544_v58  ;;  %v1731_v28 = vsub.f32 1.0, %v1611_v1  ;;  %v992_v37 = vand.u32 2147483647, %v864_v33  ;;  %v5186_v35 = vpop.permute.xlu1 %735 }
 0x13d   : > { %7452 = vst [vmem:[#allocation86_spill] sm:$0xff] %v5170_v38  ;;  %7453 = vst [vmem:[#allocation87_spill] sm:$0xff] %v5174_v27  ;;  %v1977_v40 = vmul.f32 %v5170_v38, %v1249_v18  ;;  %v1251_v5 = vmax.f32 %v1123_v49, 0.0  ;;  %v1981_v55 = vmul.f32 %v5174_v27, %v1253_v30  ;;  %v1255_v15 = vmax.f32 %v1127_v32, 0.0 }
 0x13e   : > { %v1735_v12 = vsub.f32 1.0, %v1615_v24  ;;  %v996_v20 = vand.u32 2147483647, %v868_v39  ;;  %v5180_v44 = vmax.f32 %v1731_v28, 0.0  ;;  %v1120_v25 = vsub.f32 1.0, %v992_v37  ;;  %7455 = vst [vmem:[#allocation89_spill] sm:$0xff] %v5186_v35 }
 0x13f   : > { %v1488_v54 = vsub.f32 %v5138_v16, %v4569_v8  ;;  %v1492_v42 = vsub.f32 %v5144_v48, %v4569_v8  ;;  %v2077_v18 = vpack.c.bf16 %v1981_v55, %v1977_v40  ;;  %v866_v30 = vsub.f32 %v4662_v34, %v4556_v0  ;;  %v4237_v39 = vld [vmem:[%s7058_s3 + $0x8] sm:$0xff]  }
 0x140   : > { %7454 = vst [vmem:[#allocation88_spill] sm:$0xff] %v5180_v44  ;;  %v5188_v49 = vmax.f32 %v1735_v12, 0.0  ;;  %v1124_v1 = vsub.f32 1.0, %v996_v20  ;;  %v1979_v24 = vmul.f32 %v5180_v44, %v1251_v5  ;;  %v1248_v33 = vmax.f32 %v1120_v25, 0.0  ;;  %4105 = vmatmul.mubr.msk.bf16.gmra.mrb[4].mxu0 %vm514_vm0, %v4237_v39  ;;  %4108 = vmatmul.mubr.msk.bf16.gmra.mrb[4].mxu1 %vm514_vm0, %v4237_v39  ;;  %v5215_v39 = vpop.permute.xlu1 %1381 }
 0x141   : > { %v1608_v32 = vand.u32 2147483647, %v1488_v54  ;;  %v1612_v37 = vand.u32 2147483647, %v1492_v42  ;;  %2138 = vmatprep.subr.bf16.mxu0 %v2077_v18  ;;  %v870_v40 = vsub.f32 %v5116_v29, %v4556_v0  ;;  %v994_v20 = vand.u32 2147483647, %v866_v30  ;;  %576 = vmatprep.mubr.bf16.mxu0 %v7381_v45 }
 0x142   : > { %7456 = vst [vmem:[#allocation90_spill] sm:$0xff] %v5188_v49  ;;  %v1983_v28 = vmul.f32 %v5188_v49, %v1255_v15  ;;  %v1252_v27 = vmax.f32 %v1124_v1, 0.0  ;;  %v1490_v5 = vsub.f32 %v5138_v16, %v4571_v9  ;;  %v1494_v25 = vsub.f32 %v5144_v48, %v4571_v9  ;;  %639 = vmatprep.mubr.bf16.mxu1 %v7381_v45  ;;  %v5209_v1 = vpop.permute.xlu0 %1377 }
 0x143   : > { %v1728_v55 = vsub.f32 1.0, %v1608_v32  ;;  %v1732_v12 = vsub.f32 1.0, %v1612_v37  ;;  %v998_v42 = vand.u32 2147483647, %v870_v40  ;;  %v1122_v15 = vsub.f32 1.0, %v994_v20  ;;  %7457 = vst [vmem:[#allocation91_spill] sm:$0xff] %v5209_v1 }
 0x144   : > { %v2079_v54 = vpack.c.bf16 %v1983_v28, %v1979_v24  ;;  %v873_v18 = vsub.f32 %v5166_v14, %v4546_v59  ;;  %v1610_v37 = vand.u32 2147483647, %v1490_v5  ;;  %v1614_v48 = vand.u32 2147483647, %v1494_v25  ;;  %7460 = vst [vmem:[#allocation94_spill] sm:$0xff] %v5215_v39 }
 0x145   : > { %v5211_v30 = vmax.f32 %v1728_v55, 0.0  ;;  %v5213_v32 = vmax.f32 %v1732_v12, 0.0  ;;  %v1126_v24 = vsub.f32 1.0, %v998_v42  ;;  %v1250_v28 = vmax.f32 %v1122_v15, 0.0 }
 0x146   : > { %2181 = vmatprep.subr.bf16.mxu1 %v2079_v54  ;;  %v877_v40 = vsub.f32 %v5186_v35, %v4546_v59  ;;  %v1001_v20 = vand.u32 2147483647, %v873_v18  ;;  %v1730_v49 = vsub.f32 1.0, %v1610_v37  ;;  %v1734_v55 = vsub.f32 1.0, %v1614_v48 }
 0x147   : > { %7458 = vst [vmem:[#allocation92_spill] sm:$0xff] %v5211_v30  ;;  %7459 = vst [vmem:[#allocation93_spill] sm:$0xff] %v5213_v32  ;;  %v1976_v16 = vmul.f32 %v5211_v30, %v1248_v33  ;;  %v1980_v45 = vmul.f32 %v5213_v32, %v1252_v27  ;;  %v1254_v44 = vmax.f32 %v1126_v24, 0.0  ;;  %v1497_v5 = vsub.f32 %v5209_v1, %v4565_v6  ;;  %v5249_v32 = vpop.permute.xlu1 %745 }
 0x148   : > { %v1005_v12 = vand.u32 2147483647, %v877_v40  ;;  %v1129_v38 = vsub.f32 1.0, %v1001_v20  ;;  %v5223_v54 = vmax.f32 %v1730_v49, 0.0  ;;  %v5225_v42 = vmax.f32 %v1734_v55, 0.0  ;;  %7465 = vst [vmem:[#allocation99_spill] sm:$0xff] %v5249_v32 }
 0x149   : > { %v2076_v25 = vpack.c.bf16 %v1980_v45, %v1976_v16  ;;  %v1501_v15 = vsub.f32 %v5215_v39, %v4565_v6  ;;  %v1617_v30 = vand.u32 2147483647, %v1497_v5  ;;  %v875_v48 = vsub.f32 %v5166_v14, %v4548_v60 }
 0x14a   : > { %7461 = vst [vmem:[#allocation95_spill] sm:$0xff] %v5223_v54  ;;  %7462 = vst [vmem:[#allocation96_spill] sm:$0xff] %v5225_v42  ;;  %v1133_v18 = vsub.f32 1.0, %v1005_v12  ;;  %v1257_v33 = vmax.f32 %v1129_v38, 0.0  ;;  %v1978_v27 = vmul.f32 %v5223_v54, %v1250_v28  ;;  %v1982_v37 = vmul.f32 %v5225_v42, %v1254_v44 }
 0x14b   : > { %2139 = vmatpush1.bf16.msra.mxu0 %v2076_v25  ;;  %v1621_v24 = vand.u32 2147483647, %v1501_v15  ;;  %v879_v16 = vsub.f32 %v5186_v35, %v4548_v60  ;;  %v1737_v40 = vsub.f32 1.0, %v1617_v30  ;;  %v1003_v20 = vand.u32 2147483647, %v875_v48 }
 0x14c   : > { %v1261_v49 = vmax.f32 %v1133_v18, 0.0  ;;  %v1499_v45 = vsub.f32 %v5209_v1, %v4567_v7  ;;  %v2078_v38 = vpack.c.bf16 %v1982_v37, %v1978_v27  ;;  %v1503_v5 = vsub.f32 %v5215_v39, %v4567_v7 }
 0x14d   : > { %v1741_v55 = vsub.f32 1.0, %v1621_v24  ;;  %v1007_v12 = vand.u32 2147483647, %v879_v16  ;;  %v5239_v25 = vmax.f32 %v1737_v40, 0.0  ;;  %v1131_v28 = vsub.f32 1.0, %v1003_v20 }
 0x14e   : > { %v1619_v44 = vand.u32 2147483647, %v1499_v45  ;;  %v872_v15 = vsub.f32 %v5166_v14, %v4544_v58  ;;  %2182 = vmatpush1.bf16.msra.mxu1 %v2078_v38  ;;  %v1623_v48 = vand.u32 2147483647, %v1503_v5  ;;  %v876_v27 = vsub.f32 %v5186_v35, %v4544_v58 }
 0x14f   : > { %7463 = vst [vmem:[#allocation97_spill] sm:$0xff] %v5239_v25  ;;  %v5243_v18 = vmax.f32 %v1741_v55, 0.0  ;;  %v1135_v30 = vsub.f32 1.0, %v1007_v12  ;;  %v1985_v37 = vmul.f32 %v5239_v25, %v1257_v33  ;;  %v1259_v24 = vmax.f32 %v1131_v28, 0.0  ;;  %v5286_v25 = vpop.permute.xlu0 %1389 }
 0x150   : > { %v1739_v16 = vsub.f32 1.0, %v1619_v44  ;;  %v1000_v42 = vand.u32 2147483647, %v872_v15  ;;  %v1743_v45 = vsub.f32 1.0, %v1623_v48  ;;  %v1004_v54 = vand.u32 2147483647, %v876_v27 }
 0x151   : > { %7464 = vst [vmem:[#allocation98_spill] sm:$0xff] %v5243_v18  ;;  %v1989_v40 = vmul.f32 %v5243_v18, %v1261_v49  ;;  %v1263_v20 = vmax.f32 %v1135_v30, 0.0  ;;  %v1496_v12 = vsub.f32 %v5209_v1, %v4569_v8  ;;  %v1500_v5 = vsub.f32 %v5215_v39, %v4569_v8  ;;  %7471 = vst [vmem:[#allocation105_spill] sm:$0xff] %v5286_v25 }
 0x152   : > { %v5251_v38 = vmax.f32 %v1739_v16, 0.0  ;;  %v1128_v55 = vsub.f32 1.0, %v1000_v42  ;;  %v5257_v28 = vmax.f32 %v1743_v45, 0.0  ;;  %v1132_v44 = vsub.f32 1.0, %v1004_v54  ;;  %v4238_v42 = vld [vmem:[%s7058_s3 + $0x10] sm:$0xff]  }
 0x153   : > { %v2081_v33 = vpack.c.bf16 %v1989_v40, %v1985_v37  ;;  %v874_v49 = vsub.f32 %v5166_v14, %v4556_v0  ;;  %v1616_v48 = vand.u32 2147483647, %v1496_v12  ;;  %v1620_v27 = vand.u32 2147483647, %v1500_v5  ;;  %4106 = vmatmul.mubr.msk.bf16.gmra.mrb[8].mxu0 %vm514_vm0, %v4238_v42  ;;  %4109 = vmatmul.mubr.msk.bf16.gmra.mrb[8].mxu1 %vm514_vm0, %v4238_v42 }
 0x154   : > { %7466 = vst [vmem:[#allocation100_spill] sm:$0xff] %v5251_v38  ;;  %7467 = vst [vmem:[#allocation101_spill] sm:$0xff] %v5257_v28  ;;  %v1987_v15 = vmul.f32 %v5251_v38, %v1259_v24  ;;  %v1256_v30 = vmax.f32 %v1128_v55, 0.0  ;;  %v1991_v16 = vmul.f32 %v5257_v28, %v1263_v20  ;;  %v1260_v18 = vmax.f32 %v1132_v44, 0.0  ;;  %v5276_v44 = vpop.permute.xlu1 %1385 }
 0x155   : > { %2140 = vmatprep.subr.bf16.mxu0 %v2081_v33  ;;  %v878_v37 = vsub.f32 %v5186_v35, %v4556_v0  ;;  %v1002_v54 = vand.u32 2147483647, %v874_v49  ;;  %v1736_v40 = vsub.f32 1.0, %v1616_v48  ;;  %v1740_v45 = vsub.f32 1.0, %v1620_v27  ;;  %7468 = vst [vmem:[#allocation102_spill] sm:$0xff] %v5276_v44 }
 0x156   : > { %v1498_v24 = vsub.f32 %v5209_v1, %v4571_v9  ;;  %v1502_v55 = vsub.f32 %v5215_v39, %v4571_v9  ;;  %v2083_v12 = vpack.c.bf16 %v1991_v16, %v1987_v15  ;;  %v881_v33 = vsub.f32 %v4681_v51, %v4546_v59 }
 0x157   : > { %v1006_v5 = vand.u32 2147483647, %v878_v37  ;;  %v1130_v20 = vsub.f32 1.0, %v1002_v54  ;;  %v5278_v49 = vmax.f32 %v1736_v40, 0.0  ;;  %v5280_v48 = vmax.f32 %v1740_v45, 0.0 }
 0x158   : > { %v1618_v27 = vand.u32 2147483647, %v1498_v24  ;;  %v1622_v1 = vand.u32 2147483647, %v1502_v55  ;;  %2183 = vmatprep.subr.bf16.mxu1 %v2083_v12  ;;  %v885_v42 = vsub.f32 %v5249_v32, %v4546_v59  ;;  %v1009_v15 = vand.u32 2147483647, %v881_v33 }
 0x159   : > { %7469 = vst [vmem:[#allocation103_spill] sm:$0xff] %v5278_v49  ;;  %7470 = vst [vmem:[#allocation104_spill] sm:$0xff] %v5280_v48  ;;  %v1134_v39 = vsub.f32 1.0, %v1006_v5  ;;  %v1258_v28 = vmax.f32 %v1130_v20, 0.0  ;;  %v1984_v16 = vmul.f32 %v5278_v49, %v1256_v30  ;;  %v1988_v37 = vmul.f32 %v5280_v48, %v1260_v18 }
 0x15a   : > { %v1738_v54 = vsub.f32 1.0, %v1618_v27  ;;  %v1742_v38 = vsub.f32 1.0, %v1622_v1  ;;  %v1013_v45 = vand.u32 2147483647, %v885_v42  ;;  %v1137_v35 = vsub.f32 1.0, %v1009_v15 }
 0x15b   : > { %v1262_v40 = vmax.f32 %v1134_v39, 0.0  ;;  %v1505_v24 = vsub.f32 %v5276_v44, %v4565_v6  ;;  %v2080_v55 = vpack.c.bf16 %v1988_v37, %v1984_v16  ;;  %v1509_v30 = vsub.f32 %v5286_v25, %v4565_v6 }
 0x15c   : > { %v5290_v12 = vmax.f32 %v1738_v54, 0.0  ;;  %v5292_v5 = vmax.f32 %v1742_v38, 0.0  ;;  %v1141_v20 = vsub.f32 1.0, %v1013_v45  ;;  %v1265_v18 = vmax.f32 %v1137_v35, 0.0  ;;  %v5304_v45 = vpop.permute.xlu1 %750 }
 0x15d   : > { %v1625_v33 = vand.u32 2147483647, %v1505_v24  ;;  %v883_v1 = vsub.f32 %v4681_v51, %v4548_v60  ;;  %2141 = vmatpush1.bf16.msra.mxu0 %v2080_v55  ;;  %v1629_v42 = vand.u32 2147483647, %v1509_v30  ;;  %v887_v15 = vsub.f32 %v5249_v32, %v4548_v60  ;;  %7474 = vst [vmem:[#allocation108_spill] sm:$0xff] %v5304_v45 }
 0x15e   : > { %7472 = vst [vmem:[#allocation106_spill] sm:$0xff] %v5290_v12  ;;  %7473 = vst [vmem:[#allocation107_spill] sm:$0xff] %v5292_v5  ;;  %v1986_v39 = vmul.f32 %v5290_v12, %v1258_v28  ;;  %v1990_v27 = vmul.f32 %v5292_v5, %v1262_v40  ;;  %v1269_v38 = vmax.f32 %v1141_v20, 0.0  ;;  %v1507_v54 = vsub.f32 %v5276_v44, %v4567_v7 }
 0x15f   : > { %v1745_v16 = vsub.f32 1.0, %v1625_v33  ;;  %v1011_v37 = vand.u32 2147483647, %v883_v1  ;;  %v1749_v24 = vsub.f32 1.0, %v1629_v42  ;;  %v1015_v48 = vand.u32 2147483647, %v887_v15 }
 0x160   : > { %v2082_v35 = vpack.c.bf16 %v1990_v27, %v1986_v39  ;;  %v1511_v28 = vsub.f32 %v5286_v25, %v4567_v7  ;;  %v1627_v30 = vand.u32 2147483647, %v1507_v54  ;;  %v880_v20 = vsub.f32 %v4681_v51, %v4544_v58 }
 0x161   : > { %v5308_v55 = vmax.f32 %v1745_v16, 0.0  ;;  %v1139_v40 = vsub.f32 1.0, %v1011_v37  ;;  %v5312_v33 = vmax.f32 %v1749_v24, 0.0  ;;  %v1143_v1 = vsub.f32 1.0, %v1015_v48 }
 0x162   : > { %2184 = vmatpush1.bf16.msra.mxu1 %v2082_v35  ;;  %v1631_v5 = vand.u32 2147483647, %v1511_v28  ;;  %v884_v39 = vsub.f32 %v5249_v32, %v4544_v58  ;;  %v1747_v15 = vsub.f32 1.0, %v1627_v30  ;;  %v1008_v12 = vand.u32 2147483647, %v880_v20  ;;  %v5324_v28 = vpop.permute.xlu1 %755 }
 0x163   : > { %7475 = vst [vmem:[#allocation109_spill] sm:$0xff] %v5308_v55  ;;  %7476 = vst [vmem:[#allocation110_spill] sm:$0xff] %v5312_v33  ;;  %v1993_v27 = vmul.f32 %v5308_v55, %v1265_v18  ;;  %v1267_v42 = vmax.f32 %v1139_v40, 0.0  ;;  %v1997_v16 = vmul.f32 %v5312_v33, %v1269_v38  ;;  %v1271_v37 = vmax.f32 %v1143_v1, 0.0 }
 0x164   : > { %v1751_v54 = vsub.f32 1.0, %v1631_v5  ;;  %v1012_v49 = vand.u32 2147483647, %v884_v39  ;;  %v5318_v14 = vmax.f32 %v1747_v15, 0.0  ;;  %v1136_v35 = vsub.f32 1.0, %v1008_v12  ;;  %7478 = vst [vmem:[#allocation112_spill] sm:$0xff] %v5324_v28 }
 0x165   : > { %v1504_v48 = vsub.f32 %v5276_v44, %v4569_v8  ;;  %v1508_v24 = vsub.f32 %v5286_v25, %v4569_v8  ;;  %v2085_v18 = vpack.c.bf16 %v1997_v16, %v1993_v27  ;;  %v882_v38 = vsub.f32 %v4681_v51, %v4556_v0 }
 0x166   : > { %7477 = vst [vmem:[#allocation111_spill] sm:$0xff] %v5318_v14  ;;  %v5326_v40 = vmax.f32 %v1751_v54, 0.0  ;;  %v1140_v30 = vsub.f32 1.0, %v1012_v49  ;;  %v1995_v5 = vmul.f32 %v5318_v14, %v1267_v42  ;;  %v1264_v20 = vmax.f32 %v1136_v35, 0.0 }
 0x167   : > { %v1624_v1 = vand.u32 2147483647, %v1504_v48  ;;  %v1628_v12 = vand.u32 2147483647, %v1508_v24  ;;  %2142 = vmatprep.subr.bf16.mxu0 %v2085_v18  ;;  %v886_v33 = vsub.f32 %v5249_v32, %v4556_v0  ;;  %v1010_v55 = vand.u32 2147483647, %v882_v38 }
 0x168   : > { %7479 = vst [vmem:[#allocation113_spill] sm:$0xff] %v5326_v40  ;;  %v1999_v39 = vmul.f32 %v5326_v40, %v1271_v37  ;;  %v1268_v15 = vmax.f32 %v1140_v30, 0.0  ;;  %v1506_v49 = vsub.f32 %v5276_v44, %v4571_v9  ;;  %v1510_v54 = vsub.f32 %v5286_v25, %v4571_v9 }
 0x169   : > { %v1744_v27 = vsub.f32 1.0, %v1624_v1  ;;  %v1748_v16 = vsub.f32 1.0, %v1628_v12  ;;  %v1014_v35 = vand.u32 2147483647, %v886_v33  ;;  %v1138_v48 = vsub.f32 1.0, %v1010_v55  ;;  %v5344_v1 = vpop.permute.xlu1 %1397  ;;  %v5348_v33 = vpop.permute.xlu0 %1393 }
 0x16a   : > { %v2087_v42 = vpack.c.bf16 %v1999_v39, %v1995_v5  ;;  %v889_v24 = vsub.f32 %v5304_v45, %v4546_v59  ;;  %v1626_v30 = vand.u32 2147483647, %v1506_v49  ;;  %v1630_v38 = vand.u32 2147483647, %v1510_v54  ;;  %7482 = vst [vmem:[#allocation116_spill] sm:$0xff] %v5344_v1  ;;  %7483 = vst [vmem:[#allocation117_spill] sm:$0xff] %v5348_v33 }
 0x16b   : > { %v5340_v37 = vmax.f32 %v1744_v27, 0.0  ;;  %v5342_v18 = vmax.f32 %v1748_v16, 0.0  ;;  %v1142_v12 = vsub.f32 1.0, %v1014_v35  ;;  %v1266_v44 = vmax.f32 %v1138_v48, 0.0  ;;  %v4241_v49 = vld [vmem:[%s7057_s2 + $0x4] ss:$8 sps:$4 sm:$0xff]  }
 0x16c   : > { %2185 = vmatprep.subr.bf16.mxu1 %v2087_v42  ;;  %v893_v25 = vsub.f32 %v5324_v28, %v4546_v59  ;;  %v1017_v5 = vand.u32 2147483647, %v889_v24  ;;  %v1746_v27 = vsub.f32 1.0, %v1626_v30  ;;  %v1750_v16 = vsub.f32 1.0, %v1630_v38  ;;  %2156 = vmatprep.mubr.bf16.mxu0 %v4241_v49 }
 0x16d   : > { %7480 = vst [vmem:[#allocation114_spill] sm:$0xff] %v5340_v37  ;;  %7481 = vst [vmem:[#allocation115_spill] sm:$0xff] %v5342_v18  ;;  %v1992_v55 = vmul.f32 %v5340_v37, %v1264_v20  ;;  %v1996_v39 = vmul.f32 %v5342_v18, %v1268_v15  ;;  %v1270_v54 = vmax.f32 %v1142_v12, 0.0  ;;  %v1513_v48 = vsub.f32 %v5348_v33, %v4565_v6  ;;  %v5383_v32 = vpop.permute.xlu1 %765 }
 0x16e   : > { %v1021_v42 = vand.u32 2147483647, %v893_v25  ;;  %v1145_v35 = vsub.f32 1.0, %v1017_v5  ;;  %v5357_v24 = vmax.f32 %v1746_v27, 0.0  ;;  %v5359_v14 = vmax.f32 %v1750_v16, 0.0  ;;  %2199 = vmatprep.mubr.bf16.mxu1 %v4241_v49  ;;  %7488 = vst [vmem:[#allocation122_spill] sm:$0xff] %v5383_v32 }
 0x16f   : > { %v2084_v40 = vpack.c.bf16 %v1996_v39, %v1992_v55  ;;  %v1517_v20 = vsub.f32 %v5344_v1, %v4565_v6  ;;  %v1633_v38 = vand.u32 2147483647, %v1513_v48  ;;  %v891_v25 = vsub.f32 %v5304_v45, %v4548_v60 }
 0x170   : > { %7484 = vst [vmem:[#allocation118_spill] sm:$0xff] %v5357_v24  ;;  %7485 = vst [vmem:[#allocation119_spill] sm:$0xff] %v5359_v14  ;;  %v1149_v15 = vsub.f32 1.0, %v1021_v42  ;;  %v1273_v30 = vmax.f32 %v1145_v35, 0.0  ;;  %v1994_v12 = vmul.f32 %v5357_v24, %v1266_v44  ;;  %v1998_v5 = vmul.f32 %v5359_v14, %v1270_v54 }
 0x171   : > { %2143 = vmatpush1.bf16.msra.mxu0 %v2084_v40  ;;  %v1637_v55 = vand.u32 2147483647, %v1517_v20  ;;  %v895_v39 = vsub.f32 %v5324_v28, %v4548_v60  ;;  %v1753_v16 = vsub.f32 1.0, %v1633_v38  ;;  %v1019_v18 = vand.u32 2147483647, %v891_v25 }
 0x172   : > { %v1277_v27 = vmax.f32 %v1149_v15, 0.0  ;;  %v1515_v49 = vsub.f32 %v5348_v33, %v4567_v7  ;;  %v2086_v42 = vpack.c.bf16 %v1998_v5, %v1994_v12  ;;  %v1519_v40 = vsub.f32 %v5344_v1, %v4567_v7 }
 0x173   : > { %v1757_v35 = vsub.f32 1.0, %v1637_v55  ;;  %v1023_v48 = vand.u32 2147483647, %v895_v39  ;;  %v5373_v37 = vmax.f32 %v1753_v16, 0.0  ;;  %v1147_v44 = vsub.f32 1.0, %v1019_v18 }
 0x174   : > { %v1635_v54 = vand.u32 2147483647, %v1515_v49  ;;  %v888_v20 = vsub.f32 %v5304_v45, %v4544_v58  ;;  %2186 = vmatpush1.bf16.msra.mxu1 %v2086_v42  ;;  %v1639_v25 = vand.u32 2147483647, %v1519_v40  ;;  %v892_v12 = vsub.f32 %v5324_v28, %v4544_v58 }
 0x175   : > { %7486 = vst [vmem:[#allocation120_spill] sm:$0xff] %v5373_v37  ;;  %v5377_v15 = vmax.f32 %v1757_v35, 0.0  ;;  %v1151_v38 = vsub.f32 1.0, %v1023_v48  ;;  %v2001_v5 = vmul.f32 %v5373_v37, %v1273_v30  ;;  %v1275_v55 = vmax.f32 %v1147_v44, 0.0 }
 0x176   : > { %v1755_v39 = vsub.f32 1.0, %v1635_v54  ;;  %v1016_v14 = vand.u32 2147483647, %v888_v20  ;;  %v1759_v49 = vsub.f32 1.0, %v1639_v25  ;;  %v1020_v24 = vand.u32 2147483647, %v892_v12 }
 0x177   : > { %7487 = vst [vmem:[#allocation121_spill] sm:$0xff] %v5377_v15  ;;  %v2005_v16 = vmul.f32 %v5377_v15, %v1277_v27  ;;  %v1279_v18 = vmax.f32 %v1151_v38, 0.0  ;;  %v1512_v48 = vsub.f32 %v5348_v33, %v4569_v8  ;;  %v1516_v40 = vsub.f32 %v5344_v1, %v4569_v8 }
 0x178   : > { %v5385_v42 = vmax.f32 %v1755_v39, 0.0  ;;  %v1144_v35 = vsub.f32 1.0, %v1016_v14  ;;  %v5391_v44 = vmax.f32 %v1759_v49, 0.0  ;;  %v1148_v54 = vsub.f32 1.0, %v1020_v24 }
 0x179   : > { %v2089_v30 = vpack.c.bf16 %v2005_v16, %v2001_v5  ;;  %v890_v27 = vsub.f32 %v5304_v45, %v4556_v0  ;;  %v1632_v25 = vand.u32 2147483647, %v1512_v48  ;;  %v1636_v12 = vand.u32 2147483647, %v1516_v40 }
 0x17a   : > { %7489 = vst [vmem:[#allocation123_spill] sm:$0xff] %v5385_v42  ;;  %7490 = vst [vmem:[#allocation124_spill] sm:$0xff] %v5391_v44  ;;  %v2003_v20 = vmul.f32 %v5385_v42, %v1275_v55  ;;  %v1272_v38 = vmax.f32 %v1144_v35, 0.0  ;;  %v2007_v14 = vmul.f32 %v5391_v44, %v1279_v18  ;;  %v1276_v39 = vmax.f32 %v1148_v54, 0.0  ;;  %v5405_v18 = vpop.permute.xlu1 %1401  ;;  %v5415_v42 = vpop.permute.xlu0 %1405 }
 0x17b   : > { %2144 = vmatprep.subr.bf16.mxu0 %v2089_v30  ;;  %v894_v15 = vsub.f32 %v5324_v28, %v4556_v0  ;;  %v1018_v37 = vand.u32 2147483647, %v890_v27  ;;  %v1752_v5 = vsub.f32 1.0, %v1632_v25  ;;  %v1756_v16 = vsub.f32 1.0, %v1636_v12  ;;  %7491 = vst [vmem:[#allocation125_spill] sm:$0xff] %v5405_v18  ;;  %7494 = vst [vmem:[#allocation128_spill] sm:$0xff] %v5415_v42 }
 0x17c   : > { %v1514_v24 = vsub.f32 %v5348_v33, %v4571_v9  ;;  %v1518_v49 = vsub.f32 %v5344_v1, %v4571_v9  ;;  %v2091_v55 = vpack.c.bf16 %v2007_v14, %v2003_v20  ;;  %v897_v40 = vsub.f32 %v4706_v36, %v4546_v59 }
 0x17d   : > { %v1022_v35 = vand.u32 2147483647, %v894_v15  ;;  %v1146_v48 = vsub.f32 1.0, %v1018_v37  ;;  %v5407_v30 = vmax.f32 %v1752_v5, 0.0  ;;  %v5409_v54 = vmax.f32 %v1756_v16, 0.0 }
 0x17e   : > { %v1634_v27 = vand.u32 2147483647, %v1514_v24  ;;  %v1638_v25 = vand.u32 2147483647, %v1518_v49  ;;  %2187 = vmatprep.subr.bf16.mxu1 %v2091_v55  ;;  %v901_v1 = vsub.f32 %v5383_v32, %v4546_v59  ;;  %v1025_v20 = vand.u32 2147483647, %v897_v40 }
 0x17f   : > { %7492 = vst [vmem:[#allocation126_spill] sm:$0xff] %v5407_v30  ;;  %7493 = vst [vmem:[#allocation127_spill] sm:$0xff] %v5409_v54  ;;  %v1150_v12 = vsub.f32 1.0, %v1022_v35  ;;  %v1274_v33 = vmax.f32 %v1146_v48, 0.0  ;;  %v2000_v37 = vmul.f32 %v5407_v30, %v1272_v38  ;;  %v2004_v15 = vmul.f32 %v5409_v54, %v1276_v39 }
 0x180   : > { %v1754_v14 = vsub.f32 1.0, %v1634_v27  ;;  %v1758_v44 = vsub.f32 1.0, %v1638_v25  ;;  %v1029_v16 = vand.u32 2147483647, %v901_v1  ;;  %v1153_v28 = vsub.f32 1.0, %v1025_v20 }
 0x181   : > { %v1278_v5 = vmax.f32 %v1150_v12, 0.0  ;;  %v1521_v24 = vsub.f32 %v5405_v18, %v4565_v6  ;;  %v2088_v49 = vpack.c.bf16 %v2004_v15, %v2000_v37  ;;  %v1525_v38 = vsub.f32 %v5415_v42, %v4565_v6 }
 0x182   : > { %v5419_v55 = vmax.f32 %v1754_v14, 0.0  ;;  %v5421_v35 = vmax.f32 %v1758_v44, 0.0  ;;  %v1157_v48 = vsub.f32 1.0, %v1029_v16  ;;  %v1281_v39 = vmax.f32 %v1153_v28, 0.0  ;;  %v5433_v16 = vpop.permute.xlu1 %770 }
 0x183   : > { %v1641_v40 = vand.u32 2147483647, %v1521_v24  ;;  %v899_v27 = vsub.f32 %v4706_v36, %v4548_v60  ;;  %2145 = vmatpush1.bf16.msra.mxu0 %v2088_v49  ;;  %v1645_v12 = vand.u32 2147483647, %v1525_v38  ;;  %v903_v20 = vsub.f32 %v5383_v32, %v4548_v60  ;;  %7497 = vst [vmem:[#allocation131_spill] sm:$0xff] %v5433_v16 }
 0x184   : > { %7495 = vst [vmem:[#allocation129_spill] sm:$0xff] %v5419_v55  ;;  %7496 = vst [vmem:[#allocation130_spill] sm:$0xff] %v5421_v35  ;;  %v2002_v1 = vmul.f32 %v5419_v55, %v1274_v33  ;;  %v2006_v25 = vmul.f32 %v5421_v35, %v1278_v5  ;;  %v1285_v44 = vmax.f32 %v1157_v48, 0.0  ;;  %v1523_v14 = vsub.f32 %v5405_v18, %v4567_v7 }
 0x185   : > { %v1761_v37 = vsub.f32 1.0, %v1641_v40  ;;  %v1027_v15 = vand.u32 2147483647, %v899_v27  ;;  %v1765_v24 = vsub.f32 1.0, %v1645_v12  ;;  %v1031_v54 = vand.u32 2147483647, %v903_v20 }
 0x186   : > { %v2090_v28 = vpack.c.bf16 %v2006_v25, %v2002_v1  ;;  %v1527_v33 = vsub.f32 %v5415_v42, %v4567_v7  ;;  %v1643_v38 = vand.u32 2147483647, %v1523_v14  ;;  %v896_v48 = vsub.f32 %v4706_v36, %v4544_v58 }
 0x187   : > { %v5437_v49 = vmax.f32 %v1761_v37, 0.0  ;;  %v1155_v5 = vsub.f32 1.0, %v1027_v15  ;;  %v5441_v40 = vmax.f32 %v1765_v24, 0.0  ;;  %v1159_v27 = vsub.f32 1.0, %v1031_v54 }
 0x188   : > { %2188 = vmatpush1.bf16.msra.mxu1 %v2090_v28  ;;  %v1647_v35 = vand.u32 2147483647, %v1527_v33  ;;  %v900_v1 = vsub.f32 %v5383_v32, %v4544_v58  ;;  %v1763_v20 = vsub.f32 1.0, %v1643_v38  ;;  %v1024_v55 = vand.u32 2147483647, %v896_v48  ;;  %v5453_v33 = vpop.permute.xlu1 %775 }
 0x189   : > { %7498 = vst [vmem:[#allocation132_spill] sm:$0xff] %v5437_v49  ;;  %7499 = vst [vmem:[#allocation133_spill] sm:$0xff] %v5441_v40  ;;  %v2009_v25 = vmul.f32 %v5437_v49, %v1281_v39  ;;  %v1283_v12 = vmax.f32 %v1155_v5, 0.0  ;;  %v2013_v37 = vmul.f32 %v5441_v40, %v1285_v44  ;;  %v1287_v15 = vmax.f32 %v1159_v27, 0.0 }
 0x18a   : > { %v1767_v14 = vsub.f32 1.0, %v1647_v35  ;;  %v1028_v30 = vand.u32 2147483647, %v900_v1  ;;  %v5447_v45 = vmax.f32 %v1763_v20, 0.0  ;;  %v1152_v28 = vsub.f32 1.0, %v1024_v55  ;;  %7501 = vst [vmem:[#allocation135_spill] sm:$0xff] %v5453_v33 }
 0x18b   : > { %v1520_v54 = vsub.f32 %v5405_v18, %v4569_v8  ;;  %v1524_v24 = vsub.f32 %v5415_v42, %v4569_v8  ;;  %v2093_v39 = vpack.c.bf16 %v2013_v37, %v2009_v25  ;;  %v898_v44 = vsub.f32 %v4706_v36, %v4556_v0 }
 0x18c   : > { %7500 = vst [vmem:[#allocation134_spill] sm:$0xff] %v5447_v45  ;;  %v5455_v5 = vmax.f32 %v1767_v14, 0.0  ;;  %v1156_v38 = vsub.f32 1.0, %v1028_v30  ;;  %v2011_v35 = vmul.f32 %v5447_v45, %v1283_v12  ;;  %v1280_v48 = vmax.f32 %v1152_v28, 0.0 }
 0x18d   : > { %v1640_v27 = vand.u32 2147483647, %v1520_v54  ;;  %v1644_v55 = vand.u32 2147483647, %v1524_v24  ;;  %2146 = vmatprep.subr.bf16.mxu0 %v2093_v39  ;;  %v902_v40 = vsub.f32 %v5383_v32, %v4556_v0  ;;  %v1026_v49 = vand.u32 2147483647, %v898_v44 }
 0x18e   : > { %7502 = vst [vmem:[#allocation136_spill] sm:$0xff] %v5455_v5  ;;  %v2015_v1 = vmul.f32 %v5455_v5, %v1287_v15  ;;  %v1284_v20 = vmax.f32 %v1156_v38, 0.0  ;;  %v1522_v30 = vsub.f32 %v5405_v18, %v4571_v9  ;;  %v1526_v14 = vsub.f32 %v5415_v42, %v4571_v9 }
 0x18f   : > { %v1760_v25 = vsub.f32 1.0, %v1640_v27  ;;  %v1764_v37 = vsub.f32 1.0, %v1644_v55  ;;  %v1030_v28 = vand.u32 2147483647, %v902_v40  ;;  %v1154_v54 = vsub.f32 1.0, %v1026_v49  ;;  %v5473_v27 = vpop.permute.xlu1 %1413  ;;  %v5477_v40 = vpop.permute.xlu0 %1409 }
 0x190   : > { %v2095_v12 = vpack.c.bf16 %v2015_v1, %v2011_v35  ;;  %v905_v24 = vsub.f32 %v5433_v16, %v4546_v59  ;;  %v1642_v38 = vand.u32 2147483647, %v1522_v30  ;;  %v1646_v44 = vand.u32 2147483647, %v1526_v14  ;;  %7505 = vst [vmem:[#allocation139_spill] sm:$0xff] %v5473_v27  ;;  %7506 = vst [vmem:[#allocation140_spill] sm:$0xff] %v5477_v40 }
 0x191   : > { %v5469_v15 = vmax.f32 %v1760_v25, 0.0  ;;  %v5471_v39 = vmax.f32 %v1764_v37, 0.0  ;;  %v1158_v55 = vsub.f32 1.0, %v1030_v28  ;;  %v1282_v18 = vmax.f32 %v1154_v54, 0.0 }
 0x192   : > { %2189 = vmatprep.subr.bf16.mxu1 %v2095_v12  ;;  %v909_v42 = vsub.f32 %v5453_v33, %v4546_v59  ;;  %v1033_v35 = vand.u32 2147483647, %v905_v24  ;;  %v1762_v25 = vsub.f32 1.0, %v1642_v38  ;;  %v1766_v37 = vsub.f32 1.0, %v1646_v44 }
 0x193   : > { %7503 = vst [vmem:[#allocation137_spill] sm:$0xff] %v5469_v15  ;;  %7504 = vst [vmem:[#allocation138_spill] sm:$0xff] %v5471_v39  ;;  %v2008_v49 = vmul.f32 %v5469_v15, %v1280_v48  ;;  %v2012_v1 = vmul.f32 %v5471_v39, %v1284_v20  ;;  %v1286_v5 = vmax.f32 %v1158_v55, 0.0  ;;  %v1529_v12 = vsub.f32 %v5477_v40, %v4565_v6  ;;  %v5509_v39 = vpop.permute.xlu1 %785 }
 0x194   : > { %v1037_v30 = vand.u32 2147483647, %v909_v42  ;;  %v1161_v14 = vsub.f32 1.0, %v1033_v35  ;;  %v5483_v54 = vmax.f32 %v1762_v25, 0.0  ;;  %v5485_v45 = vmax.f32 %v1766_v37, 0.0  ;;  %7511 = vst [vmem:[#allocation145_spill] sm:$0xff] %v5509_v39 }
 0x195   : > { %v2092_v28 = vpack.c.bf16 %v2012_v1, %v2008_v49  ;;  %v1533_v24 = vsub.f32 %v5473_v27, %v4565_v6  ;;  %v1649_v15 = vand.u32 2147483647, %v1529_v12  ;;  %v907_v20 = vsub.f32 %v5433_v16, %v4548_v60 }
 0x196   : > { %7507 = vst [vmem:[#allocation141_spill] sm:$0xff] %v5483_v54  ;;  %7508 = vst [vmem:[#allocation142_spill] sm:$0xff] %v5485_v45  ;;  %v1165_v32 = vsub.f32 1.0, %v1037_v30  ;;  %v1289_v48 = vmax.f32 %v1161_v14, 0.0  ;;  %v2010_v42 = vmul.f32 %v5483_v54, %v1282_v18  ;;  %v2014_v38 = vmul.f32 %v5485_v45, %v1286_v5 }
 0x197   : > { %2147 = vmatpush1.bf16.msra.mxu0 %v2092_v28  ;;  %v1653_v44 = vand.u32 2147483647, %v1533_v24  ;;  %v911_v55 = vsub.f32 %v5453_v33, %v4548_v60  ;;  %v1769_v49 = vsub.f32 1.0, %v1649_v15  ;;  %v1035_v1 = vand.u32 2147483647, %v907_v20 }
 0x198   : > { %v1293_v35 = vmax.f32 %v1165_v32, 0.0  ;;  %v1531_v25 = vsub.f32 %v5477_v40, %v4567_v7  ;;  %v2094_v37 = vpack.c.bf16 %v2014_v38, %v2010_v42  ;;  %v1535_v12 = vsub.f32 %v5473_v27, %v4567_v7 }
 0x199   : > { %v1773_v30 = vsub.f32 1.0, %v1653_v44  ;;  %v1039_v14 = vand.u32 2147483647, %v911_v55  ;;  %v5499_v28 = vmax.f32 %v1769_v49, 0.0  ;;  %v1163_v18 = vsub.f32 1.0, %v1035_v1 }
 0x19a   : > { %v1651_v5 = vand.u32 2147483647, %v1531_v25  ;;  %v904_v24 = vsub.f32 %v5433_v16, %v4544_v58  ;;  %2190 = vmatpush1.bf16.msra.mxu1 %v2094_v37  ;;  %v1655_v20 = vand.u32 2147483647, %v1535_v12  ;;  %v908_v42 = vsub.f32 %v5453_v33, %v4544_v58 }
 0x19b   : > { %7509 = vst [vmem:[#allocation143_spill] sm:$0xff] %v5499_v28  ;;  %v5503_v32 = vmax.f32 %v1773_v30, 0.0  ;;  %v1167_v15 = vsub.f32 1.0, %v1039_v14  ;;  %v2017_v38 = vmul.f32 %v5499_v28, %v1289_v48  ;;  %v1291_v44 = vmax.f32 %v1163_v18, 0.0 }
 0x19c   : > { %v1771_v55 = vsub.f32 1.0, %v1651_v5  ;;  %v1032_v45 = vand.u32 2147483647, %v904_v24  ;;  %v1775_v25 = vsub.f32 1.0, %v1655_v20  ;;  %v1036_v54 = vand.u32 2147483647, %v908_v42 }
 0x19d   : > { %7510 = vst [vmem:[#allocation144_spill] sm:$0xff] %v5503_v32  ;;  %v2021_v49 = vmul.f32 %v5503_v32, %v1293_v35  ;;  %v1295_v1 = vmax.f32 %v1167_v15, 0.0  ;;  %v1528_v14 = vsub.f32 %v5477_v40, %v4569_v8  ;;  %v1532_v12 = vsub.f32 %v5473_v27, %v4569_v8 }
 0x19e   : > { %v5511_v37 = vmax.f32 %v1771_v55, 0.0  ;;  %v1160_v30 = vsub.f32 1.0, %v1032_v45  ;;  %v5517_v18 = vmax.f32 %v1775_v25, 0.0  ;;  %v1164_v5 = vsub.f32 1.0, %v1036_v54 }
 0x19f   : > { %v2097_v48 = vpack.c.bf16 %v2021_v49, %v2017_v38  ;;  %v906_v35 = vsub.f32 %v5433_v16, %v4556_v0  ;;  %v1648_v20 = vand.u32 2147483647, %v1528_v14  ;;  %v1652_v42 = vand.u32 2147483647, %v1532_v12 }
 0x1a0   : > { %7512 = vst [vmem:[#allocation146_spill] sm:$0xff] %v5511_v37  ;;  %7513 = vst [vmem:[#allocation147_spill] sm:$0xff] %v5517_v18  ;;  %v2019_v24 = vmul.f32 %v5511_v37, %v1291_v44  ;;  %v1288_v15 = vmax.f32 %v1160_v30, 0.0  ;;  %v2023_v45 = vmul.f32 %v5517_v18, %v1295_v1  ;;  %v1292_v55 = vmax.f32 %v1164_v5, 0.0  ;;  %v5531_v1 = vpop.permute.xlu1 %1417  ;;  %v5541_v37 = vpop.permute.xlu0 %1421 }
 0x1a1   : > { %2148 = vmatprep.subr.bf16.mxu0 %v2097_v48  ;;  %v910_v32 = vsub.f32 %v5453_v33, %v4556_v0  ;;  %v1034_v28 = vand.u32 2147483647, %v906_v35  ;;  %v1768_v38 = vsub.f32 1.0, %v1648_v20  ;;  %v1772_v49 = vsub.f32 1.0, %v1652_v42  ;;  %7514 = vst [vmem:[#allocation148_spill] sm:$0xff] %v5531_v1  ;;  %7517 = vst [vmem:[#allocation151_spill] sm:$0xff] %v5541_v37 }
 0x1a2   : > { %v1530_v54 = vsub.f32 %v5477_v40, %v4571_v9  ;;  %v1534_v25 = vsub.f32 %v5473_v27, %v4571_v9  ;;  %v2099_v44 = vpack.c.bf16 %v2023_v45, %v2019_v24  ;;  %v913_v12 = vsub.f32 %v4725_v57, %v4546_v59 }
 0x1a3   : > { %v1038_v30 = vand.u32 2147483647, %v910_v32  ;;  %v1162_v14 = vsub.f32 1.0, %v1034_v28  ;;  %v5533_v48 = vmax.f32 %v1768_v38, 0.0  ;;  %v5535_v5 = vmax.f32 %v1772_v49, 0.0 }
 0x1a4   : > { %v1650_v35 = vand.u32 2147483647, %v1530_v54  ;;  %v1654_v20 = vand.u32 2147483647, %v1534_v25  ;;  %2191 = vmatprep.subr.bf16.mxu1 %v2099_v44  ;;  %v917_v27 = vsub.f32 %v5509_v39, %v4546_v59  ;;  %v1041_v24 = vand.u32 2147483647, %v913_v12 }
 0x1a5   : > { %7515 = vst [vmem:[#allocation149_spill] sm:$0xff] %v5533_v48  ;;  %7516 = vst [vmem:[#allocation150_spill] sm:$0xff] %v5535_v5  ;;  %v1166_v42 = vsub.f32 1.0, %v1038_v30  ;;  %v1290_v40 = vmax.f32 %v1162_v14, 0.0  ;;  %v2016_v28 = vmul.f32 %v5533_v48, %v1288_v15  ;;  %v2020_v32 = vmul.f32 %v5535_v5, %v1292_v55 }
 0x1a6   : > { %v1770_v45 = vsub.f32 1.0, %v1650_v35  ;;  %v1774_v18 = vsub.f32 1.0, %v1654_v20  ;;  %v1045_v49 = vand.u32 2147483647, %v917_v27  ;;  %v1169_v33 = vsub.f32 1.0, %v1041_v24 }
 0x1a7   : > { %v1294_v38 = vmax.f32 %v1166_v42, 0.0  ;;  %v1537_v54 = vsub.f32 %v5531_v1, %v4565_v6  ;;  %v2096_v25 = vpack.c.bf16 %v2020_v32, %v2016_v28  ;;  %v1541_v15 = vsub.f32 %v5541_v37, %v4565_v6 }
 0x1a8   : > { %v5545_v44 = vmax.f32 %v1770_v45, 0.0  ;;  %v5547_v30 = vmax.f32 %v1774_v18, 0.0  ;;  %v1173_v14 = vsub.f32 1.0, %v1045_v49  ;;  %v1297_v55 = vmax.f32 %v1169_v33, 0.0  ;;  %v5559_v49 = vpop.permute.xlu1 %790 }
 0x1a9   : > { %v1657_v12 = vand.u32 2147483647, %v1537_v54  ;;  %v915_v35 = vsub.f32 %v4725_v57, %v4548_v60  ;;  %2149 = vmatpush1.bf16.msra.mxu0 %v2096_v25  ;;  %v1661_v42 = vand.u32 2147483647, %v1541_v15  ;;  %v919_v24 = vsub.f32 %v5509_v39, %v4548_v60 }
 0x1aa   : > { %7518 = vst [vmem:[#allocation152_spill] sm:$0xff] %v5545_v44  ;;  %7519 = vst [vmem:[#allocation153_spill] sm:$0xff] %v5547_v30  ;;  %v2018_v27 = vmul.f32 %v5545_v44, %v1290_v40  ;;  %v2022_v20 = vmul.f32 %v5547_v30, %v1294_v38  ;;  %v1301_v18 = vmax.f32 %v1173_v14, 0.0  ;;  %v1539_v45 = vsub.f32 %v5531_v1, %v4567_v7 }
 0x1ab   : > { %v1777_v28 = vsub.f32 1.0, %v1657_v12  ;;  %v1043_v32 = vand.u32 2147483647, %v915_v35  ;;  %v1781_v54 = vsub.f32 1.0, %v1661_v42  ;;  %v1047_v5 = vand.u32 2147483647, %v919_v24 }
 0x1ac   : > { %v2098_v33 = vpack.c.bf16 %v2022_v20, %v2018_v27  ;;  %v1543_v40 = vsub.f32 %v5541_v37, %v4567_v7  ;;  %v1659_v15 = vand.u32 2147483647, %v1539_v45  ;;  %v912_v14 = vsub.f32 %v4725_v57, %v4544_v58 }
 0x1ad   : > { %v5563_v25 = vmax.f32 %v1777_v28, 0.0  ;;  %v1171_v38 = vsub.f32 1.0, %v1043_v32  ;;  %v5567_v12 = vmax.f32 %v1781_v54, 0.0  ;;  %v1175_v35 = vsub.f32 1.0, %v1047_v5 }
 0x1ae   : > { %2192 = vmatpush1.bf16.msra.mxu1 %v2098_v33  ;;  %v1663_v30 = vand.u32 2147483647, %v1543_v40  ;;  %v916_v27 = vsub.f32 %v5509_v39, %v4544_v58  ;;  %v1779_v24 = vsub.f32 1.0, %v1659_v15  ;;  %v1040_v44 = vand.u32 2147483647, %v912_v14  ;;  %v5579_v40 = vpop.permute.xlu1 %795 }
 0x1af   : > { %7520 = vst [vmem:[#allocation154_spill] sm:$0xff] %v5563_v25  ;;  %7521 = vst [vmem:[#allocation155_spill] sm:$0xff] %v5567_v12  ;;  %v2025_v20 = vmul.f32 %v5563_v25, %v1297_v55  ;;  %v1299_v42 = vmax.f32 %v1171_v38, 0.0  ;;  %v2029_v28 = vmul.f32 %v5567_v12, %v1301_v18  ;;  %v1303_v32 = vmax.f32 %v1175_v35, 0.0 }
 0x1b0   : > { %v1783_v45 = vsub.f32 1.0, %v1663_v30  ;;  %v1044_v48 = vand.u32 2147483647, %v916_v27  ;;  %v5573_v16 = vmax.f32 %v1779_v24, 0.0  ;;  %v1168_v33 = vsub.f32 1.0, %v1040_v44  ;;  %7523 = vst [vmem:[#allocation157_spill] sm:$0xff] %v5579_v40 }
 0x1b1   : > { %v1536_v5 = vsub.f32 %v5531_v1, %v4569_v8  ;;  %v1540_v54 = vsub.f32 %v5541_v37, %v4569_v8  ;;  %v2101_v55 = vpack.c.bf16 %v2029_v28, %v2025_v20  ;;  %v914_v18 = vsub.f32 %v4725_v57, %v4556_v0 }
 0x1b2   : > { %7522 = vst [vmem:[#allocation156_spill] sm:$0xff] %v5573_v16  ;;  %v5581_v38 = vmax.f32 %v1783_v45, 0.0  ;;  %v1172_v15 = vsub.f32 1.0, %v1044_v48  ;;  %v2027_v30 = vmul.f32 %v5573_v16, %v1299_v42  ;;  %v1296_v14 = vmax.f32 %v1168_v33, 0.0 }
 0x1b3   : > { %v1656_v35 = vand.u32 2147483647, %v1536_v5  ;;  %v1660_v44 = vand.u32 2147483647, %v1540_v54  ;;  %2150 = vmatprep.subr.bf16.mxu0 %v2101_v55  ;;  %v918_v12 = vsub.f32 %v5509_v39, %v4556_v0  ;;  %v1042_v25 = vand.u32 2147483647, %v914_v18 }
 0x1b4   : > { %7524 = vst [vmem:[#allocation158_spill] sm:$0xff] %v5581_v38  ;;  %v2031_v27 = vmul.f32 %v5581_v38, %v1303_v32  ;;  %v1300_v24 = vmax.f32 %v1172_v15, 0.0  ;;  %v1538_v48 = vsub.f32 %v5531_v1, %v4571_v9  ;;  %v1542_v45 = vsub.f32 %v5541_v37, %v4571_v9 }
 0x1b5   : > { %v1776_v20 = vsub.f32 1.0, %v1656_v35  ;;  %v1780_v28 = vsub.f32 1.0, %v1660_v44  ;;  %v1046_v33 = vand.u32 2147483647, %v918_v12  ;;  %v1170_v5 = vsub.f32 1.0, %v1042_v25  ;;  %v5599_v35 = vpop.permute.xlu1 %1429  ;;  %v5603_v12 = vpop.permute.xlu0 %1425 }
 0x1b6   : > { %v2103_v42 = vpack.c.bf16 %v2031_v27, %v2027_v30  ;;  %v921_v54 = vsub.f32 %v5559_v49, %v4546_v59  ;;  %v1658_v15 = vand.u32 2147483647, %v1538_v48  ;;  %v1662_v18 = vand.u32 2147483647, %v1542_v45  ;;  %7527 = vst [vmem:[#allocation161_spill] sm:$0xff] %v5599_v35  ;;  %7528 = vst [vmem:[#allocation162_spill] sm:$0xff] %v5603_v12 }
 0x1b7   : > { %v5595_v32 = vmax.f32 %v1776_v20, 0.0  ;;  %v5597_v55 = vmax.f32 %v1780_v28, 0.0  ;;  %v1174_v44 = vsub.f32 1.0, %v1046_v33  ;;  %v1298_v1 = vmax.f32 %v1170_v5, 0.0 }
 0x1b8   : > { %2193 = vmatprep.subr.bf16.mxu1 %v2103_v42  ;;  %v925_v37 = vsub.f32 %v5579_v40, %v4546_v59  ;;  %v1049_v30 = vand.u32 2147483647, %v921_v54  ;;  %v1778_v20 = vsub.f32 1.0, %v1658_v15  ;;  %v1782_v28 = vsub.f32 1.0, %v1662_v18 }
 0x1b9   : > { %7525 = vst [vmem:[#allocation159_spill] sm:$0xff] %v5595_v32  ;;  %7526 = vst [vmem:[#allocation160_spill] sm:$0xff] %v5597_v55  ;;  %v2024_v25 = vmul.f32 %v5595_v32, %v1296_v14  ;;  %v2028_v27 = vmul.f32 %v5597_v55, %v1300_v24  ;;  %v1302_v38 = vmax.f32 %v1174_v44, 0.0  ;;  %v1545_v42 = vsub.f32 %v5603_v12, %v4565_v6  ;;  %v5635_v55 = vpop.permute.xlu1 %805 }
 0x1ba   : > { %v1053_v48 = vand.u32 2147483647, %v925_v37  ;;  %v1177_v45 = vsub.f32 1.0, %v1049_v30  ;;  %v5609_v5 = vmax.f32 %v1778_v20, 0.0  ;;  %v5611_v16 = vmax.f32 %v1782_v28, 0.0 }
 0x1bb   : > { %v2100_v33 = vpack.c.bf16 %v2028_v27, %v2024_v25  ;;  %v1549_v54 = vsub.f32 %v5599_v35, %v4565_v6  ;;  %v1665_v32 = vand.u32 2147483647, %v1545_v42  ;;  %v923_v24 = vsub.f32 %v5559_v49, %v4548_v60 }
 0x1bc   : > { %7529 = vst [vmem:[#allocation163_spill] sm:$0xff] %v5609_v5  ;;  %7530 = vst [vmem:[#allocation164_spill] sm:$0xff] %v5611_v16  ;;  %v1181_v39 = vsub.f32 1.0, %v1053_v48  ;;  %v1305_v14 = vmax.f32 %v1177_v45, 0.0  ;;  %v2026_v37 = vmul.f32 %v5609_v5, %v1298_v1  ;;  %v2030_v15 = vmul.f32 %v5611_v16, %v1302_v38 }
 0x1bd   : > { %2151 = vmatpush1.bf16.msra.mxu0 %v2100_v33  ;;  %v1669_v18 = vand.u32 2147483647, %v1549_v54  ;;  %v927_v44 = vsub.f32 %v5579_v40, %v4548_v60  ;;  %v1785_v25 = vsub.f32 1.0, %v1665_v32  ;;  %v1051_v27 = vand.u32 2147483647, %v923_v24 }
 0x1be   : > { %v1309_v30 = vmax.f32 %v1181_v39, 0.0  ;;  %v1547_v20 = vsub.f32 %v5603_v12, %v4567_v7  ;;  %v2102_v28 = vpack.c.bf16 %v2030_v15, %v2026_v37  ;;  %v1551_v42 = vsub.f32 %v5599_v35, %v4567_v7 }
 0x1bf   : > { %v1789_v48 = vsub.f32 1.0, %v1669_v18  ;;  %v1055_v45 = vand.u32 2147483647, %v927_v44  ;;  %v5625_v33 = vmax.f32 %v1785_v25, 0.0  ;;  %v1179_v1 = vsub.f32 1.0, %v1051_v27 }
 0x1c0   : > { %v1667_v38 = vand.u32 2147483647, %v1547_v20  ;;  %v920_v54 = vsub.f32 %v5559_v49, %v4544_v58  ;;  %2194 = vmatpush1.bf16.msra.mxu1 %v2102_v28  ;;  %v1671_v24 = vand.u32 2147483647, %v1551_v42  ;;  %v924_v37 = vsub.f32 %v5579_v40, %v4544_v58 }
 0x1c1   : > { %7531 = vst [vmem:[#allocation165_spill] sm:$0xff] %v5625_v33  ;;  %v5629_v39 = vmax.f32 %v1789_v48, 0.0  ;;  %v1183_v32 = vsub.f32 1.0, %v1055_v45  ;;  %v2033_v15 = vmul.f32 %v5625_v33, %v1305_v14  ;;  %v1307_v18 = vmax.f32 %v1179_v1, 0.0 }
 0x1c2   : > { %v1787_v44 = vsub.f32 1.0, %v1667_v38  ;;  %v1048_v16 = vand.u32 2147483647, %v920_v54  ;;  %v1791_v20 = vsub.f32 1.0, %v1671_v24  ;;  %v1052_v5 = vand.u32 2147483647, %v924_v37 }
 0x1c3   : > { %7532 = vst [vmem:[#allocation166_spill] sm:$0xff] %v5629_v39  ;;  %v2037_v25 = vmul.f32 %v5629_v39, %v1309_v30  ;;  %v1311_v27 = vmax.f32 %v1183_v32, 0.0  ;;  %v1544_v45 = vsub.f32 %v5603_v12, %v4569_v8  ;;  %v1548_v42 = vsub.f32 %v5599_v35, %v4569_v8 }
 0x1c4   : > { %v5637_v28 = vmax.f32 %v1787_v44, 0.0  ;;  %v1176_v48 = vsub.f32 1.0, %v1048_v16  ;;  %v5643_v1 = vmax.f32 %v1791_v20, 0.0  ;;  %v1180_v38 = vsub.f32 1.0, %v1052_v5 }
 0x1c5   : > { %v2105_v14 = vpack.c.bf16 %v2037_v25, %v2033_v15  ;;  %v922_v30 = vsub.f32 %v5559_v49, %v4556_v0  ;;  %v1664_v24 = vand.u32 2147483647, %v1544_v45  ;;  %v1668_v37 = vand.u32 2147483647, %v1548_v42 }
 0x1c6   : > { %7533 = vst [vmem:[#allocation167_spill] sm:$0xff] %v5637_v28  ;;  %7534 = vst [vmem:[#allocation168_spill] sm:$0xff] %v5643_v1  ;;  %v2035_v54 = vmul.f32 %v5637_v28, %v1307_v18  ;;  %v1304_v32 = vmax.f32 %v1176_v48, 0.0  ;;  %v2039_v16 = vmul.f32 %v5643_v1, %v1311_v27  ;;  %v1308_v44 = vmax.f32 %v1180_v38, 0.0  ;;  %v5657_v27 = vpop.permute.xlu1 %1433 }
 0x1c7   : > { %2152 = vmatprep.subr.bf16.mxu0 %v2105_v14  ;;  %v926_v39 = vsub.f32 %v5579_v40, %v4556_v0  ;;  %v1050_v33 = vand.u32 2147483647, %v922_v30  ;;  %v1784_v15 = vsub.f32 1.0, %v1664_v24  ;;  %v1788_v25 = vsub.f32 1.0, %v1668_v37  ;;  %7535 = vst [vmem:[#allocation169_spill] sm:$0xff] %v5657_v27  ;;  %v5663_v37 = vpop.permute.xlu0 %1437 }
 0x1c8   : > { %v1546_v5 = vsub.f32 %v5603_v12, %v4571_v9  ;;  %v1550_v20 = vsub.f32 %v5599_v35, %v4571_v9  ;;  %v2107_v18 = vpack.c.bf16 %v2039_v16, %v2035_v54  ;;  %v929_v42 = vsub.f32 %v4750_v2, %v4546_v59  ;;  %7536 = vst [vmem:[#allocation170_spill] sm:$0xff] %v5663_v37 }
 0x1c9   : > { %v1054_v48 = vand.u32 2147483647, %v926_v39  ;;  %v1178_v45 = vsub.f32 1.0, %v1050_v33  ;;  %v5659_v14 = vmax.f32 %v1784_v15, 0.0  ;;  %v5661_v38 = vmax.f32 %v1788_v25, 0.0 }
 0x1ca   : > { %v1666_v30 = vand.u32 2147483647, %v1546_v5  ;;  %v1670_v24 = vand.u32 2147483647, %v1550_v20  ;;  %2195 = vmatprep.subr.bf16.mxu1 %v2107_v18  ;;  %v933_v39 = vsub.f32 %v5635_v55, %v4546_v59  ;;  %v1057_v33 = vand.u32 2147483647, %v929_v42 }
 0x1cb   : > { %v1182_v12 = vsub.f32 1.0, %v1054_v48  ;;  %v1306_v1 = vmax.f32 %v1178_v45, 0.0  ;;  %v2032_v54 = vmul.f32 %v5659_v14, %v1304_v32  ;;  %v2036_v16 = vmul.f32 %v5661_v38, %v1308_v44 }
 0x1cc   : > { %v1786_v35 = vsub.f32 1.0, %v1666_v30  ;;  %v1790_v15 = vsub.f32 1.0, %v1670_v24  ;;  %v1061_v25 = vand.u32 2147483647, %v933_v39  ;;  %v1185_v40 = vsub.f32 1.0, %v1057_v33 }
 0x1cd   : > { %v1310_v28 = vmax.f32 %v1182_v12, 0.0  ;;  %v1553_v5 = vsub.f32 %v5657_v27, %v4565_v6  ;;  %v2104_v20 = vpack.c.bf16 %v2036_v16, %v2032_v54  ;;  %v1557_v45 = vsub.f32 %v5663_v37, %v4565_v6 }
 0x1ce   : > { %v5671_v18 = vmax.f32 %v1786_v35, 0.0  ;;  %v5673_v48 = vmax.f32 %v1790_v15, 0.0  ;;  %v1189_v42 = vsub.f32 1.0, %v1061_v25  ;;  %v1313_v32 = vmax.f32 %v1185_v40, 0.0 }
 0x1cf   : > { %v1673_v59 = vand.u32 2147483647, %v1553_v5  ;;  %v931_v44 = vsub.f32 %v4750_v2, %v4548_v60  ;;  %2153 = vmatpush1.bf16.msra.mxu0 %v2104_v20  ;;  %v1677_v24 = vand.u32 2147483647, %v1557_v45  ;;  %v935_v35 = vsub.f32 %v5635_v55, %v4548_v60 }
 0x1d0   : > { %v2034_v12 = vmul.f32 %v5671_v18, %v1306_v1  ;;  %v2038_v30 = vmul.f32 %v5673_v48, %v1310_v28  ;;  %v1317_v39 = vmax.f32 %v1189_v42, 0.0  ;;  %v1555_v6 = vsub.f32 %v5657_v27, %v4567_v7 }
 0x1d1   : > { %v1793_v33 = vsub.f32 1.0, %v1673_v59  ;;  %v1059_v54 = vand.u32 2147483647, %v931_v44  ;;  %v1797_v16 = vsub.f32 1.0, %v1677_v24  ;;  %v1063_v15 = vand.u32 2147483647, %v935_v35 }
 0x1d2   : > { %v2106_v40 = vpack.c.bf16 %v2038_v30, %v2034_v12  ;;  %v1559_v25 = vsub.f32 %v5663_v37, %v4567_v7  ;;  %v1675_v28 = vand.u32 2147483647, %v1555_v6  ;;  %v928_v20 = vsub.f32 %v4750_v2, %v4544_v58 }
 0x1d3   : > { %v5687_v5 = vmax.f32 %v1793_v33, 0.0  ;;  %v1187_v1 = vsub.f32 1.0, %v1059_v54  ;;  %v5691_v45 = vmax.f32 %v1797_v16, 0.0  ;;  %v1191_v59 = vsub.f32 1.0, %v1063_v15 }
 0x1d4   : > { %2196 = vmatpush1.bf16.msra.mxu1 %v2106_v40  ;;  %v1679_v42 = vand.u32 2147483647, %v1559_v25  ;;  %v932_v44 = vsub.f32 %v5635_v55, %v4544_v58  ;;  %v1795_v24 = vsub.f32 1.0, %v1675_v28  ;;  %v1056_v7 = vand.u32 2147483647, %v928_v20 }
 0x1d5   : > { %v2041_v12 = vmul.f32 %v5687_v5, %v1313_v32  ;;  %v1315_v30 = vmax.f32 %v1187_v1, 0.0  ;;  %v2045_v35 = vmul.f32 %v5691_v45, %v1317_v39  ;;  %v1319_v33 = vmax.f32 %v1191_v59, 0.0 }
 0x1d6   : > { %v1799_v54 = vsub.f32 1.0, %v1679_v42  ;;  %v1060_v6 = vand.u32 2147483647, %v932_v44  ;;  %v5697_v60 = vmax.f32 %v1795_v24, 0.0  ;;  %v1184_v40 = vsub.f32 1.0, %v1056_v7 }
 0x1d7   : > { %v1552_v16 = vsub.f32 %v5657_v27, %v4569_v8  ;;  %v1556_v15 = vsub.f32 %v5663_v37, %v4569_v8  ;;  %v2109_v25 = vpack.c.bf16 %v2045_v35, %v2041_v12  ;;  %v930_v1 = vsub.f32 %v4750_v2, %v4556_v0 }
 0x1d8   : > { %v5703_v58 = vmax.f32 %v1799_v54, 0.0  ;;  %v1188_v32 = vsub.f32 1.0, %v1060_v6  ;;  %v2043_v39 = vmul.f32 %v5697_v60, %v1315_v30  ;;  %v1312_v28 = vmax.f32 %v1184_v40, 0.0 }
 0x1d9   : > { %v1672_v20 = vand.u32 2147483647, %v1552_v16  ;;  %v1676_v59 = vand.u32 2147483647, %v1556_v15  ;;  %2154 = vmatprep.subr.bf16.mxu0 %v2109_v25  ;;  %v934_v24 = vsub.f32 %v5635_v55, %v4556_v0  ;;  %v1058_v8 = vand.u32 2147483647, %v930_v1 }
 0x1da   : > { %v2047_v42 = vmul.f32 %v5703_v58, %v1319_v33  ;;  %v1316_v44 = vmax.f32 %v1188_v32, 0.0  ;;  %v1554_v35 = vsub.f32 %v5657_v27, %v4571_v9  ;;  %v1558_v54 = vsub.f32 %v5663_v37, %v4571_v9 }
 0x1db   : > { %v1792_v12 = vsub.f32 1.0, %v1672_v20  ;;  %v1796_v7 = vsub.f32 1.0, %v1676_v59  ;;  %v1062_v6 = vand.u32 2147483647, %v934_v24  ;;  %v1186_v40 = vsub.f32 1.0, %v1058_v8 }
 0x1dc   : > { %v2111_v30 = vpack.c.bf16 %v2047_v42, %v2043_v39  ;;  %v2211_v16 = vsub.f32 %v4561_v4, %v4552_v62  ;;  %v1674_v25 = vand.u32 2147483647, %v1554_v35  ;;  %v1678_v32 = vand.u32 2147483647, %v1558_v54 }
 0x1dd   : > { %v5717_v33 = vmax.f32 %v1792_v12, 0.0  ;;  %v5719_v15 = vmax.f32 %v1796_v7, 0.0  ;;  %v1190_v1 = vsub.f32 1.0, %v1062_v6  ;;  %v1314_v20 = vmax.f32 %v1186_v40, 0.0 }
 0x1de   : > { %2197 = vmatprep.subr.bf16.mxu1 %v2111_v30  ;;  %v2215_v59 = vsub.f32 %v4616_v17, %v4552_v62  ;;  %v2339_v27 = vand.u32 2147483647, %v2211_v16  ;;  %v1794_v42 = vsub.f32 1.0, %v1674_v25  ;;  %v1798_v24 = vsub.f32 1.0, %v1678_v32  ;;  %v4239_v16 = vld [vmem:[%s7057_s2] ss:$8 sps:$4 sm:$0xff]  }
 0x1df   : > { %v2040_v9 = vmul.f32 %v5717_v33, %v1312_v28  ;;  %v2044_v39 = vmul.f32 %v5719_v15, %v1316_v44  ;;  %v1318_v8 = vmax.f32 %v1190_v1, 0.0  ;;  %v2213_v7 = vsub.f32 %v4561_v4, %v4554_v63 }
 0x1e0   : > { %v2343_v12 = vand.u32 2147483647, %v2215_v59  ;;  %v2467_v37 = vsub.f32 1.0, %v2339_v27  ;;  %v5727_v54 = vmax.f32 %v1794_v42, 0.0  ;;  %v5729_v30 = vmax.f32 %v1798_v24, 0.0 }
 0x1e1   : > { %v2108_v35 = vpack.c.bf16 %v2044_v39, %v2040_v9  ;;  %v2217_v6 = vsub.f32 %v4616_v17, %v4554_v63  ;;  %v2341_v44 = vand.u32 2147483647, %v2213_v7  ;;  %v2722_v27 = vmul.f32 %v4648_v56, %v4713_v41 }
 0x1e2   : > { %v2471_v40 = vsub.f32 1.0, %v2343_v12  ;;  %v5733_v28 = vmax.f32 %v2467_v37, 0.0  ;;  %v2042_v4 = vmul.f32 %v5727_v54, %v1314_v20  ;;  %v2046_v25 = vmul.f32 %v5729_v30, %v1318_v8 }
 0x1e3   : > { %2155 = vmatpush1.bf16.msra.mxu0 %v2108_v35  ;;  %v2345_v32 = vand.u32 2147483647, %v2217_v6  ;;  %v2726_v17 = vmul.f32 %v4657_v23, %v4717_v19  ;;  %v2469_v59 = vsub.f32 1.0, %v2341_v44  ;;  %v2724_v9 = vmul.f32 %v4673_v43, %v4731_v21 }
 0x1e4   : > { %v5744_v1 = vmax.f32 %v2471_v40, 0.0  ;;  %v2723_v37 = vmul.f32 %v5733_v28, %v4686_v53  ;;  %v2110_v39 = vpack.c.bf16 %v2046_v25, %v2042_v4  ;;  %v2728_v20 = vmul.f32 %v4676_v46, %v4733_v11 }
 0x1e5   : > { %v2473_v56 = vsub.f32 1.0, %v2345_v32  ;;  %v2850_v41 = vpack.c.bf16 %v2726_v17, %v2722_v27  ;;  %v5754_v24 = vmax.f32 %v2469_v59, 0.0  ;;  %v2219_v23 = vsub.f32 %v4606_v50, %v4552_v62 }
 0x1e6   : > { %v2727_v42 = vmul.f32 %v5744_v1, %v4693_v13  ;;  %2157 = vmatmul.mubr.bf16.vlgmr.msra.gmra.mrb[12].mxu0 %v4239_v16  ;;  %v2223_v53 = vsub.f32 %v4727_v10, %v4552_v62  ;;  %2198 = vmatpush1.bf16.msra.mxu1 %v2110_v39  ;;  %v2852_v19 = vpack.c.bf16 %v2728_v20, %v2724_v9 }
 0x1e7   : > { %v5760_v43 = vmax.f32 %v2473_v56, 0.0  ;;  %v2221_v21 = vsub.f32 %v4606_v50, %v4554_v63  ;;  %v2225_v46 = vsub.f32 %v4727_v10, %v4554_v63  ;;  %v2725_v11 = vmul.f32 %v5754_v24, %v4699_v22 }
 0x1e8   : > { %v2851_v13 = vpack.c.bf16 %v2727_v42, %v2723_v37  ;;  %v2347_v8 = vand.u32 2147483647, %v2219_v23  ;;  %v2351_v12 = vand.u32 2147483647, %v2223_v53  ;;  %v2218_v40 = vsub.f32 %v4606_v50, %v4550_v61  ;;  %v7537_v42 = vld [vmem:[#allocation19_spill] sm:$0xff] }
 0x1e9   : > { %v2729_v7 = vmul.f32 %v5760_v43, %v4701_v26  ;;  %v2349_v35 = vand.u32 2147483647, %v2221_v21  ;;  %v2353_v6 = vand.u32 2147483647, %v2225_v46  ;;  %2200 = vmatmul.mubr.bf16.vlgmr.msra.gmra.mrb[12].mxu1 %v4239_v16  ;;  %v2222_v4 = vsub.f32 %v4727_v10, %v4550_v61  ;;  %v7538_v46 = vld [vmem:[#allocation20_spill] sm:$0xff] }
 0x1ea   : > { %2927 = vmatprep.subr.bf16.mxu0 %v2851_v13  ;;  %v2475_v44 = vsub.f32 1.0, %v2347_v8  ;;  %v2479_v27 = vsub.f32 1.0, %v2351_v12  ;;  %v2220_v22 = vsub.f32 %v4606_v50, %v4558_v3  ;;  %v2346_v26 = vand.u32 2147483647, %v2218_v40 }
 0x1eb   : > { %v2853_v25 = vpack.c.bf16 %v2729_v7, %v2725_v11  ;;  %2928 = vmatpush1.bf16.msra.mxu0 %v2850_v41  ;;  %v2477_v32 = vsub.f32 1.0, %v2349_v35  ;;  %v2481_v17 = vsub.f32 1.0, %v2353_v6  ;;  %v2350_v9 = vand.u32 2147483647, %v2222_v4 }
 0x1ec   : > { %v5776_v37 = vmax.f32 %v2475_v44, 0.0  ;;  %v5778_v59 = vmax.f32 %v2479_v27, 0.0  ;;  %v2224_v16 = vsub.f32 %v4727_v10, %v4558_v3  ;;  %v2474_v20 = vsub.f32 1.0, %v2346_v26  ;;  %v7539_v10 = vld [vmem:[#allocation22_spill] sm:$0xff]  ;;  %v7541_v44 = vld [vmem:[#allocation24_spill] sm:$0xff] }
 0x1ed   : > { %2970 = vmatprep.subr.bf16.mxu1 %v2853_v25  ;;  %v5782_v39 = vmax.f32 %v2477_v32, 0.0  ;;  %v5784_v56 = vmax.f32 %v2481_v17, 0.0  ;;  %v2348_v50 = vand.u32 2147483647, %v2220_v22  ;;  %v2478_v53 = vsub.f32 1.0, %v2350_v9  ;;  %v7542_v22 = vld [vmem:[#allocation21_spill] sm:$0xff] }
 0x1ee   : > { %2971 = vmatpush1.bf16.msra.mxu1 %v2852_v19  ;;  %v2731_v41 = vmul.f32 %v5776_v37, %v4790_v52  ;;  %v2735_v23 = vmul.f32 %v5778_v59, %v7537_v42  ;;  %v2352_v21 = vand.u32 2147483647, %v2224_v16  ;;  %v5794_v8 = vmax.f32 %v2474_v20, 0.0  ;;  %v7540_v52 = vld [vmem:[#allocation18_spill] sm:$0xff]  ;;  %v7543_v32 = vld [vmem:[#allocation25_spill] sm:$0xff]  ;;  %v7544_v20 = vld [vmem:[#allocation27_spill] sm:$0xff] }
 0x1ef   : > { %v2733_v13 = vmul.f32 %v5782_v39, %v7538_v46  ;;  %v2737_v11 = vmul.f32 %v5784_v56, %v7539_v10  ;;  %v2476_v12 = vsub.f32 1.0, %v2348_v50  ;;  %v5796_v35 = vmax.f32 %v2478_v53, 0.0 }
 0x1f0   : > { %v2855_v7 = vpack.c.bf16 %v2735_v23, %v2731_v41  ;;  %v2480_v19 = vsub.f32 1.0, %v2352_v21  ;;  %v2227_v6 = vsub.f32 %v7540_v52, %v4552_v62  ;;  %v2730_v27 = vmul.f32 %v5794_v8, %v7541_v44  ;;  %v7545_v21 = vld [vmem:[#allocation28_spill] sm:$0xff] }
 0x1f1   : > { %v2857_v40 = vpack.c.bf16 %v2737_v11, %v2733_v13  ;;  %v5802_v4 = vmax.f32 %v2476_v12, 0.0  ;;  %v2231_v25 = vsub.f32 %v7542_v22, %v4552_v62  ;;  %v2734_v17 = vmul.f32 %v5796_v35, %v7543_v32 }
 0x1f2   : > { %2929 = vmatprep.subr.bf16.mxu0 %v2855_v7  ;;  %v5808_v26 = vmax.f32 %v2480_v19, 0.0  ;;  %v2355_v9 = vand.u32 2147483647, %v2227_v6  ;;  %v2229_v16 = vsub.f32 %v7540_v52, %v4554_v63  ;;  %v2233_v42 = vsub.f32 %v7542_v22, %v4554_v63 }
 0x1f3   : > { %2972 = vmatprep.subr.bf16.mxu1 %v2857_v40  ;;  %v2732_v50 = vmul.f32 %v5802_v4, %v7544_v20  ;;  %v2359_v41 = vand.u32 2147483647, %v2231_v25  ;;  %v2226_v23 = vsub.f32 %v7540_v52, %v4550_v61  ;;  %v2854_v53 = vpack.c.bf16 %v2734_v17, %v2730_v27 }
 0x1f4   : > { %v2736_v46 = vmul.f32 %v5808_v26, %v7545_v21  ;;  %v2483_v13 = vsub.f32 1.0, %v2355_v9  ;;  %v2357_v10 = vand.u32 2147483647, %v2229_v16  ;;  %v2361_v12 = vand.u32 2147483647, %v2233_v42  ;;  %v7548_v16 = vld [vmem:[#allocation29_spill] sm:$0xff] }
 0x1f5   : > { %v2487_v11 = vsub.f32 1.0, %v2359_v41  ;;  %v2230_v7 = vsub.f32 %v7542_v22, %v4550_v61  ;;  %v2354_v19 = vand.u32 2147483647, %v2226_v23  ;;  %2930 = vmatpush1.bf16.msra.mxu0 %v2854_v53  ;;  %v2228_v25 = vsub.f32 %v7540_v52, %v4558_v3  ;;  %v7550_v23 = vld [vmem:[#allocation30_spill] sm:$0xff] }
 0x1f6   : > { %v2856_v6 = vpack.c.bf16 %v2736_v46, %v2732_v50  ;;  %v5822_v40 = vmax.f32 %v2483_v13, 0.0  ;;  %v2485_v44 = vsub.f32 1.0, %v2357_v10  ;;  %v2489_v32 = vsub.f32 1.0, %v2361_v12  ;;  %v7553_v13 = vld [vmem:[#allocation32_spill] sm:$0xff] }
 0x1f7   : > { %v5826_v27 = vmax.f32 %v2487_v11, 0.0  ;;  %v2358_v17 = vand.u32 2147483647, %v2230_v7  ;;  %v2482_v9 = vsub.f32 1.0, %v2354_v19  ;;  %v2232_v50 = vsub.f32 %v7542_v22, %v4558_v3 }
 0x1f8   : > { %7546 = vst [vmem:[#allocation19_spill] sm:$0xff] %v5822_v40  ;;  %2973 = vmatpush1.bf16.msra.mxu1 %v2856_v6  ;;  %v2739_v20 = vmul.f32 %v5822_v40, %v7548_v16  ;;  %v5830_v41 = vmax.f32 %v2485_v44, 0.0  ;;  %v2356_v42 = vand.u32 2147483647, %v2228_v25  ;;  %v5836_v21 = vmax.f32 %v2489_v32, 0.0  ;;  %v7554_v6 = vld [vmem:[#allocation33_spill] sm:$0xff] }
 0x1f9   : > { %7547 = vst [vmem:[#allocation20_spill] sm:$0xff] %v5826_v27  ;;  %v2743_v53 = vmul.f32 %v5826_v27, %v7550_v23  ;;  %v2486_v52 = vsub.f32 1.0, %v2358_v17  ;;  %v5838_v46 = vmax.f32 %v2482_v9, 0.0  ;;  %v2360_v11 = vand.u32 2147483647, %v2232_v50  ;;  %v7556_v25 = vld [vmem:[#allocation35_spill] sm:$0xff] }
 0x1fa   : > { %7549 = vst [vmem:[#allocation22_spill] sm:$0xff] %v5830_v41  ;;  %7551 = vst [vmem:[#allocation18_spill] sm:$0xff] %v5836_v21  ;;  %v2741_v10 = vmul.f32 %v5830_v41, %v7553_v13  ;;  %v2484_v12 = vsub.f32 1.0, %v2356_v42  ;;  %v2235_v7 = vsub.f32 %v4623_v31, %v4552_v62  ;;  %v2745_v22 = vmul.f32 %v5836_v21, %v7554_v6  ;;  %v7558_v16 = vld [vmem:[#allocation31_spill] sm:$0xff]  ;;  %v7559_v13 = vld [vmem:[#allocation36_spill] sm:$0xff] }
 0x1fb   : > { %7552 = vst [vmem:[#allocation24_spill] sm:$0xff] %v5838_v46  ;;  %v2859_v19 = vpack.c.bf16 %v2743_v53, %v2739_v20  ;;  %v5846_v44 = vmax.f32 %v2486_v52, 0.0  ;;  %v2738_v32 = vmul.f32 %v5838_v46, %v7556_v25  ;;  %v2488_v17 = vsub.f32 1.0, %v2360_v11  ;;  %v7561_v11 = vld [vmem:[#allocation38_spill] sm:$0xff] }
 0x1fc   : > { %v5850_v9 = vmax.f32 %v2484_v12, 0.0  ;;  %v2239_v23 = vsub.f32 %v7558_v16, %v4552_v62  ;;  %v2363_v50 = vand.u32 2147483647, %v2235_v7  ;;  %v2861_v42 = vpack.c.bf16 %v2745_v22, %v2741_v10 }
 0x1fd   : > { %7555 = vst [vmem:[#allocation21_spill] sm:$0xff] %v5846_v44  ;;  %2931 = vmatprep.subr.bf16.mxu0 %v2859_v19  ;;  %v2742_v20 = vmul.f32 %v5846_v44, %v7559_v13  ;;  %v2237_v53 = vsub.f32 %v4623_v31, %v4554_v63  ;;  %v2241_v52 = vsub.f32 %v7558_v16, %v4554_v63  ;;  %v5860_v6 = vmax.f32 %v2488_v17, 0.0  ;;  %v7562_v13 = vld [vmem:[#allocation39_spill] sm:$0xff] }
 0x1fe   : > { %7557 = vst [vmem:[#allocation25_spill] sm:$0xff] %v5850_v9  ;;  %v2740_v12 = vmul.f32 %v5850_v9, %v7561_v11  ;;  %v2367_v25 = vand.u32 2147483647, %v2239_v23  ;;  %v2491_v46 = vsub.f32 1.0, %v2363_v50  ;;  %2974 = vmatprep.subr.bf16.mxu1 %v2861_v42  ;;  %v2234_v22 = vsub.f32 %v4623_v31, %v4550_v61 }
 0x1ff   : > { %7560 = vst [vmem:[#allocation27_spill] sm:$0xff] %v5860_v6  ;;  %v2858_v7 = vpack.c.bf16 %v2742_v20, %v2738_v32  ;;  %v2365_v19 = vand.u32 2147483647, %v2237_v53  ;;  %v2369_v10 = vand.u32 2147483647, %v2241_v52  ;;  %v2744_v44 = vmul.f32 %v5860_v6, %v7562_v13  ;;  %v7565_v53 = vld [vmem:[#allocation41_spill] sm:$0xff] }
 0x200   : > { %v2495_v21 = vsub.f32 1.0, %v2367_v25  ;;  %v5868_v41 = vmax.f32 %v2491_v46, 0.0  ;;  %v2238_v17 = vsub.f32 %v7558_v16, %v4550_v61  ;;  %v2362_v50 = vand.u32 2147483647, %v2234_v22  ;;  %v7568_v22 = vld [vmem:[#allocation43_spill] sm:$0xff] }
 0x201   : > { %2932 = vmatpush1.bf16.msra.mxu0 %v2858_v7  ;;  %v2493_v11 = vsub.f32 1.0, %v2365_v19  ;;  %v2497_v23 = vsub.f32 1.0, %v2369_v10  ;;  %v2236_v32 = vsub.f32 %v4623_v31, %v4558_v3  ;;  %v2860_v42 = vpack.c.bf16 %v2744_v44, %v2740_v12  ;;  %v7566_v19 = vld [vmem:[#allocation42_spill] sm:$0xff] }
 0x202   : > { %7563 = vst [vmem:[#allocation28_spill] sm:$0xff] %v5868_v41  ;;  %v5874_v20 = vmax.f32 %v2495_v21, 0.0  ;;  %v2747_v52 = vmul.f32 %v5868_v41, %v7565_v53  ;;  %v2366_v13 = vand.u32 2147483647, %v2238_v17  ;;  %v2490_v6 = vsub.f32 1.0, %v2362_v50  ;;  %v7567_v21 = vld [vmem:[#allocation40_spill] sm:$0xff] }
 0x203   : > { %v5878_v25 = vmax.f32 %v2493_v11, 0.0  ;;  %v5880_v46 = vmax.f32 %v2497_v23, 0.0  ;;  %v2240_v7 = vsub.f32 %v7558_v16, %v4558_v3  ;;  %2975 = vmatpush1.bf16.msra.mxu1 %v2860_v42  ;;  %v2364_v44 = vand.u32 2147483647, %v2236_v32  ;;  %v7569_v11 = vld [vmem:[#allocation45_spill] sm:$0xff] }
 0x204   : > { %7564 = vst [vmem:[#allocation29_spill] sm:$0xff] %v5874_v20  ;;  %v2751_v10 = vmul.f32 %v5874_v20, %v7566_v19  ;;  %v2494_v31 = vsub.f32 1.0, %v2366_v13  ;;  %v2243_v12 = vsub.f32 %v7567_v21, %v4552_v62  ;;  %v5892_v53 = vmax.f32 %v2490_v6, 0.0  ;;  %v7572_v19 = vld [vmem:[#allocation44_spill] sm:$0xff]  ;;  %v7573_v20 = vld [vmem:[#allocation47_spill] sm:$0xff] }
 0x205   : > { %v2749_v17 = vmul.f32 %v5878_v25, %v7568_v22  ;;  %v2753_v23 = vmul.f32 %v5880_v46, %v7569_v11  ;;  %v2368_v50 = vand.u32 2147483647, %v2240_v7  ;;  %v2492_v42 = vsub.f32 1.0, %v2364_v44  ;;  %v7574_v22 = vld [vmem:[#allocation48_spill] sm:$0xff] }
 0x206   : > { %7570 = vst [vmem:[#allocation30_spill] sm:$0xff] %v5892_v53  ;;  %v2863_v41 = vpack.c.bf16 %v2751_v10, %v2747_v52  ;;  %v5894_v16 = vmax.f32 %v2494_v31, 0.0  ;;  %v2247_v13 = vsub.f32 %v7572_v19, %v4552_v62  ;;  %v2746_v9 = vmul.f32 %v5892_v53, %v7573_v20 }
 0x207   : > { %v2865_v32 = vpack.c.bf16 %v2753_v23, %v2749_v17  ;;  %v2496_v27 = vsub.f32 1.0, %v2368_v50  ;;  %v2371_v40 = vand.u32 2147483647, %v2243_v12  ;;  %v5902_v6 = vmax.f32 %v2492_v42, 0.0  ;;  %v7577_v12 = vld [vmem:[#allocation50_spill] sm:$0xff]  ;;  %v7578_v42 = vld [vmem:[#allocation51_spill] sm:$0xff] }
 0x208   : > { %7571 = vst [vmem:[#allocation32_spill] sm:$0xff] %v5894_v16  ;;  %2933 = vmatprep.subr.bf16.mxu0 %v2863_v41  ;;  %v2750_v11 = vmul.f32 %v5894_v16, %v7574_v22  ;;  %v2375_v7 = vand.u32 2147483647, %v2247_v13  ;;  %v2245_v52 = vsub.f32 %v7567_v21, %v4554_v63  ;;  %v2249_v44 = vsub.f32 %v7572_v19, %v4554_v63 }
 0x209   : > { %7575 = vst [vmem:[#allocation33_spill] sm:$0xff] %v5902_v6  ;;  %2976 = vmatprep.subr.bf16.mxu1 %v2865_v32  ;;  %v5906_v10 = vmax.f32 %v2496_v27, 0.0  ;;  %v2499_v31 = vsub.f32 1.0, %v2371_v40  ;;  %v2242_v20 = vsub.f32 %v7567_v21, %v4550_v61  ;;  %v2748_v17 = vmul.f32 %v5902_v6, %v7577_v12 }
 0x20a   : > { %v2862_v41 = vpack.c.bf16 %v2750_v11, %v2746_v9  ;;  %v2503_v23 = vsub.f32 1.0, %v2375_v7  ;;  %v2373_v50 = vand.u32 2147483647, %v2245_v52  ;;  %v2377_v27 = vand.u32 2147483647, %v2249_v44  ;;  %v7580_v7 = vld [vmem:[#allocation52_spill] sm:$0xff] }
 0x20b   : > { %7576 = vst [vmem:[#allocation35_spill] sm:$0xff] %v5906_v10  ;;  %v2752_v13 = vmul.f32 %v5906_v10, %v7578_v42  ;;  %v5916_v22 = vmax.f32 %v2499_v31, 0.0  ;;  %v2246_v40 = vsub.f32 %v7572_v19, %v4550_v61  ;;  %v2370_v53 = vand.u32 2147483647, %v2242_v20  ;;  %v7581_v31 = vld [vmem:[#allocation53_spill] sm:$0xff] }
 0x20c   : > { %2934 = vmatpush1.bf16.msra.mxu0 %v2862_v41  ;;  %v5920_v32 = vmax.f32 %v2503_v23, 0.0  ;;  %v2501_v16 = vsub.f32 1.0, %v2373_v50  ;;  %v2244_v9 = vsub.f32 %v7567_v21, %v4558_v3  ;;  %v2505_v12 = vsub.f32 1.0, %v2377_v27 }
 0x20d   : > { %v2864_v11 = vpack.c.bf16 %v2752_v13, %v2748_v17  ;;  %v2755_v52 = vmul.f32 %v5916_v22, %v7580_v7  ;;  %v2374_v42 = vand.u32 2147483647, %v2246_v40  ;;  %v2498_v6 = vsub.f32 1.0, %v2370_v53  ;;  %v7584_v13 = vld [vmem:[#allocation55_spill] sm:$0xff]  ;;  %v7586_v7 = vld [vmem:[#allocation56_spill] sm:$0xff] }
 0x20e   : > { %7579 = vst [vmem:[#allocation31_spill] sm:$0xff] %v5920_v32  ;;  %v2759_v44 = vmul.f32 %v5920_v32, %v7581_v31  ;;  %v5928_v10 = vmax.f32 %v2501_v16, 0.0  ;;  %v2248_v41 = vsub.f32 %v7572_v19, %v4558_v3  ;;  %v5932_v20 = vmax.f32 %v2505_v12, 0.0 }
 0x20f   : > { %2977 = vmatpush1.bf16.msra.mxu1 %v2864_v11  ;;  %v2502_v23 = vsub.f32 1.0, %v2374_v42  ;;  %v2372_v21 = vand.u32 2147483647, %v2244_v9  ;;  %v2251_v17 = vsub.f32 %v4641_v47, %v4552_v62  ;;  %v5938_v40 = vmax.f32 %v2498_v6, 0.0  ;;  %v7588_v11 = vld [vmem:[#allocation54_spill] sm:$0xff] }
 0x210   : > { %7582 = vst [vmem:[#allocation36_spill] sm:$0xff] %v5928_v10  ;;  %7583 = vst [vmem:[#allocation38_spill] sm:$0xff] %v5932_v20  ;;  %v2867_v50 = vpack.c.bf16 %v2759_v44, %v2755_v52  ;;  %v2757_v27 = vmul.f32 %v5928_v10, %v7584_v13  ;;  %v2376_v16 = vand.u32 2147483647, %v2248_v41  ;;  %v2761_v53 = vmul.f32 %v5932_v20, %v7586_v7  ;;  %v7589_v9 = vld [vmem:[#allocation58_spill] sm:$0xff]  ;;  %v7590_v41 = vld [vmem:[#allocation59_spill] sm:$0xff] }
 0x211   : > { %7585 = vst [vmem:[#allocation39_spill] sm:$0xff] %v5938_v40  ;;  %v5942_v31 = vmax.f32 %v2502_v23, 0.0  ;;  %v2500_v19 = vsub.f32 1.0, %v2372_v21  ;;  %v2255_v12 = vsub.f32 %v7588_v11, %v4552_v62  ;;  %v2754_v42 = vmul.f32 %v5938_v40, %v7589_v9 }
 0x212   : > { %2935 = vmatprep.subr.bf16.mxu0 %v2867_v50  ;;  %v2504_v52 = vsub.f32 1.0, %v2376_v16  ;;  %v2379_v44 = vand.u32 2147483647, %v2251_v17  ;;  %v2253_v6 = vsub.f32 %v4641_v47, %v4554_v63  ;;  %v2869_v13 = vpack.c.bf16 %v2761_v53, %v2757_v27  ;;  %v7593_v17 = vld [vmem:[#allocation61_spill] sm:$0xff]  ;;  %v4244_v53 = vld [vmem:[%s7057_s2 + $0x14] ss:$8 sps:$4 sm:$0xff]  }
 0x213   : > { %7587 = vst [vmem:[#allocation41_spill] sm:$0xff] %v5942_v31  ;;  %v2758_v10 = vmul.f32 %v5942_v31, %v7590_v41  ;;  %v5952_v7 = vmax.f32 %v2500_v19, 0.0  ;;  %v2383_v23 = vand.u32 2147483647, %v2255_v12  ;;  %v2257_v50 = vsub.f32 %v7588_v11, %v4554_v63  ;;  %v7594_v19 = vld [vmem:[#allocation62_spill] sm:$0xff]  ;;  %2959 = vmatprep.mubr.bf16.mxu0 %v4244_v53  ;;  %3002 = vmatprep.mubr.bf16.mxu1 %v4244_v53 }
 0x214   : > { %v5954_v21 = vmax.f32 %v2504_v52, 0.0  ;;  %v2507_v20 = vsub.f32 1.0, %v2379_v44  ;;  %v2381_v32 = vand.u32 2147483647, %v2253_v6  ;;  %2978 = vmatprep.subr.bf16.mxu1 %v2869_v13  ;;  %v2250_v27 = vsub.f32 %v4641_v47, %v4550_v61 }
 0x215   : > { %7591 = vst [vmem:[#allocation42_spill] sm:$0xff] %v5952_v7  ;;  %v2866_v16 = vpack.c.bf16 %v2758_v10, %v2754_v42  ;;  %v2756_v9 = vmul.f32 %v5952_v7, %v7593_v17  ;;  %v2511_v40 = vsub.f32 1.0, %v2383_v23  ;;  %v2385_v44 = vand.u32 2147483647, %v2257_v50  ;;  %v7597_v17 = vld [vmem:[#allocation64_spill] sm:$0xff] }
 0x216   : > { %7592 = vst [vmem:[#allocation40_spill] sm:$0xff] %v5954_v21  ;;  %v2760_v12 = vmul.f32 %v5954_v21, %v7594_v19  ;;  %v5967_v52 = vmax.f32 %v2507_v20, 0.0  ;;  %v2509_v6 = vsub.f32 1.0, %v2381_v32  ;;  %v2254_v42 = vsub.f32 %v7588_v11, %v4550_v61  ;;  %v7599_v32 = vld [vmem:[#allocation65_spill] sm:$0xff] }
 0x217   : > { %2936 = vmatpush1.bf16.msra.mxu0 %v2866_v16  ;;  %v5969_v10 = vmax.f32 %v2511_v40, 0.0  ;;  %v2378_v13 = vand.u32 2147483647, %v2250_v27  ;;  %v2252_v41 = vsub.f32 %v4641_v47, %v4558_v3  ;;  %v2513_v19 = vsub.f32 1.0, %v2385_v44  ;;  %v7601_v47 = vld [vmem:[#allocation66_spill] sm:$0xff]  ;;  %v7602_v44 = vld [vmem:[#allocation63_spill] sm:$0xff] }
 0x218   : > { %7595 = vst [vmem:[#allocation43_spill] sm:$0xff] %v5967_v52  ;;  %v2868_v23 = vpack.c.bf16 %v2760_v12, %v2756_v9  ;;  %v2763_v7 = vmul.f32 %v5967_v52, %v7597_v17  ;;  %v5977_v20 = vmax.f32 %v2509_v6, 0.0  ;;  %v2382_v50 = vand.u32 2147483647, %v2254_v42  ;;  %v7604_v42 = vld [vmem:[#allocation68_spill] sm:$0xff] }
 0x219   : > { %7596 = vst [vmem:[#allocation45_spill] sm:$0xff] %v5969_v10  ;;  %v2767_v40 = vmul.f32 %v5969_v10, %v7599_v32  ;;  %v2506_v16 = vsub.f32 1.0, %v2378_v13  ;;  %v2256_v27 = vsub.f32 %v7588_v11, %v4558_v3  ;;  %v5983_v21 = vmax.f32 %v2513_v19, 0.0  ;;  %v7605_v11 = vld [vmem:[#allocation67_spill] sm:$0xff] }
 0x21a   : > { %7598 = vst [vmem:[#allocation44_spill] sm:$0xff] %v5977_v20  ;;  %2979 = vmatpush1.bf16.msra.mxu1 %v2868_v23  ;;  %v2765_v9 = vmul.f32 %v5977_v20, %v7601_v47  ;;  %v2380_v12 = vand.u32 2147483647, %v2252_v41  ;;  %v2259_v6 = vsub.f32 %v7602_v44, %v4552_v62  ;;  %v2510_v53 = vsub.f32 1.0, %v2382_v50  ;;  %v7607_v41 = vld [vmem:[#allocation70_spill] sm:$0xff] }
 0x21b   : > { %7600 = vst [vmem:[#allocation47_spill] sm:$0xff] %v5983_v21  ;;  %v2871_v17 = vpack.c.bf16 %v2767_v40, %v2763_v7  ;;  %v5989_v52 = vmax.f32 %v2506_v16, 0.0  ;;  %v2384_v32 = vand.u32 2147483647, %v2256_v27  ;;  %v2769_v13 = vmul.f32 %v5983_v21, %v7604_v42 }
 0x21c   : > { %v2508_v10 = vsub.f32 1.0, %v2380_v12  ;;  %v2263_v23 = vsub.f32 %v7605_v11, %v4552_v62  ;;  %v2387_v19 = vand.u32 2147483647, %v2259_v6  ;;  %v5995_v31 = vmax.f32 %v2510_v53, 0.0  ;;  %v7609_v12 = vld [vmem:[#allocation71_spill] sm:$0xff]  ;;  %v7610_v53 = vld [vmem:[#allocation73_spill] sm:$0xff] }
 0x21d   : > { %7603 = vst [vmem:[#allocation48_spill] sm:$0xff] %v5989_v52  ;;  %2937 = vmatprep.subr.bf16.mxu0 %v2871_v17  ;;  %v2762_v47 = vmul.f32 %v5989_v52, %v7607_v41  ;;  %v2512_v20 = vsub.f32 1.0, %v2384_v32  ;;  %v2261_v7 = vsub.f32 %v7602_v44, %v4554_v63  ;;  %v2873_v40 = vpack.c.bf16 %v2769_v13, %v2765_v9  ;;  %v7611_v13 = vld [vmem:[#allocation74_spill] sm:$0xff] }
 0x21e   : > { %7606 = vst [vmem:[#allocation50_spill] sm:$0xff] %v5995_v31  ;;  %v6001_v50 = vmax.f32 %v2508_v10, 0.0  ;;  %v2391_v16 = vand.u32 2147483647, %v2263_v23  ;;  %v2515_v27 = vsub.f32 1.0, %v2387_v19  ;;  %v2766_v42 = vmul.f32 %v5995_v31, %v7609_v12  ;;  %v7613_v31 = vld [vmem:[#allocation75_spill] sm:$0xff] }
 0x21f   : > { %v6005_v21 = vmax.f32 %v2512_v20, 0.0  ;;  %v2265_v6 = vsub.f32 %v7605_v11, %v4554_v63  ;;  %v2389_v17 = vand.u32 2147483647, %v2261_v7  ;;  %2980 = vmatprep.subr.bf16.mxu1 %v2873_v40  ;;  %v2258_v10 = vsub.f32 %v7602_v44, %v4550_v61 }
 0x220   : > { %7608 = vst [vmem:[#allocation51_spill] sm:$0xff] %v6001_v50  ;;  %v2764_v32 = vmul.f32 %v6001_v50, %v7610_v53  ;;  %v2519_v41 = vsub.f32 1.0, %v2391_v16  ;;  %v6011_v52 = vmax.f32 %v2515_v27, 0.0  ;;  %v2870_v9 = vpack.c.bf16 %v2766_v42, %v2762_v47  ;;  %v7615_v42 = vld [vmem:[#allocation76_spill] sm:$0xff] }
 0x221   : > { %v2768_v23 = vmul.f32 %v6005_v21, %v7611_v13  ;;  %v2393_v20 = vand.u32 2147483647, %v2265_v6  ;;  %v2517_v19 = vsub.f32 1.0, %v2389_v17  ;;  %v2262_v40 = vsub.f32 %v7605_v11, %v4550_v61 }
 0x222   : > { %v6017_v12 = vmax.f32 %v2519_v41, 0.0  ;;  %v2771_v7 = vmul.f32 %v6011_v52, %v7613_v31  ;;  %v2386_v16 = vand.u32 2147483647, %v2258_v10  ;;  %2938 = vmatpush1.bf16.msra.mxu0 %v2870_v9  ;;  %v2260_v47 = vsub.f32 %v7602_v44, %v4558_v3  ;;  %v7617_v10 = vld [vmem:[#allocation77_spill] sm:$0xff] }
 0x223   : > { %v2872_v27 = vpack.c.bf16 %v2768_v23, %v2764_v32  ;;  %v2521_v53 = vsub.f32 1.0, %v2393_v20  ;;  %v6023_v50 = vmax.f32 %v2517_v19, 0.0  ;;  %v2390_v17 = vand.u32 2147483647, %v2262_v40  ;;  %v7619_v40 = vld [vmem:[#allocation78_spill] sm:$0xff] }
 0x224   : > { %7612 = vst [vmem:[#allocation52_spill] sm:$0xff] %v6017_v12  ;;  %v2775_v6 = vmul.f32 %v6017_v12, %v7615_v42  ;;  %v2514_v41 = vsub.f32 1.0, %v2386_v16  ;;  %v2264_v31 = vsub.f32 %v7605_v11, %v4558_v3  ;;  %v2388_v9 = vand.u32 2147483647, %v2260_v47  ;;  %v7621_v47 = vld [vmem:[#allocation80_spill] sm:$0xff] }
 0x225   : > { %7614 = vst [vmem:[#allocation53_spill] sm:$0xff] %v6023_v50  ;;  %2981 = vmatpush1.bf16.msra.mxu1 %v2872_v27  ;;  %v6031_v13 = vmax.f32 %v2521_v53, 0.0  ;;  %v2773_v32 = vmul.f32 %v6023_v50, %v7617_v10  ;;  %v2267_v23 = vsub.f32 %v4662_v34, %v4552_v62  ;;  %v2518_v44 = vsub.f32 1.0, %v2390_v17 }
 0x226   : > { %v2875_v20 = vpack.c.bf16 %v2775_v6, %v2771_v7  ;;  %v6037_v19 = vmax.f32 %v2514_v41, 0.0  ;;  %v2392_v42 = vand.u32 2147483647, %v2264_v31  ;;  %v2516_v12 = vsub.f32 1.0, %v2388_v9  ;;  %v7623_v9 = vld [vmem:[#allocation81_spill] sm:$0xff] }
 0x227   : > { %7616 = vst [vmem:[#allocation55_spill] sm:$0xff] %v6031_v13  ;;  %v2777_v16 = vmul.f32 %v6031_v13, %v7619_v40  ;;  %v2271_v11 = vsub.f32 %v5116_v29, %v4552_v62  ;;  %v2395_v27 = vand.u32 2147483647, %v2267_v23  ;;  %v6043_v53 = vmax.f32 %v2518_v44, 0.0  ;;  %v7625_v44 = vld [vmem:[#allocation83_spill] sm:$0xff] }
 0x228   : > { %7618 = vst [vmem:[#allocation56_spill] sm:$0xff] %v6037_v19  ;;  %2939 = vmatprep.subr.bf16.mxu0 %v2875_v20  ;;  %v2770_v10 = vmul.f32 %v6037_v19, %v7621_v47  ;;  %v2520_v50 = vsub.f32 1.0, %v2392_v42  ;;  %v2269_v7 = vsub.f32 %v4662_v34, %v4554_v63  ;;  %v6049_v17 = vmax.f32 %v2516_v12, 0.0 }
 0x229   : > { %7620 = vst [vmem:[#allocation54_spill] sm:$0xff] %v6043_v53  ;;  %v2877_v6 = vpack.c.bf16 %v2777_v16, %v2773_v32  ;;  %v2399_v41 = vand.u32 2147483647, %v2271_v11  ;;  %v2523_v31 = vsub.f32 1.0, %v2395_v27  ;;  %v2774_v40 = vmul.f32 %v6043_v53, %v7623_v9  ;;  %v7627_v16 = vld [vmem:[#allocation84_spill] sm:$0xff]  ;;  %v7629_v53 = vld [vmem:[#allocation86_spill] sm:$0xff] }
 0x22a   : > { %7622 = vst [vmem:[#allocation58_spill] sm:$0xff] %v6049_v17  ;;  %v6053_v13 = vmax.f32 %v2520_v50, 0.0  ;;  %v2273_v23 = vsub.f32 %v5116_v29, %v4554_v63  ;;  %v2397_v20 = vand.u32 2147483647, %v2269_v7  ;;  %v2772_v42 = vmul.f32 %v6049_v17, %v7625_v44 }
 0x22b   : > { %2982 = vmatprep.subr.bf16.mxu1 %v2877_v6  ;;  %v2527_v47 = vsub.f32 1.0, %v2399_v41  ;;  %v6059_v19 = vmax.f32 %v2523_v31, 0.0  ;;  %v2266_v12 = vsub.f32 %v4662_v34, %v4550_v61  ;;  %v2874_v32 = vpack.c.bf16 %v2774_v40, %v2770_v10  ;;  %v7631_v40 = vld [vmem:[#allocation87_spill] sm:$0xff] }
 0x22c   : > { %7624 = vst [vmem:[#allocation59_spill] sm:$0xff] %v6053_v13  ;;  %v2776_v11 = vmul.f32 %v6053_v13, %v7627_v16  ;;  %v2401_v50 = vand.u32 2147483647, %v2273_v23  ;;  %v2525_v27 = vsub.f32 1.0, %v2397_v20  ;;  %v2270_v6 = vsub.f32 %v5116_v29, %v4550_v61 }
 0x22d   : > { %7626 = vst [vmem:[#allocation61_spill] sm:$0xff] %v6059_v19  ;;  %v6065_v9 = vmax.f32 %v2527_v47, 0.0  ;;  %v2779_v7 = vmul.f32 %v6059_v19, %v7629_v53  ;;  %v2394_v41 = vand.u32 2147483647, %v2266_v12  ;;  %2940 = vmatpush1.bf16.msra.mxu0 %v2874_v32  ;;  %v2268_v10 = vsub.f32 %v4662_v34, %v4558_v3  ;;  %v7633_v12 = vld [vmem:[#allocation88_spill] sm:$0xff] }
 0x22e   : > { %v2876_v31 = vpack.c.bf16 %v2776_v11, %v2772_v42  ;;  %v2529_v44 = vsub.f32 1.0, %v2401_v50  ;;  %v6071_v17 = vmax.f32 %v2525_v27, 0.0  ;;  %v2398_v20 = vand.u32 2147483647, %v2270_v6  ;;  %v7634_v11 = vld [vmem:[#allocation85_spill] sm:$0xff]  ;;  %v7636_v6 = vld [vmem:[#allocation90_spill] sm:$0xff] }
 0x22f   : > { %7628 = vst [vmem:[#allocation62_spill] sm:$0xff] %v6065_v9  ;;  %v2783_v23 = vmul.f32 %v6065_v9, %v7631_v40  ;;  %v2522_v47 = vsub.f32 1.0, %v2394_v41  ;;  %v2272_v53 = vsub.f32 %v5116_v29, %v4558_v3  ;;  %v2396_v32 = vand.u32 2147483647, %v2268_v10  ;;  %v7637_v29 = vld [vmem:[#allocation89_spill] sm:$0xff]  ;;  %v7639_v10 = vld [vmem:[#allocation92_spill] sm:$0xff] }
 0x230   : > { %7630 = vst [vmem:[#allocation64_spill] sm:$0xff] %v6071_v17  ;;  %2983 = vmatpush1.bf16.msra.mxu1 %v2876_v31  ;;  %v6079_v16 = vmax.f32 %v2529_v44, 0.0  ;;  %v2781_v42 = vmul.f32 %v6071_v17, %v7633_v12  ;;  %v2275_v50 = vsub.f32 %v7634_v11, %v4552_v62  ;;  %v2526_v34 = vsub.f32 1.0, %v2398_v20 }
 0x231   : > { %v2879_v27 = vpack.c.bf16 %v2783_v23, %v2779_v7  ;;  %v6085_v19 = vmax.f32 %v2522_v47, 0.0  ;;  %v2400_v40 = vand.u32 2147483647, %v2272_v53  ;;  %v2524_v9 = vsub.f32 1.0, %v2396_v32  ;;  %v7641_v32 = vld [vmem:[#allocation93_spill] sm:$0xff] }
 0x232   : > { %7632 = vst [vmem:[#allocation65_spill] sm:$0xff] %v6079_v16  ;;  %v2785_v41 = vmul.f32 %v6079_v16, %v7636_v6  ;;  %v2279_v31 = vsub.f32 %v7637_v29, %v4552_v62  ;;  %v2403_v44 = vand.u32 2147483647, %v2275_v50  ;;  %v6091_v13 = vmax.f32 %v2526_v34, 0.0  ;;  %v7642_v34 = vld [vmem:[#allocation95_spill] sm:$0xff] }
 0x233   : > { %7635 = vst [vmem:[#allocation66_spill] sm:$0xff] %v6085_v19  ;;  %2941 = vmatprep.subr.bf16.mxu0 %v2879_v27  ;;  %v2778_v12 = vmul.f32 %v6085_v19, %v7639_v10  ;;  %v2528_v17 = vsub.f32 1.0, %v2400_v40  ;;  %v2277_v7 = vsub.f32 %v7634_v11, %v4554_v63  ;;  %v6097_v20 = vmax.f32 %v2524_v9, 0.0 }
 0x234   : > { %7638 = vst [vmem:[#allocation63_spill] sm:$0xff] %v6091_v13  ;;  %v2881_v23 = vpack.c.bf16 %v2785_v41, %v2781_v42  ;;  %v2407_v47 = vand.u32 2147483647, %v2279_v31  ;;  %v2531_v53 = vsub.f32 1.0, %v2403_v44  ;;  %v2782_v6 = vmul.f32 %v6091_v13, %v7641_v32  ;;  %v7644_v41 = vld [vmem:[#allocation96_spill] sm:$0xff]  ;;  %v7646_v13 = vld [vmem:[#allocation97_spill] sm:$0xff] }
 0x235   : > { %7640 = vst [vmem:[#allocation68_spill] sm:$0xff] %v6097_v20  ;;  %v6101_v16 = vmax.f32 %v2528_v17, 0.0  ;;  %v2281_v50 = vsub.f32 %v7637_v29, %v4554_v63  ;;  %v2405_v27 = vand.u32 2147483647, %v2277_v7  ;;  %v2780_v40 = vmul.f32 %v6097_v20, %v7642_v34 }
 0x236   : > { %2984 = vmatprep.subr.bf16.mxu1 %v2881_v23  ;;  %v2535_v10 = vsub.f32 1.0, %v2407_v47  ;;  %v6107_v19 = vmax.f32 %v2531_v53, 0.0  ;;  %v2274_v9 = vsub.f32 %v7634_v11, %v4550_v61  ;;  %v2878_v42 = vpack.c.bf16 %v2782_v6, %v2778_v12  ;;  %v7648_v6 = vld [vmem:[#allocation98_spill] sm:$0xff] }
 0x237   : > { %v2784_v31 = vmul.f32 %v6101_v16, %v7644_v41  ;;  %v2409_v17 = vand.u32 2147483647, %v2281_v50  ;;  %v2533_v44 = vsub.f32 1.0, %v2405_v27  ;;  %v2278_v23 = vsub.f32 %v7637_v29, %v4550_v61 }
 0x238   : > { %7643 = vst [vmem:[#allocation67_spill] sm:$0xff] %v6107_v19  ;;  %v6113_v32 = vmax.f32 %v2535_v10, 0.0  ;;  %v2787_v7 = vmul.f32 %v6107_v19, %v7646_v13  ;;  %v2402_v47 = vand.u32 2147483647, %v2274_v9  ;;  %2942 = vmatpush1.bf16.msra.mxu0 %v2878_v42  ;;  %v2276_v12 = vsub.f32 %v7634_v11, %v4558_v3  ;;  %v7650_v9 = vld [vmem:[#allocation100_spill] sm:$0xff] }
 0x239   : > { %v2880_v53 = vpack.c.bf16 %v2784_v31, %v2780_v40  ;;  %v2537_v34 = vsub.f32 1.0, %v2409_v17  ;;  %v6119_v20 = vmax.f32 %v2533_v44, 0.0  ;;  %v2406_v27 = vand.u32 2147483647, %v2278_v23  ;;  %v7652_v23 = vld [vmem:[#allocation101_spill] sm:$0xff] }
 0x23a   : > { %7645 = vst [vmem:[#allocation70_spill] sm:$0xff] %v6113_v32  ;;  %v2791_v50 = vmul.f32 %v6113_v32, %v7648_v6  ;;  %v2530_v10 = vsub.f32 1.0, %v2402_v47  ;;  %v2280_v13 = vsub.f32 %v7637_v29, %v4558_v3  ;;  %v2404_v42 = vand.u32 2147483647, %v2276_v12  ;;  %v7653_v29 = vld [vmem:[#allocation99_spill] sm:$0xff] }
 0x23b   : > { %7647 = vst [vmem:[#allocation71_spill] sm:$0xff] %v6119_v20  ;;  %2985 = vmatpush1.bf16.msra.mxu1 %v2880_v53  ;;  %v6127_v41 = vmax.f32 %v2537_v34, 0.0  ;;  %v2789_v40 = vmul.f32 %v6119_v20, %v7650_v9  ;;  %v2283_v31 = vsub.f32 %v4681_v51, %v4552_v62  ;;  %v2534_v11 = vsub.f32 1.0, %v2406_v27  ;;  %v7655_v12 = vld [vmem:[#allocation103_spill] sm:$0xff] }
 0x23c   : > { %v2883_v17 = vpack.c.bf16 %v2791_v50, %v2787_v7  ;;  %v6133_v44 = vmax.f32 %v2530_v10, 0.0  ;;  %v2408_v6 = vand.u32 2147483647, %v2280_v13  ;;  %v2532_v32 = vsub.f32 1.0, %v2404_v42  ;;  %v7657_v42 = vld [vmem:[#allocation104_spill] sm:$0xff] }
 0x23d   : > { %7649 = vst [vmem:[#allocation73_spill] sm:$0xff] %v6127_v41  ;;  %v2793_v47 = vmul.f32 %v6127_v41, %v7652_v23  ;;  %v2287_v53 = vsub.f32 %v7653_v29, %v4552_v62  ;;  %v2411_v34 = vand.u32 2147483647, %v2283_v31  ;;  %v6139_v19 = vmax.f32 %v2534_v11, 0.0  ;;  %v7659_v11 = vld [vmem:[#allocation106_spill] sm:$0xff] }
 0x23e   : > { %7651 = vst [vmem:[#allocation74_spill] sm:$0xff] %v6133_v44  ;;  %2943 = vmatprep.subr.bf16.mxu0 %v2883_v17  ;;  %v2786_v9 = vmul.f32 %v6133_v44, %v7655_v12  ;;  %v2536_v20 = vsub.f32 1.0, %v2408_v6  ;;  %v2285_v7 = vsub.f32 %v4681_v51, %v4554_v63  ;;  %v6145_v27 = vmax.f32 %v2532_v32, 0.0 }
 0x23f   : > { %7654 = vst [vmem:[#allocation75_spill] sm:$0xff] %v6139_v19  ;;  %v2885_v50 = vpack.c.bf16 %v2793_v47, %v2789_v40  ;;  %v2415_v10 = vand.u32 2147483647, %v2287_v53  ;;  %v2539_v13 = vsub.f32 1.0, %v2411_v34  ;;  %v2790_v23 = vmul.f32 %v6139_v19, %v7657_v42  ;;  %v7661_v47 = vld [vmem:[#allocation107_spill] sm:$0xff]  ;;  %v7663_v19 = vld [vmem:[#allocation109_spill] sm:$0xff] }
 0x240   : > { %7656 = vst [vmem:[#allocation76_spill] sm:$0xff] %v6145_v27  ;;  %v6149_v41 = vmax.f32 %v2536_v20, 0.0  ;;  %v2289_v31 = vsub.f32 %v7653_v29, %v4554_v63  ;;  %v2413_v17 = vand.u32 2147483647, %v2285_v7  ;;  %v2788_v6 = vmul.f32 %v6145_v27, %v7659_v11 }
 0x241   : > { %2986 = vmatprep.subr.bf16.mxu1 %v2885_v50  ;;  %v2543_v12 = vsub.f32 1.0, %v2415_v10  ;;  %v6155_v44 = vmax.f32 %v2539_v13, 0.0  ;;  %v2282_v32 = vsub.f32 %v4681_v51, %v4550_v61  ;;  %v2882_v40 = vpack.c.bf16 %v2790_v23, %v2786_v9  ;;  %v7665_v23 = vld [vmem:[#allocation110_spill] sm:$0xff] }
 0x242   : > { %7658 = vst [vmem:[#allocation77_spill] sm:$0xff] %v6149_v41  ;;  %v2792_v53 = vmul.f32 %v6149_v41, %v7661_v47  ;;  %v2417_v20 = vand.u32 2147483647, %v2289_v31  ;;  %v2541_v34 = vsub.f32 1.0, %v2413_v17  ;;  %v2286_v50 = vsub.f32 %v7653_v29, %v4550_v61 }
 0x243   : > { %7660 = vst [vmem:[#allocation78_spill] sm:$0xff] %v6155_v44  ;;  %v6161_v42 = vmax.f32 %v2543_v12, 0.0  ;;  %v2795_v7 = vmul.f32 %v6155_v44, %v7663_v19  ;;  %v2410_v10 = vand.u32 2147483647, %v2282_v32  ;;  %2944 = vmatpush1.bf16.msra.mxu0 %v2882_v40  ;;  %v2284_v9 = vsub.f32 %v4681_v51, %v4558_v3  ;;  %v7667_v32 = vld [vmem:[#allocation111_spill] sm:$0xff] }
 0x244   : > { %v2884_v13 = vpack.c.bf16 %v2792_v53, %v2788_v6  ;;  %v2545_v11 = vsub.f32 1.0, %v2417_v20  ;;  %v6167_v27 = vmax.f32 %v2541_v34, 0.0  ;;  %v2414_v17 = vand.u32 2147483647, %v2286_v50  ;;  %v7668_v53 = vld [vmem:[#allocation108_spill] sm:$0xff]  ;;  %v7670_v50 = vld [vmem:[#allocation113_spill] sm:$0xff] }
 0x245   : > { %7662 = vst [vmem:[#allocation80_spill] sm:$0xff] %v6161_v42  ;;  %v2799_v31 = vmul.f32 %v6161_v42, %v7665_v23  ;;  %v2538_v12 = vsub.f32 1.0, %v2410_v10  ;;  %v2288_v19 = vsub.f32 %v7653_v29, %v4558_v3  ;;  %v2412_v40 = vand.u32 2147483647, %v2284_v9  ;;  %v7671_v29 = vld [vmem:[#allocation112_spill] sm:$0xff]  ;;  %v7673_v9 = vld [vmem:[#allocation114_spill] sm:$0xff] }
 0x246   : > { %7664 = vst [vmem:[#allocation81_spill] sm:$0xff] %v6167_v27  ;;  %2987 = vmatpush1.bf16.msra.mxu1 %v2884_v13  ;;  %v6175_v47 = vmax.f32 %v2545_v11, 0.0  ;;  %v2797_v6 = vmul.f32 %v6167_v27, %v7667_v32  ;;  %v2291_v20 = vsub.f32 %v7668_v53, %v4552_v62  ;;  %v2542_v51 = vsub.f32 1.0, %v2414_v17 }
 0x247   : > { %v2887_v34 = vpack.c.bf16 %v2799_v31, %v2795_v7  ;;  %v6181_v44 = vmax.f32 %v2538_v12, 0.0  ;;  %v2416_v23 = vand.u32 2147483647, %v2288_v19  ;;  %v2540_v42 = vsub.f32 1.0, %v2412_v40  ;;  %v7675_v40 = vld [vmem:[#allocation115_spill] sm:$0xff] }
 0x248   : > { %7666 = vst [vmem:[#allocation83_spill] sm:$0xff] %v6175_v47  ;;  %v2801_v10 = vmul.f32 %v6175_v47, %v7670_v50  ;;  %v2295_v13 = vsub.f32 %v7671_v29, %v4552_v62  ;;  %v2419_v11 = vand.u32 2147483647, %v2291_v20  ;;  %v6187_v41 = vmax.f32 %v2542_v51, 0.0  ;;  %v7676_v51 = vld [vmem:[#allocation118_spill] sm:$0xff] }
 0x249   : > { %7669 = vst [vmem:[#allocation84_spill] sm:$0xff] %v6181_v44  ;;  %2945 = vmatprep.subr.bf16.mxu0 %v2887_v34  ;;  %v2794_v32 = vmul.f32 %v6181_v44, %v7673_v9  ;;  %v2544_v27 = vsub.f32 1.0, %v2416_v23  ;;  %v2293_v7 = vsub.f32 %v7668_v53, %v4554_v63  ;;  %v6193_v17 = vmax.f32 %v2540_v42, 0.0 }
 0x24a   : > { %7672 = vst [vmem:[#allocation86_spill] sm:$0xff] %v6187_v41  ;;  %v2889_v31 = vpack.c.bf16 %v2801_v10, %v2797_v6  ;;  %v2423_v12 = vand.u32 2147483647, %v2295_v13  ;;  %v2547_v19 = vsub.f32 1.0, %v2419_v11  ;;  %v2798_v50 = vmul.f32 %v6187_v41, %v7675_v40  ;;  %v7678_v10 = vld [vmem:[#allocation119_spill] sm:$0xff]  ;;  %v7680_v41 = vld [vmem:[#allocation120_spill] sm:$0xff] }
 0x24b   : > { %7674 = vst [vmem:[#allocation87_spill] sm:$0xff] %v6193_v17  ;;  %v6197_v47 = vmax.f32 %v2544_v27, 0.0  ;;  %v2297_v20 = vsub.f32 %v7671_v29, %v4554_v63  ;;  %v2421_v34 = vand.u32 2147483647, %v2293_v7  ;;  %v2796_v23 = vmul.f32 %v6193_v17, %v7676_v51 }
 0x24c   : > { %2988 = vmatprep.subr.bf16.mxu1 %v2889_v31  ;;  %v2551_v9 = vsub.f32 1.0, %v2423_v12  ;;  %v6203_v44 = vmax.f32 %v2547_v19, 0.0  ;;  %v2290_v42 = vsub.f32 %v7668_v53, %v4550_v61  ;;  %v2886_v6 = vpack.c.bf16 %v2798_v50, %v2794_v32  ;;  %v7682_v50 = vld [vmem:[#allocation121_spill] sm:$0xff] }
 0x24d   : > { %v2800_v13 = vmul.f32 %v6197_v47, %v7678_v10  ;;  %v2425_v27 = vand.u32 2147483647, %v2297_v20  ;;  %v2549_v11 = vsub.f32 1.0, %v2421_v34  ;;  %v2294_v31 = vsub.f32 %v7671_v29, %v4550_v61 }
 0x24e   : > { %7677 = vst [vmem:[#allocation88_spill] sm:$0xff] %v6203_v44  ;;  %v6209_v40 = vmax.f32 %v2551_v9, 0.0  ;;  %v2803_v7 = vmul.f32 %v6203_v44, %v7680_v41  ;;  %v2418_v12 = vand.u32 2147483647, %v2290_v42  ;;  %2946 = vmatpush1.bf16.msra.mxu0 %v2886_v6  ;;  %v2292_v32 = vsub.f32 %v7668_v53, %v4558_v3  ;;  %v7684_v42 = vld [vmem:[#allocation123_spill] sm:$0xff] }
 0x24f   : > { %v2888_v19 = vpack.c.bf16 %v2800_v13, %v2796_v23  ;;  %v2553_v51 = vsub.f32 1.0, %v2425_v27  ;;  %v6215_v17 = vmax.f32 %v2549_v11, 0.0  ;;  %v2422_v34 = vand.u32 2147483647, %v2294_v31  ;;  %v7686_v31 = vld [vmem:[#allocation124_spill] sm:$0xff] }
 0x250   : > { %7679 = vst [vmem:[#allocation85_spill] sm:$0xff] %v6209_v40  ;;  %v2807_v20 = vmul.f32 %v6209_v40, %v7682_v50  ;;  %v2546_v9 = vsub.f32 1.0, %v2418_v12  ;;  %v2296_v41 = vsub.f32 %v7671_v29, %v4558_v3  ;;  %v2420_v6 = vand.u32 2147483647, %v2292_v32  ;;  %v7687_v29 = vld [vmem:[#allocation122_spill] sm:$0xff] }
 0x251   : > { %7681 = vst [vmem:[#allocation90_spill] sm:$0xff] %v6215_v17  ;;  %2989 = vmatpush1.bf16.msra.mxu1 %v2888_v19  ;;  %v6223_v10 = vmax.f32 %v2553_v51, 0.0  ;;  %v2805_v23 = vmul.f32 %v6215_v17, %v7684_v42  ;;  %v2299_v13 = vsub.f32 %v4706_v36, %v4552_v62  ;;  %v2550_v53 = vsub.f32 1.0, %v2422_v34  ;;  %v7689_v32 = vld [vmem:[#allocation126_spill] sm:$0xff] }
 0x252   : > { %v2891_v27 = vpack.c.bf16 %v2807_v20, %v2803_v7  ;;  %v6229_v11 = vmax.f32 %v2546_v9, 0.0  ;;  %v2424_v50 = vand.u32 2147483647, %v2296_v41  ;;  %v2548_v40 = vsub.f32 1.0, %v2420_v6  ;;  %v7691_v6 = vld [vmem:[#allocation127_spill] sm:$0xff] }
 0x253   : > { %7683 = vst [vmem:[#allocation89_spill] sm:$0xff] %v6223_v10  ;;  %v2809_v12 = vmul.f32 %v6223_v10, %v7686_v31  ;;  %v2303_v19 = vsub.f32 %v7687_v29, %v4552_v62  ;;  %v2427_v51 = vand.u32 2147483647, %v2299_v13  ;;  %v6235_v44 = vmax.f32 %v2550_v53, 0.0  ;;  %v7693_v53 = vld [vmem:[#allocation129_spill] sm:$0xff] }
 0x254   : > { %7685 = vst [vmem:[#allocation92_spill] sm:$0xff] %v6229_v11  ;;  %2947 = vmatprep.subr.bf16.mxu0 %v2891_v27  ;;  %v2802_v42 = vmul.f32 %v6229_v11, %v7689_v32  ;;  %v2552_v17 = vsub.f32 1.0, %v2424_v50  ;;  %v2301_v7 = vsub.f32 %v4706_v36, %v4554_v63  ;;  %v6241_v34 = vmax.f32 %v2548_v40, 0.0 }
 0x255   : > { %7688 = vst [vmem:[#allocation93_spill] sm:$0xff] %v6235_v44  ;;  %v2893_v20 = vpack.c.bf16 %v2809_v12, %v2805_v23  ;;  %v2431_v9 = vand.u32 2147483647, %v2303_v19  ;;  %v2555_v41 = vsub.f32 1.0, %v2427_v51  ;;  %v2806_v31 = vmul.f32 %v6235_v44, %v7691_v6  ;;  %v7695_v12 = vld [vmem:[#allocation130_spill] sm:$0xff]  ;;  %v7697_v44 = vld [vmem:[#allocation132_spill] sm:$0xff] }
 0x256   : > { %7690 = vst [vmem:[#allocation95_spill] sm:$0xff] %v6241_v34  ;;  %v6245_v10 = vmax.f32 %v2552_v17, 0.0  ;;  %v2305_v13 = vsub.f32 %v7687_v29, %v4554_v63  ;;  %v2429_v27 = vand.u32 2147483647, %v2301_v7  ;;  %v2804_v50 = vmul.f32 %v6241_v34, %v7693_v53 }
 0x257   : > { %2990 = vmatprep.subr.bf16.mxu1 %v2893_v20  ;;  %v2559_v32 = vsub.f32 1.0, %v2431_v9  ;;  %v6251_v11 = vmax.f32 %v2555_v41, 0.0  ;;  %v2298_v40 = vsub.f32 %v4706_v36, %v4550_v61  ;;  %v2890_v23 = vpack.c.bf16 %v2806_v31, %v2802_v42  ;;  %v7699_v31 = vld [vmem:[#allocation133_spill] sm:$0xff] }
 0x258   : > { %7692 = vst [vmem:[#allocation96_spill] sm:$0xff] %v6245_v10  ;;  %v2808_v19 = vmul.f32 %v6245_v10, %v7695_v12  ;;  %v2433_v17 = vand.u32 2147483647, %v2305_v13  ;;  %v2557_v51 = vsub.f32 1.0, %v2429_v27  ;;  %v2302_v20 = vsub.f32 %v7687_v29, %v4550_v61 }
 0x259   : > { %7694 = vst [vmem:[#allocation97_spill] sm:$0xff] %v6251_v11  ;;  %v6257_v6 = vmax.f32 %v2559_v32, 0.0  ;;  %v2811_v7 = vmul.f32 %v6251_v11, %v7697_v44  ;;  %v2426_v9 = vand.u32 2147483647, %v2298_v40  ;;  %2948 = vmatpush1.bf16.msra.mxu0 %v2890_v23  ;;  %v2300_v42 = vsub.f32 %v4706_v36, %v4558_v3  ;;  %v7701_v40 = vld [vmem:[#allocation134_spill] sm:$0xff] }
 0x25a   : > { %v2892_v41 = vpack.c.bf16 %v2808_v19, %v2804_v50  ;;  %v2561_v53 = vsub.f32 1.0, %v2433_v17  ;;  %v6263_v34 = vmax.f32 %v2557_v51, 0.0  ;;  %v2430_v27 = vand.u32 2147483647, %v2302_v20  ;;  %v7702_v19 = vld [vmem:[#allocation131_spill] sm:$0xff]  ;;  %v7704_v20 = vld [vmem:[#allocation136_spill] sm:$0xff] }
 0x25b   : > { %7696 = vst [vmem:[#allocation98_spill] sm:$0xff] %v6257_v6  ;;  %v2815_v13 = vmul.f32 %v6257_v6, %v7699_v31  ;;  %v2554_v32 = vsub.f32 1.0, %v2426_v9  ;;  %v2304_v44 = vsub.f32 %v7687_v29, %v4558_v3  ;;  %v2428_v23 = vand.u32 2147483647, %v2300_v42  ;;  %v7705_v29 = vld [vmem:[#allocation135_spill] sm:$0xff]  ;;  %v7707_v42 = vld [vmem:[#allocation137_spill] sm:$0xff] }
 0x25c   : > { %7698 = vst [vmem:[#allocation100_spill] sm:$0xff] %v6263_v34  ;;  %2991 = vmatpush1.bf16.msra.mxu1 %v2892_v41  ;;  %v6271_v12 = vmax.f32 %v2561_v53, 0.0  ;;  %v2813_v50 = vmul.f32 %v6263_v34, %v7701_v40  ;;  %v2307_v17 = vsub.f32 %v7702_v19, %v4552_v62  ;;  %v2558_v36 = vsub.f32 1.0, %v2430_v27 }
 0x25d   : > { %v2895_v51 = vpack.c.bf16 %v2815_v13, %v2811_v7  ;;  %v6277_v11 = vmax.f32 %v2554_v32, 0.0  ;;  %v2432_v31 = vand.u32 2147483647, %v2304_v44  ;;  %v2556_v6 = vsub.f32 1.0, %v2428_v23  ;;  %v7709_v23 = vld [vmem:[#allocation138_spill] sm:$0xff] }
 0x25e   : > { %7700 = vst [vmem:[#allocation101_spill] sm:$0xff] %v6271_v12  ;;  %v2817_v9 = vmul.f32 %v6271_v12, %v7704_v20  ;;  %v2311_v41 = vsub.f32 %v7705_v29, %v4552_v62  ;;  %v2435_v53 = vand.u32 2147483647, %v2307_v17  ;;  %v6283_v10 = vmax.f32 %v2558_v36, 0.0  ;;  %v7710_v36 = vld [vmem:[#allocation141_spill] sm:$0xff] }
 0x25f   : > { %7703 = vst [vmem:[#allocation99_spill] sm:$0xff] %v6277_v11  ;;  %2949 = vmatprep.subr.bf16.mxu0 %v2895_v51  ;;  %v2810_v40 = vmul.f32 %v6277_v11, %v7707_v42  ;;  %v2560_v34 = vsub.f32 1.0, %v2432_v31  ;;  %v2309_v7 = vsub.f32 %v7702_v19, %v4554_v63  ;;  %v6289_v27 = vmax.f32 %v2556_v6, 0.0 }
 0x260   : > { %7706 = vst [vmem:[#allocation103_spill] sm:$0xff] %v6283_v10  ;;  %v2897_v13 = vpack.c.bf16 %v2817_v9, %v2813_v50  ;;  %v2439_v32 = vand.u32 2147483647, %v2311_v41  ;;  %v2563_v44 = vsub.f32 1.0, %v2435_v53  ;;  %v2814_v20 = vmul.f32 %v6283_v10, %v7709_v23  ;;  %v7712_v9 = vld [vmem:[#allocation142_spill] sm:$0xff]  ;;  %v7714_v10 = vld [vmem:[#allocation143_spill] sm:$0xff] }
 0x261   : > { %7708 = vst [vmem:[#allocation104_spill] sm:$0xff] %v6289_v27  ;;  %v6293_v12 = vmax.f32 %v2560_v34, 0.0  ;;  %v2313_v17 = vsub.f32 %v7705_v29, %v4554_v63  ;;  %v2437_v51 = vand.u32 2147483647, %v2309_v7  ;;  %v2812_v31 = vmul.f32 %v6289_v27, %v7710_v36 }
 0x262   : > { %2992 = vmatprep.subr.bf16.mxu1 %v2897_v13  ;;  %v2567_v42 = vsub.f32 1.0, %v2439_v32  ;;  %v6299_v11 = vmax.f32 %v2563_v44, 0.0  ;;  %v2306_v6 = vsub.f32 %v7702_v19, %v4550_v61  ;;  %v2894_v50 = vpack.c.bf16 %v2814_v20, %v2810_v40  ;;  %v7716_v20 = vld [vmem:[#allocation144_spill] sm:$0xff] }
 0x263   : > { %v2816_v41 = vmul.f32 %v6293_v12, %v7712_v9  ;;  %v2441_v34 = vand.u32 2147483647, %v2313_v17  ;;  %v2565_v53 = vsub.f32 1.0, %v2437_v51  ;;  %v2310_v13 = vsub.f32 %v7705_v29, %v4550_v61 }
 0x264   : > { %7711 = vst [vmem:[#allocation106_spill] sm:$0xff] %v6299_v11  ;;  %v6305_v23 = vmax.f32 %v2567_v42, 0.0  ;;  %v2819_v7 = vmul.f32 %v6299_v11, %v7714_v10  ;;  %v2434_v32 = vand.u32 2147483647, %v2306_v6  ;;  %2950 = vmatpush1.bf16.msra.mxu0 %v2894_v50  ;;  %v2308_v40 = vsub.f32 %v7702_v19, %v4558_v3  ;;  %v7718_v6 = vld [vmem:[#allocation146_spill] sm:$0xff] }
 0x265   : > { %v2896_v44 = vpack.c.bf16 %v2816_v41, %v2812_v31  ;;  %v2569_v36 = vsub.f32 1.0, %v2441_v34  ;;  %v6311_v27 = vmax.f32 %v2565_v53, 0.0  ;;  %v2438_v51 = vand.u32 2147483647, %v2310_v13  ;;  %v7720_v13 = vld [vmem:[#allocation147_spill] sm:$0xff] }
 0x266   : > { %7713 = vst [vmem:[#allocation107_spill] sm:$0xff] %v6305_v23  ;;  %v2823_v17 = vmul.f32 %v6305_v23, %v7716_v20  ;;  %v2562_v42 = vsub.f32 1.0, %v2434_v32  ;;  %v2312_v10 = vsub.f32 %v7705_v29, %v4558_v3  ;;  %v2436_v50 = vand.u32 2147483647, %v2308_v40  ;;  %v7721_v29 = vld [vmem:[#allocation145_spill] sm:$0xff] }
 0x267   : > { %7715 = vst [vmem:[#allocation109_spill] sm:$0xff] %v6311_v27  ;;  %2993 = vmatpush1.bf16.msra.mxu1 %v2896_v44  ;;  %v6319_v9 = vmax.f32 %v2569_v36, 0.0  ;;  %v2821_v31 = vmul.f32 %v6311_v27, %v7718_v6  ;;  %v2315_v41 = vsub.f32 %v4725_v57, %v4552_v62  ;;  %v2566_v19 = vsub.f32 1.0, %v2438_v51  ;;  %v7723_v40 = vld [vmem:[#allocation149_spill] sm:$0xff] }
 0x268   : > { %v2899_v34 = vpack.c.bf16 %v2823_v17, %v2819_v7  ;;  %v6325_v53 = vmax.f32 %v2562_v42, 0.0  ;;  %v2440_v20 = vand.u32 2147483647, %v2312_v10  ;;  %v2564_v23 = vsub.f32 1.0, %v2436_v50  ;;  %v7725_v50 = vld [vmem:[#allocation150_spill] sm:$0xff] }
 0x269   : > { %7717 = vst [vmem:[#allocation110_spill] sm:$0xff] %v6319_v9  ;;  %v2825_v32 = vmul.f32 %v6319_v9, %v7720_v13  ;;  %v2319_v44 = vsub.f32 %v7721_v29, %v4552_v62  ;;  %v2443_v36 = vand.u32 2147483647, %v2315_v41  ;;  %v6331_v11 = vmax.f32 %v2566_v19, 0.0  ;;  %v7726_v19 = vld [vmem:[#allocation152_spill] sm:$0xff] }
 0x26a   : > { %7719 = vst [vmem:[#allocation111_spill] sm:$0xff] %v6325_v53  ;;  %2951 = vmatprep.subr.bf16.mxu0 %v2899_v34  ;;  %v2818_v6 = vmul.f32 %v6325_v53, %v7723_v40  ;;  %v2568_v27 = vsub.f32 1.0, %v2440_v20  ;;  %v2317_v7 = vsub.f32 %v4725_v57, %v4554_v63  ;;  %v6337_v51 = vmax.f32 %v2564_v23, 0.0 }
 0x26b   : > { %7722 = vst [vmem:[#allocation108_spill] sm:$0xff] %v6331_v11  ;;  %v2901_v17 = vpack.c.bf16 %v2825_v32, %v2821_v31  ;;  %v2447_v42 = vand.u32 2147483647, %v2319_v44  ;;  %v2571_v10 = vsub.f32 1.0, %v2443_v36  ;;  %v2822_v13 = vmul.f32 %v6331_v11, %v7725_v50  ;;  %v7728_v32 = vld [vmem:[#allocation153_spill] sm:$0xff]  ;;  %v7730_v11 = vld [vmem:[#allocation154_spill] sm:$0xff] }
 0x26c   : > { %7724 = vst [vmem:[#allocation113_spill] sm:$0xff] %v6337_v51  ;;  %v6341_v9 = vmax.f32 %v2568_v27, 0.0  ;;  %v2321_v41 = vsub.f32 %v7721_v29, %v4554_v63  ;;  %v2445_v34 = vand.u32 2147483647, %v2317_v7  ;;  %v2820_v20 = vmul.f32 %v6337_v51, %v7726_v19 }
 0x26d   : > { %2994 = vmatprep.subr.bf16.mxu1 %v2901_v17  ;;  %v2575_v40 = vsub.f32 1.0, %v2447_v42  ;;  %v6347_v53 = vmax.f32 %v2571_v10, 0.0  ;;  %v2314_v23 = vsub.f32 %v4725_v57, %v4550_v61  ;;  %v2898_v31 = vpack.c.bf16 %v2822_v13, %v2818_v6  ;;  %v7732_v13 = vld [vmem:[#allocation155_spill] sm:$0xff] }
 0x26e   : > { %v2824_v44 = vmul.f32 %v6341_v9, %v7728_v32  ;;  %v2449_v27 = vand.u32 2147483647, %v2321_v41  ;;  %v2573_v36 = vsub.f32 1.0, %v2445_v34  ;;  %v2318_v17 = vsub.f32 %v7721_v29, %v4550_v61 }
 0x26f   : > { %7727 = vst [vmem:[#allocation112_spill] sm:$0xff] %v6347_v53  ;;  %v6353_v50 = vmax.f32 %v2575_v40, 0.0  ;;  %v2827_v7 = vmul.f32 %v6347_v53, %v7730_v11  ;;  %v2442_v42 = vand.u32 2147483647, %v2314_v23  ;;  %2952 = vmatpush1.bf16.msra.mxu0 %v2898_v31  ;;  %v2316_v6 = vsub.f32 %v4725_v57, %v4558_v3  ;;  %v7734_v23 = vld [vmem:[#allocation156_spill] sm:$0xff] }
 0x270   : > { %v2900_v10 = vpack.c.bf16 %v2824_v44, %v2820_v20  ;;  %v2577_v19 = vsub.f32 1.0, %v2449_v27  ;;  %v6359_v51 = vmax.f32 %v2573_v36, 0.0  ;;  %v2446_v34 = vand.u32 2147483647, %v2318_v17  ;;  %v7736_v17 = vld [vmem:[#allocation158_spill] sm:$0xff] }
 0x271   : > { %7729 = vst [vmem:[#allocation114_spill] sm:$0xff] %v6353_v50  ;;  %v2831_v41 = vmul.f32 %v6353_v50, %v7732_v13  ;;  %v2570_v40 = vsub.f32 1.0, %v2442_v42  ;;  %v2320_v11 = vsub.f32 %v7721_v29, %v4558_v3  ;;  %v2444_v31 = vand.u32 2147483647, %v2316_v6  ;;  %v7737_v29 = vld [vmem:[#allocation157_spill] sm:$0xff]  ;;  %v7739_v6 = vld [vmem:[#allocation159_spill] sm:$0xff] }
 0x272   : > { %7731 = vst [vmem:[#allocation115_spill] sm:$0xff] %v6359_v51  ;;  %2995 = vmatpush1.bf16.msra.mxu1 %v2900_v10  ;;  %v6367_v32 = vmax.f32 %v2577_v19, 0.0  ;;  %v2829_v20 = vmul.f32 %v6359_v51, %v7734_v23  ;;  %v2323_v44 = vsub.f32 %v5559_v49, %v4552_v62  ;;  %v2574_v57 = vsub.f32 1.0, %v2446_v34 }
 0x273   : > { %v2903_v27 = vpack.c.bf16 %v2831_v41, %v2827_v7  ;;  %v6373_v36 = vmax.f32 %v2570_v40, 0.0  ;;  %v2448_v13 = vand.u32 2147483647, %v2320_v11  ;;  %v2572_v50 = vsub.f32 1.0, %v2444_v31  ;;  %v7741_v31 = vld [vmem:[#allocation160_spill] sm:$0xff] }
 0x274   : > { %7733 = vst [vmem:[#allocation118_spill] sm:$0xff] %v6367_v32  ;;  %v2833_v42 = vmul.f32 %v6367_v32, %v7736_v17  ;;  %v2327_v10 = vsub.f32 %v7737_v29, %v4552_v62  ;;  %v2451_v19 = vand.u32 2147483647, %v2323_v44  ;;  %v6379_v53 = vmax.f32 %v2574_v57, 0.0  ;;  %v7742_v57 = vld [vmem:[#allocation163_spill] sm:$0xff] }
 0x275   : > { %7735 = vst [vmem:[#allocation119_spill] sm:$0xff] %v6373_v36  ;;  %2953 = vmatprep.subr.bf16.mxu0 %v2903_v27  ;;  %v2826_v23 = vmul.f32 %v6373_v36, %v7739_v6  ;;  %v2576_v51 = vsub.f32 1.0, %v2448_v13  ;;  %v2325_v7 = vsub.f32 %v5559_v49, %v4554_v63  ;;  %v6385_v34 = vmax.f32 %v2572_v50, 0.0 }
 0x276   : > { %7738 = vst [vmem:[#allocation120_spill] sm:$0xff] %v6379_v53  ;;  %v2905_v41 = vpack.c.bf16 %v2833_v42, %v2829_v20  ;;  %v2455_v40 = vand.u32 2147483647, %v2327_v10  ;;  %v2579_v11 = vsub.f32 1.0, %v2451_v19  ;;  %v2830_v17 = vmul.f32 %v6379_v53, %v7741_v31  ;;  %v7743_v42 = vld [vmem:[#allocation164_spill] sm:$0xff]  ;;  %v7745_v53 = vld [vmem:[#allocation165_spill] sm:$0xff] }
 0x277   : > { %7740 = vst [vmem:[#allocation121_spill] sm:$0xff] %v6385_v34  ;;  %v6389_v32 = vmax.f32 %v2576_v51, 0.0  ;;  %v2329_v44 = vsub.f32 %v7737_v29, %v4554_v63  ;;  %v2453_v27 = vand.u32 2147483647, %v2325_v7  ;;  %v2828_v13 = vmul.f32 %v6385_v34, %v7742_v57 }
 0x278   : > { %2996 = vmatprep.subr.bf16.mxu1 %v2905_v41  ;;  %v2583_v6 = vsub.f32 1.0, %v2455_v40  ;;  %v6395_v36 = vmax.f32 %v2579_v11, 0.0  ;;  %v2322_v50 = vsub.f32 %v5559_v49, %v4550_v61  ;;  %v2902_v20 = vpack.c.bf16 %v2830_v17, %v2826_v23  ;;  %v7746_v17 = vld [vmem:[#allocation166_spill] sm:$0xff] }
 0x279   : > { %v2832_v10 = vmul.f32 %v6389_v32, %v7743_v42  ;;  %v2457_v51 = vand.u32 2147483647, %v2329_v44  ;;  %v2581_v19 = vsub.f32 1.0, %v2453_v27  ;;  %v2326_v41 = vsub.f32 %v7737_v29, %v4550_v61 }
 0x27a   : > { %v6401_v31 = vmax.f32 %v2583_v6, 0.0  ;;  %v2835_v7 = vmul.f32 %v6395_v36, %v7745_v53  ;;  %v2450_v40 = vand.u32 2147483647, %v2322_v50  ;;  %2954 = vmatpush1.bf16.msra.mxu0 %v2902_v20  ;;  %v2324_v23 = vsub.f32 %v5559_v49, %v4558_v3  ;;  %v7747_v50 = vld [vmem:[#allocation167_spill] sm:$0xff] }
 0x27b   : > { %v2904_v11 = vpack.c.bf16 %v2832_v10, %v2828_v13  ;;  %v2585_v57 = vsub.f32 1.0, %v2457_v51  ;;  %v6407_v34 = vmax.f32 %v2581_v19, 0.0  ;;  %v2454_v27 = vand.u32 2147483647, %v2326_v41  ;;  %v7748_v41 = vld [vmem:[#allocation168_spill] sm:$0xff] }
 0x27c   : > { %7744 = vst [vmem:[#allocation123_spill] sm:$0xff] %v6401_v31  ;;  %v2839_v44 = vmul.f32 %v6401_v31, %v7746_v17  ;;  %v2578_v6 = vsub.f32 1.0, %v2450_v40  ;;  %v2328_v53 = vsub.f32 %v7737_v29, %v4558_v3  ;;  %v2452_v20 = vand.u32 2147483647, %v2324_v23 }
 0x27d   : > { %2997 = vmatpush1.bf16.msra.mxu1 %v2904_v11  ;;  %v6415_v42 = vmax.f32 %v2585_v57, 0.0  ;;  %v2837_v13 = vmul.f32 %v6407_v34, %v7747_v50  ;;  %v2331_v10 = vsub.f32 %v4750_v2, %v4552_v62  ;;  %v2582_v49 = vsub.f32 1.0, %v2454_v27 }
 0x27e   : > { %v2907_v51 = vpack.c.bf16 %v2839_v44, %v2835_v7  ;;  %v6421_v19 = vmax.f32 %v2578_v6, 0.0  ;;  %v2456_v17 = vand.u32 2147483647, %v2328_v53  ;;  %v2580_v31 = vsub.f32 1.0, %v2452_v20 }
 0x27f   : > { %v2841_v40 = vmul.f32 %v6415_v42, %v7748_v41  ;;  %v2335_v29 = vsub.f32 %v5635_v55, %v4552_v62  ;;  %v2459_v11 = vand.u32 2147483647, %v2331_v10  ;;  %v6427_v57 = vmax.f32 %v2582_v49, 0.0 }
 0x280   : > { %2955 = vmatprep.subr.bf16.mxu0 %v2907_v51  ;;  %v2834_v23 = vmul.f32 %v6421_v19, %v5659_v14  ;;  %v2584_v50 = vsub.f32 1.0, %v2456_v17  ;;  %v2333_v7 = vsub.f32 %v4750_v2, %v4554_v63  ;;  %v6433_v27 = vmax.f32 %v2580_v31, 0.0 }
 0x281   : > { %v2909_v44 = vpack.c.bf16 %v2841_v40, %v2837_v13  ;;  %v2463_v6 = vand.u32 2147483647, %v2335_v29  ;;  %v2587_v53 = vsub.f32 1.0, %v2459_v11  ;;  %v2838_v20 = vmul.f32 %v6427_v57, %v5661_v38 }
 0x282   : > { %v6437_v62 = vmax.f32 %v2584_v50, 0.0  ;;  %v2337_v10 = vsub.f32 %v5635_v55, %v4554_v63  ;;  %v2461_v51 = vand.u32 2147483647, %v2333_v7  ;;  %v2836_v14 = vmul.f32 %v6433_v27, %v5671_v18 }
 0x283   : > { %2998 = vmatprep.subr.bf16.mxu1 %v2909_v44  ;;  %v2591_v49 = vsub.f32 1.0, %v2463_v6  ;;  %v6443_v17 = vmax.f32 %v2587_v53, 0.0  ;;  %v2330_v31 = vsub.f32 %v4750_v2, %v4550_v61  ;;  %v2906_v13 = vpack.c.bf16 %v2838_v20, %v2834_v23 }
 0x284   : > { %v2840_v38 = vmul.f32 %v6437_v62, %v5673_v48  ;;  %v2465_v41 = vand.u32 2147483647, %v2337_v10  ;;  %v2589_v40 = vsub.f32 1.0, %v2461_v51  ;;  %v2334_v18 = vsub.f32 %v5635_v55, %v4550_v61  ;;  %v7749_v51 = vld [vmem:[#allocation8_spill] sm:$0xff] }
 0x285   : > { %v6449_v29 = vmax.f32 %v2591_v49, 0.0  ;;  %v2843_v63 = vmul.f32 %v6443_v17, %v5687_v5  ;;  %v2458_v11 = vand.u32 2147483647, %v2330_v31  ;;  %2956 = vmatpush1.bf16.msra.mxu0 %v2906_v13  ;;  %v2332_v23 = vsub.f32 %v4750_v2, %v4558_v3 }
 0x286   : > { %v2908_v50 = vpack.c.bf16 %v2840_v38, %v2836_v14  ;;  %v2593_v7 = vsub.f32 1.0, %v2465_v41  ;;  %v6455_v44 = vmax.f32 %v2589_v40, 0.0  ;;  %v2462_v6 = vand.u32 2147483647, %v2334_v18  ;;  %v7751_v41 = vld [vmem:[#allocation9_spill] sm:$0xff]  ;;  %v7752_v18 = vld [vmem:[#allocation11_spill] sm:$0xff] }
 0x287   : > { %v2847_v48 = vmul.f32 %v6449_v29, %v5691_v45  ;;  %v2586_v53 = vsub.f32 1.0, %v2458_v11  ;;  %v2336_v5 = vsub.f32 %v5635_v55, %v4558_v3  ;;  %v2460_v10 = vand.u32 2147483647, %v2332_v23  ;;  %v7750_v3 = vld [vmem:[#allocation10_spill] sm:$0xff]  ;;  %v7754_v23 = vld [vmem:[#allocation12_spill] sm:$0xff] }
 0x288   : > { %2999 = vmatpush1.bf16.msra.mxu1 %v2908_v50  ;;  %v6463_v20 = vmax.f32 %v2593_v7, 0.0  ;;  %v2845_v61 = vmul.f32 %v6455_v44, %v5697_v60  ;;  %v3494_v14 = vmul.f32 %v5733_v28, %v7749_v51  ;;  %v2590_v2 = vsub.f32 1.0, %v2462_v6  ;;  %v7760_v51 = vld [vmem:[#allocation16_spill] sm:$0xff] }
 0x289   : > { %v2911_v49 = vpack.c.bf16 %v2847_v48, %v2843_v63  ;;  %v6469_v31 = vmax.f32 %v2586_v53, 0.0  ;;  %v2464_v45 = vand.u32 2147483647, %v2336_v5  ;;  %v2588_v38 = vsub.f32 1.0, %v2460_v10  ;;  %v7755_v48 = vld [vmem:[#allocation13_spill] sm:$0xff]  ;;  %v7757_v5 = vld [vmem:[#allocation14_spill] sm:$0xff] }
 0x28a   : > { %v2849_v13 = vmul.f32 %v6463_v20, %v5703_v58  ;;  %v3498_v55 = vmul.f32 %v5744_v1, %v7750_v3  ;;  %v3496_v40 = vmul.f32 %v5754_v24, %v7751_v41  ;;  %v6477_v60 = vmax.f32 %v2590_v2, 0.0  ;;  %v7758_v10 = vld [vmem:[#allocation15_spill] sm:$0xff] }
 0x28b   : > { %2957 = vmatprep.subr.bf16.mxu0 %v2911_v49  ;;  %v2842_v28 = vmul.f32 %v6469_v31, %v5717_v33  ;;  %v2592_v63 = vsub.f32 1.0, %v2464_v45  ;;  %v3500_v11 = vmul.f32 %v5760_v43, %v7752_v18  ;;  %v6483_v7 = vmax.f32 %v2588_v38, 0.0  ;;  %v7762_v45 = vld [vmem:[#allocation7_spill] sm:$0xff] }
 0x28c   : > { %v2913_v50 = vpack.c.bf16 %v2849_v13, %v2845_v61  ;;  %v3622_v58 = vpack.c.bf16 %v3498_v55, %v3494_v14  ;;  %v3621_v1 = vpack.c.bf16 %v7755_v48, %v7754_v23  ;;  %v2846_v24 = vmul.f32 %v6477_v60, %v5719_v15  ;;  %v7759_v61 = vld [vmem:[#allocation6_spill] sm:$0xff]  ;;  %v7761_v14 = vld [vmem:[#allocation17_spill] sm:$0xff]  ;;  %v4242_v3 = vld [vmem:[%s7057_s2 + $0x10] ss:$8 sps:$4 sm:$0xff]  }
 0x28d   : > { %7753 = vst [vmem:[#allocation124_spill] sm:$0xff] %v6483_v7  ;;  %v6489_v6 = vmax.f32 %v2592_v63, 0.0  ;;  %v3624_v53 = vpack.c.bf16 %v3500_v11, %v3496_v40  ;;  %v3623_v33 = vpack.c.bf16 %v7758_v10, %v7757_v5  ;;  %v2844_v43 = vmul.f32 %v6483_v7, %v5727_v54  ;;  %v7763_v55 = vld [vmem:[#allocation5_spill] sm:$0xff] }
 0x28e   : > { %3000 = vmatprep.subr.bf16.mxu1 %v2913_v50  ;;  %v3014_v49 = vsub.f32 %v7760_v51, %v7759_v61  ;;  %v3018_v2 = vsub.f32 %v7761_v14, %v7759_v61  ;;  %v3016_v13 = vsub.f32 %v7760_v51, %v7762_v45  ;;  %v2910_v15 = vpack.c.bf16 %v2846_v24, %v2842_v28 }
 0x28f   : > { %7756 = vst [vmem:[#allocation122_spill] sm:$0xff] %v6489_v6  ;;  %v2848_v38 = vmul.f32 %v6489_v6, %v5729_v30  ;;  %v3020_v54 = vsub.f32 %v7761_v14, %v7762_v45  ;;  %v3013_v41 = vsub.f32 %v7760_v51, %v7763_v55  ;;  %v3017_v11 = vsub.f32 %v7761_v14, %v7763_v55 }
 0x290   : > { %v3134_v40 = vand.u32 2147483647, %v3014_v49  ;;  %v3138_v63 = vand.u32 2147483647, %v3018_v2  ;;  %v3136_v18 = vand.u32 2147483647, %v3016_v13  ;;  %2958 = vmatpush1.bf16.msra.mxu0 %v2910_v15  ;;  %v3015_v23 = vsub.f32 %v7760_v51, %v4556_v0 }
 0x291   : > { %v2912_v28 = vpack.c.bf16 %v2848_v38, %v2844_v43  ;;  %v3140_v50 = vand.u32 2147483647, %v3020_v54  ;;  %v3133_v30 = vand.u32 2147483647, %v3013_v41  ;;  %3698 = vmatprep.subr.bf16.mxu0 %v3622_v58  ;;  %v3137_v10 = vand.u32 2147483647, %v3017_v11 }
 0x292   : > { %v3254_v48 = vsub.f32 1.0, %v3134_v40  ;;  %v3258_v24 = vsub.f32 1.0, %v3138_v63  ;;  %v3256_v5 = vsub.f32 1.0, %v3136_v18  ;;  %v3019_v2 = vsub.f32 %v7761_v14, %v4556_v0 }
 0x293   : > { %3001 = vmatpush1.bf16.msra.mxu1 %v2912_v28  ;;  %v3260_v6 = vsub.f32 1.0, %v3140_v50  ;;  %v3253_v49 = vsub.f32 1.0, %v3133_v30  ;;  %v3135_v13 = vand.u32 2147483647, %v3015_v23  ;;  %2960 = vmatmul.mubr.bf16.vlgmr.msra.gmra.mrb[16].mxu0 %v4242_v3  ;;  %v3257_v54 = vsub.f32 1.0, %v3137_v10  ;;  %v7764_v23 = vld [vmem:[#allocation23_spill] sm:$0xff] }
 0x294   : > { %3741 = vmatprep.subr.bf16.mxu1 %v3624_v53  ;;  %v3374_v43 = vmax.f32 %v3254_v48, 0.0  ;;  %v3378_v15 = vmax.f32 %v3258_v24, 0.0  ;;  %v3376_v38 = vmax.f32 %v3256_v5, 0.0  ;;  %3699 = vmatpush1.bf16.msra.mxu0 %v3621_v1  ;;  %v3139_v41 = vand.u32 2147483647, %v3019_v2 }
 0x295   : > { %v3380_v51 = vmax.f32 %v3260_v6, 0.0  ;;  %v3373_v58 = vmax.f32 %v3253_v49, 0.0  ;;  %v3255_v40 = vsub.f32 1.0, %v3135_v13  ;;  %v3377_v14 = vmax.f32 %v3257_v54, 0.0 }
 0x296   : > { %3003 = vmatmul.mubr.bf16.vlgmr.msra.gmra.mrb[16].mxu1 %v4242_v3  ;;  %v3502_v63 = vmul.f32 %v3374_v43, %v5776_v37  ;;  %v3506_v18 = vmul.f32 %v3378_v15, %v5778_v59  ;;  %v3504_v11 = vmul.f32 %v3376_v38, %v5782_v39  ;;  %v3259_v50 = vsub.f32 1.0, %v3139_v41  ;;  %v7765_v37 = vld [vmem:[#allocation26_spill] sm:$0xff] }
 0x297   : > { %3742 = vmatpush1.bf16.msra.mxu1 %v3623_v33  ;;  %v3508_v53 = vmul.f32 %v3380_v51, %v5784_v56  ;;  %v3501_v28 = vmul.f32 %v3373_v58, %v5794_v8  ;;  %v3375_v30 = vmax.f32 %v3255_v40, 0.0  ;;  %v3505_v6 = vmul.f32 %v3377_v14, %v5796_v35 }
 0x298   : > { %v3626_v1 = vpack.c.bf16 %v3506_v18, %v3502_v63  ;;  %v3022_v3 = vsub.f32 %v7764_v23, %v7759_v61  ;;  %v3026_v48 = vsub.f32 %v7765_v37, %v7759_v61  ;;  %v3379_v24 = vmax.f32 %v3259_v50, 0.0  ;;  %v7766_v50 = vld [vmem:[#allocation19_spill] sm:$0xff] }
 0x299   : > { %v3628_v59 = vpack.c.bf16 %v3508_v53, %v3504_v11  ;;  %v3503_v39 = vmul.f32 %v3375_v30, %v5802_v4  ;;  %v3024_v56 = vsub.f32 %v7764_v23, %v7762_v45  ;;  %v3625_v8 = vpack.c.bf16 %v3505_v6, %v3501_v28 }
 0x29a   : > { %3700 = vmatprep.subr.bf16.mxu0 %v3626_v1  ;;  %v3142_v33 = vand.u32 2147483647, %v3022_v3  ;;  %v3146_v5 = vand.u32 2147483647, %v3026_v48  ;;  %v3028_v35 = vsub.f32 %v7765_v37, %v7762_v45  ;;  %v3507_v10 = vmul.f32 %v3379_v24, %v5808_v26  ;;  %v7767_v1 = vld [vmem:[#allocation20_spill] sm:$0xff]  ;;  %v7768_v48 = vld [vmem:[#allocation22_spill] sm:$0xff] }
 0x29b   : > { %3743 = vmatprep.subr.bf16.mxu1 %v3628_v59  ;;  %v3144_v49 = vand.u32 2147483647, %v3024_v56  ;;  %v3021_v2 = vsub.f32 %v7764_v23, %v7763_v55  ;;  %v3025_v4 = vsub.f32 %v7765_v37, %v7763_v55  ;;  %3701 = vmatpush1.bf16.msra.mxu0 %v3625_v8  ;;  %v3023_v38 = vsub.f32 %v7764_v23, %v4556_v0 }
 0x29c   : > { %v3262_v13 = vsub.f32 1.0, %v3142_v33  ;;  %v3266_v43 = vsub.f32 1.0, %v3146_v5  ;;  %v3148_v15 = vand.u32 2147483647, %v3028_v35  ;;  %v3627_v54 = vpack.c.bf16 %v3507_v10, %v3503_v39  ;;  %v7769_v33 = vld [vmem:[#allocation18_spill] sm:$0xff] }
 0x29d   : > { %v3264_v51 = vsub.f32 1.0, %v3144_v49  ;;  %v3141_v58 = vand.u32 2147483647, %v3021_v2  ;;  %v3145_v41 = vand.u32 2147483647, %v3025_v4  ;;  %v3027_v18 = vsub.f32 %v7765_v37, %v4556_v0  ;;  %v7770_v35 = vld [vmem:[#allocation34_spill] sm:$0xff] }
 0x29e   : > { %v3382_v40 = vmax.f32 %v3262_v13, 0.0  ;;  %v3386_v26 = vmax.f32 %v3266_v43, 0.0  ;;  %v3268_v63 = vsub.f32 1.0, %v3148_v15  ;;  %3744 = vmatpush1.bf16.msra.mxu1 %v3627_v54  ;;  %v3143_v28 = vand.u32 2147483647, %v3023_v38  ;;  %v7771_v49 = vld [vmem:[#allocation24_spill] sm:$0xff] }
 0x29f   : > { %v3384_v11 = vmax.f32 %v3264_v51, 0.0  ;;  %v3261_v14 = vsub.f32 1.0, %v3141_v58  ;;  %v3265_v53 = vsub.f32 1.0, %v3145_v41  ;;  %v3147_v3 = vand.u32 2147483647, %v3027_v18  ;;  %v7772_v4 = vld [vmem:[#allocation21_spill] sm:$0xff] }
 0x2a0   : > { %v3510_v30 = vmul.f32 %v3382_v40, %v7766_v50  ;;  %v3514_v6 = vmul.f32 %v3386_v26, %v7767_v1  ;;  %v3388_v23 = vmax.f32 %v3268_v63, 0.0  ;;  %v3263_v56 = vsub.f32 1.0, %v3143_v28  ;;  %v7773_v15 = vld [vmem:[#allocation37_spill] sm:$0xff] }
 0x2a1   : > { %v3512_v59 = vmul.f32 %v3384_v11, %v7768_v48  ;;  %v3381_v24 = vmax.f32 %v3261_v14, 0.0  ;;  %v3385_v39 = vmax.f32 %v3265_v53, 0.0  ;;  %v3267_v37 = vsub.f32 1.0, %v3147_v3  ;;  %v7774_v26 = vld [vmem:[#allocation25_spill] sm:$0xff]  ;;  %v7775_v14 = vld [vmem:[#allocation27_spill] sm:$0xff] }
 0x2a2   : > { %v3630_v8 = vpack.c.bf16 %v3514_v6, %v3510_v30  ;;  %v3516_v5 = vmul.f32 %v3388_v23, %v7769_v33  ;;  %v3030_v10 = vsub.f32 %v7770_v35, %v7759_v61  ;;  %v3383_v43 = vmax.f32 %v3263_v56, 0.0 }
 0x2a3   : > { %v3509_v2 = vmul.f32 %v3381_v24, %v7771_v49  ;;  %v3513_v13 = vmul.f32 %v3385_v39, %v7772_v4  ;;  %v3034_v38 = vsub.f32 %v7773_v15, %v7759_v61  ;;  %v3387_v51 = vmax.f32 %v3267_v37, 0.0  ;;  %v7776_v37 = vld [vmem:[#allocation28_spill] sm:$0xff] }
 0x2a4   : > { %3702 = vmatprep.subr.bf16.mxu0 %v3630_v8  ;;  %v3632_v54 = vpack.c.bf16 %v3516_v5, %v3512_v59  ;;  %v3150_v58 = vand.u32 2147483647, %v3030_v10  ;;  %v3032_v41 = vsub.f32 %v7770_v35, %v7762_v45  ;;  %v3511_v63 = vmul.f32 %v3383_v43, %v7774_v26 }
 0x2a5   : > { %v3629_v40 = vpack.c.bf16 %v3513_v13, %v3509_v2  ;;  %v3154_v18 = vand.u32 2147483647, %v3034_v38  ;;  %v3036_v11 = vsub.f32 %v7773_v15, %v7762_v45  ;;  %v3515_v53 = vmul.f32 %v3387_v51, %v7775_v14  ;;  %v7777_v13 = vld [vmem:[#allocation29_spill] sm:$0xff]  ;;  %v7779_v14 = vld [vmem:[#allocation30_spill] sm:$0xff] }
 0x2a6   : > { %3745 = vmatprep.subr.bf16.mxu1 %v3632_v54  ;;  %v3270_v28 = vsub.f32 1.0, %v3150_v58  ;;  %v3152_v50 = vand.u32 2147483647, %v3032_v41  ;;  %v3029_v30 = vsub.f32 %v7770_v35, %v7763_v55  ;;  %v3033_v23 = vsub.f32 %v7773_v15, %v7763_v55 }
 0x2a7   : > { %3703 = vmatpush1.bf16.msra.mxu0 %v3629_v40  ;;  %v3274_v1 = vsub.f32 1.0, %v3154_v18  ;;  %v3156_v6 = vand.u32 2147483647, %v3036_v11  ;;  %v3031_v3 = vsub.f32 %v7770_v35, %v4556_v0  ;;  %v3631_v48 = vpack.c.bf16 %v3515_v53, %v3511_v63  ;;  %v7778_v40 = vld [vmem:[#allocation46_spill] sm:$0xff] }
 0x2a8   : > { %v3390_v59 = vmax.f32 %v3270_v28, 0.0  ;;  %v3272_v24 = vsub.f32 1.0, %v3152_v50  ;;  %v3149_v39 = vand.u32 2147483647, %v3029_v30  ;;  %v3153_v33 = vand.u32 2147483647, %v3033_v23 }
 0x2a9   : > { %v3394_v56 = vmax.f32 %v3274_v1, 0.0  ;;  %v3276_v8 = vsub.f32 1.0, %v3156_v6  ;;  %v3035_v5 = vsub.f32 %v7773_v15, %v4556_v0  ;;  %3746 = vmatpush1.bf16.msra.mxu1 %v3631_v48  ;;  %v3151_v4 = vand.u32 2147483647, %v3031_v3  ;;  %v7780_v50 = vld [vmem:[#allocation49_spill] sm:$0xff] }
 0x2aa   : > { %v3518_v10 = vmul.f32 %v3390_v59, %v7776_v37  ;;  %v3392_v49 = vmax.f32 %v3272_v24, 0.0  ;;  %v3269_v2 = vsub.f32 1.0, %v3149_v39  ;;  %v3273_v35 = vsub.f32 1.0, %v3153_v33  ;;  %v7782_v59 = vld [vmem:[#allocation33_spill] sm:$0xff]  ;;  %v7783_v33 = vld [vmem:[#allocation35_spill] sm:$0xff] }
 0x2ab   : > { %v3522_v43 = vmul.f32 %v3394_v56, %v7777_v13  ;;  %v3396_v38 = vmax.f32 %v3276_v8, 0.0  ;;  %v3155_v54 = vand.u32 2147483647, %v3035_v5  ;;  %v3271_v41 = vsub.f32 1.0, %v3151_v4 }
 0x2ac   : > { %v3520_v51 = vmul.f32 %v3392_v49, %v5878_v25  ;;  %v3389_v58 = vmax.f32 %v3269_v2, 0.0  ;;  %v3038_v26 = vsub.f32 %v7778_v40, %v7759_v61  ;;  %v3393_v18 = vmax.f32 %v3273_v35, 0.0  ;;  %v7781_v25 = vld [vmem:[#allocation32_spill] sm:$0xff] }
 0x2ad   : > { %v3634_v63 = vpack.c.bf16 %v3522_v43, %v3518_v10  ;;  %v3524_v15 = vmul.f32 %v3396_v38, %v5880_v46  ;;  %v3275_v11 = vsub.f32 1.0, %v3155_v54  ;;  %v3391_v28 = vmax.f32 %v3271_v41, 0.0 }
 0x2ae   : > { %v3517_v53 = vmul.f32 %v3389_v58, %v7779_v14  ;;  %v3042_v30 = vsub.f32 %v7780_v50, %v7759_v61  ;;  %v3158_v1 = vand.u32 2147483647, %v3038_v26  ;;  %v3521_v23 = vmul.f32 %v3393_v18, %v7781_v25  ;;  %v7784_v14 = vld [vmem:[#allocation31_spill] sm:$0xff] }
 0x2af   : > { %3704 = vmatprep.subr.bf16.mxu0 %v3634_v63  ;;  %v3636_v6 = vpack.c.bf16 %v3524_v15, %v3520_v51  ;;  %v3395_v3 = vmax.f32 %v3275_v11, 0.0  ;;  %v3040_v48 = vsub.f32 %v7778_v40, %v7762_v45  ;;  %v3519_v24 = vmul.f32 %v3391_v28, %v7782_v59  ;;  %v7787_v59 = vld [vmem:[#allocation38_spill] sm:$0xff] }
 0x2b0   : > { %v3162_v46 = vand.u32 2147483647, %v3042_v30  ;;  %v3278_v39 = vsub.f32 1.0, %v3158_v1  ;;  %v3044_v56 = vsub.f32 %v7780_v50, %v7762_v45  ;;  %v3633_v8 = vpack.c.bf16 %v3521_v23, %v3517_v53  ;;  %v7785_v1 = vld [vmem:[#allocation57_spill] sm:$0xff] }
 0x2b1   : > { %3747 = vmatprep.subr.bf16.mxu1 %v3636_v6  ;;  %v3523_v5 = vmul.f32 %v3395_v3, %v7783_v33  ;;  %v3160_v37 = vand.u32 2147483647, %v3040_v48  ;;  %v3037_v10 = vsub.f32 %v7778_v40, %v7763_v55  ;;  %v3041_v13 = vsub.f32 %v7780_v50, %v7763_v55 }
 0x2b2   : > { %v3282_v49 = vsub.f32 1.0, %v3162_v46  ;;  %v3398_v2 = vmax.f32 %v3278_v39, 0.0  ;;  %v3164_v4 = vand.u32 2147483647, %v3044_v56  ;;  %3705 = vmatpush1.bf16.msra.mxu0 %v3633_v8  ;;  %v3039_v54 = vsub.f32 %v7778_v40, %v4556_v0  ;;  %v7786_v40 = vld [vmem:[#allocation36_spill] sm:$0xff]  ;;  %v7789_v56 = vld [vmem:[#allocation39_spill] sm:$0xff] }
 0x2b3   : > { %v3635_v43 = vpack.c.bf16 %v3523_v5, %v3519_v24  ;;  %v3280_v38 = vsub.f32 1.0, %v3160_v37  ;;  %v3157_v35 = vand.u32 2147483647, %v3037_v10  ;;  %v3161_v26 = vand.u32 2147483647, %v3041_v13  ;;  %v7788_v39 = vld [vmem:[#allocation60_spill] sm:$0xff] }
 0x2b4   : > { %v3402_v51 = vmax.f32 %v3282_v49, 0.0  ;;  %v3526_v58 = vmul.f32 %v3398_v2, %v5916_v22  ;;  %v3284_v41 = vsub.f32 1.0, %v3164_v4  ;;  %v3043_v18 = vsub.f32 %v7780_v50, %v4556_v0  ;;  %v7790_v49 = vld [vmem:[#allocation41_spill] sm:$0xff] }
 0x2b5   : > { %3748 = vmatpush1.bf16.msra.mxu1 %v3635_v43  ;;  %v3400_v63 = vmax.f32 %v3280_v38, 0.0  ;;  %v3277_v15 = vsub.f32 1.0, %v3157_v35  ;;  %v3159_v11 = vand.u32 2147483647, %v3039_v54  ;;  %v3281_v30 = vsub.f32 1.0, %v3161_v26  ;;  %v7791_v35 = vld [vmem:[#allocation42_spill] sm:$0xff] }
 0x2b6   : > { %v3530_v53 = vmul.f32 %v3402_v51, %v7784_v14  ;;  %v3404_v28 = vmax.f32 %v3284_v41, 0.0  ;;  %v3046_v6 = vsub.f32 %v7785_v1, %v7759_v61  ;;  %v3163_v22 = vand.u32 2147483647, %v3043_v18  ;;  %v4247_v43 = vld [vmem:[%s7057_s2 + $0x24] ss:$8 sps:$4 sm:$0xff]   ;;  %v7792_v18 = vld [vmem:[#allocation40_spill] sm:$0xff] }
 0x2b7   : > { %v3528_v25 = vmul.f32 %v3400_v63, %v7786_v40  ;;  %v3397_v23 = vmax.f32 %v3277_v15, 0.0  ;;  %v3279_v3 = vsub.f32 1.0, %v3159_v11  ;;  %v3401_v46 = vmax.f32 %v3281_v30, 0.0  ;;  %3730 = vmatprep.mubr.bf16.mxu0 %v4247_v43  ;;  %3773 = vmatprep.mubr.bf16.mxu1 %v4247_v43  ;;  %v6611_v30 = vpop.f32.mrb[0].mxu0 }
 0x2b8   : > { %v3638_v48 = vpack.c.bf16 %v3530_v53, %v3526_v58  ;;  %v3532_v24 = vmul.f32 %v3404_v28, %v7787_v59  ;;  %v3050_v50 = vsub.f32 %v7788_v39, %v7759_v61  ;;  %v3283_v33 = vsub.f32 1.0, %v3163_v22 }
 0x2b9   : > { %v3525_v8 = vmul.f32 %v3397_v23, %v7789_v56  ;;  %v3399_v5 = vmax.f32 %v3279_v3, 0.0  ;;  %v3166_v37 = vand.u32 2147483647, %v3046_v6  ;;  %v3529_v2 = vmul.f32 %v3401_v46, %v7790_v49  ;;  %v6613_v6 = vpop.f32.mrb[0].mxu1  ;;  %v6617_v3 = vpop.f32.mrb[1].mxu0 }
 0x2ba   : > { %3706 = vmatprep.subr.bf16.mxu0 %v3638_v48  ;;  %v3640_v10 = vpack.c.bf16 %v3532_v24, %v3528_v25  ;;  %v3170_v4 = vand.u32 2147483647, %v3050_v50  ;;  %v3048_v13 = vsub.f32 %v7785_v1, %v7762_v45  ;;  %v3403_v38 = vmax.f32 %v3283_v33, 0.0  ;;  %v6619_v48 = vpop.f32.mrb[1].mxu1  ;;  %v7793_v24 = vld [vmem:[#allocation43_spill] sm:$0xff] }
 0x2bb   : > { %v3527_v54 = vmul.f32 %v3399_v5, %v7791_v35  ;;  %v3286_v51 = vsub.f32 1.0, %v3166_v37  ;;  %v3052_v58 = vsub.f32 %v7788_v39, %v7762_v45  ;;  %v3637_v41 = vpack.c.bf16 %v3529_v2, %v3525_v8  ;;  %v6622_v8 = vpop.f32.mrb[2].mxu0  ;;  %v6624_v33 = vpop.f32.mrb[2].mxu1  ;;  %v7794_v5 = vld [vmem:[#allocation45_spill] sm:$0xff] }
 0x2bc   : > { %3749 = vmatprep.subr.bf16.mxu1 %v3640_v10  ;;  %v3290_v26 = vsub.f32 1.0, %v3170_v4  ;;  %v3168_v63 = vand.u32 2147483647, %v3048_v13  ;;  %v3045_v15 = vsub.f32 %v7785_v1, %v7763_v55  ;;  %v3531_v11 = vmul.f32 %v3403_v38, %v7792_v18  ;;  %v6629_v2 = vpop.f32.mrb[3].mxu0  ;;  %v6631_v4 = vpop.f32.mrb[3].mxu1  ;;  %v7795_v35 = vld [vmem:[#allocation69_spill] sm:$0xff] }
 0x2bd   : > { %v3406_v14 = vmax.f32 %v3286_v51, 0.0  ;;  %v3172_v53 = vand.u32 2147483647, %v3052_v58  ;;  %v3049_v28 = vsub.f32 %v7788_v39, %v7763_v55  ;;  %3707 = vmatpush1.bf16.msra.mxu0 %v3637_v41  ;;  %v3047_v22 = vsub.f32 %v7785_v1, %v4556_v0  ;;  %v6635_v51 = vpop.f32.mrb[4].mxu0  ;;  %v6637_v58 = vpop.f32.mrb[4].mxu1 }
 0x2be   : > { %v3410_v40 = vmax.f32 %v3290_v26, 0.0  ;;  %v3288_v25 = vsub.f32 1.0, %v3168_v63  ;;  %v3165_v23 = vand.u32 2147483647, %v3045_v15  ;;  %v3639_v59 = vpack.c.bf16 %v3531_v11, %v3527_v54  ;;  %7796 = vst [vmem:[#allocation126_spill] sm:$0xff] %v6635_v51  ;;  %7797 = vst [vmem:[#allocation127_spill] sm:$0xff] %v6637_v58 }
 0x2bf   : > { %v3534_v46 = vmul.f32 %v3406_v14, %v7793_v24  ;;  %v3292_v50 = vsub.f32 1.0, %v3172_v53  ;;  %v3169_v56 = vand.u32 2147483647, %v3049_v28  ;;  %v3051_v1 = vsub.f32 %v7788_v39, %v4556_v0  ;;  %v7798_v26 = vld [vmem:[#allocation44_spill] sm:$0xff]  ;;  %v6640_v18 = vpop.f32.mrb[5].mxu0  ;;  %v6642_v11 = vpop.f32.mrb[5].mxu1 }
 0x2c0   : > { %v3538_v37 = vmul.f32 %v3410_v40, %v7794_v5  ;;  %v3408_v10 = vmax.f32 %v3288_v25, 0.0  ;;  %v3285_v49 = vsub.f32 1.0, %v3165_v23  ;;  %3750 = vmatpush1.bf16.msra.mxu1 %v3639_v59  ;;  %v3167_v38 = vand.u32 2147483647, %v3047_v22  ;;  %7799 = vst [vmem:[#allocation129_spill] sm:$0xff] %v6640_v18  ;;  %7800 = vst [vmem:[#allocation130_spill] sm:$0xff] %v6642_v11 }
 0x2c1   : > { %v3412_v13 = vmax.f32 %v3292_v50, 0.0  ;;  %v3289_v43 = vsub.f32 1.0, %v3169_v56  ;;  %v3054_v54 = vsub.f32 %v7795_v35, %v7759_v61  ;;  %v3171_v39 = vand.u32 2147483647, %v3051_v1  ;;  %v7801_v14 = vld [vmem:[#allocation47_spill] sm:$0xff]  ;;  %v7802_v25 = vld [vmem:[#allocation72_spill] sm:$0xff] }
 0x2c2   : > { %v3642_v41 = vpack.c.bf16 %v3538_v37, %v3534_v46  ;;  %v3536_v63 = vmul.f32 %v3408_v10, %v7798_v26  ;;  %v3405_v15 = vmax.f32 %v3285_v49, 0.0  ;;  %v3287_v40 = vsub.f32 1.0, %v3167_v38  ;;  %v6647_v22 = vpop.f32.mrb[6].mxu0  ;;  %v6649_v59 = vpop.f32.mrb[6].mxu1  ;;  %v7805_v24 = vld [vmem:[#allocation48_spill] sm:$0xff]  ;;  %v7808_v1 = vld [vmem:[#allocation50_spill] sm:$0xff] }
 0x2c3   : > { %v3540_v53 = vmul.f32 %v3412_v13, %v7801_v14  ;;  %v3409_v28 = vmax.f32 %v3289_v43, 0.0  ;;  %v3058_v23 = vsub.f32 %v7802_v25, %v7759_v61  ;;  %7803 = vst [vmem:[#allocation132_spill] sm:$0xff] %v6647_v22  ;;  %7804 = vst [vmem:[#allocation133_spill] sm:$0xff] %v6649_v59  ;;  %v3291_v50 = vsub.f32 1.0, %v3171_v39  ;;  %v6654_v37 = vpop.f32.mrb[7].mxu0  ;;  %v6656_v10 = vpop.f32.mrb[7].mxu1 }
 0x2c4   : > { %3708 = vmatprep.subr.bf16.mxu0 %v3642_v41  ;;  %v3533_v46 = vmul.f32 %v3405_v15, %v7805_v24  ;;  %v3174_v56 = vand.u32 2147483647, %v3054_v54  ;;  %v3056_v5 = vsub.f32 %v7795_v35, %v7762_v45  ;;  %7806 = vst [vmem:[#allocation134_spill] sm:$0xff] %v6654_v37  ;;  %7807 = vst [vmem:[#allocation131_spill] sm:$0xff] %v6656_v10  ;;  %v3407_v43 = vmax.f32 %v3287_v40, 0.0  ;;  %v6659_v26 = vpop.f32.mrb[8].mxu0 }
 0x2c5   : > { %v3644_v49 = vpack.c.bf16 %v3540_v53, %v3536_v63  ;;  %v3537_v13 = vmul.f32 %v3409_v28, %v7808_v1  ;;  %v3178_v38 = vand.u32 2147483647, %v3058_v23  ;;  %7809 = vst [vmem:[#allocation136_spill] sm:$0xff] %v6659_v26  ;;  %v6661_v14 = vpop.f32.mrb[8].mxu1  ;;  %v3411_v41 = vmax.f32 %v3291_v50, 0.0  ;;  %v6665_v24 = vpop.f32.mrb[9].mxu0 }
 0x2c6   : > { %7810 = vst [vmem:[#allocation135_spill] sm:$0xff] %v6661_v14  ;;  %v3294_v15 = vsub.f32 1.0, %v3174_v56  ;;  %v3060_v54 = vsub.f32 %v7802_v25, %v7762_v45  ;;  %v3176_v39 = vand.u32 2147483647, %v3056_v5  ;;  %7811 = vst [vmem:[#allocation137_spill] sm:$0xff] %v6665_v24  ;;  %v6667_v59 = vpop.f32.mrb[9].mxu1  ;;  %v3053_v23 = vsub.f32 %v7795_v35, %v7763_v55 }
 0x2c7   : > { %7812 = vst [vmem:[#allocation138_spill] sm:$0xff] %v6667_v59  ;;  %3751 = vmatprep.subr.bf16.mxu1 %v3644_v49  ;;  %v3641_v63 = vpack.c.bf16 %v3537_v13, %v3533_v46  ;;  %v7813_v53 = vld [vmem:[#allocation51_spill] sm:$0xff]  ;;  %v3298_v40 = vsub.f32 1.0, %v3178_v38  ;;  %v6672_v1 = vpop.f32.mrb[10].mxu0  ;;  %v6674_v50 = vpop.f32.mrb[10].mxu1  ;;  %v3539_v56 = vmul.f32 %v3411_v41, %v6005_v21  ;;  %v3057_v49 = vsub.f32 %v7802_v25, %v7763_v55 }
 0x2c8   : > { %v3535_v28 = vmul.f32 %v3407_v43, %v7813_v53  ;;  %7814 = vst [vmem:[#allocation141_spill] sm:$0xff] %v6672_v1  ;;  %7815 = vst [vmem:[#allocation142_spill] sm:$0xff] %v6674_v50  ;;  %v3414_v14 = vmax.f32 %v3294_v15, 0.0  ;;  %v3180_v5 = vand.u32 2147483647, %v3060_v54  ;;  %v3296_v26 = vsub.f32 1.0, %v3176_v39 }
 0x2c9   : > { %v6677_v24 = vpop.f32.mrb[11].mxu0  ;;  %v6679_v59 = vpop.f32.mrb[11].mxu1  ;;  %3709 = vmatpush1.bf16.msra.mxu0 %v3641_v63  ;;  %v3418_v46 = vmax.f32 %v3298_v40, 0.0  ;;  %v3173_v13 = vand.u32 2147483647, %v3053_v23  ;;  %v3055_v43 = vsub.f32 %v7795_v35, %v4556_v0  ;;  %v7818_v40 = vld [vmem:[#allocation52_spill] sm:$0xff]  ;;  %v3059_v35 = vsub.f32 %v7802_v25, %v4556_v0 }
 0x2ca   : > { %7816 = vst [vmem:[#allocation143_spill] sm:$0xff] %v6677_v24  ;;  %7817 = vst [vmem:[#allocation144_spill] sm:$0xff] %v6679_v59  ;;  %v6685_v38 = vpop.f32.mrb[12].mxu0  ;;  %v6687_v53 = vpop.f32.mrb[12].mxu1  ;;  %v3643_v21 = vpack.c.bf16 %v3539_v56, %v3535_v28  ;;  %v3542_v41 = vmul.f32 %v3414_v14, %v6011_v52  ;;  %v3300_v15 = vsub.f32 1.0, %v3180_v5  ;;  %v3416_v54 = vmax.f32 %v3296_v26, 0.0 }
 0x2cb   : > { %v6690_v39 = vpop.f32.mrb[13].mxu0  ;;  %v6692_v63 = vpop.f32.mrb[13].mxu1  ;;  %v3546_v59 = vmul.f32 %v3418_v46, %v7818_v40  ;;  %v3177_v50 = vand.u32 2147483647, %v3057_v49  ;;  %v3293_v23 = vsub.f32 1.0, %v3173_v13  ;;  %v7819_v52 = vld [vmem:[#allocation53_spill] sm:$0xff] }
 0x2cc   : > { %v6697_v24 = vpop.f32.mrb[14].mxu0  ;;  %v6699_v1 = vpop.f32.mrb[14].mxu1  ;;  %3752 = vmatpush1.bf16.msra.mxu1 %v3643_v21  ;;  %v3420_v28 = vmax.f32 %v3300_v15, 0.0  ;;  %v3544_v14 = vmul.f32 %v3416_v54, %v7819_v52  ;;  %v3175_v26 = vand.u32 2147483647, %v3055_v43  ;;  %v7820_v56 = vld [vmem:[#allocation79_spill] sm:$0xff] }
 0x2cd   : > { %v3062_v5 = vsub.f32 %v7820_v56, %v7759_v61  ;;  %v6704_v10 = vpop.f32.mrb[15].mxu0  ;;  %v6706_v46 = vpop.f32.mrb[15].mxu1  ;;  %v3646_v49 = vpack.c.bf16 %v3546_v59, %v3542_v41  ;;  %v3297_v13 = vsub.f32 1.0, %v3177_v50  ;;  %v3413_v40 = vmax.f32 %v3293_v23, 0.0  ;;  %v7821_v37 = vld [vmem:[#allocation55_spill] sm:$0xff]  ;;  %v7822_v21 = vld [vmem:[#allocation82_spill] sm:$0xff] }
 0x2ce   : > { %v3179_v25 = vand.u32 2147483647, %v3059_v35  ;;  %v3548_v11 = vmul.f32 %v3420_v28, %v7821_v37  ;;  %v3295_v22 = vsub.f32 1.0, %v3175_v26  ;;  %v3066_v15 = vsub.f32 %v7822_v21, %v7759_v61  ;;  %v7823_v54 = vld [vmem:[#allocation56_spill] sm:$0xff]  ;;  %v7824_v23 = vld [vmem:[#allocation54_spill] sm:$0xff] }
 0x2cf   : > { %v3182_v58 = vand.u32 2147483647, %v3062_v5  ;;  %3710 = vmatprep.subr.bf16.mxu0 %v3646_v49  ;;  %v3417_v43 = vmax.f32 %v3297_v13, 0.0  ;;  %v3541_v52 = vmul.f32 %v3413_v40, %v7823_v54  ;;  %v3064_v51 = vsub.f32 %v7820_v56, %v7762_v45  ;;  %v7825_v5 = vld [vmem:[#allocation58_spill] sm:$0xff] }
 0x2d0   : > { %v3299_v18 = vsub.f32 1.0, %v3179_v25  ;;  %v3648_v7 = vpack.c.bf16 %v3548_v11, %v3544_v14  ;;  %v3415_v59 = vmax.f32 %v3295_v22, 0.0  ;;  %v3186_v50 = vand.u32 2147483647, %v3066_v15  ;;  %v7826_v11 = vld [vmem:[#allocation59_spill] sm:$0xff] }
 0x2d1   : > { %v3302_v41 = vsub.f32 1.0, %v3182_v58  ;;  %v3545_v35 = vmul.f32 %v3417_v43, %v7824_v23  ;;  %v3068_v28 = vsub.f32 %v7822_v21, %v7762_v45  ;;  %v3184_v26 = vand.u32 2147483647, %v3064_v51  ;;  %v7827_v43 = vld [vmem:[#allocation61_spill] sm:$0xff] }
 0x2d2   : > { %v3419_v37 = vmax.f32 %v3299_v18, 0.0  ;;  %3753 = vmatprep.subr.bf16.mxu1 %v3648_v7  ;;  %v3543_v49 = vmul.f32 %v3415_v59, %v7825_v5  ;;  %v3306_v13 = vsub.f32 1.0, %v3186_v50  ;;  %v3061_v25 = vsub.f32 %v7820_v56, %v7763_v55  ;;  %v7828_v5 = vld [vmem:[#allocation62_spill] sm:$0xff] }
 0x2d3   : > { %v3422_v40 = vmax.f32 %v3302_v41, 0.0  ;;  %v3645_v54 = vpack.c.bf16 %v3545_v35, %v3541_v52  ;;  %v3188_v14 = vand.u32 2147483647, %v3068_v28  ;;  %v3304_v58 = vsub.f32 1.0, %v3184_v26 }
 0x2d4   : > { %v3547_v22 = vmul.f32 %v3419_v37, %v7826_v11  ;;  %v3426_v15 = vmax.f32 %v3306_v13, 0.0  ;;  %v3065_v23 = vsub.f32 %v7822_v21, %v7763_v55  ;;  %v3181_v51 = vand.u32 2147483647, %v3061_v25  ;;  %v7829_v13 = vld [vmem:[#allocation64_spill] sm:$0xff]  ;;  %v7830_v25 = vld [vmem:[#allocation91_spill] sm:$0xff] }
 0x2d5   : > { %v3550_v18 = vmul.f32 %v3422_v40, %v7827_v43  ;;  %3711 = vmatpush1.bf16.msra.mxu0 %v3645_v54  ;;  %v3308_v59 = vsub.f32 1.0, %v3188_v14  ;;  %v3424_v50 = vmax.f32 %v3304_v58, 0.0  ;;  %v3063_v41 = vsub.f32 %v7820_v56, %v4556_v0  ;;  %v7831_v56 = vld [vmem:[#allocation65_spill] sm:$0xff] }
 0x2d6   : > { %v3647_v7 = vpack.c.bf16 %v3547_v22, %v3543_v49  ;;  %v3554_v52 = vmul.f32 %v3426_v15, %v7828_v5  ;;  %v3185_v35 = vand.u32 2147483647, %v3065_v23  ;;  %v3301_v37 = vsub.f32 1.0, %v3181_v51  ;;  %v7832_v23 = vld [vmem:[#allocation94_spill] sm:$0xff] }
 0x2d7   : > { %v3067_v28 = vsub.f32 %v7822_v21, %v4556_v0  ;;  %v3428_v26 = vmax.f32 %v3308_v59, 0.0  ;;  %v3552_v40 = vmul.f32 %v3424_v50, %v7829_v13  ;;  %v3183_v11 = vand.u32 2147483647, %v3063_v41 }
 0x2d8   : > { %3754 = vmatpush1.bf16.msra.mxu1 %v3647_v7  ;;  %v3070_v49 = vsub.f32 %v7830_v25, %v7759_v61  ;;  %v3650_v54 = vpack.c.bf16 %v3554_v52, %v3550_v18  ;;  %v3305_v22 = vsub.f32 1.0, %v3185_v35  ;;  %v3421_v14 = vmax.f32 %v3301_v37, 0.0  ;;  %v7833_v7 = vld [vmem:[#allocation66_spill] sm:$0xff]  ;;  %v7834_v37 = vld [vmem:[#allocation63_spill] sm:$0xff] }
 0x2d9   : > { %v3187_v58 = vand.u32 2147483647, %v3067_v28  ;;  %v3556_v43 = vmul.f32 %v3428_v26, %v7831_v56  ;;  %v3303_v15 = vsub.f32 1.0, %v3183_v11  ;;  %v3074_v51 = vsub.f32 %v7832_v23, %v7759_v61 }
 0x2da   : > { %v3190_v5 = vand.u32 2147483647, %v3070_v49  ;;  %3712 = vmatprep.subr.bf16.mxu0 %v3650_v54  ;;  %v3425_v21 = vmax.f32 %v3305_v22, 0.0  ;;  %v3549_v59 = vmul.f32 %v3421_v14, %v7833_v7  ;;  %v3072_v41 = vsub.f32 %v7830_v25, %v7762_v45  ;;  %v7835_v49 = vld [vmem:[#allocation68_spill] sm:$0xff] }
 0x2db   : > { %v3307_v50 = vsub.f32 1.0, %v3187_v58  ;;  %v3652_v13 = vpack.c.bf16 %v3556_v43, %v3552_v40  ;;  %v3423_v18 = vmax.f32 %v3303_v15, 0.0  ;;  %v3194_v52 = vand.u32 2147483647, %v3074_v51 }
 0x2dc   : > { %v3310_v35 = vsub.f32 1.0, %v3190_v5  ;;  %v3553_v28 = vmul.f32 %v3425_v21, %v7834_v37  ;;  %v3076_v11 = vsub.f32 %v7832_v23, %v7762_v45  ;;  %v3192_v56 = vand.u32 2147483647, %v3072_v41  ;;  %v7836_v5 = vld [vmem:[#allocation67_spill] sm:$0xff]  ;;  %v7837_v37 = vld [vmem:[#allocation70_spill] sm:$0xff] }
 0x2dd   : > { %v3427_v26 = vmax.f32 %v3307_v50, 0.0  ;;  %3755 = vmatprep.subr.bf16.mxu1 %v3652_v13  ;;  %v3551_v54 = vmul.f32 %v3423_v18, %v7835_v49  ;;  %v3314_v22 = vsub.f32 1.0, %v3194_v52  ;;  %v3069_v58 = vsub.f32 %v7830_v25, %v7763_v55 }
 0x2de   : > { %v3430_v14 = vmax.f32 %v3310_v35, 0.0  ;;  %v3649_v7 = vpack.c.bf16 %v3553_v28, %v3549_v59  ;;  %v3196_v43 = vand.u32 2147483647, %v3076_v11  ;;  %v3312_v15 = vsub.f32 1.0, %v3192_v56  ;;  %v7838_v56 = vld [vmem:[#allocation71_spill] sm:$0xff] }
 0x2df   : > { %v3555_v40 = vmul.f32 %v3427_v26, %v6101_v16  ;;  %v3434_v51 = vmax.f32 %v3314_v22, 0.0  ;;  %v3073_v50 = vsub.f32 %v7832_v23, %v7763_v55  ;;  %v3189_v41 = vand.u32 2147483647, %v3069_v58 }
 0x2e0   : > { %v3558_v21 = vmul.f32 %v3430_v14, %v7836_v5  ;;  %3713 = vmatpush1.bf16.msra.mxu0 %v3649_v7  ;;  %v3316_v18 = vsub.f32 1.0, %v3196_v43  ;;  %v3432_v52 = vmax.f32 %v3312_v15, 0.0  ;;  %v3071_v35 = vsub.f32 %v7830_v25, %v4556_v0  ;;  %v7839_v14 = vld [vmem:[#allocation102_spill] sm:$0xff]  ;;  %v7840_v25 = vld [vmem:[#allocation73_spill] sm:$0xff] }
 0x2e1   : > { %v3651_v13 = vpack.c.bf16 %v3555_v40, %v3551_v54  ;;  %v3562_v59 = vmul.f32 %v3434_v51, %v7837_v37  ;;  %v3193_v28 = vand.u32 2147483647, %v3073_v50  ;;  %v3309_v16 = vsub.f32 1.0, %v3189_v41  ;;  %v7841_v5 = vld [vmem:[#allocation105_spill] sm:$0xff] }
 0x2e2   : > { %v3075_v26 = vsub.f32 %v7832_v23, %v4556_v0  ;;  %v3436_v11 = vmax.f32 %v3316_v18, 0.0  ;;  %v3560_v49 = vmul.f32 %v3432_v52, %v7838_v56  ;;  %v3191_v22 = vand.u32 2147483647, %v3071_v35 }
 0x2e3   : > { %3756 = vmatpush1.bf16.msra.mxu1 %v3651_v13  ;;  %v3078_v54 = vsub.f32 %v7839_v14, %v7759_v61  ;;  %v3654_v58 = vpack.c.bf16 %v3562_v59, %v3558_v21  ;;  %v3313_v7 = vsub.f32 1.0, %v3193_v28  ;;  %v3429_v40 = vmax.f32 %v3309_v16, 0.0  ;;  %v7842_v13 = vld [vmem:[#allocation74_spill] sm:$0xff]  ;;  %v7843_v16 = vld [vmem:[#allocation75_spill] sm:$0xff] }
 0x2e4   : > { %v3195_v43 = vand.u32 2147483647, %v3075_v26  ;;  %v3564_v15 = vmul.f32 %v3436_v11, %v7840_v25  ;;  %v3311_v51 = vsub.f32 1.0, %v3191_v22  ;;  %v3082_v50 = vsub.f32 %v7841_v5, %v7759_v61 }
 0x2e5   : > { %v3198_v41 = vand.u32 2147483647, %v3078_v54  ;;  %3714 = vmatprep.subr.bf16.mxu0 %v3654_v58  ;;  %v3433_v23 = vmax.f32 %v3313_v7, 0.0  ;;  %v3557_v18 = vmul.f32 %v3429_v40, %v7842_v13  ;;  %v3080_v35 = vsub.f32 %v7839_v14, %v7762_v45  ;;  %v7844_v54 = vld [vmem:[#allocation76_spill] sm:$0xff] }
 0x2e6   : > { %v3315_v52 = vsub.f32 1.0, %v3195_v43  ;;  %v3656_v37 = vpack.c.bf16 %v3564_v15, %v3560_v49  ;;  %v3431_v21 = vmax.f32 %v3311_v51, 0.0  ;;  %v3202_v59 = vand.u32 2147483647, %v3082_v50  ;;  %v7845_v49 = vld [vmem:[#allocation77_spill] sm:$0xff] }
 0x2e7   : > { %v3318_v28 = vsub.f32 1.0, %v3198_v41  ;;  %v3561_v26 = vmul.f32 %v3433_v23, %v7843_v16  ;;  %v3084_v56 = vsub.f32 %v7841_v5, %v7762_v45  ;;  %v3200_v22 = vand.u32 2147483647, %v3080_v35  ;;  %v7846_v23 = vld [vmem:[#allocation78_spill] sm:$0xff]  ;;  %v7847_v16 = vld [vmem:[#allocation80_spill] sm:$0xff] }
 0x2e8   : > { %v3435_v11 = vmax.f32 %v3315_v52, 0.0  ;;  %3757 = vmatprep.subr.bf16.mxu1 %v3656_v37  ;;  %v3559_v58 = vmul.f32 %v3431_v21, %v7844_v54  ;;  %v3322_v7 = vsub.f32 1.0, %v3202_v59  ;;  %v3077_v43 = vsub.f32 %v7839_v14, %v7763_v55  ;;  %v7848_v54 = vld [vmem:[#allocation81_spill] sm:$0xff] }
 0x2e9   : > { %v3438_v40 = vmax.f32 %v3318_v28, 0.0  ;;  %v3653_v25 = vpack.c.bf16 %v3561_v26, %v3557_v18  ;;  %v3204_v51 = vand.u32 2147483647, %v3084_v56  ;;  %v3320_v50 = vsub.f32 1.0, %v3200_v22 }
 0x2ea   : > { %v3563_v15 = vmul.f32 %v3435_v11, %v7845_v49  ;;  %v3442_v41 = vmax.f32 %v3322_v7, 0.0  ;;  %v3081_v52 = vsub.f32 %v7841_v5, %v7763_v55  ;;  %v3197_v35 = vand.u32 2147483647, %v3077_v43  ;;  %v7849_v43 = vld [vmem:[#allocation117_spill] sm:$0xff] }
 0x2eb   : > { %v3566_v13 = vmul.f32 %v3438_v40, %v7846_v23  ;;  %3715 = vmatpush1.bf16.msra.mxu0 %v3653_v25  ;;  %v3324_v21 = vsub.f32 1.0, %v3204_v51  ;;  %v3440_v59 = vmax.f32 %v3320_v50, 0.0  ;;  %v3079_v28 = vsub.f32 %v7839_v14, %v4556_v0  ;;  %v7850_v14 = vld [vmem:[#allocation83_spill] sm:$0xff]  ;;  %v7851_v23 = vld [vmem:[#allocation116_spill] sm:$0xff] }
 0x2ec   : > { %v3655_v37 = vpack.c.bf16 %v3563_v15, %v3559_v58  ;;  %v3570_v18 = vmul.f32 %v3442_v41, %v7847_v16  ;;  %v3201_v26 = vand.u32 2147483647, %v3081_v52  ;;  %v3317_v11 = vsub.f32 1.0, %v3197_v35 }
 0x2ed   : > { %v3083_v56 = vsub.f32 %v7841_v5, %v4556_v0  ;;  %v3444_v22 = vmax.f32 %v3324_v21, 0.0  ;;  %v3568_v7 = vmul.f32 %v3440_v59, %v7848_v54  ;;  %v3199_v40 = vand.u32 2147483647, %v3079_v28 }
 0x2ee   : > { %3758 = vmatpush1.bf16.msra.mxu1 %v3655_v37  ;;  %v3086_v58 = vsub.f32 %v7849_v43, %v7759_v61  ;;  %v3658_v25 = vpack.c.bf16 %v3570_v18, %v3566_v13  ;;  %v3321_v49 = vsub.f32 1.0, %v3201_v26  ;;  %v3437_v15 = vmax.f32 %v3317_v11, 0.0  ;;  %v7852_v37 = vld [vmem:[#allocation84_spill] sm:$0xff]  ;;  %v7853_v11 = vld [vmem:[#allocation86_spill] sm:$0xff] }
 0x2ef   : > { %v3203_v51 = vand.u32 2147483647, %v3083_v56  ;;  %v3572_v50 = vmul.f32 %v3444_v22, %v7850_v14  ;;  %v3319_v41 = vsub.f32 1.0, %v3199_v40  ;;  %v3090_v52 = vsub.f32 %v7851_v23, %v7759_v61 }
 0x2f0   : > { %v3206_v35 = vand.u32 2147483647, %v3086_v58  ;;  %3716 = vmatprep.subr.bf16.mxu0 %v3658_v25  ;;  %v3441_v5 = vmax.f32 %v3321_v49, 0.0  ;;  %v3565_v21 = vmul.f32 %v3437_v15, %v7852_v37  ;;  %v3088_v28 = vsub.f32 %v7849_v43, %v7762_v45  ;;  %v7854_v58 = vld [vmem:[#allocation87_spill] sm:$0xff] }
 0x2f1   : > { %v3323_v59 = vsub.f32 1.0, %v3203_v51  ;;  %v3660_v16 = vpack.c.bf16 %v3572_v50, %v3568_v7  ;;  %v3439_v13 = vmax.f32 %v3319_v41, 0.0  ;;  %v3210_v18 = vand.u32 2147483647, %v3090_v52 }
 0x2f2   : > { %v3326_v26 = vsub.f32 1.0, %v3206_v35  ;;  %v3569_v56 = vmul.f32 %v3441_v5, %v7853_v11  ;;  %v3092_v54 = vsub.f32 %v7851_v23, %v7762_v45  ;;  %v3208_v40 = vand.u32 2147483647, %v3088_v28  ;;  %v7855_v35 = vld [vmem:[#allocation88_spill] sm:$0xff] }
 0x2f3   : > { %v3443_v22 = vmax.f32 %v3323_v59, 0.0  ;;  %3759 = vmatprep.subr.bf16.mxu1 %v3660_v16  ;;  %v3567_v25 = vmul.f32 %v3439_v13, %v7854_v58  ;;  %v3330_v49 = vsub.f32 1.0, %v3210_v18  ;;  %v3085_v51 = vsub.f32 %v7849_v43, %v7763_v55 }
 0x2f4   : > { %v3446_v15 = vmax.f32 %v3326_v26, 0.0  ;;  %v3657_v14 = vpack.c.bf16 %v3569_v56, %v3565_v21  ;;  %v3212_v50 = vand.u32 2147483647, %v3092_v54  ;;  %v3328_v41 = vsub.f32 1.0, %v3208_v40  ;;  %v7856_v26 = vld [vmem:[#allocation85_spill] sm:$0xff]  ;;  %v7857_v54 = vld [vmem:[#allocation90_spill] sm:$0xff] }
 0x2f5   : > { %v3571_v7 = vmul.f32 %v3443_v22, %v6197_v47  ;;  %v3450_v52 = vmax.f32 %v3330_v49, 0.0  ;;  %v3089_v37 = vsub.f32 %v7851_v23, %v7763_v55  ;;  %v3205_v59 = vand.u32 2147483647, %v3085_v51  ;;  %v7858_v49 = vld [vmem:[#allocation125_spill] sm:$0xff] }
 0x2f6   : > { %v3574_v5 = vmul.f32 %v3446_v15, %v7855_v35  ;;  %3717 = vmatpush1.bf16.msra.mxu0 %v3657_v14  ;;  %v3332_v16 = vsub.f32 1.0, %v3212_v50  ;;  %v3448_v13 = vmax.f32 %v3328_v41, 0.0  ;;  %v3087_v18 = vsub.f32 %v7849_v43, %v4556_v0  ;;  %v7859_v43 = vld [vmem:[#allocation89_spill] sm:$0xff] }
 0x2f7   : > { %v3659_v28 = vpack.c.bf16 %v3571_v7, %v3567_v25  ;;  %v3578_v21 = vmul.f32 %v3450_v52, %v7856_v26  ;;  %v3209_v11 = vand.u32 2147483647, %v3089_v37  ;;  %v3325_v47 = vsub.f32 1.0, %v3205_v59  ;;  %v7860_v52 = vld [vmem:[#allocation128_spill] sm:$0xff] }
 0x2f8   : > { %v3091_v56 = vsub.f32 %v7851_v23, %v4556_v0  ;;  %v3452_v22 = vmax.f32 %v3332_v16, 0.0  ;;  %v3576_v40 = vmul.f32 %v3448_v13, %v7857_v54  ;;  %v3207_v58 = vand.u32 2147483647, %v3087_v18  ;;  %v7861_v59 = vld [vmem:[#allocation92_spill] sm:$0xff] }
 0x2f9   : > { %3760 = vmatpush1.bf16.msra.mxu1 %v3659_v28  ;;  %v3094_v25 = vsub.f32 %v7858_v49, %v7759_v61  ;;  %v3662_v15 = vpack.c.bf16 %v3578_v21, %v3574_v5  ;;  %v3329_v51 = vsub.f32 1.0, %v3209_v11  ;;  %v3445_v14 = vmax.f32 %v3325_v47, 0.0  ;;  %v7862_v11 = vld [vmem:[#allocation93_spill] sm:$0xff] }
 0x2fa   : > { %v3211_v7 = vand.u32 2147483647, %v3091_v56  ;;  %v3580_v50 = vmul.f32 %v3452_v22, %v7859_v43  ;;  %v3327_v41 = vsub.f32 1.0, %v3207_v58  ;;  %v3098_v35 = vsub.f32 %v7860_v52, %v7759_v61  ;;  %v7863_v58 = vld [vmem:[#allocation95_spill] sm:$0xff] }
 0x2fb   : > { %v3214_v37 = vand.u32 2147483647, %v3094_v25  ;;  %3718 = vmatprep.subr.bf16.mxu0 %v3662_v15  ;;  %v3449_v23 = vmax.f32 %v3329_v51, 0.0  ;;  %v3573_v28 = vmul.f32 %v3445_v14, %v7861_v59  ;;  %v3096_v13 = vsub.f32 %v7858_v49, %v7762_v45 }
 0x2fc   : > { %v3331_v16 = vsub.f32 1.0, %v3211_v7  ;;  %v3664_v18 = vpack.c.bf16 %v3580_v50, %v3576_v40  ;;  %v3447_v5 = vmax.f32 %v3327_v41, 0.0  ;;  %v3218_v26 = vand.u32 2147483647, %v3098_v35  ;;  %v7864_v40 = vld [vmem:[#allocation96_spill] sm:$0xff] }
 0x2fd   : > { %v3334_v21 = vsub.f32 1.0, %v3214_v37  ;;  %v3577_v47 = vmul.f32 %v3449_v23, %v7862_v11  ;;  %v3100_v22 = vsub.f32 %v7860_v52, %v7762_v45  ;;  %v3216_v54 = vand.u32 2147483647, %v3096_v13  ;;  %v7865_v37 = vld [vmem:[#allocation97_spill] sm:$0xff] }
 0x2fe   : > { %v3451_v56 = vmax.f32 %v3331_v16, 0.0  ;;  %3761 = vmatprep.subr.bf16.mxu1 %v3664_v18  ;;  %v3575_v25 = vmul.f32 %v3447_v5, %v7863_v58  ;;  %v3338_v15 = vsub.f32 1.0, %v3218_v26  ;;  %v3093_v14 = vsub.f32 %v7858_v49, %v7763_v55 }
 0x2ff   : > { %v3454_v51 = vmax.f32 %v3334_v21, 0.0  ;;  %v3661_v7 = vpack.c.bf16 %v3577_v47, %v3573_v28  ;;  %v3220_v50 = vand.u32 2147483647, %v3100_v22  ;;  %v3336_v41 = vsub.f32 1.0, %v3216_v54  ;;  %v7866_v21 = vld [vmem:[#allocation98_spill] sm:$0xff]  ;;  %v7867_v54 = vld [vmem:[#allocation100_spill] sm:$0xff] }
 0x300   : > { %v3579_v43 = vmul.f32 %v3451_v56, %v7864_v40  ;;  %v3458_v35 = vmax.f32 %v3338_v15, 0.0  ;;  %v3097_v59 = vsub.f32 %v7860_v52, %v7763_v55  ;;  %v3213_v16 = vand.u32 2147483647, %v3093_v14 }
 0x301   : > { %v3582_v23 = vmul.f32 %v3454_v51, %v7865_v37  ;;  %3719 = vmatpush1.bf16.msra.mxu0 %v3661_v7  ;;  %v3340_v18 = vsub.f32 1.0, %v3220_v50  ;;  %v3456_v5 = vmax.f32 %v3336_v41, 0.0  ;;  %v3095_v26 = vsub.f32 %v7858_v49, %v4556_v0  ;;  %v7868_v51 = vld [vmem:[#allocation140_spill] sm:$0xff]  ;;  %v7869_v49 = vld [vmem:[#allocation101_spill] sm:$0xff] }
 0x302   : > { %v3663_v13 = vpack.c.bf16 %v3579_v43, %v3575_v25  ;;  %v3586_v28 = vmul.f32 %v3458_v35, %v7866_v21  ;;  %v3217_v11 = vand.u32 2147483647, %v3097_v59  ;;  %v3333_v47 = vsub.f32 1.0, %v3213_v16  ;;  %v7870_v35 = vld [vmem:[#allocation139_spill] sm:$0xff] }
 0x303   : > { %v3099_v56 = vsub.f32 %v7860_v52, %v4556_v0  ;;  %v3460_v22 = vmax.f32 %v3340_v18, 0.0  ;;  %v3584_v58 = vmul.f32 %v3456_v5, %v7867_v54  ;;  %v3215_v15 = vand.u32 2147483647, %v3095_v26  ;;  %v7871_v16 = vld [vmem:[#allocation99_spill] sm:$0xff] }
 0x304   : > { %3762 = vmatpush1.bf16.msra.mxu1 %v3663_v13  ;;  %v3102_v25 = vsub.f32 %v7868_v51, %v7759_v61  ;;  %v3666_v14 = vpack.c.bf16 %v3586_v28, %v3582_v23  ;;  %v3337_v7 = vsub.f32 1.0, %v3217_v11  ;;  %v3453_v40 = vmax.f32 %v3333_v47, 0.0  ;;  %v7872_v11 = vld [vmem:[#allocation103_spill] sm:$0xff] }
 0x305   : > { %v3219_v43 = vand.u32 2147483647, %v3099_v56  ;;  %v3588_v50 = vmul.f32 %v3460_v22, %v7869_v49  ;;  %v3335_v41 = vsub.f32 1.0, %v3215_v15  ;;  %v3106_v37 = vsub.f32 %v7870_v35, %v7759_v61  ;;  %v7873_v15 = vld [vmem:[#allocation104_spill] sm:$0xff] }
 0x306   : > { %v3222_v59 = vand.u32 2147483647, %v3102_v25  ;;  %3720 = vmatprep.subr.bf16.mxu0 %v3666_v14  ;;  %v3457_v52 = vmax.f32 %v3337_v7, 0.0  ;;  %v3581_v13 = vmul.f32 %v3453_v40, %v7871_v16  ;;  %v3104_v5 = vsub.f32 %v7868_v51, %v7762_v45 }
 0x307   : > { %v3339_v18 = vsub.f32 1.0, %v3219_v43  ;;  %v3668_v26 = vpack.c.bf16 %v3588_v50, %v3584_v58  ;;  %v3455_v23 = vmax.f32 %v3335_v41, 0.0  ;;  %v3226_v21 = vand.u32 2147483647, %v3106_v37  ;;  %v7874_v37 = vld [vmem:[#allocation106_spill] sm:$0xff] }
 0x308   : > { %v3342_v28 = vsub.f32 1.0, %v3222_v59  ;;  %v3585_v47 = vmul.f32 %v3457_v52, %v7872_v11  ;;  %v3108_v22 = vsub.f32 %v7870_v35, %v7762_v45  ;;  %v3224_v54 = vand.u32 2147483647, %v3104_v5 }
 0x309   : > { %v3459_v56 = vmax.f32 %v3339_v18, 0.0  ;;  %3763 = vmatprep.subr.bf16.mxu1 %v3668_v26  ;;  %v3583_v25 = vmul.f32 %v3455_v23, %v7873_v15  ;;  %v3346_v14 = vsub.f32 1.0, %v3226_v21  ;;  %v3101_v40 = vsub.f32 %v7868_v51, %v7763_v55  ;;  %v7875_v21 = vld [vmem:[#allocation107_spill] sm:$0xff]  ;;  %v7877_v15 = vld [vmem:[#allocation148_spill] sm:$0xff] }
 0x30a   : > { %v3462_v7 = vmax.f32 %v3342_v28, 0.0  ;;  %v3665_v43 = vpack.c.bf16 %v3585_v47, %v3581_v13  ;;  %v3228_v49 = vand.u32 2147483647, %v3108_v22  ;;  %v3344_v50 = vsub.f32 1.0, %v3224_v54 }
 0x30b   : > { %v3587_v58 = vmul.f32 %v3459_v56, %v6293_v12  ;;  %v3466_v41 = vmax.f32 %v3346_v14, 0.0  ;;  %v3105_v52 = vsub.f32 %v7870_v35, %v7763_v55  ;;  %v3221_v16 = vand.u32 2147483647, %v3101_v40  ;;  %v7876_v56 = vld [vmem:[#allocation109_spill] sm:$0xff] }
 0x30c   : > { %v3590_v59 = vmul.f32 %v3462_v7, %v7874_v37  ;;  %3721 = vmatpush1.bf16.msra.mxu0 %v3665_v43  ;;  %v3348_v5 = vsub.f32 1.0, %v3228_v49  ;;  %v3464_v26 = vmax.f32 %v3344_v50, 0.0  ;;  %v3103_v23 = vsub.f32 %v7868_v51, %v4556_v0  ;;  %v7878_v51 = vld [vmem:[#allocation110_spill] sm:$0xff]  ;;  %v7879_v50 = vld [vmem:[#allocation151_spill] sm:$0xff] }
 0x30d   : > { %v3667_v18 = vpack.c.bf16 %v3587_v58, %v3583_v25  ;;  %v3594_v13 = vmul.f32 %v3466_v41, %v7875_v21  ;;  %v3225_v28 = vand.u32 2147483647, %v3105_v52  ;;  %v3341_v12 = vsub.f32 1.0, %v3221_v16  ;;  %v7880_v52 = vld [vmem:[#allocation111_spill] sm:$0xff] }
 0x30e   : > { %v3107_v11 = vsub.f32 %v7870_v35, %v4556_v0  ;;  %v3468_v47 = vmax.f32 %v3348_v5, 0.0  ;;  %v3592_v22 = vmul.f32 %v3464_v26, %v7876_v56  ;;  %v3223_v54 = vand.u32 2147483647, %v3103_v23  ;;  %v7882_v56 = vld [vmem:[#allocation113_spill] sm:$0xff] }
 0x30f   : > { %3764 = vmatpush1.bf16.msra.mxu1 %v3667_v18  ;;  %v3110_v25 = vsub.f32 %v7877_v15, %v7759_v61  ;;  %v3670_v14 = vpack.c.bf16 %v3594_v13, %v3590_v59  ;;  %v3345_v7 = vsub.f32 1.0, %v3225_v28  ;;  %v3461_v40 = vmax.f32 %v3341_v12, 0.0  ;;  %v7881_v13 = vld [vmem:[#allocation108_spill] sm:$0xff] }
 0x310   : > { %v3227_v43 = vand.u32 2147483647, %v3107_v11  ;;  %v3596_v58 = vmul.f32 %v3468_v47, %v7878_v51  ;;  %v3343_v49 = vsub.f32 1.0, %v3223_v54  ;;  %v3114_v41 = vsub.f32 %v7879_v50, %v7759_v61 }
 0x311   : > { %v3230_v37 = vand.u32 2147483647, %v3110_v25  ;;  %3722 = vmatprep.subr.bf16.mxu0 %v3670_v14  ;;  %v3465_v35 = vmax.f32 %v3345_v7, 0.0  ;;  %v3589_v16 = vmul.f32 %v3461_v40, %v7880_v52  ;;  %v3112_v5 = vsub.f32 %v7877_v15, %v7762_v45 }
 0x312   : > { %v3347_v18 = vsub.f32 1.0, %v3227_v43  ;;  %v3672_v26 = vpack.c.bf16 %v3596_v58, %v3592_v22  ;;  %v3463_v59 = vmax.f32 %v3343_v49, 0.0  ;;  %v3234_v23 = vand.u32 2147483647, %v3114_v41  ;;  %v7883_v49 = vld [vmem:[#allocation112_spill] sm:$0xff] }
 0x313   : > { %v3350_v21 = vsub.f32 1.0, %v3230_v37  ;;  %v3593_v28 = vmul.f32 %v3465_v35, %v7881_v13  ;;  %v3116_v11 = vsub.f32 %v7879_v50, %v7762_v45  ;;  %v3232_v47 = vand.u32 2147483647, %v3112_v5 }
 0x314   : > { %v3467_v12 = vmax.f32 %v3347_v18, 0.0  ;;  %3765 = vmatprep.subr.bf16.mxu1 %v3672_v26  ;;  %v3591_v54 = vmul.f32 %v3463_v59, %v7882_v56  ;;  %v3354_v25 = vsub.f32 1.0, %v3234_v23  ;;  %v3109_v7 = vsub.f32 %v7877_v15, %v7763_v55  ;;  %v7884_v59 = vld [vmem:[#allocation114_spill] sm:$0xff] }
 0x315   : > { %v3470_v14 = vmax.f32 %v3350_v21, 0.0  ;;  %v3669_v40 = vpack.c.bf16 %v3593_v28, %v3589_v16  ;;  %v3236_v43 = vand.u32 2147483647, %v3116_v11  ;;  %v3352_v51 = vsub.f32 1.0, %v3232_v47  ;;  %v7885_v28 = vld [vmem:[#allocation115_spill] sm:$0xff]  ;;  %v7886_v47 = vld [vmem:[#allocation162_spill] sm:$0xff] }
 0x316   : > { %v3595_v22 = vmul.f32 %v3467_v12, %v6341_v9  ;;  %v3474_v58 = vmax.f32 %v3354_v25, 0.0  ;;  %v3113_v37 = vsub.f32 %v7879_v50, %v7763_v55  ;;  %v3229_v35 = vand.u32 2147483647, %v3109_v7 }
 0x317   : > { %v3598_v41 = vmul.f32 %v3470_v14, %v7883_v49  ;;  %3723 = vmatpush1.bf16.msra.mxu0 %v3669_v40  ;;  %v3356_v18 = vsub.f32 1.0, %v3236_v43  ;;  %v3472_v5 = vmax.f32 %v3352_v51, 0.0  ;;  %v3111_v26 = vsub.f32 %v7877_v15, %v4556_v0  ;;  %v7887_v15 = vld [vmem:[#allocation118_spill] sm:$0xff]  ;;  %v7888_v43 = vld [vmem:[#allocation161_spill] sm:$0xff]  ;;  %v7889_v49 = vld [vmem:[#allocation119_spill] sm:$0xff] }
 0x318   : > { %v3671_v52 = vpack.c.bf16 %v3595_v22, %v3591_v54  ;;  %v3602_v16 = vmul.f32 %v3474_v58, %v7884_v59  ;;  %v3233_v23 = vand.u32 2147483647, %v3113_v37  ;;  %v3349_v9 = vsub.f32 1.0, %v3229_v35  ;;  %v7890_v59 = vld [vmem:[#allocation120_spill] sm:$0xff] }
 0x319   : > { %v3115_v21 = vsub.f32 %v7879_v50, %v4556_v0  ;;  %v3476_v13 = vmax.f32 %v3356_v18, 0.0  ;;  %v3600_v12 = vmul.f32 %v3472_v5, %v7885_v28  ;;  %v3231_v11 = vand.u32 2147483647, %v3111_v26 }
 0x31a   : > { %3766 = vmatpush1.bf16.msra.mxu1 %v3671_v52  ;;  %v3118_v56 = vsub.f32 %v7886_v47, %v7759_v61  ;;  %v3674_v54 = vpack.c.bf16 %v3602_v16, %v3598_v41  ;;  %v3353_v25 = vsub.f32 1.0, %v3233_v23  ;;  %v3469_v14 = vmax.f32 %v3349_v9, 0.0 }
 0x31b   : > { %v3235_v7 = vand.u32 2147483647, %v3115_v21  ;;  %v3604_v40 = vmul.f32 %v3476_v13, %v7887_v15  ;;  %v3351_v22 = vsub.f32 1.0, %v3231_v11  ;;  %v3122_v51 = vsub.f32 %v7888_v43, %v7759_v61  ;;  %v7891_v13 = vld [vmem:[#allocation121_spill] sm:$0xff] }
 0x31c   : > { %v3238_v58 = vand.u32 2147483647, %v3118_v56  ;;  %3724 = vmatprep.subr.bf16.mxu0 %v3674_v54  ;;  %v3473_v50 = vmax.f32 %v3353_v25, 0.0  ;;  %v3597_v37 = vmul.f32 %v3469_v14, %v7889_v49  ;;  %v3120_v52 = vsub.f32 %v7886_v47, %v7762_v45 }
 0x31d   : > { %v3355_v35 = vsub.f32 1.0, %v3235_v7  ;;  %v3676_v18 = vpack.c.bf16 %v3604_v40, %v3600_v12  ;;  %v3471_v41 = vmax.f32 %v3351_v22, 0.0  ;;  %v3242_v5 = vand.u32 2147483647, %v3122_v51 }
 0x31e   : > { %v3358_v26 = vsub.f32 1.0, %v3238_v58  ;;  %v3601_v16 = vmul.f32 %v3473_v50, %v7890_v59  ;;  %v3124_v9 = vsub.f32 %v7888_v43, %v7762_v45  ;;  %v3240_v21 = vand.u32 2147483647, %v3120_v52  ;;  %v7892_v52 = vld [vmem:[#allocation123_spill] sm:$0xff]  ;;  %v7893_v59 = vld [vmem:[#allocation169_spill] sm:$0xff] }
 0x31f   : > { %v3475_v23 = vmax.f32 %v3355_v35, 0.0  ;;  %3767 = vmatprep.subr.bf16.mxu1 %v3676_v18  ;;  %v3599_v28 = vmul.f32 %v3471_v41, %v7891_v13  ;;  %v3362_v11 = vsub.f32 1.0, %v3242_v5  ;;  %v3117_v54 = vsub.f32 %v7886_v47, %v7763_v55 }
 0x320   : > { %v3478_v56 = vmax.f32 %v3358_v26, 0.0  ;;  %v3673_v25 = vpack.c.bf16 %v3601_v16, %v3597_v37  ;;  %v3244_v14 = vand.u32 2147483647, %v3124_v9  ;;  %v3360_v7 = vsub.f32 1.0, %v3240_v21 }
 0x321   : > { %v3603_v12 = vmul.f32 %v3475_v23, %v6389_v32  ;;  %v3482_v15 = vmax.f32 %v3362_v11, 0.0  ;;  %v3121_v22 = vsub.f32 %v7888_v43, %v7763_v55  ;;  %v3237_v51 = vand.u32 2147483647, %v3117_v54  ;;  %v7894_v11 = vld [vmem:[#allocation170_spill] sm:$0xff] }
 0x322   : > { %v3606_v40 = vmul.f32 %v3478_v56, %v6395_v36  ;;  %3725 = vmatpush1.bf16.msra.mxu0 %v3673_v25  ;;  %v3364_v50 = vsub.f32 1.0, %v3244_v14  ;;  %v3480_v49 = vmax.f32 %v3360_v7, 0.0  ;;  %v3119_v35 = vsub.f32 %v7886_v47, %v4556_v0 }
 0x323   : > { %v3675_v58 = vpack.c.bf16 %v3603_v12, %v3599_v28  ;;  %v3610_v37 = vmul.f32 %v3482_v15, %v7892_v52  ;;  %v3241_v18 = vand.u32 2147483647, %v3121_v22  ;;  %v3357_v32 = vsub.f32 1.0, %v3237_v51 }
 0x324   : > { %v3123_v41 = vsub.f32 %v7888_v43, %v4556_v0  ;;  %v3484_v36 = vmax.f32 %v3364_v50, 0.0  ;;  %v3608_v5 = vmul.f32 %v3480_v49, %v6407_v34  ;;  %v3239_v26 = vand.u32 2147483647, %v3119_v35 }
 0x325   : > { %3768 = vmatpush1.bf16.msra.mxu1 %v3675_v58  ;;  %v3126_v16 = vsub.f32 %v7893_v59, %v7759_v61  ;;  %v3678_v23 = vpack.c.bf16 %v3610_v37, %v3606_v40  ;;  %v3361_v9 = vsub.f32 1.0, %v3241_v18  ;;  %v3477_v21 = vmax.f32 %v3357_v32, 0.0 }
 0x326   : > { %v3243_v13 = vand.u32 2147483647, %v3123_v41  ;;  %v3612_v47 = vmul.f32 %v3484_v36, %v6415_v42  ;;  %v3359_v28 = vsub.f32 1.0, %v3239_v26  ;;  %v3130_v56 = vsub.f32 %v7894_v11, %v7759_v61 }
 0x327   : > { %v3246_v54 = vand.u32 2147483647, %v3126_v16  ;;  %3726 = vmatprep.subr.bf16.mxu0 %v3678_v23  ;;  %v3481_v43 = vmax.f32 %v3361_v9, 0.0  ;;  %v3605_v25 = vmul.f32 %v3477_v21, %v6421_v19  ;;  %v3128_v12 = vsub.f32 %v7893_v59, %v7762_v45 }
 0x328   : > { %v3363_v34 = vsub.f32 1.0, %v3243_v13  ;;  %v3680_v14 = vpack.c.bf16 %v3612_v47, %v3608_v5  ;;  %v3479_v7 = vmax.f32 %v3359_v28, 0.0  ;;  %v3250_v15 = vand.u32 2147483647, %v3130_v56 }
 0x329   : > { %v3366_v40 = vsub.f32 1.0, %v3246_v54  ;;  %v3609_v22 = vmul.f32 %v3481_v43, %v6427_v57  ;;  %v3132_v51 = vsub.f32 %v7894_v11, %v7762_v45  ;;  %v3248_v61 = vand.u32 2147483647, %v3128_v12 }
 0x32a   : > { %v3483_v42 = vmax.f32 %v3363_v34, 0.0  ;;  %3769 = vmatprep.subr.bf16.mxu1 %v3680_v14  ;;  %v3607_v58 = vmul.f32 %v3479_v7, %v6433_v27  ;;  %v3370_v50 = vsub.f32 1.0, %v3250_v15  ;;  %v3125_v49 = vsub.f32 %v7893_v59, %v7763_v55  ;;  %v7896_v15 = vld [vmem:[#allocation122_spill] sm:$0xff] }
 0x32b   : > { %v3486_v19 = vmax.f32 %v3366_v40, 0.0  ;;  %v3677_v35 = vpack.c.bf16 %v3609_v22, %v3605_v25  ;;  %v3252_v37 = vand.u32 2147483647, %v3132_v51  ;;  %v3368_v18 = vsub.f32 1.0, %v3248_v61  ;;  %v7898_v22 = vld [vmem:[#allocation129_spill] sm:$0xff]  ;;  %v7899_v61 = vld [vmem:[#allocation127_spill] sm:$0xff] }
 0x32c   : > { %v3611_v52 = vmul.f32 %v3483_v42, %v6437_v62  ;;  %v3490_v32 = vmax.f32 %v3370_v50, 0.0  ;;  %v3129_v45 = vsub.f32 %v7894_v11, %v7763_v55  ;;  %v3245_v41 = vand.u32 2147483647, %v3125_v49 }
 0x32d   : > { %v3614_v57 = vmul.f32 %v3486_v19, %v6443_v17  ;;  %3727 = vmatpush1.bf16.msra.mxu0 %v3677_v35  ;;  %v3372_v27 = vsub.f32 1.0, %v3252_v37  ;;  %v3488_v5 = vmax.f32 %v3368_v18, 0.0  ;;  %v3127_v26 = vsub.f32 %v7893_v59, %v4556_v0  ;;  %v7900_v19 = vld [vmem:[#allocation132_spill] sm:$0xff] }
 0x32e   : > { %v3679_v36 = vpack.c.bf16 %v3611_v52, %v3607_v58  ;;  %v3618_v16 = vmul.f32 %v3490_v32, %v6449_v29  ;;  %v3249_v23 = vand.u32 2147483647, %v3129_v45  ;;  %v3365_v62 = vsub.f32 1.0, %v3245_v41  ;;  %v7901_v52 = vld [vmem:[#allocation130_spill] sm:$0xff]  ;;  %v7903_v41 = vld [vmem:[#allocation133_spill] sm:$0xff] }
 0x32f   : > { %v3131_v9 = vsub.f32 %v7894_v11, %v4556_v0  ;;  %v3492_v17 = vmax.f32 %v3372_v27, 0.0  ;;  %v3616_v21 = vmul.f32 %v3488_v5, %v6455_v44  ;;  %v3247_v55 = vand.u32 2147483647, %v3127_v26  ;;  %v7902_v32 = vld [vmem:[#allocation134_spill] sm:$0xff]  ;;  %v7904_v26 = vld [vmem:[#allocation131_spill] sm:$0xff] }
 0x330   : > { %3770 = vmatpush1.bf16.msra.mxu1 %v3679_v36  ;;  %v3788_v13 = vmul.f32 %v6685_v38, %v6611_v30  ;;  %v3682_v47 = vpack.c.bf16 %v3618_v16, %v3614_v57  ;;  %v3369_v28 = vsub.f32 1.0, %v3249_v23  ;;  %v3485_v56 = vmax.f32 %v3365_v62, 0.0 }
 0x331   : > { %v3251_v54 = vand.u32 2147483647, %v3131_v9  ;;  %v3620_v59 = vmul.f32 %v3492_v17, %v6463_v20  ;;  %v3367_v29 = vsub.f32 1.0, %v3247_v55  ;;  %v3790_v43 = vmul.f32 %v6687_v53, %v6613_v6 }
 0x332   : > { %v3789_v0 = vmul.f32 %v6690_v39, %v6617_v3  ;;  %3728 = vmatprep.subr.bf16.mxu0 %v3682_v47  ;;  %v3489_v11 = vmax.f32 %v3369_v28, 0.0  ;;  %v3613_v44 = vmul.f32 %v3485_v56, %v6469_v31  ;;  %v3791_v30 = vmul.f32 %v6692_v63, %v6619_v48  ;;  %v7895_v39 = vld [vmem:[#allocation124_spill] sm:$0xff]  ;;  %v7906_v28 = vld [vmem:[#allocation137_spill] sm:$0xff] }
 0x333   : > { %v3371_v25 = vsub.f32 1.0, %v3251_v54  ;;  %v3684_v38 = vpack.c.bf16 %v3620_v59, %v3616_v21  ;;  %v3487_v34 = vmax.f32 %v3367_v29, 0.0  ;;  %v3792_v20 = vmul.f32 %v6697_v24, %v6622_v8  ;;  %v7905_v21 = vld [vmem:[#allocation136_spill] sm:$0xff]  ;;  %v7907_v59 = vld [vmem:[#allocation135_spill] sm:$0xff] }
 0x334   : > { %v3794_v12 = vmul.f32 %v6699_v1, %v6624_v33  ;;  %v3617_v6 = vmul.f32 %v3489_v11, %v6477_v60  ;;  %v3793_v3 = vmul.f32 %v6704_v10, %v6629_v2  ;;  %v3795_v31 = vmul.f32 %v6706_v46, %v6631_v4  ;;  %v4245_v60 = vld [vmem:[%s7057_s2 + $0x20] ss:$8 sps:$4 sm:$0xff]  }
 0x335   : > { %v3491_v53 = vmax.f32 %v3371_v25, 0.0  ;;  %3771 = vmatprep.subr.bf16.mxu1 %v3684_v38  ;;  %v3615_v48 = vmul.f32 %v3487_v34, %v7895_v39  ;;  %v4136_v63 = vpack.c.bf16 %v3792_v20, %v3788_v13  ;;  %v7897_v4 = vld [vmem:[#allocation126_spill] sm:$0xff]  ;;  %v4314_v9 = vmov 0.0   ;;  %v7910_v34 = vld [vmem:[#allocation143_spill] sm:$0xff]  ;;  %v7912_v39 = vld [vmem:[#allocation144_spill] sm:$0xff] }
 0x336   : > { %v4148_v14 = vpack.c.bf16 %v3794_v12, %v3790_v43  ;;  %v3681_v7 = vpack.c.bf16 %v3617_v6, %v3613_v44  ;;  %v4134_v24 = vpack.c.bf16 %v3793_v3, %v3789_v0  ;;  %v4146_v40 = vpack.c.bf16 %v3795_v31, %v3791_v30  ;;  %v7908_v0 = vld [vmem:[#allocation141_spill] sm:$0xff]  ;;  %v7909_v25 = vld [vmem:[#allocation138_spill] sm:$0xff] }
 0x337   : > { %v3619_v8 = vmul.f32 %v3491_v53, %v7896_v15  ;;  %v7911_v6 = vld [vmem:[#allocation142_spill] sm:$0xff] }
 0x338   : > { %3729 = vmatpush1.bf16.msra.mxu0 %v3681_v7  ;;  %v3784_v7 = vld [vmem:[%s7059_s4] sm:$0xff]  ;;  %v3785_v15 = vld [vmem:[%s7059_s4 + $0x8] sm:$0xff] }
 0x339   : > { %v3683_v33 = vpack.c.bf16 %v3619_v8, %v3615_v48  ;;  %4135 = vmatprep.subr.bf16.mxu0 %v4134_v24  ;;  %v3786_v8 = vld [vmem:[%s7059_s4 + $0x10] sm:$0xff]  ;;  %v3787_v24 = vld [vmem:[%s7059_s4 + $0x18] sm:$0xff] }
 0x33b   : > { %3772 = vmatpush1.bf16.msra.mxu1 %v3683_v33  ;;  %3731 = vmatmul.mubr.bf16.vlgmr.msra.gmra.mrb[20].mxu0 %v4245_v60 }
 0x33c   : > { %4147 = vmatprep.subr.bf16.mxu1 %v4146_v40  ;;  %4137 = vmatpush1.bf16.msra.mxu0 %v4136_v63 }
 0x33d   : > { %3888 = vmatprep.mubr.f32.mxu0 %v4314_v9 }
 0x33e   : > { %3774 = vmatmul.mubr.bf16.vlgmr.msra.gmra.mrb[20].mxu1 %v4245_v60 }
 0x33f   : > { %4149 = vmatpush1.bf16.msra.mxu1 %v4148_v14  ;;  %3977 = vmatprep.mubr.f32.mxu1 %v4314_v9 }
 0x366   : > { %v2961_v2 = vpop.f32.mrb[16].mxu0 }
 0x367   : > { %v3796_v10 = vmul.f32 %v2961_v2, %v7897_v4  ;;  %v2963_v1 = vpop.f32.mrb[17].mxu0 }
 0x368   : > { %v3797_v42 = vmul.f32 %v2963_v1, %v7898_v22  ;;  %v2965_v51 = vpop.f32.mrb[18].mxu0 }
 0x369   : > { %v3004_v46 = vpop.f32.mrb[16].mxu1  ;;  %v3800_v49 = vmul.f32 %v2965_v51, %v7900_v19  ;;  %v2967_v35 = vpop.f32.mrb[19].mxu0 }
 0x36a   : > { %v3798_v58 = vmul.f32 %v3004_v46, %v7899_v61  ;;  %v3006_v50 = vpop.f32.mrb[17].mxu1  ;;  %v3801_v57 = vmul.f32 %v2967_v35, %v7902_v32 }
 0x36b   : > { %v3799_v37 = vmul.f32 %v3006_v50, %v7901_v52  ;;  %v3008_v18 = vpop.f32.mrb[18].mxu1  ;;  %v4140_v45 = vpack.c.bf16 %v3800_v49, %v3796_v10 }
 0x36c   : > { %v3802_v36 = vmul.f32 %v3008_v18, %v7903_v41  ;;  %v3010_v27 = vpop.f32.mrb[19].mxu1  ;;  %v4138_v5 = vpack.c.bf16 %v3801_v57, %v3797_v42 }
 0x36d   : > { %v3803_v16 = vmul.f32 %v3010_v27, %v7904_v26 }
 0x36e   : > { %v4152_v23 = vpack.c.bf16 %v3802_v36, %v3798_v58  ;;  %4139 = vmatprep.subr.bf16.mxu0 %v4138_v5 }
 0x36f   : > { %v4150_v62 = vpack.c.bf16 %v3803_v16, %v3799_v37  ;;  %4141 = vmatpush1.bf16.msra.mxu0 %v4140_v45 }
 0x371   : > { %4151 = vmatprep.subr.bf16.mxu1 %v4150_v62 }
 0x372   : > { %4153 = vmatpush1.bf16.msra.mxu1 %v4152_v23 }
 0x40e   : > { %v3732_v17 = vpop.f32.mrb[20].mxu0 }
 0x40f   : > { %v3804_v55 = vmul.f32 %v3732_v17, %v7905_v21  ;;  %v3734_v13 = vpop.f32.mrb[21].mxu0 }
 0x410   : > { %v3805_v56 = vmul.f32 %v3734_v13, %v7906_v28  ;;  %v3736_v54 = vpop.f32.mrb[22].mxu0 }
 0x411   : > { %v3775_v47 = vpop.f32.mrb[20].mxu1  ;;  %v3808_v11 = vmul.f32 %v3736_v54, %v7908_v0  ;;  %v3738_v44 = vpop.f32.mrb[23].mxu0 }
 0x412   : > { %v3806_v29 = vmul.f32 %v3775_v47, %v7907_v59  ;;  %v3777_v43 = vpop.f32.mrb[21].mxu1  ;;  %v3809_v20 = vmul.f32 %v3738_v44, %v7910_v34 }
 0x413   : > { %v3807_v30 = vmul.f32 %v3777_v43, %v7909_v25  ;;  %v3779_v38 = vpop.f32.mrb[22].mxu1  ;;  %v4144_v12 = vpack.c.bf16 %v3808_v11, %v3804_v55 }
 0x414   : > { %v3810_v53 = vmul.f32 %v3779_v38, %v7911_v6  ;;  %v3781_v3 = vpop.f32.mrb[23].mxu1  ;;  %v4142_v31 = vpack.c.bf16 %v3809_v20, %v3805_v56 }
 0x415   : > { %v3811_v48 = vmul.f32 %v3781_v3, %v7912_v39 }
 0x416   : > { %v4156_v63 = vpack.c.bf16 %v3810_v53, %v3806_v29  ;;  %4143 = vmatprep.subr.bf16.mxu0 %v4142_v31 }
 0x417   : > { %v4154_v14 = vpack.c.bf16 %v3811_v48, %v3807_v30  ;;  %4145 = vmatpush1.bf16.msra.mxu0 %v4144_v12 }
 0x419   : > { %4155 = vmatprep.subr.bf16.mxu1 %v4154_v14 }
 0x41a   : > { %4157 = vmatpush1.bf16.msra.mxu1 %v4156_v63  ;;  %4120 = vmatmul.mubr.msk.f32.vlgmr.msra.gmra.mrb[24].mxu0 %vm514_vm0, %v3784_v7 }
 0x41b   : > { %3894 = vmatprep.mubr.f32.mxu0 %v4314_v9 }
 0x41d   : > { %4124 = vmatmul.mubr.msk.f32.vlgmr.msra.gmra.mrb[24].mxu1 %vm514_vm0, %v3784_v7 }
 0x41e   : > { %3983 = vmatprep.mubr.f32.mxu1 %v4314_v9  ;;  %4121 = vmatmul.mubr.msk.f32.gmra.mrb[26].mxu0 %vm514_vm0, %v3785_v15 }
 0x41f   : > { %3900 = vmatprep.mubr.f32.mxu0 %v4314_v9 }
 0x421   : > { %4125 = vmatmul.mubr.msk.f32.gmra.mrb[26].mxu1 %vm514_vm0, %v3785_v15 }
 0x422   : > { %3989 = vmatprep.mubr.f32.mxu1 %v4314_v9  ;;  %4122 = vmatmul.mubr.msk.f32.gmra.mrb[28].mxu0 %vm514_vm0, %v3786_v8 }
 0x423   : > { %3906 = vmatprep.mubr.f32.mxu0 %v4314_v9 }
 0x425   : > { %4126 = vmatmul.mubr.msk.f32.gmra.mrb[28].mxu1 %vm514_vm0, %v3786_v8 }
 0x426   : > { %3995 = vmatprep.mubr.f32.mxu1 %v4314_v9  ;;  %4123 = vmatmul.mubr.msk.f32.gmra.mrb[30].mxu0 %vm514_vm0, %v3787_v24 }
 0x429   : > { %4127 = vmatmul.mubr.msk.f32.gmra.mrb[30].mxu1 %vm514_vm0, %v3787_v24 }
 0x4ed   : > { %v3890_v40 = vpop.f32.mrb[24].mxu0 }
 0x4ee   : > { %4002 = vst [vmem:[%s6985_s6] sm:$0xff] %v3890_v40  ;;  %v3892_v60 = vpop.f32.mrb[25].mxu0 }
 0x4ef   : > { %4003 = vst [vmem:[%s6985_s6 + $0x8] sm:$0xff] %v3892_v60 }
 0x4f0   : > { %v3979_v33 = vpop.f32.mrb[24].mxu1 }
 0x4f1   : > { %4004 = vst [vmem:[%s6985_s6 + $0x10] sm:$0xff] %v3979_v33  ;;  %v3981_v2 = vpop.f32.mrb[25].mxu1  ;;  %v3896_v4 = vpop.f32.mrb[26].mxu0 }
 0x4f2   : > { %4005 = vst [vmem:[%s6985_s6 + $0x18] sm:$0xff] %v3981_v2  ;;  %4006 = vst [vmem:[%s6985_s6 + $0x20] sm:$0xff] %v3896_v4  ;;  %v3898_v10 = vpop.f32.mrb[27].mxu0 }
 0x4f3   : > { %4007 = vst [vmem:[%s6985_s6 + $0x28] sm:$0xff] %v3898_v10 }
 0x4f4   : > { %v3985_v1 = vpop.f32.mrb[26].mxu1 }
 0x4f5   : > { %4008 = vst [vmem:[%s6985_s6 + $0x30] sm:$0xff] %v3985_v1  ;;  %v3987_v46 = vpop.f32.mrb[27].mxu1  ;;  %v3902_v22 = vpop.f32.mrb[28].mxu0 }
 0x4f6   : > { %4009 = vst [vmem:[%s6985_s6 + $0x38] sm:$0xff] %v3987_v46  ;;  %4010 = vst [vmem:[%s6985_s6 + $0x40] sm:$0xff] %v3902_v22  ;;  %v3904_v42 = vpop.f32.mrb[29].mxu0 }
 0x4f7   : > { %4011 = vst [vmem:[%s6985_s6 + $0x48] sm:$0xff] %v3904_v42 }
 0x4f8   : > { %v3991_v51 = vpop.f32.mrb[28].mxu1 }
 0x4f9   : > { %4012 = vst [vmem:[%s6985_s6 + $0x50] sm:$0xff] %v3991_v51  ;;  %v3993_v61 = vpop.f32.mrb[29].mxu1  ;;  %v3908_v58 = vpop.f32.mrb[30].mxu0 }
 0x4fa   : > { %4013 = vst [vmem:[%s6985_s6 + $0x58] sm:$0xff] %v3993_v61  ;;  %4014 = vst [vmem:[%s6985_s6 + $0x60] sm:$0xff] %v3908_v58  ;;  %v3910_v50 = vpop.f32.mrb[31].mxu0 }
 0x4fb   : > { %4015 = vst [vmem:[%s6985_s6 + $0x68] sm:$0xff] %v3910_v50 }
 0x4fc   : > { %v3997_v19 = vpop.f32.mrb[30].mxu1 }
 0x4fd   : > { %4016 = vst [vmem:[%s6985_s6 + $0x70] sm:$0xff] %v3997_v19  ;;  %v3999_v49 = vpop.f32.mrb[31].mxu1 }
 0x4fe   : > { %4017 = vst [vmem:[%s6985_s6 + $0x78] sm:$0xff] %v3999_v49 }
 0x4ff   : > { %4261 = shalt.err (!%p4258_p3)
}
 0x500   : > { %s4262_s16 = scalar_lea.hbm %s7004_s11, 2048  ;;  %s4266_s25 = scalar_lea.hbm %s7060_s5, 4096 }
 0x501   : > { %p4263_p4 = scmp.ne.s32.totalorder %s7004_s11, %s4262_s16  ;;  %p4267_p9 = scmp.lt.u32.totalorder %s7004_s11, %s7060_s5 }
 0x502   : > { %p4268_p10 = scmp.lt.u32.totalorder %s4266_s25, %s4262_s16  ;;  %p4270_p12 = scmp.lt.u32.totalorder %s4262_s16, %s7004_s11 }
 0x503   : > { %p4264_p7 = pnand %p4263_p4, %p4387_p5 }
 0x504   : > { %p4269_p11 = por %p4268_p10, %p4267_p9 }
 0x505   : > { %p4265_p8 = pneg %p4264_p7 }
 0x506   : > { %p4271_p13 = por %p4270_p12, %p4269_p11 }
 0x508   : > { %p4272_p0 = pnand %p4271_p13, %p4265_p8 }
 0x50a   : > { %4275 = shalt.err (!%p4272_p0)
}
 0x50b   : > { %s4316_s6 = smov 512   ;;  %s4317_s7 = smov 1024  }
 0x50c   : > { %s4318_s9 = smov 32  }
 0x50d   : > { %4158 = dma.vmem_to_hbm [thread:$0]  (%p4387_p5), %s7007_s8, 2048, %s7004_s11, %s7014_s22, %s4316_s6, %s4317_s7, %s4318_s9  }
 0x50e PF: > { %p4164_p1 = scmp.ge.s32.totalorder %s4310_s21, 2  ;;  %s4047_s10 = sand.u32 1, %s4298_s18  }
 0x50f   : > { %s4048_s12 = scalar_lea.sflag [#allocation3], %s4047_s10 }
 0x510   : > { %p4161_p2 = pnand %p4164_p1, %p4391_p6 }
 0x512   : > { %4293 = dma.done.wait (!%p4161_p2), %s4048_s12, 2048  }
 0x513   : > { %4295 = vsyncadd (!%p4161_p2), %s4048_s12, 4294965248  ;;  %p15_p3 = scmp.ge.s32.totalorder %s4374_s24, 4   ;;  %s7913_s18 = smov %s4302_s19 }
 0x514   : > { %s7914_s19 = smov %s4306_s20  ;;  %s7915_s20 = smov %s4385_s27 }
 0x515   : > { %s7916_s21 = smov %s4374_s24  ;;  %17 = sbr.rel (!%p15_p3) target bundleno = 3 (0x3), region = 77 }
 0x51c   :  { %4053 = vsyncpa [#allocation3], 1 }
 0x51d   :  { %4055 = vsyncpa [#allocation3 + $0x1], 1 }

</bundles_post_ra>
